<compile_context>
chip_gen: v5e
topology: v5e:2x2
jax: 0.10.0
libtpu: 0.0.40
codegen_flags: <defaults>
</compile_context>

<pallas_src>
import functools

import jax
import jax.numpy as jnp
from jax import lax
from jax.experimental import pallas as pl
from jax.experimental.pallas import tpu as pltpu

CP = 128            # padded channel count == TPU lane width
_BN_EPS = 1e-5
_STRIP = 8          # output-row strip for depthwise -> project fusion
_PAD_L = 8          # left spatial halo along W (sublane-aligned interior start)

# (type, expand_ratio, cin, cout, stride) -- synthetic stand-in for derive_blocks()
BLOCK_CONFIG = [
    ("stem",   None, 3,  8,  2),
    ("mbconv", 1,    8,  8,  1),
    ("mbconv", 3,    8,  16, 2),
    ("mbconv", 3,    16, 16, 1),
    ("mbconv", 3,    16, 24, 2),
    ("mbconv", 3,    24, 24, 1),
    ("mbconv", 3,    24, 24, 1),
    ("mbconv", 3,    24, 32, 2),
    ("mbconv", 3,    32, 32, 1),
]


# ------------------------------ static plan ---------------------------------

def _make_plan(Hin, Win):
    """Static per-block geometry, scratch-buffer assignment and weight indices.

    Scratch buffers:
      * act buffers   (Ho, Wo, CP): un-padded activations, <=2 per resolution
        (ping-pong; a block never writes the buffer it reads).
      * halo buffers  (H+2, _PAD_L + W + 8, CP): spatially padded tensors fed
        to 3x3 taps (stem input pad + one per MBConv input resolution).
        Interior lives at [1:H+1, _PAD_L:_PAD_L+W] (sublane-aligned W start).
    """
    scratch_shapes = []
    halos = []                       # (buf_id, H, W) interior dims

    def alloc(shape, halo_hw=None):
        scratch_shapes.append(shape)
        bid = len(scratch_shapes) - 1
        if halo_hw is not None:
            halos.append((bid, halo_hw[0], halo_hw[1]))
        return bid

    act_pool, mid_ids, plan = {}, {}, []
    mm_i = dw_i = 0

    H, W = Hin, Win
    pad_id = alloc((Hin + 2, _PAD_L + Win + 8, CP), halo_hw=(Hin, Win))
    cur = None
    for (btype, t, cin, cout, stride) in BLOCK_CONFIG:
        Ho = (H + 2 - 3) // stride + 1
        Wo = (W + 2 - 3) // stride + 1
        pool = act_pool.setdefault((Ho, Wo), [])
        dst = next((b for b in pool if b != cur), None)
        if dst is None:
            dst = alloc((Ho, Wo, CP))
            pool.append(dst)
        if btype == "stem":
            plan.append(dict(btype="stem", H=H, W=W, Ho=Ho, Wo=Wo, stride=stride,
                             src=pad_id, dst=dst))
        else:
            if (H, W) not in mid_ids:
                mid_ids[(H, W)] = alloc((H + 2, _PAD_L + W + 8, CP),
                                        halo_hw=(H, W))
            exp_idx = None
            if t != 1:
                exp_idx = mm_i
                mm_i += 1
            proj_idx = mm_i
            mm_i += 1
            dw_idx = dw_i
            dw_i += 1
            plan.append(dict(btype="mbconv", H=H, W=W, Ho=Ho, Wo=Wo,
                             stride=stride, src=cur, mid=mid_ids[(H, W)],
                             dst=dst, use_res=(stride == 1 and cin == cout),
                             exp_idx=exp_idx, proj_idx=proj_idx, dw_idx=dw_idx))
        cur = dst
        H, W = Ho, Wo
    return plan, scratch_shapes, halos


# ------------------------------ fused kernel --------------------------------

def _fused_kernel(*refs, plan, halos, out_map, n_out):
    (x_ref, stem_w_ref, stem_b_ref, mm_w_ref, mm_b_ref,
     dw_k_ref, dw_b_ref) = refs[:7]
    out_refs = refs[7:7 + n_out]
    bufs = refs[7 + n_out:]

    # Re-zero only the 1-pixel halo border the 3x3 taps read.  Interiors are
    # fully rewritten by every block each grid step; borders are never written
    # by compute.  (Done every step, not under pl.when(program_id==0), to stay
    # correct under megacore grid sharding -- see header comment.)
    for bid, hh, ww in halos:
        buf = bufs[bid]
        zrow = jnp.zeros((1, ww + 2, CP), jnp.float32)
        buf[0:1, _PAD_L - 1:_PAD_L + ww + 1, :] = zrow
        buf[hh + 1:hh + 2, _PAD_L - 1:_PAD_L + ww + 1, :] = zrow
        zcol = jnp.zeros((hh + 2, 1, CP), jnp.float32)
        buf[:, _PAD_L - 1:_PAD_L, :] = zcol
        buf[:, _PAD_L + ww:_PAD_L + ww + 1, :] = zcol

    def tap_window(pad_buf, r0, sr, Wo, stride, dy, dx):
        # output row i / col j  ->  padded row stride*i + dy, col stride*j + _PAD_L-1 + dx
        if stride == 1:
            return pad_buf[r0 + dy:r0 + dy + sr,
                           _PAD_L - 1 + dx:_PAD_L - 1 + dx + Wo, :]
        return pad_buf[pl.ds(stride * r0 + dy, sr, stride=stride),
                       pl.ds(_PAD_L - 1 + dx, Wo, stride=stride), :]

    def emit(bi, dst_id):
        if bi in out_map:
            o_ref = out_refs[out_map[bi]]
            o_ref[...] = bufs[dst_id][...].astype(o_ref.dtype)

    # --------------------------------- stem ---------------------------------
    cfg = plan[0]
    H, W, Ho, Wo, stride = cfg["H"], cfg["W"], cfg["Ho"], cfg["Wo"], cfg["stride"]
    pad, dst = bufs[cfg["src"]], bufs[cfg["dst"]]
    pad[1:H + 1, _PAD_L:_PAD_L + W, :] = x_ref[...]      # in-kernel spatial pad
    stem_b = stem_b_ref[...]
    for r0 in range(0, Ho, _STRIP):
        sr = min(_STRIP, Ho - r0)
        acc = jnp.zeros((sr * Wo, CP), jnp.float32)
        for t in range(9):
            dy, dx = divmod(t, 3)
            win = tap_window(pad, r0, sr, Wo, stride, dy, dx)
            acc = acc + jnp.dot(win.reshape(sr * Wo, CP).astype(jnp.bfloat16),
                                stem_w_ref[t],
                                preferred_element_type=jnp.float32)
        y = jnp.clip(acc + stem_b, 0.0, 6.0)              # folded BN + ReLU6
        dst[r0:r0 + sr, :, :] = y.reshape(sr, Wo, CP)
    emit(0, cfg["dst"])

    # ----------------------------- MBConv blocks ----------------------------
    for bi, cfg in enumerate(plan[1:], start=1):
        H, W, Ho, Wo = cfg["H"], cfg["W"], cfg["Ho"], cfg["Wo"]
        stride = cfg["stride"]
        src, mid, dst = bufs[cfg["src"]], bufs[cfg["mid"]], bufs[cfg["dst"]]

        # 1x1 expand + folded BN + ReLU6 into the halo scratch interior
        # (sublane-aligned start at W offset _PAD_L -> unmasked stores).
        if cfg["exp_idx"] is not None:
            rows = src[...].reshape(H * W, CP).astype(jnp.bfloat16)
            y = jnp.dot(rows, mm_w_ref[cfg["exp_idx"]],
                        preferred_element_type=jnp.float32)
            y = jnp.clip(y + mm_b_ref[cfg["exp_idx"]], 0.0, 6.0)
            mid[1:H + 1, _PAD_L:_PAD_L + W, :] = y.reshape(H, W, CP)
        else:
            mid[1:H + 1, _PAD_L:_PAD_L + W, :] = src[...]

        # 3x3 depthwise (+BN +ReLU6) -> 1x1 project (+BN, +residual),
        # strip-wise so the tap accumulator stays in vregs and VPU depthwise
        # interleaves with the MXU project.
        dwk = dw_k_ref[cfg["dw_idx"]]          # (9, CP)  f32
        dwb = dw_b_ref[cfg["dw_idx"]]          # (1, CP)  f32
        pw = mm_w_ref[cfg["proj_idx"]]         # (CP, CP) bf16
        pb = mm_b_ref[cfg["proj_idx"]]         # (1, CP)  f32
        for r0 in range(0, Ho, _STRIP):
            sr = min(_STRIP, Ho - r0)
            acc = jnp.zeros((sr, Wo, CP), jnp.float32)
            for t in range(9):
                dy, dx = divmod(t, 3)
                acc = acc + tap_window(mid, r0, sr, Wo, stride, dy, dx) * dwk[t]
            y = jnp.clip(acc + dwb, 0.0, 6.0)
            o = jnp.dot(y.reshape(sr * Wo, CP).astype(jnp.bfloat16), pw,
                        preferred_element_type=jnp.float32) + pb
            if cfg["use_res"]:                 # stride==1 and cin==cout
                o = o + src[r0:r0 + sr, :, :].reshape(sr * Wo, CP)
            dst[r0:r0 + sr, :, :] = o.reshape(sr, Wo, CP)
        emit(bi, cfg["dst"])


# ---------------------------- params / forward ------------------------------

def _kaiming(key, shape, fan_in):
    return jax.random.normal(key, shape, jnp.float32) * jnp.sqrt(2.0 / fan_in)


def _pad_to(a, shape):
    return jnp.pad(a, [(0, t - s) for s, t in zip(a.shape, shape)])


def init_params(seed=0):
    """Kaiming conv init; BN(weight=1, bias=0, running stats (0,1)) folded into
    the conv weights.  Returns (packed params for the kernel, raw f32 per-block
    params for the pure-JAX reference)."""
    key = jax.random.PRNGKey(seed)
    bn_scale = 1.0 / float(jnp.sqrt(1.0 + _BN_EPS))
    mm_w, mm_b, dw_k, dw_b = [], [], [], []
    packed, raw = {}, []
    for (btype, t, cin, cout, stride) in BLOCK_CONFIG:
        if btype == "stem":
            key, k1 = jax.random.split(key)
            w = _kaiming(k1, (3, 3, cin, cout), fan_in=9 * cin)
            packed["stem_w"] = _pad_to((w * bn_scale).reshape(9, cin, cout),
                                       (9, CP, CP)).astype(jnp.bfloat16)
            packed["stem_b"] = jnp.zeros((1, CP), jnp.float32)
            raw.append({"w": w})
        else:
            cmid = cin * t
            blk = {}
            if t != 1:
                key, k1 = jax.random.split(key)
                ew = _kaiming(k1, (cin, cmid), fan_in=cin)
                mm_w.append(_pad_to(ew * bn_scale, (CP, CP)))
                mm_b.append(jnp.zeros((1, CP), jnp.float32))
                blk["ew"] = ew
            key, k2 = jax.random.split(key)
            dk = _kaiming(k2, (3, 3, cmid), fan_in=9)
            dw_k.append(_pad_to((dk * bn_scale).reshape(9, cmid), (9, CP)))
            dw_b.append(jnp.zeros((1, CP), jnp.float32))
            blk["dk"] = dk
            key, k3 = jax.random.split(key)
            pw = _kaiming(k3, (cmid, cout), fan_in=cmid)
            mm_w.append(_pad_to(pw * bn_scale, (CP, CP)))
            mm_b.append(jnp.zeros((1, CP), jnp.float32))
            blk["pw"] = pw
            raw.append(blk)
    packed["mm_w"] = jnp.stack(mm_w).astype(jnp.bfloat16)
    packed["mm_b"] = jnp.stack(mm_b)
    packed["dw_k"] = jnp.stack(dw_k)
    packed["dw_b"] = jnp.stack(dw_b)
    return packed, raw


@functools.partial(jax.jit, static_argnames=("output_indices",))
def fna_yolof_forward(params, x_nchw, output_indices=(8,)):
    """Pallas port of FNA_Yolof.forward: sequential blocks, multi-output tuple."""
    N, C, Hin, Win = x_nchw.shape
    x = jnp.transpose(x_nchw, (0, 2, 3, 1))                        # NCHW -> NHWC
    x = jnp.pad(x, ((0, 0), (0, 0), (0, 0), (0, CP - C)))          # lane pad

    plan, scratch_shapes, halos = _make_plan(Hin, Win)
    oidx = tuple(sorted(output_indices))
    out_map = {bi: k for k, bi in enumerate(oidx)}
    out_shapes = tuple(
        jax.ShapeDtypeStruct((N, plan[bi]["Ho"], plan[bi]["Wo"], CP), jnp.float32)
        for bi in oidx)
    out_specs = tuple(
        pl.BlockSpec((None, plan[bi]["Ho"], plan[bi]["Wo"], CP),
                     lambda n: (n, 0, 0, 0))
        for bi in oidx)

    kernel = functools.partial(_fused_kernel, plan=plan, halos=halos,
                               out_map=out_map, n_out=len(oidx))
    res = pl.pallas_call(
        kernel,
        out_shape=out_shapes,
        grid_spec=pltpu.PrefetchScalarGridSpec(
            num_scalar_prefetch=0,
            grid=(N,),
            in_specs=[
                pl.BlockSpec((None, Hin, Win, CP), lambda n: (n, 0, 0, 0)),
                pl.BlockSpec(params["stem_w"].shape, lambda n: (0, 0, 0)),
                pl.BlockSpec(params["stem_b"].shape, lambda n: (0, 0)),
                pl.BlockSpec(params["mm_w"].shape, lambda n: (0, 0, 0)),
                pl.BlockSpec(params["mm_b"].shape, lambda n: (0, 0, 0)),
                pl.BlockSpec(params["dw_k"].shape, lambda n: (0, 0, 0)),
                pl.BlockSpec(params["dw_b"].shape, lambda n: (0, 0, 0)),
            ],
            out_specs=out_specs,
            scratch_shapes=[pltpu.VMEM(s, jnp.float32) for s in scratch_shapes],
        ),
        compiler_params=pltpu.CompilerParams(
            dimension_semantics=("parallel",)),
    )(x, params["stem_w"], params["stem_b"], params["mm_w"], params["mm_b"],
      params["dw_k"], params["dw_b"])

    if not isinstance(res, (tuple, list)):
        res = (res,)
    outs = []
    for k, bi in enumerate(oidx):
        cout = BLOCK_CONFIG[bi][3]
        outs.append(jnp.transpose(res[k][..., :cout], (0, 3, 1, 2)))  # NHWC->NCHW
    return tuple(outs)


# --------------------------- pure-JAX reference ------------------------------

def reference_forward(raw, x_nchw, output_indices=(8,)):
    """f32 XLA reference of the same forward pass (for correctness checking)."""
    s = 1.0 / float(jnp.sqrt(1.0 + _BN_EPS))
    x = jnp.transpose(x_nchw, (0, 2, 3, 1))
    outs = []
    for i, ((btype, t, cin, cout, stride), p) in enumerate(zip(BLOCK_CONFIG, raw)):
        if btype == "stem":
            x = lax.conv_general_dilated(
                x, p["w"], (stride, stride), [(1, 1), (1, 1)],
                dimension_numbers=("NHWC", "HWIO", "NHWC"))
            x = jnp.clip(x * s, 0.0, 6.0)
        else:
            cmid = cin * t
            h = x
            if t != 1:
                h = jnp.clip((h @ p["ew"]) * s, 0.0, 6.0)
            h = lax.conv_general_dilated(
                h, p["dk"].reshape(3, 3, 1, cmid), (stride, stride),
                [(1, 1), (1, 1)],
                dimension_numbers=("NHWC", "HWIO", "NHWC"),
                feature_group_count=cmid)
            h = jnp.clip(h * s, 0.0, 6.0)
            h = (h @ p["pw"]) * s
            if stride == 1 and cin == cout:
                h = h + x
            x = h
        if i in output_indices:
            outs.append(jnp.transpose(x, (0, 3, 1, 2)))
    return tuple(outs)


if __name__ == "__main__":
    key = jax.random.PRNGKey(0)
    x = jax.random.normal(key, (2, 3, 32, 32), jnp.float32)     # NCHW like PyTorch

    params, raw = init_params(seed=0)
    outs = fna_yolof_forward(params, x, output_indices=(8,))
    outs = jax.block_until_ready(outs)

    assert isinstance(outs, tuple) and len(outs) == 1
    assert outs[0].shape == (2, 32, 2, 2), outs[0].shape
    assert bool(jnp.all(jnp.isfinite(outs[0])))

    # Correctness vs pure-JAX f32 reference (bf16 MXU operands -> loose tol).
    ref = reference_forward(raw, x, output_indices=(8,))
    err = float(jnp.linalg.norm(outs[0] - ref[0]) /
                (jnp.linalg.norm(ref[0]) + 1e-6))
    assert err < 0.1, f"relative error vs reference too large: {err}"

    print("KERNEL_OK")
</pallas_src>

<mosaic_0001>
module attributes {stable_mosaic.version = 11 : i64} {
  func.func @_fused_kernel(%arg0: i32, %arg1: memref<1x32x32x128xf32, #tpu.memory_space<vmem>>, %arg2: memref<9x128x128xbf16, #tpu.memory_space<vmem>>, %arg3: memref<1x128xf32, #tpu.memory_space<vmem>>, %arg4: memref<15x128x128xbf16, #tpu.memory_space<vmem>>, %arg5: memref<15x1x128xf32, #tpu.memory_space<vmem>>, %arg6: memref<8x9x128xf32, #tpu.memory_space<vmem>>, %arg7: memref<8x1x128xf32, #tpu.memory_space<vmem>>, %arg8: memref<1x2x2x128xf32, #tpu.memory_space<vmem>>, %arg9: memref<34x48x128xf32, #tpu.memory_space<vmem>>, %arg10: memref<16x16x128xf32, #tpu.memory_space<vmem>>, %arg11: memref<16x16x128xf32, #tpu.memory_space<vmem>>, %arg12: memref<18x32x128xf32, #tpu.memory_space<vmem>>, %arg13: memref<8x8x128xf32, #tpu.memory_space<vmem>>, %arg14: memref<8x8x128xf32, #tpu.memory_space<vmem>>, %arg15: memref<10x24x128xf32, #tpu.memory_space<vmem>>, %arg16: memref<4x4x128xf32, #tpu.memory_space<vmem>>, %arg17: memref<4x4x128xf32, #tpu.memory_space<vmem>>, %arg18: memref<6x20x128xf32, #tpu.memory_space<vmem>>, %arg19: memref<2x2x128xf32, #tpu.memory_space<vmem>>, %arg20: memref<2x2x128xf32, #tpu.memory_space<vmem>>, %arg21: memref<4x18x128xf32, #tpu.memory_space<vmem>>) attributes {dimension_semantics = [#tpu.dimension_semantics<parallel>], iteration_bounds = array<i64: 2>, scalar_prefetch = 0 : i64, scratch_operands = 13 : i64, tpu.core_type = #tpu.core_type<tc>, window_params = [{transform_indices = @transform_0, window_bounds = array<i64: 1, 32, 32, 128>}, {pipeline_mode = #tpu.pipeline_mode<synchronous>, transform_indices = @transform_1, window_bounds = array<i64: 9, 128, 128>}, {pipeline_mode = #tpu.pipeline_mode<synchronous>, transform_indices = @transform_2, window_bounds = array<i64: 1, 128>}, {pipeline_mode = #tpu.pipeline_mode<synchronous>, transform_indices = @transform_3, window_bounds = array<i64: 15, 128, 128>}, {pipeline_mode = #tpu.pipeline_mode<synchronous>, transform_indices = @transform_4, window_bounds = array<i64: 15, 1, 128>}, {pipeline_mode = #tpu.pipeline_mode<synchronous>, transform_indices = @transform_5, window_bounds = array<i64: 8, 9, 128>}, {pipeline_mode = #tpu.pipeline_mode<synchronous>, transform_indices = @transform_6, window_bounds = array<i64: 8, 1, 128>}, {transform_indices = @transform_7, window_bounds = array<i64: 1, 2, 2, 128>}]} {
    %cst = arith.constant 0.000000e+00 : f32
    %0 = vector.broadcast %cst : f32 to vector<1x34x128xf32>
    %c0 = arith.constant 0 : index
    %c7 = arith.constant 7 : index
    %c0_0 = arith.constant 0 : index
    %1 = vector.load %arg9[%c0, %c7, %c0_0] : memref<34x48x128xf32, #tpu.memory_space<vmem>>, vector<1x34x128xf32>
    tpu.vector_store %arg9[%c0, %c7, %c0_0], %0 {strides = array<i32>} : memref<34x48x128xf32, #tpu.memory_space<vmem>>, vector<1x34x128xf32>,
    %c33 = arith.constant 33 : index
    %c7_1 = arith.constant 7 : index
    %c0_2 = arith.constant 0 : index
    %2 = vector.load %arg9[%c33, %c7_1, %c0_2] : memref<34x48x128xf32, #tpu.memory_space<vmem>>, vector<1x34x128xf32>
    tpu.vector_store %arg9[%c33, %c7_1, %c0_2], %0 {strides = array<i32>} : memref<34x48x128xf32, #tpu.memory_space<vmem>>, vector<1x34x128xf32>,
    %cst_3 = arith.constant 0.000000e+00 : f32
    %3 = vector.broadcast %cst_3 : f32 to vector<34x1x128xf32>
    %c0_4 = arith.constant 0 : index
    %c7_5 = arith.constant 7 : index
    %c0_6 = arith.constant 0 : index
    %4 = vector.load %arg9[%c0_4, %c7_5, %c0_6] : memref<34x48x128xf32, #tpu.memory_space<vmem>>, vector<34x1x128xf32>
    tpu.vector_store %arg9[%c0_4, %c7_5, %c0_6], %3 {strides = array<i32>} : memref<34x48x128xf32, #tpu.memory_space<vmem>>, vector<34x1x128xf32>,
    %c0_7 = arith.constant 0 : index
    %c40 = arith.constant 40 : index
    %c0_8 = arith.constant 0 : index
    %5 = vector.load %arg9[%c0_7, %c40, %c0_8] : memref<34x48x128xf32, #tpu.memory_space<vmem>>, vector<34x1x128xf32>
    tpu.vector_store %arg9[%c0_7, %c40, %c0_8], %3 {strides = array<i32>} : memref<34x48x128xf32, #tpu.memory_space<vmem>>, vector<34x1x128xf32>,
    %cst_9 = arith.constant 0.000000e+00 : f32
    %6 = vector.broadcast %cst_9 : f32 to vector<1x18x128xf32>
    %c0_10 = arith.constant 0 : index
    %c7_11 = arith.constant 7 : index
    %c0_12 = arith.constant 0 : index
    %7 = vector.load %arg12[%c0_10, %c7_11, %c0_12] : memref<18x32x128xf32, #tpu.memory_space<vmem>>, vector<1x18x128xf32>
    tpu.vector_store %arg12[%c0_10, %c7_11, %c0_12], %6 {strides = array<i32>} : memref<18x32x128xf32, #tpu.memory_space<vmem>>, vector<1x18x128xf32>,
    %c17 = arith.constant 17 : index
    %c7_13 = arith.constant 7 : index
    %c0_14 = arith.constant 0 : index
    %8 = vector.load %arg12[%c17, %c7_13, %c0_14] : memref<18x32x128xf32, #tpu.memory_space<vmem>>, vector<1x18x128xf32>
    tpu.vector_store %arg12[%c17, %c7_13, %c0_14], %6 {strides = array<i32>} : memref<18x32x128xf32, #tpu.memory_space<vmem>>, vector<1x18x128xf32>,
    %cst_15 = arith.constant 0.000000e+00 : f32
    %9 = vector.broadcast %cst_15 : f32 to vector<18x1x128xf32>
    %c0_16 = arith.constant 0 : index
    %c7_17 = arith.constant 7 : index
    %c0_18 = arith.constant 0 : index
    %10 = vector.load %arg12[%c0_16, %c7_17, %c0_18] : memref<18x32x128xf32, #tpu.memory_space<vmem>>, vector<18x1x128xf32>
    tpu.vector_store %arg12[%c0_16, %c7_17, %c0_18], %9 {strides = array<i32>} : memref<18x32x128xf32, #tpu.memory_space<vmem>>, vector<18x1x128xf32>,
    %c0_19 = arith.constant 0 : index
    %c24 = arith.constant 24 : index
    %c0_20 = arith.constant 0 : index
    %11 = vector.load %arg12[%c0_19, %c24, %c0_20] : memref<18x32x128xf32, #tpu.memory_space<vmem>>, vector<18x1x128xf32>
    tpu.vector_store %arg12[%c0_19, %c24, %c0_20], %9 {strides = array<i32>} : memref<18x32x128xf32, #tpu.memory_space<vmem>>, vector<18x1x128xf32>,
    %cst_21 = arith.constant 0.000000e+00 : f32
    %12 = vector.broadcast %cst_21 : f32 to vector<1x10x128xf32>
    %c0_22 = arith.constant 0 : index
    %c7_23 = arith.constant 7 : index
    %c0_24 = arith.constant 0 : index
    %13 = vector.load %arg15[%c0_22, %c7_23, %c0_24] : memref<10x24x128xf32, #tpu.memory_space<vmem>>, vector<1x10x128xf32>
    tpu.vector_store %arg15[%c0_22, %c7_23, %c0_24], %12 {strides = array<i32>} : memref<10x24x128xf32, #tpu.memory_space<vmem>>, vector<1x10x128xf32>,
    %c9 = arith.constant 9 : index
    %c7_25 = arith.constant 7 : index
    %c0_26 = arith.constant 0 : index
    %14 = vector.load %arg15[%c9, %c7_25, %c0_26] : memref<10x24x128xf32, #tpu.memory_space<vmem>>, vector<1x10x128xf32>
    tpu.vector_store %arg15[%c9, %c7_25, %c0_26], %12 {strides = array<i32>} : memref<10x24x128xf32, #tpu.memory_space<vmem>>, vector<1x10x128xf32>,
    %cst_27 = arith.constant 0.000000e+00 : f32
    %15 = vector.broadcast %cst_27 : f32 to vector<10x1x128xf32>
    %c0_28 = arith.constant 0 : index
    %c7_29 = arith.constant 7 : index
    %c0_30 = arith.constant 0 : index
    %16 = vector.load %arg15[%c0_28, %c7_29, %c0_30] : memref<10x24x128xf32, #tpu.memory_space<vmem>>, vector<10x1x128xf32>
    tpu.vector_store %arg15[%c0_28, %c7_29, %c0_30], %15 {strides = array<i32>} : memref<10x24x128xf32, #tpu.memory_space<vmem>>, vector<10x1x128xf32>,
    %c0_31 = arith.constant 0 : index
    %c16 = arith.constant 16 : index
    %c0_32 = arith.constant 0 : index
    %17 = vector.load %arg15[%c0_31, %c16, %c0_32] : memref<10x24x128xf32, #tpu.memory_space<vmem>>, vector<10x1x128xf32>
    tpu.vector_store %arg15[%c0_31, %c16, %c0_32], %15 {strides = array<i32>} : memref<10x24x128xf32, #tpu.memory_space<vmem>>, vector<10x1x128xf32>,
    %cst_33 = arith.constant 0.000000e+00 : f32
    %18 = vector.broadcast %cst_33 : f32 to vector<1x6x128xf32>
    %c0_34 = arith.constant 0 : index
    %c7_35 = arith.constant 7 : index
    %c0_36 = arith.constant 0 : index
    %19 = vector.load %arg18[%c0_34, %c7_35, %c0_36] : memref<6x20x128xf32, #tpu.memory_space<vmem>>, vector<1x6x128xf32>
    tpu.vector_store %arg18[%c0_34, %c7_35, %c0_36], %18 {strides = array<i32>} : memref<6x20x128xf32, #tpu.memory_space<vmem>>, vector<1x6x128xf32>,
    %c5 = arith.constant 5 : index
    %c7_37 = arith.constant 7 : index
    %c0_38 = arith.constant 0 : index
    %20 = vector.load %arg18[%c5, %c7_37, %c0_38] : memref<6x20x128xf32, #tpu.memory_space<vmem>>, vector<1x6x128xf32>
    tpu.vector_store %arg18[%c5, %c7_37, %c0_38], %18 {strides = array<i32>} : memref<6x20x128xf32, #tpu.memory_space<vmem>>, vector<1x6x128xf32>,
    %cst_39 = arith.constant 0.000000e+00 : f32
    %21 = vector.broadcast %cst_39 : f32 to vector<6x1x128xf32>
    %c0_40 = arith.constant 0 : index
    %c7_41 = arith.constant 7 : index
    %c0_42 = arith.constant 0 : index
    %22 = vector.load %arg18[%c0_40, %c7_41, %c0_42] : memref<6x20x128xf32, #tpu.memory_space<vmem>>, vector<6x1x128xf32>
    tpu.vector_store %arg18[%c0_40, %c7_41, %c0_42], %21 {strides = array<i32>} : memref<6x20x128xf32, #tpu.memory_space<vmem>>, vector<6x1x128xf32>,
    %c0_43 = arith.constant 0 : index
    %c12 = arith.constant 12 : index
    %c0_44 = arith.constant 0 : index
    %23 = vector.load %arg18[%c0_43, %c12, %c0_44] : memref<6x20x128xf32, #tpu.memory_space<vmem>>, vector<6x1x128xf32>
    tpu.vector_store %arg18[%c0_43, %c12, %c0_44], %21 {strides = array<i32>} : memref<6x20x128xf32, #tpu.memory_space<vmem>>, vector<6x1x128xf32>,
    %cst_45 = arith.constant 0.000000e+00 : f32
    %24 = vector.broadcast %cst_45 : f32 to vector<1x4x128xf32>
    %c0_46 = arith.constant 0 : index
    %c7_47 = arith.constant 7 : index
    %c0_48 = arith.constant 0 : index
    %25 = vector.load %arg21[%c0_46, %c7_47, %c0_48] : memref<4x18x128xf32, #tpu.memory_space<vmem>>, vector<1x4x128xf32>
    tpu.vector_store %arg21[%c0_46, %c7_47, %c0_48], %24 {strides = array<i32>} : memref<4x18x128xf32, #tpu.memory_space<vmem>>, vector<1x4x128xf32>,
    %c3 = arith.constant 3 : index
    %c7_49 = arith.constant 7 : index
    %c0_50 = arith.constant 0 : index
    %26 = vector.load %arg21[%c3, %c7_49, %c0_50] : memref<4x18x128xf32, #tpu.memory_space<vmem>>, vector<1x4x128xf32>
    tpu.vector_store %arg21[%c3, %c7_49, %c0_50], %24 {strides = array<i32>} : memref<4x18x128xf32, #tpu.memory_space<vmem>>, vector<1x4x128xf32>,
    %cst_51 = arith.constant 0.000000e+00 : f32
    %27 = vector.broadcast %cst_51 : f32 to vector<4x1x128xf32>
    %c0_52 = arith.constant 0 : index
    %c7_53 = arith.constant 7 : index
    %c0_54 = arith.constant 0 : index
    %28 = vector.load %arg21[%c0_52, %c7_53, %c0_54] : memref<4x18x128xf32, #tpu.memory_space<vmem>>, vector<4x1x128xf32>
    tpu.vector_store %arg21[%c0_52, %c7_53, %c0_54], %27 {strides = array<i32>} : memref<4x18x128xf32, #tpu.memory_space<vmem>>, vector<4x1x128xf32>,
    %c0_55 = arith.constant 0 : index
    %c10 = arith.constant 10 : index
    %c0_56 = arith.constant 0 : index
    %29 = vector.load %arg21[%c0_55, %c10, %c0_56] : memref<4x18x128xf32, #tpu.memory_space<vmem>>, vector<4x1x128xf32>
    tpu.vector_store %arg21[%c0_55, %c10, %c0_56], %27 {strides = array<i32>} : memref<4x18x128xf32, #tpu.memory_space<vmem>>, vector<4x1x128xf32>,
    %c0_57 = arith.constant 0 : index
    %c0_58 = arith.constant 0 : index
    %c0_59 = arith.constant 0 : index
    %c0_60 = arith.constant 0 : index
    %30 = vector.load %arg1[%c0_57, %c0_58, %c0_59, %c0_60] : memref<1x32x32x128xf32, #tpu.memory_space<vmem>>, vector<1x32x32x128xf32>
    %31 = vector.shape_cast %30 : vector<1x32x32x128xf32> to vector<32x32x128xf32>
    %c1 = arith.constant 1 : index
    %c8 = arith.constant 8 : index
    %c0_61 = arith.constant 0 : index
    %32 = vector.load %arg9[%c1, %c8, %c0_61] : memref<34x48x128xf32, #tpu.memory_space<vmem>>, vector<32x32x128xf32>
    tpu.vector_store %arg9[%c1, %c8, %c0_61], %31 {strides = array<i32>} : memref<34x48x128xf32, #tpu.memory_space<vmem>>, vector<32x32x128xf32>,
    %c0_62 = arith.constant 0 : index
    %c0_63 = arith.constant 0 : index
    %33 = vector.load %arg3[%c0_62, %c0_63] : memref<1x128xf32, #tpu.memory_space<vmem>>, vector<1x128xf32>
    %cst_64 = arith.constant 0.000000e+00 : f32
    %34 = vector.broadcast %cst_64 : f32 to vector<128x128xf32>
    %c0_65 = arith.constant 0 : index
    %c7_66 = arith.constant 7 : index
    %c0_67 = arith.constant 0 : index
    %35 = tpu.strided_load %arg9[%c0_65, %c7_66, %c0_67] {strides = array<i32: 2, 2, 1>} : memref<34x48x128xf32, #tpu.memory_space<vmem>>, vector<8x16x128xf32>
    %36 = vector.shape_cast %35 : vector<8x16x128xf32> to vector<128x128xf32>
    %37 = arith.truncf %36 : vector<128x128xf32> to vector<128x128xbf16>
    %c0_68 = arith.constant 0 : index
    %c0_69 = arith.constant 0 : index
    %c0_70 = arith.constant 0 : index
    %38 = vector.load %arg2[%c0_68, %c0_69, %c0_70] : memref<9x128x128xbf16, #tpu.memory_space<vmem>>, vector<1x128x128xbf16>
    %39 = vector.shape_cast %38 : vector<1x128x128xbf16> to vector<128x128xbf16>
    %cst_71 = arith.constant dense<0.000000e+00> : vector<128x128xf32>
    %40 = tpu.matmul %37, %39, %cst_71 {dimension_numbers = #tpu.dot_dimension_numbers<[1], [0], [0], [1], [0, 0, 1, 1], [], []>} : vector<128x128xbf16>, vector<128x128xbf16>, vector<128x128xf32> -> vector<128x128xf32>
    %41 = arith.addf %34, %40 : vector<128x128xf32>
    %c0_72 = arith.constant 0 : index
    %c8_73 = arith.constant 8 : index
    %c0_74 = arith.constant 0 : index
    %42 = tpu.strided_load %arg9[%c0_72, %c8_73, %c0_74] {strides = array<i32: 2, 2, 1>} : memref<34x48x128xf32, #tpu.memory_space<vmem>>, vector<8x16x128xf32>
    %43 = vector.shape_cast %42 : vector<8x16x128xf32> to vector<128x128xf32>
    %44 = arith.truncf %43 : vector<128x128xf32> to vector<128x128xbf16>
    %c1_75 = arith.constant 1 : index
    %c0_76 = arith.constant 0 : index
    %c0_77 = arith.constant 0 : index
    %45 = vector.load %arg2[%c1_75, %c0_76, %c0_77] : memref<9x128x128xbf16, #tpu.memory_space<vmem>>, vector<1x128x128xbf16>
    %46 = vector.shape_cast %45 : vector<1x128x128xbf16> to vector<128x128xbf16>
    %cst_78 = arith.constant dense<0.000000e+00> : vector<128x128xf32>
    %47 = tpu.matmul %44, %46, %cst_78 {dimension_numbers = #tpu.dot_dimension_numbers<[1], [0], [0], [1], [0, 0, 1, 1], [], []>} : vector<128x128xbf16>, vector<128x128xbf16>, vector<128x128xf32> -> vector<128x128xf32>
    %48 = arith.addf %41, %47 : vector<128x128xf32>
    %c0_79 = arith.constant 0 : index
    %c9_80 = arith.constant 9 : index
    %c0_81 = arith.constant 0 : index
    %49 = tpu.strided_load %arg9[%c0_79, %c9_80, %c0_81] {strides = array<i32: 2, 2, 1>} : memref<34x48x128xf32, #tpu.memory_space<vmem>>, vector<8x16x128xf32>
    %50 = vector.shape_cast %49 : vector<8x16x128xf32> to vector<128x128xf32>
    %51 = arith.truncf %50 : vector<128x128xf32> to vector<128x128xbf16>
    %c2 = arith.constant 2 : index
    %c0_82 = arith.constant 0 : index
    %c0_83 = arith.constant 0 : index
    %52 = vector.load %arg2[%c2, %c0_82, %c0_83] : memref<9x128x128xbf16, #tpu.memory_space<vmem>>, vector<1x128x128xbf16>
    %53 = vector.shape_cast %52 : vector<1x128x128xbf16> to vector<128x128xbf16>
    %cst_84 = arith.constant dense<0.000000e+00> : vector<128x128xf32>
    %54 = tpu.matmul %51, %53, %cst_84 {dimension_numbers = #tpu.dot_dimension_numbers<[1], [0], [0], [1], [0, 0, 1, 1], [], []>} : vector<128x128xbf16>, vector<128x128xbf16>, vector<128x128xf32> -> vector<128x128xf32>
    %55 = arith.addf %48, %54 : vector<128x128xf32>
    %c1_85 = arith.constant 1 : index
    %c7_86 = arith.constant 7 : index
    %c0_87 = arith.constant 0 : index
    %56 = tpu.strided_load %arg9[%c1_85, %c7_86, %c0_87] {strides = array<i32: 2, 2, 1>} : memref<34x48x128xf32, #tpu.memory_space<vmem>>, vector<8x16x128xf32>
    %57 = vector.shape_cast %56 : vector<8x16x128xf32> to vector<128x128xf32>
    %58 = arith.truncf %57 : vector<128x128xf32> to vector<128x128xbf16>
    %c3_88 = arith.constant 3 : index
    %c0_89 = arith.constant 0 : index
    %c0_90 = arith.constant 0 : index
    %59 = vector.load %arg2[%c3_88, %c0_89, %c0_90] : memref<9x128x128xbf16, #tpu.memory_space<vmem>>, vector<1x128x128xbf16>
    %60 = vector.shape_cast %59 : vector<1x128x128xbf16> to vector<128x128xbf16>
    %cst_91 = arith.constant dense<0.000000e+00> : vector<128x128xf32>
    %61 = tpu.matmul %58, %60, %cst_91 {dimension_numbers = #tpu.dot_dimension_numbers<[1], [0], [0], [1], [0, 0, 1, 1], [], []>} : vector<128x128xbf16>, vector<128x128xbf16>, vector<128x128xf32> -> vector<128x128xf32>
    %62 = arith.addf %55, %61 : vector<128x128xf32>
    %c1_92 = arith.constant 1 : index
    %c8_93 = arith.constant 8 : index
    %c0_94 = arith.constant 0 : index
    %63 = tpu.strided_load %arg9[%c1_92, %c8_93, %c0_94] {strides = array<i32: 2, 2, 1>} : memref<34x48x128xf32, #tpu.memory_space<vmem>>, vector<8x16x128xf32>
    %64 = vector.shape_cast %63 : vector<8x16x128xf32> to vector<128x128xf32>
    %65 = arith.truncf %64 : vector<128x128xf32> to vector<128x128xbf16>
    %c4 = arith.constant 4 : index
    %c0_95 = arith.constant 0 : index
    %c0_96 = arith.constant 0 : index
    %66 = vector.load %arg2[%c4, %c0_95, %c0_96] : memref<9x128x128xbf16, #tpu.memory_space<vmem>>, vector<1x128x128xbf16>
    %67 = vector.shape_cast %66 : vector<1x128x128xbf16> to vector<128x128xbf16>
    %cst_97 = arith.constant dense<0.000000e+00> : vector<128x128xf32>
    %68 = tpu.matmul %65, %67, %cst_97 {dimension_numbers = #tpu.dot_dimension_numbers<[1], [0], [0], [1], [0, 0, 1, 1], [], []>} : vector<128x128xbf16>, vector<128x128xbf16>, vector<128x128xf32> -> vector<128x128xf32>
    %69 = arith.addf %62, %68 : vector<128x128xf32>
    %c1_98 = arith.constant 1 : index
    %c9_99 = arith.constant 9 : index
    %c0_100 = arith.constant 0 : index
    %70 = tpu.strided_load %arg9[%c1_98, %c9_99, %c0_100] {strides = array<i32: 2, 2, 1>} : memref<34x48x128xf32, #tpu.memory_space<vmem>>, vector<8x16x128xf32>
    %71 = vector.shape_cast %70 : vector<8x16x128xf32> to vector<128x128xf32>
    %72 = arith.truncf %71 : vector<128x128xf32> to vector<128x128xbf16>
    %c5_101 = arith.constant 5 : index
    %c0_102 = arith.constant 0 : index
    %c0_103 = arith.constant 0 : index
    %73 = vector.load %arg2[%c5_101, %c0_102, %c0_103] : memref<9x128x128xbf16, #tpu.memory_space<vmem>>, vector<1x128x128xbf16>
    %74 = vector.shape_cast %73 : vector<1x128x128xbf16> to vector<128x128xbf16>
    %cst_104 = arith.constant dense<0.000000e+00> : vector<128x128xf32>
    %75 = tpu.matmul %72, %74, %cst_104 {dimension_numbers = #tpu.dot_dimension_numbers<[1], [0], [0], [1], [0, 0, 1, 1], [], []>} : vector<128x128xbf16>, vector<128x128xbf16>, vector<128x128xf32> -> vector<128x128xf32>
    %76 = arith.addf %69, %75 : vector<128x128xf32>
    %c2_105 = arith.constant 2 : index
    %c7_106 = arith.constant 7 : index
    %c0_107 = arith.constant 0 : index
    %77 = tpu.strided_load %arg9[%c2_105, %c7_106, %c0_107] {strides = array<i32: 2, 2, 1>} : memref<34x48x128xf32, #tpu.memory_space<vmem>>, vector<8x16x128xf32>
    %78 = vector.shape_cast %77 : vector<8x16x128xf32> to vector<128x128xf32>
    %79 = arith.truncf %78 : vector<128x128xf32> to vector<128x128xbf16>
    %c6 = arith.constant 6 : index
    %c0_108 = arith.constant 0 : index
    %c0_109 = arith.constant 0 : index
    %80 = vector.load %arg2[%c6, %c0_108, %c0_109] : memref<9x128x128xbf16, #tpu.memory_space<vmem>>, vector<1x128x128xbf16>
    %81 = vector.shape_cast %80 : vector<1x128x128xbf16> to vector<128x128xbf16>
    %cst_110 = arith.constant dense<0.000000e+00> : vector<128x128xf32>
    %82 = tpu.matmul %79, %81, %cst_110 {dimension_numbers = #tpu.dot_dimension_numbers<[1], [0], [0], [1], [0, 0, 1, 1], [], []>} : vector<128x128xbf16>, vector<128x128xbf16>, vector<128x128xf32> -> vector<128x128xf32>
    %83 = arith.addf %76, %82 : vector<128x128xf32>
    %c2_111 = arith.constant 2 : index
    %c8_112 = arith.constant 8 : index
    %c0_113 = arith.constant 0 : index
    %84 = tpu.strided_load %arg9[%c2_111, %c8_112, %c0_113] {strides = array<i32: 2, 2, 1>} : memref<34x48x128xf32, #tpu.memory_space<vmem>>, vector<8x16x128xf32>
    %85 = vector.shape_cast %84 : vector<8x16x128xf32> to vector<128x128xf32>
    %86 = arith.truncf %85 : vector<128x128xf32> to vector<128x128xbf16>
    %c7_114 = arith.constant 7 : index
    %c0_115 = arith.constant 0 : index
    %c0_116 = arith.constant 0 : index
    %87 = vector.load %arg2[%c7_114, %c0_115, %c0_116] : memref<9x128x128xbf16, #tpu.memory_space<vmem>>, vector<1x128x128xbf16>
    %88 = vector.shape_cast %87 : vector<1x128x128xbf16> to vector<128x128xbf16>
    %cst_117 = arith.constant dense<0.000000e+00> : vector<128x128xf32>
    %89 = tpu.matmul %86, %88, %cst_117 {dimension_numbers = #tpu.dot_dimension_numbers<[1], [0], [0], [1], [0, 0, 1, 1], [], []>} : vector<128x128xbf16>, vector<128x128xbf16>, vector<128x128xf32> -> vector<128x128xf32>
    %90 = arith.addf %83, %89 : vector<128x128xf32>
    %c2_118 = arith.constant 2 : index
    %c9_119 = arith.constant 9 : index
    %c0_120 = arith.constant 0 : index
    %91 = tpu.strided_load %arg9[%c2_118, %c9_119, %c0_120] {strides = array<i32: 2, 2, 1>} : memref<34x48x128xf32, #tpu.memory_space<vmem>>, vector<8x16x128xf32>
    %92 = vector.shape_cast %91 : vector<8x16x128xf32> to vector<128x128xf32>
    %93 = arith.truncf %92 : vector<128x128xf32> to vector<128x128xbf16>
    %c8_121 = arith.constant 8 : index
    %c0_122 = arith.constant 0 : index
    %c0_123 = arith.constant 0 : index
    %94 = vector.load %arg2[%c8_121, %c0_122, %c0_123] : memref<9x128x128xbf16, #tpu.memory_space<vmem>>, vector<1x128x128xbf16>
    %95 = vector.shape_cast %94 : vector<1x128x128xbf16> to vector<128x128xbf16>
    %cst_124 = arith.constant dense<0.000000e+00> : vector<128x128xf32>
    %96 = tpu.matmul %93, %95, %cst_124 {dimension_numbers = #tpu.dot_dimension_numbers<[1], [0], [0], [1], [0, 0, 1, 1], [], []>} : vector<128x128xbf16>, vector<128x128xbf16>, vector<128x128xf32> -> vector<128x128xf32>
    %97 = arith.addf %90, %96 : vector<128x128xf32>
    %98 = vector.broadcast %33 : vector<1x128xf32> to vector<128x128xf32>
    %99 = arith.addf %97, %98 : vector<128x128xf32>
    %cst_125 = arith.constant 0.000000e+00 : f32
    %cst_126 = arith.constant 6.000000e+00 : f32
    %100 = vector.broadcast %cst_125 : f32 to vector<128x128xf32>
    %101 = arith.maximumf %100, %99 : vector<128x128xf32>
    %102 = vector.broadcast %cst_126 : f32 to vector<128x128xf32>
    %103 = arith.minimumf %102, %101 : vector<128x128xf32>
    %104 = vector.shape_cast %103 : vector<128x128xf32> to vector<8x16x128xf32>
    %c0_127 = arith.constant 0 : index
    %c0_128 = arith.constant 0 : index
    %c0_129 = arith.constant 0 : index
    %105 = vector.load %arg10[%c0_127, %c0_128, %c0_129] : memref<16x16x128xf32, #tpu.memory_space<vmem>>, vector<8x16x128xf32>
    tpu.vector_store %arg10[%c0_127, %c0_128, %c0_129], %104 {strides = array<i32>} : memref<16x16x128xf32, #tpu.memory_space<vmem>>, vector<8x16x128xf32>,
    %cst_130 = arith.constant 0.000000e+00 : f32
    %106 = vector.broadcast %cst_130 : f32 to vector<128x128xf32>
    %c16_131 = arith.constant 16 : index
    %c7_132 = arith.constant 7 : index
    %c0_133 = arith.constant 0 : index
    %107 = tpu.strided_load %arg9[%c16_131, %c7_132, %c0_133] {strides = array<i32: 2, 2, 1>} : memref<34x48x128xf32, #tpu.memory_space<vmem>>, vector<8x16x128xf32>
    %108 = vector.shape_cast %107 : vector<8x16x128xf32> to vector<128x128xf32>
    %109 = arith.truncf %108 : vector<128x128xf32> to vector<128x128xbf16>
    %c0_134 = arith.constant 0 : index
    %c0_135 = arith.constant 0 : index
    %c0_136 = arith.constant 0 : index
    %110 = vector.load %arg2[%c0_134, %c0_135, %c0_136] : memref<9x128x128xbf16, #tpu.memory_space<vmem>>, vector<1x128x128xbf16>
    %111 = vector.shape_cast %110 : vector<1x128x128xbf16> to vector<128x128xbf16>
    %cst_137 = arith.constant dense<0.000000e+00> : vector<128x128xf32>
    %112 = tpu.matmul %109, %111, %cst_137 {dimension_numbers = #tpu.dot_dimension_numbers<[1], [0], [0], [1], [0, 0, 1, 1], [], []>} : vector<128x128xbf16>, vector<128x128xbf16>, vector<128x128xf32> -> vector<128x128xf32>
    %113 = arith.addf %106, %112 : vector<128x128xf32>
    %c16_138 = arith.constant 16 : index
    %c8_139 = arith.constant 8 : index
    %c0_140 = arith.constant 0 : index
    %114 = tpu.strided_load %arg9[%c16_138, %c8_139, %c0_140] {strides = array<i32: 2, 2, 1>} : memref<34x48x128xf32, #tpu.memory_space<vmem>>, vector<8x16x128xf32>
    %115 = vector.shape_cast %114 : vector<8x16x128xf32> to vector<128x128xf32>
    %116 = arith.truncf %115 : vector<128x128xf32> to vector<128x128xbf16>
    %c1_141 = arith.constant 1 : index
    %c0_142 = arith.constant 0 : index
    %c0_143 = arith.constant 0 : index
    %117 = vector.load %arg2[%c1_141, %c0_142, %c0_143] : memref<9x128x128xbf16, #tpu.memory_space<vmem>>, vector<1x128x128xbf16>
    %118 = vector.shape_cast %117 : vector<1x128x128xbf16> to vector<128x128xbf16>
    %cst_144 = arith.constant dense<0.000000e+00> : vector<128x128xf32>
    %119 = tpu.matmul %116, %118, %cst_144 {dimension_numbers = #tpu.dot_dimension_numbers<[1], [0], [0], [1], [0, 0, 1, 1], [], []>} : vector<128x128xbf16>, vector<128x128xbf16>, vector<128x128xf32> -> vector<128x128xf32>
    %120 = arith.addf %113, %119 : vector<128x128xf32>
    %c16_145 = arith.constant 16 : index
    %c9_146 = arith.constant 9 : index
    %c0_147 = arith.constant 0 : index
    %121 = tpu.strided_load %arg9[%c16_145, %c9_146, %c0_147] {strides = array<i32: 2, 2, 1>} : memref<34x48x128xf32, #tpu.memory_space<vmem>>, vector<8x16x128xf32>
    %122 = vector.shape_cast %121 : vector<8x16x128xf32> to vector<128x128xf32>
    %123 = arith.truncf %122 : vector<128x128xf32> to vector<128x128xbf16>
    %c2_148 = arith.constant 2 : index
    %c0_149 = arith.constant 0 : index
    %c0_150 = arith.constant 0 : index
    %124 = vector.load %arg2[%c2_148, %c0_149, %c0_150] : memref<9x128x128xbf16, #tpu.memory_space<vmem>>, vector<1x128x128xbf16>
    %125 = vector.shape_cast %124 : vector<1x128x128xbf16> to vector<128x128xbf16>
    %cst_151 = arith.constant dense<0.000000e+00> : vector<128x128xf32>
    %126 = tpu.matmul %123, %125, %cst_151 {dimension_numbers = #tpu.dot_dimension_numbers<[1], [0], [0], [1], [0, 0, 1, 1], [], []>} : vector<128x128xbf16>, vector<128x128xbf16>, vector<128x128xf32> -> vector<128x128xf32>
    %127 = arith.addf %120, %126 : vector<128x128xf32>
    %c17_152 = arith.constant 17 : index
    %c7_153 = arith.constant 7 : index
    %c0_154 = arith.constant 0 : index
    %128 = tpu.strided_load %arg9[%c17_152, %c7_153, %c0_154] {strides = array<i32: 2, 2, 1>} : memref<34x48x128xf32, #tpu.memory_space<vmem>>, vector<8x16x128xf32>
    %129 = vector.shape_cast %128 : vector<8x16x128xf32> to vector<128x128xf32>
    %130 = arith.truncf %129 : vector<128x128xf32> to vector<128x128xbf16>
    %c3_155 = arith.constant 3 : index
    %c0_156 = arith.constant 0 : index
    %c0_157 = arith.constant 0 : index
    %131 = vector.load %arg2[%c3_155, %c0_156, %c0_157] : memref<9x128x128xbf16, #tpu.memory_space<vmem>>, vector<1x128x128xbf16>
    %132 = vector.shape_cast %131 : vector<1x128x128xbf16> to vector<128x128xbf16>
    %cst_158 = arith.constant dense<0.000000e+00> : vector<128x128xf32>
    %133 = tpu.matmul %130, %132, %cst_158 {dimension_numbers = #tpu.dot_dimension_numbers<[1], [0], [0], [1], [0, 0, 1, 1], [], []>} : vector<128x128xbf16>, vector<128x128xbf16>, vector<128x128xf32> -> vector<128x128xf32>
    %134 = arith.addf %127, %133 : vector<128x128xf32>
    %c17_159 = arith.constant 17 : index
    %c8_160 = arith.constant 8 : index
    %c0_161 = arith.constant 0 : index
    %135 = tpu.strided_load %arg9[%c17_159, %c8_160, %c0_161] {strides = array<i32: 2, 2, 1>} : memref<34x48x128xf32, #tpu.memory_space<vmem>>, vector<8x16x128xf32>
    %136 = vector.shape_cast %135 : vector<8x16x128xf32> to vector<128x128xf32>
    %137 = arith.truncf %136 : vector<128x128xf32> to vector<128x128xbf16>
    %c4_162 = arith.constant 4 : index
    %c0_163 = arith.constant 0 : index
    %c0_164 = arith.constant 0 : index
    %138 = vector.load %arg2[%c4_162, %c0_163, %c0_164] : memref<9x128x128xbf16, #tpu.memory_space<vmem>>, vector<1x128x128xbf16>
    %139 = vector.shape_cast %138 : vector<1x128x128xbf16> to vector<128x128xbf16>
    %cst_165 = arith.constant dense<0.000000e+00> : vector<128x128xf32>
    %140 = tpu.matmul %137, %139, %cst_165 {dimension_numbers = #tpu.dot_dimension_numbers<[1], [0], [0], [1], [0, 0, 1, 1], [], []>} : vector<128x128xbf16>, vector<128x128xbf16>, vector<128x128xf32> -> vector<128x128xf32>
    %141 = arith.addf %134, %140 : vector<128x128xf32>
    %c17_166 = arith.constant 17 : index
    %c9_167 = arith.constant 9 : index
    %c0_168 = arith.constant 0 : index
    %142 = tpu.strided_load %arg9[%c17_166, %c9_167, %c0_168] {strides = array<i32: 2, 2, 1>} : memref<34x48x128xf32, #tpu.memory_space<vmem>>, vector<8x16x128xf32>
    %143 = vector.shape_cast %142 : vector<8x16x128xf32> to vector<128x128xf32>
    %144 = arith.truncf %143 : vector<128x128xf32> to vector<128x128xbf16>
    %c5_169 = arith.constant 5 : index
    %c0_170 = arith.constant 0 : index
    %c0_171 = arith.constant 0 : index
    %145 = vector.load %arg2[%c5_169, %c0_170, %c0_171] : memref<9x128x128xbf16, #tpu.memory_space<vmem>>, vector<1x128x128xbf16>
    %146 = vector.shape_cast %145 : vector<1x128x128xbf16> to vector<128x128xbf16>
    %cst_172 = arith.constant dense<0.000000e+00> : vector<128x128xf32>
    %147 = tpu.matmul %144, %146, %cst_172 {dimension_numbers = #tpu.dot_dimension_numbers<[1], [0], [0], [1], [0, 0, 1, 1], [], []>} : vector<128x128xbf16>, vector<128x128xbf16>, vector<128x128xf32> -> vector<128x128xf32>
    %148 = arith.addf %141, %147 : vector<128x128xf32>
    %c18 = arith.constant 18 : index
    %c7_173 = arith.constant 7 : index
    %c0_174 = arith.constant 0 : index
    %149 = tpu.strided_load %arg9[%c18, %c7_173, %c0_174] {strides = array<i32: 2, 2, 1>} : memref<34x48x128xf32, #tpu.memory_space<vmem>>, vector<8x16x128xf32>
    %150 = vector.shape_cast %149 : vector<8x16x128xf32> to vector<128x128xf32>
    %151 = arith.truncf %150 : vector<128x128xf32> to vector<128x128xbf16>
    %c6_175 = arith.constant 6 : index
    %c0_176 = arith.constant 0 : index
    %c0_177 = arith.constant 0 : index
    %152 = vector.load %arg2[%c6_175, %c0_176, %c0_177] : memref<9x128x128xbf16, #tpu.memory_space<vmem>>, vector<1x128x128xbf16>
    %153 = vector.shape_cast %152 : vector<1x128x128xbf16> to vector<128x128xbf16>
    %cst_178 = arith.constant dense<0.000000e+00> : vector<128x128xf32>
    %154 = tpu.matmul %151, %153, %cst_178 {dimension_numbers = #tpu.dot_dimension_numbers<[1], [0], [0], [1], [0, 0, 1, 1], [], []>} : vector<128x128xbf16>, vector<128x128xbf16>, vector<128x128xf32> -> vector<128x128xf32>
    %155 = arith.addf %148, %154 : vector<128x128xf32>
    %c18_179 = arith.constant 18 : index
    %c8_180 = arith.constant 8 : index
    %c0_181 = arith.constant 0 : index
    %156 = tpu.strided_load %arg9[%c18_179, %c8_180, %c0_181] {strides = array<i32: 2, 2, 1>} : memref<34x48x128xf32, #tpu.memory_space<vmem>>, vector<8x16x128xf32>
    %157 = vector.shape_cast %156 : vector<8x16x128xf32> to vector<128x128xf32>
    %158 = arith.truncf %157 : vector<128x128xf32> to vector<128x128xbf16>
    %c7_182 = arith.constant 7 : index
    %c0_183 = arith.constant 0 : index
    %c0_184 = arith.constant 0 : index
    %159 = vector.load %arg2[%c7_182, %c0_183, %c0_184] : memref<9x128x128xbf16, #tpu.memory_space<vmem>>, vector<1x128x128xbf16>
    %160 = vector.shape_cast %159 : vector<1x128x128xbf16> to vector<128x128xbf16>
    %cst_185 = arith.constant dense<0.000000e+00> : vector<128x128xf32>
    %161 = tpu.matmul %158, %160, %cst_185 {dimension_numbers = #tpu.dot_dimension_numbers<[1], [0], [0], [1], [0, 0, 1, 1], [], []>} : vector<128x128xbf16>, vector<128x128xbf16>, vector<128x128xf32> -> vector<128x128xf32>
    %162 = arith.addf %155, %161 : vector<128x128xf32>
    %c18_186 = arith.constant 18 : index
    %c9_187 = arith.constant 9 : index
    %c0_188 = arith.constant 0 : index
    %163 = tpu.strided_load %arg9[%c18_186, %c9_187, %c0_188] {strides = array<i32: 2, 2, 1>} : memref<34x48x128xf32, #tpu.memory_space<vmem>>, vector<8x16x128xf32>
    %164 = vector.shape_cast %163 : vector<8x16x128xf32> to vector<128x128xf32>
    %165 = arith.truncf %164 : vector<128x128xf32> to vector<128x128xbf16>
    %c8_189 = arith.constant 8 : index
    %c0_190 = arith.constant 0 : index
    %c0_191 = arith.constant 0 : index
    %166 = vector.load %arg2[%c8_189, %c0_190, %c0_191] : memref<9x128x128xbf16, #tpu.memory_space<vmem>>, vector<1x128x128xbf16>
    %167 = vector.shape_cast %166 : vector<1x128x128xbf16> to vector<128x128xbf16>
    %cst_192 = arith.constant dense<0.000000e+00> : vector<128x128xf32>
    %168 = tpu.matmul %165, %167, %cst_192 {dimension_numbers = #tpu.dot_dimension_numbers<[1], [0], [0], [1], [0, 0, 1, 1], [], []>} : vector<128x128xbf16>, vector<128x128xbf16>, vector<128x128xf32> -> vector<128x128xf32>
    %169 = arith.addf %162, %168 : vector<128x128xf32>
    %170 = vector.broadcast %33 : vector<1x128xf32> to vector<128x128xf32>
    %171 = arith.addf %169, %170 : vector<128x128xf32>
    %cst_193 = arith.constant 0.000000e+00 : f32
    %cst_194 = arith.constant 6.000000e+00 : f32
    %172 = vector.broadcast %cst_193 : f32 to vector<128x128xf32>
    %173 = arith.maximumf %172, %171 : vector<128x128xf32>
    %174 = vector.broadcast %cst_194 : f32 to vector<128x128xf32>
    %175 = arith.minimumf %174, %173 : vector<128x128xf32>
    %176 = vector.shape_cast %175 : vector<128x128xf32> to vector<8x16x128xf32>
    %c8_195 = arith.constant 8 : index
    %c0_196 = arith.constant 0 : index
    %c0_197 = arith.constant 0 : index
    %177 = vector.load %arg10[%c8_195, %c0_196, %c0_197] : memref<16x16x128xf32, #tpu.memory_space<vmem>>, vector<8x16x128xf32>
    tpu.vector_store %arg10[%c8_195, %c0_196, %c0_197], %176 {strides = array<i32>} : memref<16x16x128xf32, #tpu.memory_space<vmem>>, vector<8x16x128xf32>,
    %c0_198 = arith.constant 0 : index
    %c0_199 = arith.constant 0 : index
    %c0_200 = arith.constant 0 : index
    %178 = vector.load %arg10[%c0_198, %c0_199, %c0_200] : memref<16x16x128xf32, #tpu.memory_space<vmem>>, vector<16x16x128xf32>
    %c1_201 = arith.constant 1 : index
    %c8_202 = arith.constant 8 : index
    %c0_203 = arith.constant 0 : index
    %179 = vector.load %arg12[%c1_201, %c8_202, %c0_203] : memref<18x32x128xf32, #tpu.memory_space<vmem>>, vector<16x16x128xf32>
    tpu.vector_store %arg12[%c1_201, %c8_202, %c0_203], %178 {strides = array<i32>} : memref<18x32x128xf32, #tpu.memory_space<vmem>>, vector<16x16x128xf32>,
    %c0_204 = arith.constant 0 : index
    %c0_205 = arith.constant 0 : index
    %c0_206 = arith.constant 0 : index
    %180 = vector.load %arg6[%c0_204, %c0_205, %c0_206] : memref<8x9x128xf32, #tpu.memory_space<vmem>>, vector<1x9x128xf32>
    %181 = vector.shape_cast %180 : vector<1x9x128xf32> to vector<9x128xf32>
    %c0_207 = arith.constant 0 : index
    %c0_208 = arith.constant 0 : index
    %c0_209 = arith.constant 0 : index
    %182 = vector.load %arg7[%c0_207, %c0_208, %c0_209] : memref<8x1x128xf32, #tpu.memory_space<vmem>>, vector<1x1x128xf32>
    %183 = vector.shape_cast %182 : vector<1x1x128xf32> to vector<1x128xf32>
    %c0_210 = arith.constant 0 : index
    %c0_211 = arith.constant 0 : index
    %c0_212 = arith.constant 0 : index
    %184 = vector.load %arg4[%c0_210, %c0_211, %c0_212] : memref<15x128x128xbf16, #tpu.memory_space<vmem>>, vector<1x128x128xbf16>
    %185 = vector.shape_cast %184 : vector<1x128x128xbf16> to vector<128x128xbf16>
    %c0_213 = arith.constant 0 : index
    %c0_214 = arith.constant 0 : index
    %c0_215 = arith.constant 0 : index
    %186 = vector.load %arg5[%c0_213, %c0_214, %c0_215] : memref<15x1x128xf32, #tpu.memory_space<vmem>>, vector<1x1x128xf32>
    %187 = vector.shape_cast %186 : vector<1x1x128xf32> to vector<1x128xf32>
    %cst_216 = arith.constant 0.000000e+00 : f32
    %188 = vector.broadcast %cst_216 : f32 to vector<8x16x128xf32>
    %c0_217 = arith.constant 0 : index
    %c7_218 = arith.constant 7 : index
    %c0_219 = arith.constant 0 : index
    %189 = vector.load %arg12[%c0_217, %c7_218, %c0_219] : memref<18x32x128xf32, #tpu.memory_space<vmem>>, vector<8x16x128xf32>
    %190 = vector.extract_strided_slice %181 {offsets = [0, 0], sizes = [1, 128], strides = [1, 1]} : vector<9x128xf32> to vector<1x128xf32>
    %191 = vector.shape_cast %190 : vector<1x128xf32> to vector<128xf32>
    %192 = vector.shape_cast %191 : vector<128xf32> to vector<1x1x128xf32>
    %193 = vector.broadcast %192 : vector<1x1x128xf32> to vector<8x16x128xf32>
    %194 = arith.mulf %189, %193 : vector<8x16x128xf32>
    %195 = arith.addf %188, %194 : vector<8x16x128xf32>
    %c0_220 = arith.constant 0 : index
    %c8_221 = arith.constant 8 : index
    %c0_222 = arith.constant 0 : index
    %196 = vector.load %arg12[%c0_220, %c8_221, %c0_222] : memref<18x32x128xf32, #tpu.memory_space<vmem>>, vector<8x16x128xf32>
    %197 = vector.extract_strided_slice %181 {offsets = [1, 0], sizes = [1, 128], strides = [1, 1]} : vector<9x128xf32> to vector<1x128xf32>
    %198 = vector.shape_cast %197 : vector<1x128xf32> to vector<128xf32>
    %199 = vector.shape_cast %198 : vector<128xf32> to vector<1x1x128xf32>
    %200 = vector.broadcast %199 : vector<1x1x128xf32> to vector<8x16x128xf32>
    %201 = arith.mulf %196, %200 : vector<8x16x128xf32>
    %202 = arith.addf %195, %201 : vector<8x16x128xf32>
    %c0_223 = arith.constant 0 : index
    %c9_224 = arith.constant 9 : index
    %c0_225 = arith.constant 0 : index
    %203 = vector.load %arg12[%c0_223, %c9_224, %c0_225] : memref<18x32x128xf32, #tpu.memory_space<vmem>>, vector<8x16x128xf32>
    %204 = vector.extract_strided_slice %181 {offsets = [2, 0], sizes = [1, 128], strides = [1, 1]} : vector<9x128xf32> to vector<1x128xf32>
    %205 = vector.shape_cast %204 : vector<1x128xf32> to vector<128xf32>
    %206 = vector.shape_cast %205 : vector<128xf32> to vector<1x1x128xf32>
    %207 = vector.broadcast %206 : vector<1x1x128xf32> to vector<8x16x128xf32>
    %208 = arith.mulf %203, %207 : vector<8x16x128xf32>
    %209 = arith.addf %202, %208 : vector<8x16x128xf32>
    %c1_226 = arith.constant 1 : index
    %c7_227 = arith.constant 7 : index
    %c0_228 = arith.constant 0 : index
    %210 = vector.load %arg12[%c1_226, %c7_227, %c0_228] : memref<18x32x128xf32, #tpu.memory_space<vmem>>, vector<8x16x128xf32>
    %211 = vector.extract_strided_slice %181 {offsets = [3, 0], sizes = [1, 128], strides = [1, 1]} : vector<9x128xf32> to vector<1x128xf32>
    %212 = vector.shape_cast %211 : vector<1x128xf32> to vector<128xf32>
    %213 = vector.shape_cast %212 : vector<128xf32> to vector<1x1x128xf32>
    %214 = vector.broadcast %213 : vector<1x1x128xf32> to vector<8x16x128xf32>
    %215 = arith.mulf %210, %214 : vector<8x16x128xf32>
    %216 = arith.addf %209, %215 : vector<8x16x128xf32>
    %c1_229 = arith.constant 1 : index
    %c8_230 = arith.constant 8 : index
    %c0_231 = arith.constant 0 : index
    %217 = vector.load %arg12[%c1_229, %c8_230, %c0_231] : memref<18x32x128xf32, #tpu.memory_space<vmem>>, vector<8x16x128xf32>
    %218 = vector.extract_strided_slice %181 {offsets = [4, 0], sizes = [1, 128], strides = [1, 1]} : vector<9x128xf32> to vector<1x128xf32>
    %219 = vector.shape_cast %218 : vector<1x128xf32> to vector<128xf32>
    %220 = vector.shape_cast %219 : vector<128xf32> to vector<1x1x128xf32>
    %221 = vector.broadcast %220 : vector<1x1x128xf32> to vector<8x16x128xf32>
    %222 = arith.mulf %217, %221 : vector<8x16x128xf32>
    %223 = arith.addf %216, %222 : vector<8x16x128xf32>
    %c1_232 = arith.constant 1 : index
    %c9_233 = arith.constant 9 : index
    %c0_234 = arith.constant 0 : index
    %224 = vector.load %arg12[%c1_232, %c9_233, %c0_234] : memref<18x32x128xf32, #tpu.memory_space<vmem>>, vector<8x16x128xf32>
    %225 = vector.extract_strided_slice %181 {offsets = [5, 0], sizes = [1, 128], strides = [1, 1]} : vector<9x128xf32> to vector<1x128xf32>
    %226 = vector.shape_cast %225 : vector<1x128xf32> to vector<128xf32>
    %227 = vector.shape_cast %226 : vector<128xf32> to vector<1x1x128xf32>
    %228 = vector.broadcast %227 : vector<1x1x128xf32> to vector<8x16x128xf32>
    %229 = arith.mulf %224, %228 : vector<8x16x128xf32>
    %230 = arith.addf %223, %229 : vector<8x16x128xf32>
    %c2_235 = arith.constant 2 : index
    %c7_236 = arith.constant 7 : index
    %c0_237 = arith.constant 0 : index
    %231 = vector.load %arg12[%c2_235, %c7_236, %c0_237] : memref<18x32x128xf32, #tpu.memory_space<vmem>>, vector<8x16x128xf32>
    %232 = vector.extract_strided_slice %181 {offsets = [6, 0], sizes = [1, 128], strides = [1, 1]} : vector<9x128xf32> to vector<1x128xf32>
    %233 = vector.shape_cast %232 : vector<1x128xf32> to vector<128xf32>
    %234 = vector.shape_cast %233 : vector<128xf32> to vector<1x1x128xf32>
    %235 = vector.broadcast %234 : vector<1x1x128xf32> to vector<8x16x128xf32>
    %236 = arith.mulf %231, %235 : vector<8x16x128xf32>
    %237 = arith.addf %230, %236 : vector<8x16x128xf32>
    %c2_238 = arith.constant 2 : index
    %c8_239 = arith.constant 8 : index
    %c0_240 = arith.constant 0 : index
    %238 = vector.load %arg12[%c2_238, %c8_239, %c0_240] : memref<18x32x128xf32, #tpu.memory_space<vmem>>, vector<8x16x128xf32>
    %239 = vector.extract_strided_slice %181 {offsets = [7, 0], sizes = [1, 128], strides = [1, 1]} : vector<9x128xf32> to vector<1x128xf32>
    %240 = vector.shape_cast %239 : vector<1x128xf32> to vector<128xf32>
    %241 = vector.shape_cast %240 : vector<128xf32> to vector<1x1x128xf32>
    %242 = vector.broadcast %241 : vector<1x1x128xf32> to vector<8x16x128xf32>
    %243 = arith.mulf %238, %242 : vector<8x16x128xf32>
    %244 = arith.addf %237, %243 : vector<8x16x128xf32>
    %c2_241 = arith.constant 2 : index
    %c9_242 = arith.constant 9 : index
    %c0_243 = arith.constant 0 : index
    %245 = vector.load %arg12[%c2_241, %c9_242, %c0_243] : memref<18x32x128xf32, #tpu.memory_space<vmem>>, vector<8x16x128xf32>
    %246 = vector.extract_strided_slice %181 {offsets = [8, 0], sizes = [1, 128], strides = [1, 1]} : vector<9x128xf32> to vector<1x128xf32>
    %247 = vector.shape_cast %246 : vector<1x128xf32> to vector<128xf32>
    %248 = vector.shape_cast %247 : vector<128xf32> to vector<1x1x128xf32>
    %249 = vector.broadcast %248 : vector<1x1x128xf32> to vector<8x16x128xf32>
    %250 = arith.mulf %245, %249 : vector<8x16x128xf32>
    %251 = arith.addf %244, %250 : vector<8x16x128xf32>
    %252 = vector.shape_cast %183 : vector<1x128xf32> to vector<1x1x128xf32>
    %253 = vector.broadcast %252 : vector<1x1x128xf32> to vector<8x16x128xf32>
    %254 = arith.addf %251, %253 : vector<8x16x128xf32>
    %cst_244 = arith.constant 0.000000e+00 : f32
    %cst_245 = arith.constant 6.000000e+00 : f32
    %255 = vector.broadcast %cst_244 : f32 to vector<8x16x128xf32>
    %256 = arith.maximumf %255, %254 : vector<8x16x128xf32>
    %257 = vector.broadcast %cst_245 : f32 to vector<8x16x128xf32>
    %258 = arith.minimumf %257, %256 : vector<8x16x128xf32>
    %259 = vector.shape_cast %258 : vector<8x16x128xf32> to vector<128x128xf32>
    %260 = arith.truncf %259 : vector<128x128xf32> to vector<128x128xbf16>
    %cst_246 = arith.constant dense<0.000000e+00> : vector<128x128xf32>
    %261 = tpu.matmul %260, %185, %cst_246 {dimension_numbers = #tpu.dot_dimension_numbers<[1], [0], [0], [1], [0, 0, 1, 1], [], []>} : vector<128x128xbf16>, vector<128x128xbf16>, vector<128x128xf32> -> vector<128x128xf32>
    %262 = vector.broadcast %187 : vector<1x128xf32> to vector<128x128xf32>
    %263 = arith.addf %261, %262 : vector<128x128xf32>
    %c0_247 = arith.constant 0 : index
    %c0_248 = arith.constant 0 : index
    %c0_249 = arith.constant 0 : index
    %264 = vector.load %arg10[%c0_247, %c0_248, %c0_249] : memref<16x16x128xf32, #tpu.memory_space<vmem>>, vector<8x16x128xf32>
    %265 = vector.shape_cast %264 : vector<8x16x128xf32> to vector<128x128xf32>
    %266 = arith.addf %263, %265 : vector<128x128xf32>
    %267 = vector.shape_cast %266 : vector<128x128xf32> to vector<8x16x128xf32>
    %c0_250 = arith.constant 0 : index
    %c0_251 = arith.constant 0 : index
    %c0_252 = arith.constant 0 : index
    %268 = vector.load %arg11[%c0_250, %c0_251, %c0_252] : memref<16x16x128xf32, #tpu.memory_space<vmem>>, vector<8x16x128xf32>
    tpu.vector_store %arg11[%c0_250, %c0_251, %c0_252], %267 {strides = array<i32>} : memref<16x16x128xf32, #tpu.memory_space<vmem>>, vector<8x16x128xf32>,
    %cst_253 = arith.constant 0.000000e+00 : f32
    %269 = vector.broadcast %cst_253 : f32 to vector<8x16x128xf32>
    %c8_254 = arith.constant 8 : index
    %c7_255 = arith.constant 7 : index
    %c0_256 = arith.constant 0 : index
    %270 = vector.load %arg12[%c8_254, %c7_255, %c0_256] : memref<18x32x128xf32, #tpu.memory_space<vmem>>, vector<8x16x128xf32>
    %271 = vector.extract_strided_slice %181 {offsets = [0, 0], sizes = [1, 128], strides = [1, 1]} : vector<9x128xf32> to vector<1x128xf32>
    %272 = vector.shape_cast %271 : vector<1x128xf32> to vector<128xf32>
    %273 = vector.shape_cast %272 : vector<128xf32> to vector<1x1x128xf32>
    %274 = vector.broadcast %273 : vector<1x1x128xf32> to vector<8x16x128xf32>
    %275 = arith.mulf %270, %274 : vector<8x16x128xf32>
    %276 = arith.addf %269, %275 : vector<8x16x128xf32>
    %c8_257 = arith.constant 8 : index
    %c8_258 = arith.constant 8 : index
    %c0_259 = arith.constant 0 : index
    %277 = vector.load %arg12[%c8_257, %c8_258, %c0_259] : memref<18x32x128xf32, #tpu.memory_space<vmem>>, vector<8x16x128xf32>
    %278 = vector.extract_strided_slice %181 {offsets = [1, 0], sizes = [1, 128], strides = [1, 1]} : vector<9x128xf32> to vector<1x128xf32>
    %279 = vector.shape_cast %278 : vector<1x128xf32> to vector<128xf32>
    %280 = vector.shape_cast %279 : vector<128xf32> to vector<1x1x128xf32>
    %281 = vector.broadcast %280 : vector<1x1x128xf32> to vector<8x16x128xf32>
    %282 = arith.mulf %277, %281 : vector<8x16x128xf32>
    %283 = arith.addf %276, %282 : vector<8x16x128xf32>
    %c8_260 = arith.constant 8 : index
    %c9_261 = arith.constant 9 : index
    %c0_262 = arith.constant 0 : index
    %284 = vector.load %arg12[%c8_260, %c9_261, %c0_262] : memref<18x32x128xf32, #tpu.memory_space<vmem>>, vector<8x16x128xf32>
    %285 = vector.extract_strided_slice %181 {offsets = [2, 0], sizes = [1, 128], strides = [1, 1]} : vector<9x128xf32> to vector<1x128xf32>
    %286 = vector.shape_cast %285 : vector<1x128xf32> to vector<128xf32>
    %287 = vector.shape_cast %286 : vector<128xf32> to vector<1x1x128xf32>
    %288 = vector.broadcast %287 : vector<1x1x128xf32> to vector<8x16x128xf32>
    %289 = arith.mulf %284, %288 : vector<8x16x128xf32>
    %290 = arith.addf %283, %289 : vector<8x16x128xf32>
    %c9_263 = arith.constant 9 : index
    %c7_264 = arith.constant 7 : index
    %c0_265 = arith.constant 0 : index
    %291 = vector.load %arg12[%c9_263, %c7_264, %c0_265] : memref<18x32x128xf32, #tpu.memory_space<vmem>>, vector<8x16x128xf32>
    %292 = vector.extract_strided_slice %181 {offsets = [3, 0], sizes = [1, 128], strides = [1, 1]} : vector<9x128xf32> to vector<1x128xf32>
    %293 = vector.shape_cast %292 : vector<1x128xf32> to vector<128xf32>
    %294 = vector.shape_cast %293 : vector<128xf32> to vector<1x1x128xf32>
    %295 = vector.broadcast %294 : vector<1x1x128xf32> to vector<8x16x128xf32>
    %296 = arith.mulf %291, %295 : vector<8x16x128xf32>
    %297 = arith.addf %290, %296 : vector<8x16x128xf32>
    %c9_266 = arith.constant 9 : index
    %c8_267 = arith.constant 8 : index
    %c0_268 = arith.constant 0 : index
    %298 = vector.load %arg12[%c9_266, %c8_267, %c0_268] : memref<18x32x128xf32, #tpu.memory_space<vmem>>, vector<8x16x128xf32>
    %299 = vector.extract_strided_slice %181 {offsets = [4, 0], sizes = [1, 128], strides = [1, 1]} : vector<9x128xf32> to vector<1x128xf32>
    %300 = vector.shape_cast %299 : vector<1x128xf32> to vector<128xf32>
    %301 = vector.shape_cast %300 : vector<128xf32> to vector<1x1x128xf32>
    %302 = vector.broadcast %301 : vector<1x1x128xf32> to vector<8x16x128xf32>
    %303 = arith.mulf %298, %302 : vector<8x16x128xf32>
    %304 = arith.addf %297, %303 : vector<8x16x128xf32>
    %c9_269 = arith.constant 9 : index
    %c9_270 = arith.constant 9 : index
    %c0_271 = arith.constant 0 : index
    %305 = vector.load %arg12[%c9_269, %c9_270, %c0_271] : memref<18x32x128xf32, #tpu.memory_space<vmem>>, vector<8x16x128xf32>
    %306 = vector.extract_strided_slice %181 {offsets = [5, 0], sizes = [1, 128], strides = [1, 1]} : vector<9x128xf32> to vector<1x128xf32>
    %307 = vector.shape_cast %306 : vector<1x128xf32> to vector<128xf32>
    %308 = vector.shape_cast %307 : vector<128xf32> to vector<1x1x128xf32>
    %309 = vector.broadcast %308 : vector<1x1x128xf32> to vector<8x16x128xf32>
    %310 = arith.mulf %305, %309 : vector<8x16x128xf32>
    %311 = arith.addf %304, %310 : vector<8x16x128xf32>
    %c10_272 = arith.constant 10 : index
    %c7_273 = arith.constant 7 : index
    %c0_274 = arith.constant 0 : index
    %312 = vector.load %arg12[%c10_272, %c7_273, %c0_274] : memref<18x32x128xf32, #tpu.memory_space<vmem>>, vector<8x16x128xf32>
    %313 = vector.extract_strided_slice %181 {offsets = [6, 0], sizes = [1, 128], strides = [1, 1]} : vector<9x128xf32> to vector<1x128xf32>
    %314 = vector.shape_cast %313 : vector<1x128xf32> to vector<128xf32>
    %315 = vector.shape_cast %314 : vector<128xf32> to vector<1x1x128xf32>
    %316 = vector.broadcast %315 : vector<1x1x128xf32> to vector<8x16x128xf32>
    %317 = arith.mulf %312, %316 : vector<8x16x128xf32>
    %318 = arith.addf %311, %317 : vector<8x16x128xf32>
    %c10_275 = arith.constant 10 : index
    %c8_276 = arith.constant 8 : index
    %c0_277 = arith.constant 0 : index
    %319 = vector.load %arg12[%c10_275, %c8_276, %c0_277] : memref<18x32x128xf32, #tpu.memory_space<vmem>>, vector<8x16x128xf32>
    %320 = vector.extract_strided_slice %181 {offsets = [7, 0], sizes = [1, 128], strides = [1, 1]} : vector<9x128xf32> to vector<1x128xf32>
    %321 = vector.shape_cast %320 : vector<1x128xf32> to vector<128xf32>
    %322 = vector.shape_cast %321 : vector<128xf32> to vector<1x1x128xf32>
    %323 = vector.broadcast %322 : vector<1x1x128xf32> to vector<8x16x128xf32>
    %324 = arith.mulf %319, %323 : vector<8x16x128xf32>
    %325 = arith.addf %318, %324 : vector<8x16x128xf32>
    %c10_278 = arith.constant 10 : index
    %c9_279 = arith.constant 9 : index
    %c0_280 = arith.constant 0 : index
    %326 = vector.load %arg12[%c10_278, %c9_279, %c0_280] : memref<18x32x128xf32, #tpu.memory_space<vmem>>, vector<8x16x128xf32>
    %327 = vector.extract_strided_slice %181 {offsets = [8, 0], sizes = [1, 128], strides = [1, 1]} : vector<9x128xf32> to vector<1x128xf32>
    %328 = vector.shape_cast %327 : vector<1x128xf32> to vector<128xf32>
    %329 = vector.shape_cast %328 : vector<128xf32> to vector<1x1x128xf32>
    %330 = vector.broadcast %329 : vector<1x1x128xf32> to vector<8x16x128xf32>
    %331 = arith.mulf %326, %330 : vector<8x16x128xf32>
    %332 = arith.addf %325, %331 : vector<8x16x128xf32>
    %333 = vector.shape_cast %183 : vector<1x128xf32> to vector<1x1x128xf32>
    %334 = vector.broadcast %333 : vector<1x1x128xf32> to vector<8x16x128xf32>
    %335 = arith.addf %332, %334 : vector<8x16x128xf32>
    %cst_281 = arith.constant 0.000000e+00 : f32
    %cst_282 = arith.constant 6.000000e+00 : f32
    %336 = vector.broadcast %cst_281 : f32 to vector<8x16x128xf32>
    %337 = arith.maximumf %336, %335 : vector<8x16x128xf32>
    %338 = vector.broadcast %cst_282 : f32 to vector<8x16x128xf32>
    %339 = arith.minimumf %338, %337 : vector<8x16x128xf32>
    %340 = vector.shape_cast %339 : vector<8x16x128xf32> to vector<128x128xf32>
    %341 = arith.truncf %340 : vector<128x128xf32> to vector<128x128xbf16>
    %cst_283 = arith.constant dense<0.000000e+00> : vector<128x128xf32>
    %342 = tpu.matmul %341, %185, %cst_283 {dimension_numbers = #tpu.dot_dimension_numbers<[1], [0], [0], [1], [0, 0, 1, 1], [], []>} : vector<128x128xbf16>, vector<128x128xbf16>, vector<128x128xf32> -> vector<128x128xf32>
    %343 = vector.broadcast %187 : vector<1x128xf32> to vector<128x128xf32>
    %344 = arith.addf %342, %343 : vector<128x128xf32>
    %c8_284 = arith.constant 8 : index
    %c0_285 = arith.constant 0 : index
    %c0_286 = arith.constant 0 : index
    %345 = vector.load %arg10[%c8_284, %c0_285, %c0_286] : memref<16x16x128xf32, #tpu.memory_space<vmem>>, vector<8x16x128xf32>
    %346 = vector.shape_cast %345 : vector<8x16x128xf32> to vector<128x128xf32>
    %347 = arith.addf %344, %346 : vector<128x128xf32>
    %348 = vector.shape_cast %347 : vector<128x128xf32> to vector<8x16x128xf32>
    %c8_287 = arith.constant 8 : index
    %c0_288 = arith.constant 0 : index
    %c0_289 = arith.constant 0 : index
    %349 = vector.load %arg11[%c8_287, %c0_288, %c0_289] : memref<16x16x128xf32, #tpu.memory_space<vmem>>, vector<8x16x128xf32>
    tpu.vector_store %arg11[%c8_287, %c0_288, %c0_289], %348 {strides = array<i32>} : memref<16x16x128xf32, #tpu.memory_space<vmem>>, vector<8x16x128xf32>,
    %c0_290 = arith.constant 0 : index
    %c0_291 = arith.constant 0 : index
    %c0_292 = arith.constant 0 : index
    %350 = vector.load %arg11[%c0_290, %c0_291, %c0_292] : memref<16x16x128xf32, #tpu.memory_space<vmem>>, vector<16x16x128xf32>
    %351 = vector.shape_cast %350 : vector<16x16x128xf32> to vector<256x128xf32>
    %352 = arith.truncf %351 : vector<256x128xf32> to vector<256x128xbf16>
    %c1_293 = arith.constant 1 : index
    %c0_294 = arith.constant 0 : index
    %c0_295 = arith.constant 0 : index
    %353 = vector.load %arg4[%c1_293, %c0_294, %c0_295] : memref<15x128x128xbf16, #tpu.memory_space<vmem>>, vector<1x128x128xbf16>
    %354 = vector.shape_cast %353 : vector<1x128x128xbf16> to vector<128x128xbf16>
    %cst_296 = arith.constant dense<0.000000e+00> : vector<256x128xf32>
    %355 = tpu.matmul %352, %354, %cst_296 {dimension_numbers = #tpu.dot_dimension_numbers<[1], [0], [0], [1], [0, 0, 1, 1], [], []>} : vector<256x128xbf16>, vector<128x128xbf16>, vector<256x128xf32> -> vector<256x128xf32>
    %c1_297 = arith.constant 1 : index
    %c0_298 = arith.constant 0 : index
    %c0_299 = arith.constant 0 : index
    %356 = vector.load %arg5[%c1_297, %c0_298, %c0_299] : memref<15x1x128xf32, #tpu.memory_space<vmem>>, vector<1x1x128xf32>
    %357 = vector.shape_cast %356 : vector<1x1x128xf32> to vector<1x128xf32>
    %358 = vector.broadcast %357 : vector<1x128xf32> to vector<256x128xf32>
    %359 = arith.addf %355, %358 : vector<256x128xf32>
    %cst_300 = arith.constant 0.000000e+00 : f32
    %cst_301 = arith.constant 6.000000e+00 : f32
    %360 = vector.broadcast %cst_300 : f32 to vector<256x128xf32>
    %361 = arith.maximumf %360, %359 : vector<256x128xf32>
    %362 = vector.broadcast %cst_301 : f32 to vector<256x128xf32>
    %363 = arith.minimumf %362, %361 : vector<256x128xf32>
    %364 = vector.shape_cast %363 : vector<256x128xf32> to vector<16x16x128xf32>
    %c1_302 = arith.constant 1 : index
    %c8_303 = arith.constant 8 : index
    %c0_304 = arith.constant 0 : index
    %365 = vector.load %arg12[%c1_302, %c8_303, %c0_304] : memref<18x32x128xf32, #tpu.memory_space<vmem>>, vector<16x16x128xf32>
    tpu.vector_store %arg12[%c1_302, %c8_303, %c0_304], %364 {strides = array<i32>} : memref<18x32x128xf32, #tpu.memory_space<vmem>>, vector<16x16x128xf32>,
    %c1_305 = arith.constant 1 : index
    %c0_306 = arith.constant 0 : index
    %c0_307 = arith.constant 0 : index
    %366 = vector.load %arg6[%c1_305, %c0_306, %c0_307] : memref<8x9x128xf32, #tpu.memory_space<vmem>>, vector<1x9x128xf32>
    %367 = vector.shape_cast %366 : vector<1x9x128xf32> to vector<9x128xf32>
    %c1_308 = arith.constant 1 : index
    %c0_309 = arith.constant 0 : index
    %c0_310 = arith.constant 0 : index
    %368 = vector.load %arg7[%c1_308, %c0_309, %c0_310] : memref<8x1x128xf32, #tpu.memory_space<vmem>>, vector<1x1x128xf32>
    %369 = vector.shape_cast %368 : vector<1x1x128xf32> to vector<1x128xf32>
    %c2_311 = arith.constant 2 : index
    %c0_312 = arith.constant 0 : index
    %c0_313 = arith.constant 0 : index
    %370 = vector.load %arg4[%c2_311, %c0_312, %c0_313] : memref<15x128x128xbf16, #tpu.memory_space<vmem>>, vector<1x128x128xbf16>
    %371 = vector.shape_cast %370 : vector<1x128x128xbf16> to vector<128x128xbf16>
    %c2_314 = arith.constant 2 : index
    %c0_315 = arith.constant 0 : index
    %c0_316 = arith.constant 0 : index
    %372 = vector.load %arg5[%c2_314, %c0_315, %c0_316] : memref<15x1x128xf32, #tpu.memory_space<vmem>>, vector<1x1x128xf32>
    %373 = vector.shape_cast %372 : vector<1x1x128xf32> to vector<1x128xf32>
    %cst_317 = arith.constant 0.000000e+00 : f32
    %374 = vector.broadcast %cst_317 : f32 to vector<8x8x128xf32>
    %c0_318 = arith.constant 0 : index
    %c7_319 = arith.constant 7 : index
    %c0_320 = arith.constant 0 : index
    %375 = tpu.strided_load %arg12[%c0_318, %c7_319, %c0_320] {strides = array<i32: 2, 2, 1>} : memref<18x32x128xf32, #tpu.memory_space<vmem>>, vector<8x8x128xf32>
    %376 = vector.extract_strided_slice %367 {offsets = [0, 0], sizes = [1, 128], strides = [1, 1]} : vector<9x128xf32> to vector<1x128xf32>
    %377 = vector.shape_cast %376 : vector<1x128xf32> to vector<128xf32>
    %378 = vector.shape_cast %377 : vector<128xf32> to vector<1x1x128xf32>
    %379 = vector.broadcast %378 : vector<1x1x128xf32> to vector<8x8x128xf32>
    %380 = arith.mulf %375, %379 : vector<8x8x128xf32>
    %381 = arith.addf %374, %380 : vector<8x8x128xf32>
    %c0_321 = arith.constant 0 : index
    %c8_322 = arith.constant 8 : index
    %c0_323 = arith.constant 0 : index
    %382 = tpu.strided_load %arg12[%c0_321, %c8_322, %c0_323] {strides = array<i32: 2, 2, 1>} : memref<18x32x128xf32, #tpu.memory_space<vmem>>, vector<8x8x128xf32>
    %383 = vector.extract_strided_slice %367 {offsets = [1, 0], sizes = [1, 128], strides = [1, 1]} : vector<9x128xf32> to vector<1x128xf32>
    %384 = vector.shape_cast %383 : vector<1x128xf32> to vector<128xf32>
    %385 = vector.shape_cast %384 : vector<128xf32> to vector<1x1x128xf32>
    %386 = vector.broadcast %385 : vector<1x1x128xf32> to vector<8x8x128xf32>
    %387 = arith.mulf %382, %386 : vector<8x8x128xf32>
    %388 = arith.addf %381, %387 : vector<8x8x128xf32>
    %c0_324 = arith.constant 0 : index
    %c9_325 = arith.constant 9 : index
    %c0_326 = arith.constant 0 : index
    %389 = tpu.strided_load %arg12[%c0_324, %c9_325, %c0_326] {strides = array<i32: 2, 2, 1>} : memref<18x32x128xf32, #tpu.memory_space<vmem>>, vector<8x8x128xf32>
    %390 = vector.extract_strided_slice %367 {offsets = [2, 0], sizes = [1, 128], strides = [1, 1]} : vector<9x128xf32> to vector<1x128xf32>
    %391 = vector.shape_cast %390 : vector<1x128xf32> to vector<128xf32>
    %392 = vector.shape_cast %391 : vector<128xf32> to vector<1x1x128xf32>
    %393 = vector.broadcast %392 : vector<1x1x128xf32> to vector<8x8x128xf32>
    %394 = arith.mulf %389, %393 : vector<8x8x128xf32>
    %395 = arith.addf %388, %394 : vector<8x8x128xf32>
    %c1_327 = arith.constant 1 : index
    %c7_328 = arith.constant 7 : index
    %c0_329 = arith.constant 0 : index
    %396 = tpu.strided_load %arg12[%c1_327, %c7_328, %c0_329] {strides = array<i32: 2, 2, 1>} : memref<18x32x128xf32, #tpu.memory_space<vmem>>, vector<8x8x128xf32>
    %397 = vector.extract_strided_slice %367 {offsets = [3, 0], sizes = [1, 128], strides = [1, 1]} : vector<9x128xf32> to vector<1x128xf32>
    %398 = vector.shape_cast %397 : vector<1x128xf32> to vector<128xf32>
    %399 = vector.shape_cast %398 : vector<128xf32> to vector<1x1x128xf32>
    %400 = vector.broadcast %399 : vector<1x1x128xf32> to vector<8x8x128xf32>
    %401 = arith.mulf %396, %400 : vector<8x8x128xf32>
    %402 = arith.addf %395, %401 : vector<8x8x128xf32>
    %c1_330 = arith.constant 1 : index
    %c8_331 = arith.constant 8 : index
    %c0_332 = arith.constant 0 : index
    %403 = tpu.strided_load %arg12[%c1_330, %c8_331, %c0_332] {strides = array<i32: 2, 2, 1>} : memref<18x32x128xf32, #tpu.memory_space<vmem>>, vector<8x8x128xf32>
    %404 = vector.extract_strided_slice %367 {offsets = [4, 0], sizes = [1, 128], strides = [1, 1]} : vector<9x128xf32> to vector<1x128xf32>
    %405 = vector.shape_cast %404 : vector<1x128xf32> to vector<128xf32>
    %406 = vector.shape_cast %405 : vector<128xf32> to vector<1x1x128xf32>
    %407 = vector.broadcast %406 : vector<1x1x128xf32> to vector<8x8x128xf32>
    %408 = arith.mulf %403, %407 : vector<8x8x128xf32>
    %409 = arith.addf %402, %408 : vector<8x8x128xf32>
    %c1_333 = arith.constant 1 : index
    %c9_334 = arith.constant 9 : index
    %c0_335 = arith.constant 0 : index
    %410 = tpu.strided_load %arg12[%c1_333, %c9_334, %c0_335] {strides = array<i32: 2, 2, 1>} : memref<18x32x128xf32, #tpu.memory_space<vmem>>, vector<8x8x128xf32>
    %411 = vector.extract_strided_slice %367 {offsets = [5, 0], sizes = [1, 128], strides = [1, 1]} : vector<9x128xf32> to vector<1x128xf32>
    %412 = vector.shape_cast %411 : vector<1x128xf32> to vector<128xf32>
    %413 = vector.shape_cast %412 : vector<128xf32> to vector<1x1x128xf32>
    %414 = vector.broadcast %413 : vector<1x1x128xf32> to vector<8x8x128xf32>
    %415 = arith.mulf %410, %414 : vector<8x8x128xf32>
    %416 = arith.addf %409, %415 : vector<8x8x128xf32>
    %c2_336 = arith.constant 2 : index
    %c7_337 = arith.constant 7 : index
    %c0_338 = arith.constant 0 : index
    %417 = tpu.strided_load %arg12[%c2_336, %c7_337, %c0_338] {strides = array<i32: 2, 2, 1>} : memref<18x32x128xf32, #tpu.memory_space<vmem>>, vector<8x8x128xf32>
    %418 = vector.extract_strided_slice %367 {offsets = [6, 0], sizes = [1, 128], strides = [1, 1]} : vector<9x128xf32> to vector<1x128xf32>
    %419 = vector.shape_cast %418 : vector<1x128xf32> to vector<128xf32>
    %420 = vector.shape_cast %419 : vector<128xf32> to vector<1x1x128xf32>
    %421 = vector.broadcast %420 : vector<1x1x128xf32> to vector<8x8x128xf32>
    %422 = arith.mulf %417, %421 : vector<8x8x128xf32>
    %423 = arith.addf %416, %422 : vector<8x8x128xf32>
    %c2_339 = arith.constant 2 : index
    %c8_340 = arith.constant 8 : index
    %c0_341 = arith.constant 0 : index
    %424 = tpu.strided_load %arg12[%c2_339, %c8_340, %c0_341] {strides = array<i32: 2, 2, 1>} : memref<18x32x128xf32, #tpu.memory_space<vmem>>, vector<8x8x128xf32>
    %425 = vector.extract_strided_slice %367 {offsets = [7, 0], sizes = [1, 128], strides = [1, 1]} : vector<9x128xf32> to vector<1x128xf32>
    %426 = vector.shape_cast %425 : vector<1x128xf32> to vector<128xf32>
    %427 = vector.shape_cast %426 : vector<128xf32> to vector<1x1x128xf32>
    %428 = vector.broadcast %427 : vector<1x1x128xf32> to vector<8x8x128xf32>
    %429 = arith.mulf %424, %428 : vector<8x8x128xf32>
    %430 = arith.addf %423, %429 : vector<8x8x128xf32>
    %c2_342 = arith.constant 2 : index
    %c9_343 = arith.constant 9 : index
    %c0_344 = arith.constant 0 : index
    %431 = tpu.strided_load %arg12[%c2_342, %c9_343, %c0_344] {strides = array<i32: 2, 2, 1>} : memref<18x32x128xf32, #tpu.memory_space<vmem>>, vector<8x8x128xf32>
    %432 = vector.extract_strided_slice %367 {offsets = [8, 0], sizes = [1, 128], strides = [1, 1]} : vector<9x128xf32> to vector<1x128xf32>
    %433 = vector.shape_cast %432 : vector<1x128xf32> to vector<128xf32>
    %434 = vector.shape_cast %433 : vector<128xf32> to vector<1x1x128xf32>
    %435 = vector.broadcast %434 : vector<1x1x128xf32> to vector<8x8x128xf32>
    %436 = arith.mulf %431, %435 : vector<8x8x128xf32>
    %437 = arith.addf %430, %436 : vector<8x8x128xf32>
    %438 = vector.shape_cast %369 : vector<1x128xf32> to vector<1x1x128xf32>
    %439 = vector.broadcast %438 : vector<1x1x128xf32> to vector<8x8x128xf32>
    %440 = arith.addf %437, %439 : vector<8x8x128xf32>
    %cst_345 = arith.constant 0.000000e+00 : f32
    %cst_346 = arith.constant 6.000000e+00 : f32
    %441 = vector.broadcast %cst_345 : f32 to vector<8x8x128xf32>
    %442 = arith.maximumf %441, %440 : vector<8x8x128xf32>
    %443 = vector.broadcast %cst_346 : f32 to vector<8x8x128xf32>
    %444 = arith.minimumf %443, %442 : vector<8x8x128xf32>
    %445 = vector.shape_cast %444 : vector<8x8x128xf32> to vector<64x128xf32>
    %446 = arith.truncf %445 : vector<64x128xf32> to vector<64x128xbf16>
    %cst_347 = arith.constant dense<0.000000e+00> : vector<64x128xf32>
    %447 = tpu.matmul %446, %371, %cst_347 {dimension_numbers = #tpu.dot_dimension_numbers<[1], [0], [0], [1], [0, 0, 1, 1], [], []>} : vector<64x128xbf16>, vector<128x128xbf16>, vector<64x128xf32> -> vector<64x128xf32>
    %448 = vector.broadcast %373 : vector<1x128xf32> to vector<64x128xf32>
    %449 = arith.addf %447, %448 : vector<64x128xf32>
    %450 = vector.shape_cast %449 : vector<64x128xf32> to vector<8x8x128xf32>
    %c0_348 = arith.constant 0 : index
    %c0_349 = arith.constant 0 : index
    %c0_350 = arith.constant 0 : index
    %451 = vector.load %arg13[%c0_348, %c0_349, %c0_350] : memref<8x8x128xf32, #tpu.memory_space<vmem>>, vector<8x8x128xf32>
    tpu.vector_store %arg13[%c0_348, %c0_349, %c0_350], %450 {strides = array<i32>} : memref<8x8x128xf32, #tpu.memory_space<vmem>>, vector<8x8x128xf32>,
    %c0_351 = arith.constant 0 : index
    %c0_352 = arith.constant 0 : index
    %c0_353 = arith.constant 0 : index
    %452 = vector.load %arg13[%c0_351, %c0_352, %c0_353] : memref<8x8x128xf32, #tpu.memory_space<vmem>>, vector<8x8x128xf32>
    %453 = vector.shape_cast %452 : vector<8x8x128xf32> to vector<64x128xf32>
    %454 = arith.truncf %453 : vector<64x128xf32> to vector<64x128xbf16>
    %c3_354 = arith.constant 3 : index
    %c0_355 = arith.constant 0 : index
    %c0_356 = arith.constant 0 : index
    %455 = vector.load %arg4[%c3_354, %c0_355, %c0_356] : memref<15x128x128xbf16, #tpu.memory_space<vmem>>, vector<1x128x128xbf16>
    %456 = vector.shape_cast %455 : vector<1x128x128xbf16> to vector<128x128xbf16>
    %cst_357 = arith.constant dense<0.000000e+00> : vector<64x128xf32>
    %457 = tpu.matmul %454, %456, %cst_357 {dimension_numbers = #tpu.dot_dimension_numbers<[1], [0], [0], [1], [0, 0, 1, 1], [], []>} : vector<64x128xbf16>, vector<128x128xbf16>, vector<64x128xf32> -> vector<64x128xf32>
    %c3_358 = arith.constant 3 : index
    %c0_359 = arith.constant 0 : index
    %c0_360 = arith.constant 0 : index
    %458 = vector.load %arg5[%c3_358, %c0_359, %c0_360] : memref<15x1x128xf32, #tpu.memory_space<vmem>>, vector<1x1x128xf32>
    %459 = vector.shape_cast %458 : vector<1x1x128xf32> to vector<1x128xf32>
    %460 = vector.broadcast %459 : vector<1x128xf32> to vector<64x128xf32>
    %461 = arith.addf %457, %460 : vector<64x128xf32>
    %cst_361 = arith.constant 0.000000e+00 : f32
    %cst_362 = arith.constant 6.000000e+00 : f32
    %462 = vector.broadcast %cst_361 : f32 to vector<64x128xf32>
    %463 = arith.maximumf %462, %461 : vector<64x128xf32>
    %464 = vector.broadcast %cst_362 : f32 to vector<64x128xf32>
    %465 = arith.minimumf %464, %463 : vector<64x128xf32>
    %466 = vector.shape_cast %465 : vector<64x128xf32> to vector<8x8x128xf32>
    %c1_363 = arith.constant 1 : index
    %c8_364 = arith.constant 8 : index
    %c0_365 = arith.constant 0 : index
    %467 = vector.load %arg15[%c1_363, %c8_364, %c0_365] : memref<10x24x128xf32, #tpu.memory_space<vmem>>, vector<8x8x128xf32>
    tpu.vector_store %arg15[%c1_363, %c8_364, %c0_365], %466 {strides = array<i32>} : memref<10x24x128xf32, #tpu.memory_space<vmem>>, vector<8x8x128xf32>,
    %c2_366 = arith.constant 2 : index
    %c0_367 = arith.constant 0 : index
    %c0_368 = arith.constant 0 : index
    %468 = vector.load %arg6[%c2_366, %c0_367, %c0_368] : memref<8x9x128xf32, #tpu.memory_space<vmem>>, vector<1x9x128xf32>
    %469 = vector.shape_cast %468 : vector<1x9x128xf32> to vector<9x128xf32>
    %c2_369 = arith.constant 2 : index
    %c0_370 = arith.constant 0 : index
    %c0_371 = arith.constant 0 : index
    %470 = vector.load %arg7[%c2_369, %c0_370, %c0_371] : memref<8x1x128xf32, #tpu.memory_space<vmem>>, vector<1x1x128xf32>
    %471 = vector.shape_cast %470 : vector<1x1x128xf32> to vector<1x128xf32>
    %c4_372 = arith.constant 4 : index
    %c0_373 = arith.constant 0 : index
    %c0_374 = arith.constant 0 : index
    %472 = vector.load %arg4[%c4_372, %c0_373, %c0_374] : memref<15x128x128xbf16, #tpu.memory_space<vmem>>, vector<1x128x128xbf16>
    %473 = vector.shape_cast %472 : vector<1x128x128xbf16> to vector<128x128xbf16>
    %c4_375 = arith.constant 4 : index
    %c0_376 = arith.constant 0 : index
    %c0_377 = arith.constant 0 : index
    %474 = vector.load %arg5[%c4_375, %c0_376, %c0_377] : memref<15x1x128xf32, #tpu.memory_space<vmem>>, vector<1x1x128xf32>
    %475 = vector.shape_cast %474 : vector<1x1x128xf32> to vector<1x128xf32>
    %cst_378 = arith.constant 0.000000e+00 : f32
    %476 = vector.broadcast %cst_378 : f32 to vector<8x8x128xf32>
    %c0_379 = arith.constant 0 : index
    %c7_380 = arith.constant 7 : index
    %c0_381 = arith.constant 0 : index
    %477 = vector.load %arg15[%c0_379, %c7_380, %c0_381] : memref<10x24x128xf32, #tpu.memory_space<vmem>>, vector<8x8x128xf32>
    %478 = vector.extract_strided_slice %469 {offsets = [0, 0], sizes = [1, 128], strides = [1, 1]} : vector<9x128xf32> to vector<1x128xf32>
    %479 = vector.shape_cast %478 : vector<1x128xf32> to vector<128xf32>
    %480 = vector.shape_cast %479 : vector<128xf32> to vector<1x1x128xf32>
    %481 = vector.broadcast %480 : vector<1x1x128xf32> to vector<8x8x128xf32>
    %482 = arith.mulf %477, %481 : vector<8x8x128xf32>
    %483 = arith.addf %476, %482 : vector<8x8x128xf32>
    %c0_382 = arith.constant 0 : index
    %c8_383 = arith.constant 8 : index
    %c0_384 = arith.constant 0 : index
    %484 = vector.load %arg15[%c0_382, %c8_383, %c0_384] : memref<10x24x128xf32, #tpu.memory_space<vmem>>, vector<8x8x128xf32>
    %485 = vector.extract_strided_slice %469 {offsets = [1, 0], sizes = [1, 128], strides = [1, 1]} : vector<9x128xf32> to vector<1x128xf32>
    %486 = vector.shape_cast %485 : vector<1x128xf32> to vector<128xf32>
    %487 = vector.shape_cast %486 : vector<128xf32> to vector<1x1x128xf32>
    %488 = vector.broadcast %487 : vector<1x1x128xf32> to vector<8x8x128xf32>
    %489 = arith.mulf %484, %488 : vector<8x8x128xf32>
    %490 = arith.addf %483, %489 : vector<8x8x128xf32>
    %c0_385 = arith.constant 0 : index
    %c9_386 = arith.constant 9 : index
    %c0_387 = arith.constant 0 : index
    %491 = vector.load %arg15[%c0_385, %c9_386, %c0_387] : memref<10x24x128xf32, #tpu.memory_space<vmem>>, vector<8x8x128xf32>
    %492 = vector.extract_strided_slice %469 {offsets = [2, 0], sizes = [1, 128], strides = [1, 1]} : vector<9x128xf32> to vector<1x128xf32>
    %493 = vector.shape_cast %492 : vector<1x128xf32> to vector<128xf32>
    %494 = vector.shape_cast %493 : vector<128xf32> to vector<1x1x128xf32>
    %495 = vector.broadcast %494 : vector<1x1x128xf32> to vector<8x8x128xf32>
    %496 = arith.mulf %491, %495 : vector<8x8x128xf32>
    %497 = arith.addf %490, %496 : vector<8x8x128xf32>
    %c1_388 = arith.constant 1 : index
    %c7_389 = arith.constant 7 : index
    %c0_390 = arith.constant 0 : index
    %498 = vector.load %arg15[%c1_388, %c7_389, %c0_390] : memref<10x24x128xf32, #tpu.memory_space<vmem>>, vector<8x8x128xf32>
    %499 = vector.extract_strided_slice %469 {offsets = [3, 0], sizes = [1, 128], strides = [1, 1]} : vector<9x128xf32> to vector<1x128xf32>
    %500 = vector.shape_cast %499 : vector<1x128xf32> to vector<128xf32>
    %501 = vector.shape_cast %500 : vector<128xf32> to vector<1x1x128xf32>
    %502 = vector.broadcast %501 : vector<1x1x128xf32> to vector<8x8x128xf32>
    %503 = arith.mulf %498, %502 : vector<8x8x128xf32>
    %504 = arith.addf %497, %503 : vector<8x8x128xf32>
    %c1_391 = arith.constant 1 : index
    %c8_392 = arith.constant 8 : index
    %c0_393 = arith.constant 0 : index
    %505 = vector.load %arg15[%c1_391, %c8_392, %c0_393] : memref<10x24x128xf32, #tpu.memory_space<vmem>>, vector<8x8x128xf32>
    %506 = vector.extract_strided_slice %469 {offsets = [4, 0], sizes = [1, 128], strides = [1, 1]} : vector<9x128xf32> to vector<1x128xf32>
    %507 = vector.shape_cast %506 : vector<1x128xf32> to vector<128xf32>
    %508 = vector.shape_cast %507 : vector<128xf32> to vector<1x1x128xf32>
    %509 = vector.broadcast %508 : vector<1x1x128xf32> to vector<8x8x128xf32>
    %510 = arith.mulf %505, %509 : vector<8x8x128xf32>
    %511 = arith.addf %504, %510 : vector<8x8x128xf32>
    %c1_394 = arith.constant 1 : index
    %c9_395 = arith.constant 9 : index
    %c0_396 = arith.constant 0 : index
    %512 = vector.load %arg15[%c1_394, %c9_395, %c0_396] : memref<10x24x128xf32, #tpu.memory_space<vmem>>, vector<8x8x128xf32>
    %513 = vector.extract_strided_slice %469 {offsets = [5, 0], sizes = [1, 128], strides = [1, 1]} : vector<9x128xf32> to vector<1x128xf32>
    %514 = vector.shape_cast %513 : vector<1x128xf32> to vector<128xf32>
    %515 = vector.shape_cast %514 : vector<128xf32> to vector<1x1x128xf32>
    %516 = vector.broadcast %515 : vector<1x1x128xf32> to vector<8x8x128xf32>
    %517 = arith.mulf %512, %516 : vector<8x8x128xf32>
    %518 = arith.addf %511, %517 : vector<8x8x128xf32>
    %c2_397 = arith.constant 2 : index
    %c7_398 = arith.constant 7 : index
    %c0_399 = arith.constant 0 : index
    %519 = vector.load %arg15[%c2_397, %c7_398, %c0_399] : memref<10x24x128xf32, #tpu.memory_space<vmem>>, vector<8x8x128xf32>
    %520 = vector.extract_strided_slice %469 {offsets = [6, 0], sizes = [1, 128], strides = [1, 1]} : vector<9x128xf32> to vector<1x128xf32>
    %521 = vector.shape_cast %520 : vector<1x128xf32> to vector<128xf32>
    %522 = vector.shape_cast %521 : vector<128xf32> to vector<1x1x128xf32>
    %523 = vector.broadcast %522 : vector<1x1x128xf32> to vector<8x8x128xf32>
    %524 = arith.mulf %519, %523 : vector<8x8x128xf32>
    %525 = arith.addf %518, %524 : vector<8x8x128xf32>
    %c2_400 = arith.constant 2 : index
    %c8_401 = arith.constant 8 : index
    %c0_402 = arith.constant 0 : index
    %526 = vector.load %arg15[%c2_400, %c8_401, %c0_402] : memref<10x24x128xf32, #tpu.memory_space<vmem>>, vector<8x8x128xf32>
    %527 = vector.extract_strided_slice %469 {offsets = [7, 0], sizes = [1, 128], strides = [1, 1]} : vector<9x128xf32> to vector<1x128xf32>
    %528 = vector.shape_cast %527 : vector<1x128xf32> to vector<128xf32>
    %529 = vector.shape_cast %528 : vector<128xf32> to vector<1x1x128xf32>
    %530 = vector.broadcast %529 : vector<1x1x128xf32> to vector<8x8x128xf32>
    %531 = arith.mulf %526, %530 : vector<8x8x128xf32>
    %532 = arith.addf %525, %531 : vector<8x8x128xf32>
    %c2_403 = arith.constant 2 : index
    %c9_404 = arith.constant 9 : index
    %c0_405 = arith.constant 0 : index
    %533 = vector.load %arg15[%c2_403, %c9_404, %c0_405] : memref<10x24x128xf32, #tpu.memory_space<vmem>>, vector<8x8x128xf32>
    %534 = vector.extract_strided_slice %469 {offsets = [8, 0], sizes = [1, 128], strides = [1, 1]} : vector<9x128xf32> to vector<1x128xf32>
    %535 = vector.shape_cast %534 : vector<1x128xf32> to vector<128xf32>
    %536 = vector.shape_cast %535 : vector<128xf32> to vector<1x1x128xf32>
    %537 = vector.broadcast %536 : vector<1x1x128xf32> to vector<8x8x128xf32>
    %538 = arith.mulf %533, %537 : vector<8x8x128xf32>
    %539 = arith.addf %532, %538 : vector<8x8x128xf32>
    %540 = vector.shape_cast %471 : vector<1x128xf32> to vector<1x1x128xf32>
    %541 = vector.broadcast %540 : vector<1x1x128xf32> to vector<8x8x128xf32>
    %542 = arith.addf %539, %541 : vector<8x8x128xf32>
    %cst_406 = arith.constant 0.000000e+00 : f32
    %cst_407 = arith.constant 6.000000e+00 : f32
    %543 = vector.broadcast %cst_406 : f32 to vector<8x8x128xf32>
    %544 = arith.maximumf %543, %542 : vector<8x8x128xf32>
    %545 = vector.broadcast %cst_407 : f32 to vector<8x8x128xf32>
    %546 = arith.minimumf %545, %544 : vector<8x8x128xf32>
    %547 = vector.shape_cast %546 : vector<8x8x128xf32> to vector<64x128xf32>
    %548 = arith.truncf %547 : vector<64x128xf32> to vector<64x128xbf16>
    %cst_408 = arith.constant dense<0.000000e+00> : vector<64x128xf32>
    %549 = tpu.matmul %548, %473, %cst_408 {dimension_numbers = #tpu.dot_dimension_numbers<[1], [0], [0], [1], [0, 0, 1, 1], [], []>} : vector<64x128xbf16>, vector<128x128xbf16>, vector<64x128xf32> -> vector<64x128xf32>
    %550 = vector.broadcast %475 : vector<1x128xf32> to vector<64x128xf32>
    %551 = arith.addf %549, %550 : vector<64x128xf32>
    %c0_409 = arith.constant 0 : index
    %c0_410 = arith.constant 0 : index
    %c0_411 = arith.constant 0 : index
    %552 = vector.load %arg13[%c0_409, %c0_410, %c0_411] : memref<8x8x128xf32, #tpu.memory_space<vmem>>, vector<8x8x128xf32>
    %553 = vector.shape_cast %552 : vector<8x8x128xf32> to vector<64x128xf32>
    %554 = arith.addf %551, %553 : vector<64x128xf32>
    %555 = vector.shape_cast %554 : vector<64x128xf32> to vector<8x8x128xf32>
    %c0_412 = arith.constant 0 : index
    %c0_413 = arith.constant 0 : index
    %c0_414 = arith.constant 0 : index
    %556 = vector.load %arg14[%c0_412, %c0_413, %c0_414] : memref<8x8x128xf32, #tpu.memory_space<vmem>>, vector<8x8x128xf32>
    tpu.vector_store %arg14[%c0_412, %c0_413, %c0_414], %555 {strides = array<i32>} : memref<8x8x128xf32, #tpu.memory_space<vmem>>, vector<8x8x128xf32>,
    %c0_415 = arith.constant 0 : index
    %c0_416 = arith.constant 0 : index
    %c0_417 = arith.constant 0 : index
    %557 = vector.load %arg14[%c0_415, %c0_416, %c0_417] : memref<8x8x128xf32, #tpu.memory_space<vmem>>, vector<8x8x128xf32>
    %558 = vector.shape_cast %557 : vector<8x8x128xf32> to vector<64x128xf32>
    %559 = arith.truncf %558 : vector<64x128xf32> to vector<64x128xbf16>
    %c5_418 = arith.constant 5 : index
    %c0_419 = arith.constant 0 : index
    %c0_420 = arith.constant 0 : index
    %560 = vector.load %arg4[%c5_418, %c0_419, %c0_420] : memref<15x128x128xbf16, #tpu.memory_space<vmem>>, vector<1x128x128xbf16>
    %561 = vector.shape_cast %560 : vector<1x128x128xbf16> to vector<128x128xbf16>
    %cst_421 = arith.constant dense<0.000000e+00> : vector<64x128xf32>
    %562 = tpu.matmul %559, %561, %cst_421 {dimension_numbers = #tpu.dot_dimension_numbers<[1], [0], [0], [1], [0, 0, 1, 1], [], []>} : vector<64x128xbf16>, vector<128x128xbf16>, vector<64x128xf32> -> vector<64x128xf32>
    %c5_422 = arith.constant 5 : index
    %c0_423 = arith.constant 0 : index
    %c0_424 = arith.constant 0 : index
    %563 = vector.load %arg5[%c5_422, %c0_423, %c0_424] : memref<15x1x128xf32, #tpu.memory_space<vmem>>, vector<1x1x128xf32>
    %564 = vector.shape_cast %563 : vector<1x1x128xf32> to vector<1x128xf32>
    %565 = vector.broadcast %564 : vector<1x128xf32> to vector<64x128xf32>
    %566 = arith.addf %562, %565 : vector<64x128xf32>
    %cst_425 = arith.constant 0.000000e+00 : f32
    %cst_426 = arith.constant 6.000000e+00 : f32
    %567 = vector.broadcast %cst_425 : f32 to vector<64x128xf32>
    %568 = arith.maximumf %567, %566 : vector<64x128xf32>
    %569 = vector.broadcast %cst_426 : f32 to vector<64x128xf32>
    %570 = arith.minimumf %569, %568 : vector<64x128xf32>
    %571 = vector.shape_cast %570 : vector<64x128xf32> to vector<8x8x128xf32>
    %c1_427 = arith.constant 1 : index
    %c8_428 = arith.constant 8 : index
    %c0_429 = arith.constant 0 : index
    %572 = vector.load %arg15[%c1_427, %c8_428, %c0_429] : memref<10x24x128xf32, #tpu.memory_space<vmem>>, vector<8x8x128xf32>
    tpu.vector_store %arg15[%c1_427, %c8_428, %c0_429], %571 {strides = array<i32>} : memref<10x24x128xf32, #tpu.memory_space<vmem>>, vector<8x8x128xf32>,
    %c3_430 = arith.constant 3 : index
    %c0_431 = arith.constant 0 : index
    %c0_432 = arith.constant 0 : index
    %573 = vector.load %arg6[%c3_430, %c0_431, %c0_432] : memref<8x9x128xf32, #tpu.memory_space<vmem>>, vector<1x9x128xf32>
    %574 = vector.shape_cast %573 : vector<1x9x128xf32> to vector<9x128xf32>
    %c3_433 = arith.constant 3 : index
    %c0_434 = arith.constant 0 : index
    %c0_435 = arith.constant 0 : index
    %575 = vector.load %arg7[%c3_433, %c0_434, %c0_435] : memref<8x1x128xf32, #tpu.memory_space<vmem>>, vector<1x1x128xf32>
    %576 = vector.shape_cast %575 : vector<1x1x128xf32> to vector<1x128xf32>
    %c6_436 = arith.constant 6 : index
    %c0_437 = arith.constant 0 : index
    %c0_438 = arith.constant 0 : index
    %577 = vector.load %arg4[%c6_436, %c0_437, %c0_438] : memref<15x128x128xbf16, #tpu.memory_space<vmem>>, vector<1x128x128xbf16>
    %578 = vector.shape_cast %577 : vector<1x128x128xbf16> to vector<128x128xbf16>
    %c6_439 = arith.constant 6 : index
    %c0_440 = arith.constant 0 : index
    %c0_441 = arith.constant 0 : index
    %579 = vector.load %arg5[%c6_439, %c0_440, %c0_441] : memref<15x1x128xf32, #tpu.memory_space<vmem>>, vector<1x1x128xf32>
    %580 = vector.shape_cast %579 : vector<1x1x128xf32> to vector<1x128xf32>
    %cst_442 = arith.constant 0.000000e+00 : f32
    %581 = vector.broadcast %cst_442 : f32 to vector<4x4x128xf32>
    %c0_443 = arith.constant 0 : index
    %c7_444 = arith.constant 7 : index
    %c0_445 = arith.constant 0 : index
    %582 = tpu.strided_load %arg15[%c0_443, %c7_444, %c0_445] {strides = array<i32: 2, 2, 1>} : memref<10x24x128xf32, #tpu.memory_space<vmem>>, vector<4x4x128xf32>
    %583 = vector.extract_strided_slice %574 {offsets = [0, 0], sizes = [1, 128], strides = [1, 1]} : vector<9x128xf32> to vector<1x128xf32>
    %584 = vector.shape_cast %583 : vector<1x128xf32> to vector<128xf32>
    %585 = vector.shape_cast %584 : vector<128xf32> to vector<1x1x128xf32>
    %586 = vector.broadcast %585 : vector<1x1x128xf32> to vector<4x4x128xf32>
    %587 = arith.mulf %582, %586 : vector<4x4x128xf32>
    %588 = arith.addf %581, %587 : vector<4x4x128xf32>
    %c0_446 = arith.constant 0 : index
    %c8_447 = arith.constant 8 : index
    %c0_448 = arith.constant 0 : index
    %589 = tpu.strided_load %arg15[%c0_446, %c8_447, %c0_448] {strides = array<i32: 2, 2, 1>} : memref<10x24x128xf32, #tpu.memory_space<vmem>>, vector<4x4x128xf32>
    %590 = vector.extract_strided_slice %574 {offsets = [1, 0], sizes = [1, 128], strides = [1, 1]} : vector<9x128xf32> to vector<1x128xf32>
    %591 = vector.shape_cast %590 : vector<1x128xf32> to vector<128xf32>
    %592 = vector.shape_cast %591 : vector<128xf32> to vector<1x1x128xf32>
    %593 = vector.broadcast %592 : vector<1x1x128xf32> to vector<4x4x128xf32>
    %594 = arith.mulf %589, %593 : vector<4x4x128xf32>
    %595 = arith.addf %588, %594 : vector<4x4x128xf32>
    %c0_449 = arith.constant 0 : index
    %c9_450 = arith.constant 9 : index
    %c0_451 = arith.constant 0 : index
    %596 = tpu.strided_load %arg15[%c0_449, %c9_450, %c0_451] {strides = array<i32: 2, 2, 1>} : memref<10x24x128xf32, #tpu.memory_space<vmem>>, vector<4x4x128xf32>
    %597 = vector.extract_strided_slice %574 {offsets = [2, 0], sizes = [1, 128], strides = [1, 1]} : vector<9x128xf32> to vector<1x128xf32>
    %598 = vector.shape_cast %597 : vector<1x128xf32> to vector<128xf32>
    %599 = vector.shape_cast %598 : vector<128xf32> to vector<1x1x128xf32>
    %600 = vector.broadcast %599 : vector<1x1x128xf32> to vector<4x4x128xf32>
    %601 = arith.mulf %596, %600 : vector<4x4x128xf32>
    %602 = arith.addf %595, %601 : vector<4x4x128xf32>
    %c1_452 = arith.constant 1 : index
    %c7_453 = arith.constant 7 : index
    %c0_454 = arith.constant 0 : index
    %603 = tpu.strided_load %arg15[%c1_452, %c7_453, %c0_454] {strides = array<i32: 2, 2, 1>} : memref<10x24x128xf32, #tpu.memory_space<vmem>>, vector<4x4x128xf32>
    %604 = vector.extract_strided_slice %574 {offsets = [3, 0], sizes = [1, 128], strides = [1, 1]} : vector<9x128xf32> to vector<1x128xf32>
    %605 = vector.shape_cast %604 : vector<1x128xf32> to vector<128xf32>
    %606 = vector.shape_cast %605 : vector<128xf32> to vector<1x1x128xf32>
    %607 = vector.broadcast %606 : vector<1x1x128xf32> to vector<4x4x128xf32>
    %608 = arith.mulf %603, %607 : vector<4x4x128xf32>
    %609 = arith.addf %602, %608 : vector<4x4x128xf32>
    %c1_455 = arith.constant 1 : index
    %c8_456 = arith.constant 8 : index
    %c0_457 = arith.constant 0 : index
    %610 = tpu.strided_load %arg15[%c1_455, %c8_456, %c0_457] {strides = array<i32: 2, 2, 1>} : memref<10x24x128xf32, #tpu.memory_space<vmem>>, vector<4x4x128xf32>
    %611 = vector.extract_strided_slice %574 {offsets = [4, 0], sizes = [1, 128], strides = [1, 1]} : vector<9x128xf32> to vector<1x128xf32>
    %612 = vector.shape_cast %611 : vector<1x128xf32> to vector<128xf32>
    %613 = vector.shape_cast %612 : vector<128xf32> to vector<1x1x128xf32>
    %614 = vector.broadcast %613 : vector<1x1x128xf32> to vector<4x4x128xf32>
    %615 = arith.mulf %610, %614 : vector<4x4x128xf32>
    %616 = arith.addf %609, %615 : vector<4x4x128xf32>
    %c1_458 = arith.constant 1 : index
    %c9_459 = arith.constant 9 : index
    %c0_460 = arith.constant 0 : index
    %617 = tpu.strided_load %arg15[%c1_458, %c9_459, %c0_460] {strides = array<i32: 2, 2, 1>} : memref<10x24x128xf32, #tpu.memory_space<vmem>>, vector<4x4x128xf32>
    %618 = vector.extract_strided_slice %574 {offsets = [5, 0], sizes = [1, 128], strides = [1, 1]} : vector<9x128xf32> to vector<1x128xf32>
    %619 = vector.shape_cast %618 : vector<1x128xf32> to vector<128xf32>
    %620 = vector.shape_cast %619 : vector<128xf32> to vector<1x1x128xf32>
    %621 = vector.broadcast %620 : vector<1x1x128xf32> to vector<4x4x128xf32>
    %622 = arith.mulf %617, %621 : vector<4x4x128xf32>
    %623 = arith.addf %616, %622 : vector<4x4x128xf32>
    %c2_461 = arith.constant 2 : index
    %c7_462 = arith.constant 7 : index
    %c0_463 = arith.constant 0 : index
    %624 = tpu.strided_load %arg15[%c2_461, %c7_462, %c0_463] {strides = array<i32: 2, 2, 1>} : memref<10x24x128xf32, #tpu.memory_space<vmem>>, vector<4x4x128xf32>
    %625 = vector.extract_strided_slice %574 {offsets = [6, 0], sizes = [1, 128], strides = [1, 1]} : vector<9x128xf32> to vector<1x128xf32>
    %626 = vector.shape_cast %625 : vector<1x128xf32> to vector<128xf32>
    %627 = vector.shape_cast %626 : vector<128xf32> to vector<1x1x128xf32>
    %628 = vector.broadcast %627 : vector<1x1x128xf32> to vector<4x4x128xf32>
    %629 = arith.mulf %624, %628 : vector<4x4x128xf32>
    %630 = arith.addf %623, %629 : vector<4x4x128xf32>
    %c2_464 = arith.constant 2 : index
    %c8_465 = arith.constant 8 : index
    %c0_466 = arith.constant 0 : index
    %631 = tpu.strided_load %arg15[%c2_464, %c8_465, %c0_466] {strides = array<i32: 2, 2, 1>} : memref<10x24x128xf32, #tpu.memory_space<vmem>>, vector<4x4x128xf32>
    %632 = vector.extract_strided_slice %574 {offsets = [7, 0], sizes = [1, 128], strides = [1, 1]} : vector<9x128xf32> to vector<1x128xf32>
    %633 = vector.shape_cast %632 : vector<1x128xf32> to vector<128xf32>
    %634 = vector.shape_cast %633 : vector<128xf32> to vector<1x1x128xf32>
    %635 = vector.broadcast %634 : vector<1x1x128xf32> to vector<4x4x128xf32>
    %636 = arith.mulf %631, %635 : vector<4x4x128xf32>
    %637 = arith.addf %630, %636 : vector<4x4x128xf32>
    %c2_467 = arith.constant 2 : index
    %c9_468 = arith.constant 9 : index
    %c0_469 = arith.constant 0 : index
    %638 = tpu.strided_load %arg15[%c2_467, %c9_468, %c0_469] {strides = array<i32: 2, 2, 1>} : memref<10x24x128xf32, #tpu.memory_space<vmem>>, vector<4x4x128xf32>
    %639 = vector.extract_strided_slice %574 {offsets = [8, 0], sizes = [1, 128], strides = [1, 1]} : vector<9x128xf32> to vector<1x128xf32>
    %640 = vector.shape_cast %639 : vector<1x128xf32> to vector<128xf32>
    %641 = vector.shape_cast %640 : vector<128xf32> to vector<1x1x128xf32>
    %642 = vector.broadcast %641 : vector<1x1x128xf32> to vector<4x4x128xf32>
    %643 = arith.mulf %638, %642 : vector<4x4x128xf32>
    %644 = arith.addf %637, %643 : vector<4x4x128xf32>
    %645 = vector.shape_cast %576 : vector<1x128xf32> to vector<1x1x128xf32>
    %646 = vector.broadcast %645 : vector<1x1x128xf32> to vector<4x4x128xf32>
    %647 = arith.addf %644, %646 : vector<4x4x128xf32>
    %cst_470 = arith.constant 0.000000e+00 : f32
    %cst_471 = arith.constant 6.000000e+00 : f32
    %648 = vector.broadcast %cst_470 : f32 to vector<4x4x128xf32>
    %649 = arith.maximumf %648, %647 : vector<4x4x128xf32>
    %650 = vector.broadcast %cst_471 : f32 to vector<4x4x128xf32>
    %651 = arith.minimumf %650, %649 : vector<4x4x128xf32>
    %652 = vector.shape_cast %651 : vector<4x4x128xf32> to vector<16x128xf32>
    %653 = arith.truncf %652 : vector<16x128xf32> to vector<16x128xbf16>
    %cst_472 = arith.constant dense<0.000000e+00> : vector<16x128xf32>
    %654 = tpu.matmul %653, %578, %cst_472 {dimension_numbers = #tpu.dot_dimension_numbers<[1], [0], [0], [1], [0, 0, 1, 1], [], []>} : vector<16x128xbf16>, vector<128x128xbf16>, vector<16x128xf32> -> vector<16x128xf32>
    %655 = vector.broadcast %580 : vector<1x128xf32> to vector<16x128xf32>
    %656 = arith.addf %654, %655 : vector<16x128xf32>
    %657 = vector.shape_cast %656 : vector<16x128xf32> to vector<4x4x128xf32>
    %c0_473 = arith.constant 0 : index
    %c0_474 = arith.constant 0 : index
    %c0_475 = arith.constant 0 : index
    %658 = vector.load %arg16[%c0_473, %c0_474, %c0_475] : memref<4x4x128xf32, #tpu.memory_space<vmem>>, vector<4x4x128xf32>
    tpu.vector_store %arg16[%c0_473, %c0_474, %c0_475], %657 {strides = array<i32>} : memref<4x4x128xf32, #tpu.memory_space<vmem>>, vector<4x4x128xf32>,
    %c0_476 = arith.constant 0 : index
    %c0_477 = arith.constant 0 : index
    %c0_478 = arith.constant 0 : index
    %659 = vector.load %arg16[%c0_476, %c0_477, %c0_478] : memref<4x4x128xf32, #tpu.memory_space<vmem>>, vector<4x4x128xf32>
    %660 = vector.shape_cast %659 : vector<4x4x128xf32> to vector<16x128xf32>
    %661 = arith.truncf %660 : vector<16x128xf32> to vector<16x128xbf16>
    %c7_479 = arith.constant 7 : index
    %c0_480 = arith.constant 0 : index
    %c0_481 = arith.constant 0 : index
    %662 = vector.load %arg4[%c7_479, %c0_480, %c0_481] : memref<15x128x128xbf16, #tpu.memory_space<vmem>>, vector<1x128x128xbf16>
    %663 = vector.shape_cast %662 : vector<1x128x128xbf16> to vector<128x128xbf16>
    %cst_482 = arith.constant dense<0.000000e+00> : vector<16x128xf32>
    %664 = tpu.matmul %661, %663, %cst_482 {dimension_numbers = #tpu.dot_dimension_numbers<[1], [0], [0], [1], [0, 0, 1, 1], [], []>} : vector<16x128xbf16>, vector<128x128xbf16>, vector<16x128xf32> -> vector<16x128xf32>
    %c7_483 = arith.constant 7 : index
    %c0_484 = arith.constant 0 : index
    %c0_485 = arith.constant 0 : index
    %665 = vector.load %arg5[%c7_483, %c0_484, %c0_485] : memref<15x1x128xf32, #tpu.memory_space<vmem>>, vector<1x1x128xf32>
    %666 = vector.shape_cast %665 : vector<1x1x128xf32> to vector<1x128xf32>
    %667 = vector.broadcast %666 : vector<1x128xf32> to vector<16x128xf32>
    %668 = arith.addf %664, %667 : vector<16x128xf32>
    %cst_486 = arith.constant 0.000000e+00 : f32
    %cst_487 = arith.constant 6.000000e+00 : f32
    %669 = vector.broadcast %cst_486 : f32 to vector<16x128xf32>
    %670 = arith.maximumf %669, %668 : vector<16x128xf32>
    %671 = vector.broadcast %cst_487 : f32 to vector<16x128xf32>
    %672 = arith.minimumf %671, %670 : vector<16x128xf32>
    %673 = vector.shape_cast %672 : vector<16x128xf32> to vector<4x4x128xf32>
    %c1_488 = arith.constant 1 : index
    %c8_489 = arith.constant 8 : index
    %c0_490 = arith.constant 0 : index
    %674 = vector.load %arg18[%c1_488, %c8_489, %c0_490] : memref<6x20x128xf32, #tpu.memory_space<vmem>>, vector<4x4x128xf32>
    tpu.vector_store %arg18[%c1_488, %c8_489, %c0_490], %673 {strides = array<i32>} : memref<6x20x128xf32, #tpu.memory_space<vmem>>, vector<4x4x128xf32>,
    %c4_491 = arith.constant 4 : index
    %c0_492 = arith.constant 0 : index
    %c0_493 = arith.constant 0 : index
    %675 = vector.load %arg6[%c4_491, %c0_492, %c0_493] : memref<8x9x128xf32, #tpu.memory_space<vmem>>, vector<1x9x128xf32>
    %676 = vector.shape_cast %675 : vector<1x9x128xf32> to vector<9x128xf32>
    %c4_494 = arith.constant 4 : index
    %c0_495 = arith.constant 0 : index
    %c0_496 = arith.constant 0 : index
    %677 = vector.load %arg7[%c4_494, %c0_495, %c0_496] : memref<8x1x128xf32, #tpu.memory_space<vmem>>, vector<1x1x128xf32>
    %678 = vector.shape_cast %677 : vector<1x1x128xf32> to vector<1x128xf32>
    %c8_497 = arith.constant 8 : index
    %c0_498 = arith.constant 0 : index
    %c0_499 = arith.constant 0 : index
    %679 = vector.load %arg4[%c8_497, %c0_498, %c0_499] : memref<15x128x128xbf16, #tpu.memory_space<vmem>>, vector<1x128x128xbf16>
    %680 = vector.shape_cast %679 : vector<1x128x128xbf16> to vector<128x128xbf16>
    %c8_500 = arith.constant 8 : index
    %c0_501 = arith.constant 0 : index
    %c0_502 = arith.constant 0 : index
    %681 = vector.load %arg5[%c8_500, %c0_501, %c0_502] : memref<15x1x128xf32, #tpu.memory_space<vmem>>, vector<1x1x128xf32>
    %682 = vector.shape_cast %681 : vector<1x1x128xf32> to vector<1x128xf32>
    %cst_503 = arith.constant 0.000000e+00 : f32
    %683 = vector.broadcast %cst_503 : f32 to vector<4x4x128xf32>
    %c0_504 = arith.constant 0 : index
    %c7_505 = arith.constant 7 : index
    %c0_506 = arith.constant 0 : index
    %684 = vector.load %arg18[%c0_504, %c7_505, %c0_506] : memref<6x20x128xf32, #tpu.memory_space<vmem>>, vector<4x4x128xf32>
    %685 = vector.extract_strided_slice %676 {offsets = [0, 0], sizes = [1, 128], strides = [1, 1]} : vector<9x128xf32> to vector<1x128xf32>
    %686 = vector.shape_cast %685 : vector<1x128xf32> to vector<128xf32>
    %687 = vector.shape_cast %686 : vector<128xf32> to vector<1x1x128xf32>
    %688 = vector.broadcast %687 : vector<1x1x128xf32> to vector<4x4x128xf32>
    %689 = arith.mulf %684, %688 : vector<4x4x128xf32>
    %690 = arith.addf %683, %689 : vector<4x4x128xf32>
    %c0_507 = arith.constant 0 : index
    %c8_508 = arith.constant 8 : index
    %c0_509 = arith.constant 0 : index
    %691 = vector.load %arg18[%c0_507, %c8_508, %c0_509] : memref<6x20x128xf32, #tpu.memory_space<vmem>>, vector<4x4x128xf32>
    %692 = vector.extract_strided_slice %676 {offsets = [1, 0], sizes = [1, 128], strides = [1, 1]} : vector<9x128xf32> to vector<1x128xf32>
    %693 = vector.shape_cast %692 : vector<1x128xf32> to vector<128xf32>
    %694 = vector.shape_cast %693 : vector<128xf32> to vector<1x1x128xf32>
    %695 = vector.broadcast %694 : vector<1x1x128xf32> to vector<4x4x128xf32>
    %696 = arith.mulf %691, %695 : vector<4x4x128xf32>
    %697 = arith.addf %690, %696 : vector<4x4x128xf32>
    %c0_510 = arith.constant 0 : index
    %c9_511 = arith.constant 9 : index
    %c0_512 = arith.constant 0 : index
    %698 = vector.load %arg18[%c0_510, %c9_511, %c0_512] : memref<6x20x128xf32, #tpu.memory_space<vmem>>, vector<4x4x128xf32>
    %699 = vector.extract_strided_slice %676 {offsets = [2, 0], sizes = [1, 128], strides = [1, 1]} : vector<9x128xf32> to vector<1x128xf32>
    %700 = vector.shape_cast %699 : vector<1x128xf32> to vector<128xf32>
    %701 = vector.shape_cast %700 : vector<128xf32> to vector<1x1x128xf32>
    %702 = vector.broadcast %701 : vector<1x1x128xf32> to vector<4x4x128xf32>
    %703 = arith.mulf %698, %702 : vector<4x4x128xf32>
    %704 = arith.addf %697, %703 : vector<4x4x128xf32>
    %c1_513 = arith.constant 1 : index
    %c7_514 = arith.constant 7 : index
    %c0_515 = arith.constant 0 : index
    %705 = vector.load %arg18[%c1_513, %c7_514, %c0_515] : memref<6x20x128xf32, #tpu.memory_space<vmem>>, vector<4x4x128xf32>
    %706 = vector.extract_strided_slice %676 {offsets = [3, 0], sizes = [1, 128], strides = [1, 1]} : vector<9x128xf32> to vector<1x128xf32>
    %707 = vector.shape_cast %706 : vector<1x128xf32> to vector<128xf32>
    %708 = vector.shape_cast %707 : vector<128xf32> to vector<1x1x128xf32>
    %709 = vector.broadcast %708 : vector<1x1x128xf32> to vector<4x4x128xf32>
    %710 = arith.mulf %705, %709 : vector<4x4x128xf32>
    %711 = arith.addf %704, %710 : vector<4x4x128xf32>
    %c1_516 = arith.constant 1 : index
    %c8_517 = arith.constant 8 : index
    %c0_518 = arith.constant 0 : index
    %712 = vector.load %arg18[%c1_516, %c8_517, %c0_518] : memref<6x20x128xf32, #tpu.memory_space<vmem>>, vector<4x4x128xf32>
    %713 = vector.extract_strided_slice %676 {offsets = [4, 0], sizes = [1, 128], strides = [1, 1]} : vector<9x128xf32> to vector<1x128xf32>
    %714 = vector.shape_cast %713 : vector<1x128xf32> to vector<128xf32>
    %715 = vector.shape_cast %714 : vector<128xf32> to vector<1x1x128xf32>
    %716 = vector.broadcast %715 : vector<1x1x128xf32> to vector<4x4x128xf32>
    %717 = arith.mulf %712, %716 : vector<4x4x128xf32>
    %718 = arith.addf %711, %717 : vector<4x4x128xf32>
    %c1_519 = arith.constant 1 : index
    %c9_520 = arith.constant 9 : index
    %c0_521 = arith.constant 0 : index
    %719 = vector.load %arg18[%c1_519, %c9_520, %c0_521] : memref<6x20x128xf32, #tpu.memory_space<vmem>>, vector<4x4x128xf32>
    %720 = vector.extract_strided_slice %676 {offsets = [5, 0], sizes = [1, 128], strides = [1, 1]} : vector<9x128xf32> to vector<1x128xf32>
    %721 = vector.shape_cast %720 : vector<1x128xf32> to vector<128xf32>
    %722 = vector.shape_cast %721 : vector<128xf32> to vector<1x1x128xf32>
    %723 = vector.broadcast %722 : vector<1x1x128xf32> to vector<4x4x128xf32>
    %724 = arith.mulf %719, %723 : vector<4x4x128xf32>
    %725 = arith.addf %718, %724 : vector<4x4x128xf32>
    %c2_522 = arith.constant 2 : index
    %c7_523 = arith.constant 7 : index
    %c0_524 = arith.constant 0 : index
    %726 = vector.load %arg18[%c2_522, %c7_523, %c0_524] : memref<6x20x128xf32, #tpu.memory_space<vmem>>, vector<4x4x128xf32>
    %727 = vector.extract_strided_slice %676 {offsets = [6, 0], sizes = [1, 128], strides = [1, 1]} : vector<9x128xf32> to vector<1x128xf32>
    %728 = vector.shape_cast %727 : vector<1x128xf32> to vector<128xf32>
    %729 = vector.shape_cast %728 : vector<128xf32> to vector<1x1x128xf32>
    %730 = vector.broadcast %729 : vector<1x1x128xf32> to vector<4x4x128xf32>
    %731 = arith.mulf %726, %730 : vector<4x4x128xf32>
    %732 = arith.addf %725, %731 : vector<4x4x128xf32>
    %c2_525 = arith.constant 2 : index
    %c8_526 = arith.constant 8 : index
    %c0_527 = arith.constant 0 : index
    %733 = vector.load %arg18[%c2_525, %c8_526, %c0_527] : memref<6x20x128xf32, #tpu.memory_space<vmem>>, vector<4x4x128xf32>
    %734 = vector.extract_strided_slice %676 {offsets = [7, 0], sizes = [1, 128], strides = [1, 1]} : vector<9x128xf32> to vector<1x128xf32>
    %735 = vector.shape_cast %734 : vector<1x128xf32> to vector<128xf32>
    %736 = vector.shape_cast %735 : vector<128xf32> to vector<1x1x128xf32>
    %737 = vector.broadcast %736 : vector<1x1x128xf32> to vector<4x4x128xf32>
    %738 = arith.mulf %733, %737 : vector<4x4x128xf32>
    %739 = arith.addf %732, %738 : vector<4x4x128xf32>
    %c2_528 = arith.constant 2 : index
    %c9_529 = arith.constant 9 : index
    %c0_530 = arith.constant 0 : index
    %740 = vector.load %arg18[%c2_528, %c9_529, %c0_530] : memref<6x20x128xf32, #tpu.memory_space<vmem>>, vector<4x4x128xf32>
    %741 = vector.extract_strided_slice %676 {offsets = [8, 0], sizes = [1, 128], strides = [1, 1]} : vector<9x128xf32> to vector<1x128xf32>
    %742 = vector.shape_cast %741 : vector<1x128xf32> to vector<128xf32>
    %743 = vector.shape_cast %742 : vector<128xf32> to vector<1x1x128xf32>
    %744 = vector.broadcast %743 : vector<1x1x128xf32> to vector<4x4x128xf32>
    %745 = arith.mulf %740, %744 : vector<4x4x128xf32>
    %746 = arith.addf %739, %745 : vector<4x4x128xf32>
    %747 = vector.shape_cast %678 : vector<1x128xf32> to vector<1x1x128xf32>
    %748 = vector.broadcast %747 : vector<1x1x128xf32> to vector<4x4x128xf32>
    %749 = arith.addf %746, %748 : vector<4x4x128xf32>
    %cst_531 = arith.constant 0.000000e+00 : f32
    %cst_532 = arith.constant 6.000000e+00 : f32
    %750 = vector.broadcast %cst_531 : f32 to vector<4x4x128xf32>
    %751 = arith.maximumf %750, %749 : vector<4x4x128xf32>
    %752 = vector.broadcast %cst_532 : f32 to vector<4x4x128xf32>
    %753 = arith.minimumf %752, %751 : vector<4x4x128xf32>
    %754 = vector.shape_cast %753 : vector<4x4x128xf32> to vector<16x128xf32>
    %755 = arith.truncf %754 : vector<16x128xf32> to vector<16x128xbf16>
    %cst_533 = arith.constant dense<0.000000e+00> : vector<16x128xf32>
    %756 = tpu.matmul %755, %680, %cst_533 {dimension_numbers = #tpu.dot_dimension_numbers<[1], [0], [0], [1], [0, 0, 1, 1], [], []>} : vector<16x128xbf16>, vector<128x128xbf16>, vector<16x128xf32> -> vector<16x128xf32>
    %757 = vector.broadcast %682 : vector<1x128xf32> to vector<16x128xf32>
    %758 = arith.addf %756, %757 : vector<16x128xf32>
    %c0_534 = arith.constant 0 : index
    %c0_535 = arith.constant 0 : index
    %c0_536 = arith.constant 0 : index
    %759 = vector.load %arg16[%c0_534, %c0_535, %c0_536] : memref<4x4x128xf32, #tpu.memory_space<vmem>>, vector<4x4x128xf32>
    %760 = vector.shape_cast %759 : vector<4x4x128xf32> to vector<16x128xf32>
    %761 = arith.addf %758, %760 : vector<16x128xf32>
    %762 = vector.shape_cast %761 : vector<16x128xf32> to vector<4x4x128xf32>
    %c0_537 = arith.constant 0 : index
    %c0_538 = arith.constant 0 : index
    %c0_539 = arith.constant 0 : index
    %763 = vector.load %arg17[%c0_537, %c0_538, %c0_539] : memref<4x4x128xf32, #tpu.memory_space<vmem>>, vector<4x4x128xf32>
    tpu.vector_store %arg17[%c0_537, %c0_538, %c0_539], %762 {strides = array<i32>} : memref<4x4x128xf32, #tpu.memory_space<vmem>>, vector<4x4x128xf32>,
    %c0_540 = arith.constant 0 : index
    %c0_541 = arith.constant 0 : index
    %c0_542 = arith.constant 0 : index
    %764 = vector.load %arg17[%c0_540, %c0_541, %c0_542] : memref<4x4x128xf32, #tpu.memory_space<vmem>>, vector<4x4x128xf32>
    %765 = vector.shape_cast %764 : vector<4x4x128xf32> to vector<16x128xf32>
    %766 = arith.truncf %765 : vector<16x128xf32> to vector<16x128xbf16>
    %c9_543 = arith.constant 9 : index
    %c0_544 = arith.constant 0 : index
    %c0_545 = arith.constant 0 : index
    %767 = vector.load %arg4[%c9_543, %c0_544, %c0_545] : memref<15x128x128xbf16, #tpu.memory_space<vmem>>, vector<1x128x128xbf16>
    %768 = vector.shape_cast %767 : vector<1x128x128xbf16> to vector<128x128xbf16>
    %cst_546 = arith.constant dense<0.000000e+00> : vector<16x128xf32>
    %769 = tpu.matmul %766, %768, %cst_546 {dimension_numbers = #tpu.dot_dimension_numbers<[1], [0], [0], [1], [0, 0, 1, 1], [], []>} : vector<16x128xbf16>, vector<128x128xbf16>, vector<16x128xf32> -> vector<16x128xf32>
    %c9_547 = arith.constant 9 : index
    %c0_548 = arith.constant 0 : index
    %c0_549 = arith.constant 0 : index
    %770 = vector.load %arg5[%c9_547, %c0_548, %c0_549] : memref<15x1x128xf32, #tpu.memory_space<vmem>>, vector<1x1x128xf32>
    %771 = vector.shape_cast %770 : vector<1x1x128xf32> to vector<1x128xf32>
    %772 = vector.broadcast %771 : vector<1x128xf32> to vector<16x128xf32>
    %773 = arith.addf %769, %772 : vector<16x128xf32>
    %cst_550 = arith.constant 0.000000e+00 : f32
    %cst_551 = arith.constant 6.000000e+00 : f32
    %774 = vector.broadcast %cst_550 : f32 to vector<16x128xf32>
    %775 = arith.maximumf %774, %773 : vector<16x128xf32>
    %776 = vector.broadcast %cst_551 : f32 to vector<16x128xf32>
    %777 = arith.minimumf %776, %775 : vector<16x128xf32>
    %778 = vector.shape_cast %777 : vector<16x128xf32> to vector<4x4x128xf32>
    %c1_552 = arith.constant 1 : index
    %c8_553 = arith.constant 8 : index
    %c0_554 = arith.constant 0 : index
    %779 = vector.load %arg18[%c1_552, %c8_553, %c0_554] : memref<6x20x128xf32, #tpu.memory_space<vmem>>, vector<4x4x128xf32>
    tpu.vector_store %arg18[%c1_552, %c8_553, %c0_554], %778 {strides = array<i32>} : memref<6x20x128xf32, #tpu.memory_space<vmem>>, vector<4x4x128xf32>,
    %c5_555 = arith.constant 5 : index
    %c0_556 = arith.constant 0 : index
    %c0_557 = arith.constant 0 : index
    %780 = vector.load %arg6[%c5_555, %c0_556, %c0_557] : memref<8x9x128xf32, #tpu.memory_space<vmem>>, vector<1x9x128xf32>
    %781 = vector.shape_cast %780 : vector<1x9x128xf32> to vector<9x128xf32>
    %c5_558 = arith.constant 5 : index
    %c0_559 = arith.constant 0 : index
    %c0_560 = arith.constant 0 : index
    %782 = vector.load %arg7[%c5_558, %c0_559, %c0_560] : memref<8x1x128xf32, #tpu.memory_space<vmem>>, vector<1x1x128xf32>
    %783 = vector.shape_cast %782 : vector<1x1x128xf32> to vector<1x128xf32>
    %c10_561 = arith.constant 10 : index
    %c0_562 = arith.constant 0 : index
    %c0_563 = arith.constant 0 : index
    %784 = vector.load %arg4[%c10_561, %c0_562, %c0_563] : memref<15x128x128xbf16, #tpu.memory_space<vmem>>, vector<1x128x128xbf16>
    %785 = vector.shape_cast %784 : vector<1x128x128xbf16> to vector<128x128xbf16>
    %c10_564 = arith.constant 10 : index
    %c0_565 = arith.constant 0 : index
    %c0_566 = arith.constant 0 : index
    %786 = vector.load %arg5[%c10_564, %c0_565, %c0_566] : memref<15x1x128xf32, #tpu.memory_space<vmem>>, vector<1x1x128xf32>
    %787 = vector.shape_cast %786 : vector<1x1x128xf32> to vector<1x128xf32>
    %cst_567 = arith.constant 0.000000e+00 : f32
    %788 = vector.broadcast %cst_567 : f32 to vector<4x4x128xf32>
    %c0_568 = arith.constant 0 : index
    %c7_569 = arith.constant 7 : index
    %c0_570 = arith.constant 0 : index
    %789 = vector.load %arg18[%c0_568, %c7_569, %c0_570] : memref<6x20x128xf32, #tpu.memory_space<vmem>>, vector<4x4x128xf32>
    %790 = vector.extract_strided_slice %781 {offsets = [0, 0], sizes = [1, 128], strides = [1, 1]} : vector<9x128xf32> to vector<1x128xf32>
    %791 = vector.shape_cast %790 : vector<1x128xf32> to vector<128xf32>
    %792 = vector.shape_cast %791 : vector<128xf32> to vector<1x1x128xf32>
    %793 = vector.broadcast %792 : vector<1x1x128xf32> to vector<4x4x128xf32>
    %794 = arith.mulf %789, %793 : vector<4x4x128xf32>
    %795 = arith.addf %788, %794 : vector<4x4x128xf32>
    %c0_571 = arith.constant 0 : index
    %c8_572 = arith.constant 8 : index
    %c0_573 = arith.constant 0 : index
    %796 = vector.load %arg18[%c0_571, %c8_572, %c0_573] : memref<6x20x128xf32, #tpu.memory_space<vmem>>, vector<4x4x128xf32>
    %797 = vector.extract_strided_slice %781 {offsets = [1, 0], sizes = [1, 128], strides = [1, 1]} : vector<9x128xf32> to vector<1x128xf32>
    %798 = vector.shape_cast %797 : vector<1x128xf32> to vector<128xf32>
    %799 = vector.shape_cast %798 : vector<128xf32> to vector<1x1x128xf32>
    %800 = vector.broadcast %799 : vector<1x1x128xf32> to vector<4x4x128xf32>
    %801 = arith.mulf %796, %800 : vector<4x4x128xf32>
    %802 = arith.addf %795, %801 : vector<4x4x128xf32>
    %c0_574 = arith.constant 0 : index
    %c9_575 = arith.constant 9 : index
    %c0_576 = arith.constant 0 : index
    %803 = vector.load %arg18[%c0_574, %c9_575, %c0_576] : memref<6x20x128xf32, #tpu.memory_space<vmem>>, vector<4x4x128xf32>
    %804 = vector.extract_strided_slice %781 {offsets = [2, 0], sizes = [1, 128], strides = [1, 1]} : vector<9x128xf32> to vector<1x128xf32>
    %805 = vector.shape_cast %804 : vector<1x128xf32> to vector<128xf32>
    %806 = vector.shape_cast %805 : vector<128xf32> to vector<1x1x128xf32>
    %807 = vector.broadcast %806 : vector<1x1x128xf32> to vector<4x4x128xf32>
    %808 = arith.mulf %803, %807 : vector<4x4x128xf32>
    %809 = arith.addf %802, %808 : vector<4x4x128xf32>
    %c1_577 = arith.constant 1 : index
    %c7_578 = arith.constant 7 : index
    %c0_579 = arith.constant 0 : index
    %810 = vector.load %arg18[%c1_577, %c7_578, %c0_579] : memref<6x20x128xf32, #tpu.memory_space<vmem>>, vector<4x4x128xf32>
    %811 = vector.extract_strided_slice %781 {offsets = [3, 0], sizes = [1, 128], strides = [1, 1]} : vector<9x128xf32> to vector<1x128xf32>
    %812 = vector.shape_cast %811 : vector<1x128xf32> to vector<128xf32>
    %813 = vector.shape_cast %812 : vector<128xf32> to vector<1x1x128xf32>
    %814 = vector.broadcast %813 : vector<1x1x128xf32> to vector<4x4x128xf32>
    %815 = arith.mulf %810, %814 : vector<4x4x128xf32>
    %816 = arith.addf %809, %815 : vector<4x4x128xf32>
    %c1_580 = arith.constant 1 : index
    %c8_581 = arith.constant 8 : index
    %c0_582 = arith.constant 0 : index
    %817 = vector.load %arg18[%c1_580, %c8_581, %c0_582] : memref<6x20x128xf32, #tpu.memory_space<vmem>>, vector<4x4x128xf32>
    %818 = vector.extract_strided_slice %781 {offsets = [4, 0], sizes = [1, 128], strides = [1, 1]} : vector<9x128xf32> to vector<1x128xf32>
    %819 = vector.shape_cast %818 : vector<1x128xf32> to vector<128xf32>
    %820 = vector.shape_cast %819 : vector<128xf32> to vector<1x1x128xf32>
    %821 = vector.broadcast %820 : vector<1x1x128xf32> to vector<4x4x128xf32>
    %822 = arith.mulf %817, %821 : vector<4x4x128xf32>
    %823 = arith.addf %816, %822 : vector<4x4x128xf32>
    %c1_583 = arith.constant 1 : index
    %c9_584 = arith.constant 9 : index
    %c0_585 = arith.constant 0 : index
    %824 = vector.load %arg18[%c1_583, %c9_584, %c0_585] : memref<6x20x128xf32, #tpu.memory_space<vmem>>, vector<4x4x128xf32>
    %825 = vector.extract_strided_slice %781 {offsets = [5, 0], sizes = [1, 128], strides = [1, 1]} : vector<9x128xf32> to vector<1x128xf32>
    %826 = vector.shape_cast %825 : vector<1x128xf32> to vector<128xf32>
    %827 = vector.shape_cast %826 : vector<128xf32> to vector<1x1x128xf32>
    %828 = vector.broadcast %827 : vector<1x1x128xf32> to vector<4x4x128xf32>
    %829 = arith.mulf %824, %828 : vector<4x4x128xf32>
    %830 = arith.addf %823, %829 : vector<4x4x128xf32>
    %c2_586 = arith.constant 2 : index
    %c7_587 = arith.constant 7 : index
    %c0_588 = arith.constant 0 : index
    %831 = vector.load %arg18[%c2_586, %c7_587, %c0_588] : memref<6x20x128xf32, #tpu.memory_space<vmem>>, vector<4x4x128xf32>
    %832 = vector.extract_strided_slice %781 {offsets = [6, 0], sizes = [1, 128], strides = [1, 1]} : vector<9x128xf32> to vector<1x128xf32>
    %833 = vector.shape_cast %832 : vector<1x128xf32> to vector<128xf32>
    %834 = vector.shape_cast %833 : vector<128xf32> to vector<1x1x128xf32>
    %835 = vector.broadcast %834 : vector<1x1x128xf32> to vector<4x4x128xf32>
    %836 = arith.mulf %831, %835 : vector<4x4x128xf32>
    %837 = arith.addf %830, %836 : vector<4x4x128xf32>
    %c2_589 = arith.constant 2 : index
    %c8_590 = arith.constant 8 : index
    %c0_591 = arith.constant 0 : index
    %838 = vector.load %arg18[%c2_589, %c8_590, %c0_591] : memref<6x20x128xf32, #tpu.memory_space<vmem>>, vector<4x4x128xf32>
    %839 = vector.extract_strided_slice %781 {offsets = [7, 0], sizes = [1, 128], strides = [1, 1]} : vector<9x128xf32> to vector<1x128xf32>
    %840 = vector.shape_cast %839 : vector<1x128xf32> to vector<128xf32>
    %841 = vector.shape_cast %840 : vector<128xf32> to vector<1x1x128xf32>
    %842 = vector.broadcast %841 : vector<1x1x128xf32> to vector<4x4x128xf32>
    %843 = arith.mulf %838, %842 : vector<4x4x128xf32>
    %844 = arith.addf %837, %843 : vector<4x4x128xf32>
    %c2_592 = arith.constant 2 : index
    %c9_593 = arith.constant 9 : index
    %c0_594 = arith.constant 0 : index
    %845 = vector.load %arg18[%c2_592, %c9_593, %c0_594] : memref<6x20x128xf32, #tpu.memory_space<vmem>>, vector<4x4x128xf32>
    %846 = vector.extract_strided_slice %781 {offsets = [8, 0], sizes = [1, 128], strides = [1, 1]} : vector<9x128xf32> to vector<1x128xf32>
    %847 = vector.shape_cast %846 : vector<1x128xf32> to vector<128xf32>
    %848 = vector.shape_cast %847 : vector<128xf32> to vector<1x1x128xf32>
    %849 = vector.broadcast %848 : vector<1x1x128xf32> to vector<4x4x128xf32>
    %850 = arith.mulf %845, %849 : vector<4x4x128xf32>
    %851 = arith.addf %844, %850 : vector<4x4x128xf32>
    %852 = vector.shape_cast %783 : vector<1x128xf32> to vector<1x1x128xf32>
    %853 = vector.broadcast %852 : vector<1x1x128xf32> to vector<4x4x128xf32>
    %854 = arith.addf %851, %853 : vector<4x4x128xf32>
    %cst_595 = arith.constant 0.000000e+00 : f32
    %cst_596 = arith.constant 6.000000e+00 : f32
    %855 = vector.broadcast %cst_595 : f32 to vector<4x4x128xf32>
    %856 = arith.maximumf %855, %854 : vector<4x4x128xf32>
    %857 = vector.broadcast %cst_596 : f32 to vector<4x4x128xf32>
    %858 = arith.minimumf %857, %856 : vector<4x4x128xf32>
    %859 = vector.shape_cast %858 : vector<4x4x128xf32> to vector<16x128xf32>
    %860 = arith.truncf %859 : vector<16x128xf32> to vector<16x128xbf16>
    %cst_597 = arith.constant dense<0.000000e+00> : vector<16x128xf32>
    %861 = tpu.matmul %860, %785, %cst_597 {dimension_numbers = #tpu.dot_dimension_numbers<[1], [0], [0], [1], [0, 0, 1, 1], [], []>} : vector<16x128xbf16>, vector<128x128xbf16>, vector<16x128xf32> -> vector<16x128xf32>
    %862 = vector.broadcast %787 : vector<1x128xf32> to vector<16x128xf32>
    %863 = arith.addf %861, %862 : vector<16x128xf32>
    %c0_598 = arith.constant 0 : index
    %c0_599 = arith.constant 0 : index
    %c0_600 = arith.constant 0 : index
    %864 = vector.load %arg17[%c0_598, %c0_599, %c0_600] : memref<4x4x128xf32, #tpu.memory_space<vmem>>, vector<4x4x128xf32>
    %865 = vector.shape_cast %864 : vector<4x4x128xf32> to vector<16x128xf32>
    %866 = arith.addf %863, %865 : vector<16x128xf32>
    %867 = vector.shape_cast %866 : vector<16x128xf32> to vector<4x4x128xf32>
    %c0_601 = arith.constant 0 : index
    %c0_602 = arith.constant 0 : index
    %c0_603 = arith.constant 0 : index
    %868 = vector.load %arg16[%c0_601, %c0_602, %c0_603] : memref<4x4x128xf32, #tpu.memory_space<vmem>>, vector<4x4x128xf32>
    tpu.vector_store %arg16[%c0_601, %c0_602, %c0_603], %867 {strides = array<i32>} : memref<4x4x128xf32, #tpu.memory_space<vmem>>, vector<4x4x128xf32>,
    %c0_604 = arith.constant 0 : index
    %c0_605 = arith.constant 0 : index
    %c0_606 = arith.constant 0 : index
    %869 = vector.load %arg16[%c0_604, %c0_605, %c0_606] : memref<4x4x128xf32, #tpu.memory_space<vmem>>, vector<4x4x128xf32>
    %870 = vector.shape_cast %869 : vector<4x4x128xf32> to vector<16x128xf32>
    %871 = arith.truncf %870 : vector<16x128xf32> to vector<16x128xbf16>
    %c11 = arith.constant 11 : index
    %c0_607 = arith.constant 0 : index
    %c0_608 = arith.constant 0 : index
    %872 = vector.load %arg4[%c11, %c0_607, %c0_608] : memref<15x128x128xbf16, #tpu.memory_space<vmem>>, vector<1x128x128xbf16>
    %873 = vector.shape_cast %872 : vector<1x128x128xbf16> to vector<128x128xbf16>
    %cst_609 = arith.constant dense<0.000000e+00> : vector<16x128xf32>
    %874 = tpu.matmul %871, %873, %cst_609 {dimension_numbers = #tpu.dot_dimension_numbers<[1], [0], [0], [1], [0, 0, 1, 1], [], []>} : vector<16x128xbf16>, vector<128x128xbf16>, vector<16x128xf32> -> vector<16x128xf32>
    %c11_610 = arith.constant 11 : index
    %c0_611 = arith.constant 0 : index
    %c0_612 = arith.constant 0 : index
    %875 = vector.load %arg5[%c11_610, %c0_611, %c0_612] : memref<15x1x128xf32, #tpu.memory_space<vmem>>, vector<1x1x128xf32>
    %876 = vector.shape_cast %875 : vector<1x1x128xf32> to vector<1x128xf32>
    %877 = vector.broadcast %876 : vector<1x128xf32> to vector<16x128xf32>
    %878 = arith.addf %874, %877 : vector<16x128xf32>
    %cst_613 = arith.constant 0.000000e+00 : f32
    %cst_614 = arith.constant 6.000000e+00 : f32
    %879 = vector.broadcast %cst_613 : f32 to vector<16x128xf32>
    %880 = arith.maximumf %879, %878 : vector<16x128xf32>
    %881 = vector.broadcast %cst_614 : f32 to vector<16x128xf32>
    %882 = arith.minimumf %881, %880 : vector<16x128xf32>
    %883 = vector.shape_cast %882 : vector<16x128xf32> to vector<4x4x128xf32>
    %c1_615 = arith.constant 1 : index
    %c8_616 = arith.constant 8 : index
    %c0_617 = arith.constant 0 : index
    %884 = vector.load %arg18[%c1_615, %c8_616, %c0_617] : memref<6x20x128xf32, #tpu.memory_space<vmem>>, vector<4x4x128xf32>
    tpu.vector_store %arg18[%c1_615, %c8_616, %c0_617], %883 {strides = array<i32>} : memref<6x20x128xf32, #tpu.memory_space<vmem>>, vector<4x4x128xf32>,
    %c6_618 = arith.constant 6 : index
    %c0_619 = arith.constant 0 : index
    %c0_620 = arith.constant 0 : index
    %885 = vector.load %arg6[%c6_618, %c0_619, %c0_620] : memref<8x9x128xf32, #tpu.memory_space<vmem>>, vector<1x9x128xf32>
    %886 = vector.shape_cast %885 : vector<1x9x128xf32> to vector<9x128xf32>
    %c6_621 = arith.constant 6 : index
    %c0_622 = arith.constant 0 : index
    %c0_623 = arith.constant 0 : index
    %887 = vector.load %arg7[%c6_621, %c0_622, %c0_623] : memref<8x1x128xf32, #tpu.memory_space<vmem>>, vector<1x1x128xf32>
    %888 = vector.shape_cast %887 : vector<1x1x128xf32> to vector<1x128xf32>
    %c12_624 = arith.constant 12 : index
    %c0_625 = arith.constant 0 : index
    %c0_626 = arith.constant 0 : index
    %889 = vector.load %arg4[%c12_624, %c0_625, %c0_626] : memref<15x128x128xbf16, #tpu.memory_space<vmem>>, vector<1x128x128xbf16>
    %890 = vector.shape_cast %889 : vector<1x128x128xbf16> to vector<128x128xbf16>
    %c12_627 = arith.constant 12 : index
    %c0_628 = arith.constant 0 : index
    %c0_629 = arith.constant 0 : index
    %891 = vector.load %arg5[%c12_627, %c0_628, %c0_629] : memref<15x1x128xf32, #tpu.memory_space<vmem>>, vector<1x1x128xf32>
    %892 = vector.shape_cast %891 : vector<1x1x128xf32> to vector<1x128xf32>
    %cst_630 = arith.constant 0.000000e+00 : f32
    %893 = vector.broadcast %cst_630 : f32 to vector<2x2x128xf32>
    %c0_631 = arith.constant 0 : index
    %c7_632 = arith.constant 7 : index
    %c0_633 = arith.constant 0 : index
    %894 = tpu.strided_load %arg18[%c0_631, %c7_632, %c0_633] {strides = array<i32: 2, 2, 1>} : memref<6x20x128xf32, #tpu.memory_space<vmem>>, vector<2x2x128xf32>
    %895 = vector.extract_strided_slice %886 {offsets = [0, 0], sizes = [1, 128], strides = [1, 1]} : vector<9x128xf32> to vector<1x128xf32>
    %896 = vector.shape_cast %895 : vector<1x128xf32> to vector<128xf32>
    %897 = vector.shape_cast %896 : vector<128xf32> to vector<1x1x128xf32>
    %898 = vector.broadcast %897 : vector<1x1x128xf32> to vector<2x2x128xf32>
    %899 = arith.mulf %894, %898 : vector<2x2x128xf32>
    %900 = arith.addf %893, %899 : vector<2x2x128xf32>
    %c0_634 = arith.constant 0 : index
    %c8_635 = arith.constant 8 : index
    %c0_636 = arith.constant 0 : index
    %901 = tpu.strided_load %arg18[%c0_634, %c8_635, %c0_636] {strides = array<i32: 2, 2, 1>} : memref<6x20x128xf32, #tpu.memory_space<vmem>>, vector<2x2x128xf32>
    %902 = vector.extract_strided_slice %886 {offsets = [1, 0], sizes = [1, 128], strides = [1, 1]} : vector<9x128xf32> to vector<1x128xf32>
    %903 = vector.shape_cast %902 : vector<1x128xf32> to vector<128xf32>
    %904 = vector.shape_cast %903 : vector<128xf32> to vector<1x1x128xf32>
    %905 = vector.broadcast %904 : vector<1x1x128xf32> to vector<2x2x128xf32>
    %906 = arith.mulf %901, %905 : vector<2x2x128xf32>
    %907 = arith.addf %900, %906 : vector<2x2x128xf32>
    %c0_637 = arith.constant 0 : index
    %c9_638 = arith.constant 9 : index
    %c0_639 = arith.constant 0 : index
    %908 = tpu.strided_load %arg18[%c0_637, %c9_638, %c0_639] {strides = array<i32: 2, 2, 1>} : memref<6x20x128xf32, #tpu.memory_space<vmem>>, vector<2x2x128xf32>
    %909 = vector.extract_strided_slice %886 {offsets = [2, 0], sizes = [1, 128], strides = [1, 1]} : vector<9x128xf32> to vector<1x128xf32>
    %910 = vector.shape_cast %909 : vector<1x128xf32> to vector<128xf32>
    %911 = vector.shape_cast %910 : vector<128xf32> to vector<1x1x128xf32>
    %912 = vector.broadcast %911 : vector<1x1x128xf32> to vector<2x2x128xf32>
    %913 = arith.mulf %908, %912 : vector<2x2x128xf32>
    %914 = arith.addf %907, %913 : vector<2x2x128xf32>
    %c1_640 = arith.constant 1 : index
    %c7_641 = arith.constant 7 : index
    %c0_642 = arith.constant 0 : index
    %915 = tpu.strided_load %arg18[%c1_640, %c7_641, %c0_642] {strides = array<i32: 2, 2, 1>} : memref<6x20x128xf32, #tpu.memory_space<vmem>>, vector<2x2x128xf32>
    %916 = vector.extract_strided_slice %886 {offsets = [3, 0], sizes = [1, 128], strides = [1, 1]} : vector<9x128xf32> to vector<1x128xf32>
    %917 = vector.shape_cast %916 : vector<1x128xf32> to vector<128xf32>
    %918 = vector.shape_cast %917 : vector<128xf32> to vector<1x1x128xf32>
    %919 = vector.broadcast %918 : vector<1x1x128xf32> to vector<2x2x128xf32>
    %920 = arith.mulf %915, %919 : vector<2x2x128xf32>
    %921 = arith.addf %914, %920 : vector<2x2x128xf32>
    %c1_643 = arith.constant 1 : index
    %c8_644 = arith.constant 8 : index
    %c0_645 = arith.constant 0 : index
    %922 = tpu.strided_load %arg18[%c1_643, %c8_644, %c0_645] {strides = array<i32: 2, 2, 1>} : memref<6x20x128xf32, #tpu.memory_space<vmem>>, vector<2x2x128xf32>
    %923 = vector.extract_strided_slice %886 {offsets = [4, 0], sizes = [1, 128], strides = [1, 1]} : vector<9x128xf32> to vector<1x128xf32>
    %924 = vector.shape_cast %923 : vector<1x128xf32> to vector<128xf32>
    %925 = vector.shape_cast %924 : vector<128xf32> to vector<1x1x128xf32>
    %926 = vector.broadcast %925 : vector<1x1x128xf32> to vector<2x2x128xf32>
    %927 = arith.mulf %922, %926 : vector<2x2x128xf32>
    %928 = arith.addf %921, %927 : vector<2x2x128xf32>
    %c1_646 = arith.constant 1 : index
    %c9_647 = arith.constant 9 : index
    %c0_648 = arith.constant 0 : index
    %929 = tpu.strided_load %arg18[%c1_646, %c9_647, %c0_648] {strides = array<i32: 2, 2, 1>} : memref<6x20x128xf32, #tpu.memory_space<vmem>>, vector<2x2x128xf32>
    %930 = vector.extract_strided_slice %886 {offsets = [5, 0], sizes = [1, 128], strides = [1, 1]} : vector<9x128xf32> to vector<1x128xf32>
    %931 = vector.shape_cast %930 : vector<1x128xf32> to vector<128xf32>
    %932 = vector.shape_cast %931 : vector<128xf32> to vector<1x1x128xf32>
    %933 = vector.broadcast %932 : vector<1x1x128xf32> to vector<2x2x128xf32>
    %934 = arith.mulf %929, %933 : vector<2x2x128xf32>
    %935 = arith.addf %928, %934 : vector<2x2x128xf32>
    %c2_649 = arith.constant 2 : index
    %c7_650 = arith.constant 7 : index
    %c0_651 = arith.constant 0 : index
    %936 = tpu.strided_load %arg18[%c2_649, %c7_650, %c0_651] {strides = array<i32: 2, 2, 1>} : memref<6x20x128xf32, #tpu.memory_space<vmem>>, vector<2x2x128xf32>
    %937 = vector.extract_strided_slice %886 {offsets = [6, 0], sizes = [1, 128], strides = [1, 1]} : vector<9x128xf32> to vector<1x128xf32>
    %938 = vector.shape_cast %937 : vector<1x128xf32> to vector<128xf32>
    %939 = vector.shape_cast %938 : vector<128xf32> to vector<1x1x128xf32>
    %940 = vector.broadcast %939 : vector<1x1x128xf32> to vector<2x2x128xf32>
    %941 = arith.mulf %936, %940 : vector<2x2x128xf32>
    %942 = arith.addf %935, %941 : vector<2x2x128xf32>
    %c2_652 = arith.constant 2 : index
    %c8_653 = arith.constant 8 : index
    %c0_654 = arith.constant 0 : index
    %943 = tpu.strided_load %arg18[%c2_652, %c8_653, %c0_654] {strides = array<i32: 2, 2, 1>} : memref<6x20x128xf32, #tpu.memory_space<vmem>>, vector<2x2x128xf32>
    %944 = vector.extract_strided_slice %886 {offsets = [7, 0], sizes = [1, 128], strides = [1, 1]} : vector<9x128xf32> to vector<1x128xf32>
    %945 = vector.shape_cast %944 : vector<1x128xf32> to vector<128xf32>
    %946 = vector.shape_cast %945 : vector<128xf32> to vector<1x1x128xf32>
    %947 = vector.broadcast %946 : vector<1x1x128xf32> to vector<2x2x128xf32>
    %948 = arith.mulf %943, %947 : vector<2x2x128xf32>
    %949 = arith.addf %942, %948 : vector<2x2x128xf32>
    %c2_655 = arith.constant 2 : index
    %c9_656 = arith.constant 9 : index
    %c0_657 = arith.constant 0 : index
    %950 = tpu.strided_load %arg18[%c2_655, %c9_656, %c0_657] {strides = array<i32: 2, 2, 1>} : memref<6x20x128xf32, #tpu.memory_space<vmem>>, vector<2x2x128xf32>
    %951 = vector.extract_strided_slice %886 {offsets = [8, 0], sizes = [1, 128], strides = [1, 1]} : vector<9x128xf32> to vector<1x128xf32>
    %952 = vector.shape_cast %951 : vector<1x128xf32> to vector<128xf32>
    %953 = vector.shape_cast %952 : vector<128xf32> to vector<1x1x128xf32>
    %954 = vector.broadcast %953 : vector<1x1x128xf32> to vector<2x2x128xf32>
    %955 = arith.mulf %950, %954 : vector<2x2x128xf32>
    %956 = arith.addf %949, %955 : vector<2x2x128xf32>
    %957 = vector.shape_cast %888 : vector<1x128xf32> to vector<1x1x128xf32>
    %958 = vector.broadcast %957 : vector<1x1x128xf32> to vector<2x2x128xf32>
    %959 = arith.addf %956, %958 : vector<2x2x128xf32>
    %cst_658 = arith.constant 0.000000e+00 : f32
    %cst_659 = arith.constant 6.000000e+00 : f32
    %960 = vector.broadcast %cst_658 : f32 to vector<2x2x128xf32>
    %961 = arith.maximumf %960, %959 : vector<2x2x128xf32>
    %962 = vector.broadcast %cst_659 : f32 to vector<2x2x128xf32>
    %963 = arith.minimumf %962, %961 : vector<2x2x128xf32>
    %964 = vector.shape_cast %963 : vector<2x2x128xf32> to vector<4x128xf32>
    %965 = arith.truncf %964 : vector<4x128xf32> to vector<4x128xbf16>
    %cst_660 = arith.constant dense<0.000000e+00> : vector<4x128xf32>
    %966 = tpu.matmul %965, %890, %cst_660 {dimension_numbers = #tpu.dot_dimension_numbers<[1], [0], [0], [1], [0, 0, 1, 1], [], []>} : vector<4x128xbf16>, vector<128x128xbf16>, vector<4x128xf32> -> vector<4x128xf32>
    %967 = vector.broadcast %892 : vector<1x128xf32> to vector<4x128xf32>
    %968 = arith.addf %966, %967 : vector<4x128xf32>
    %969 = vector.shape_cast %968 : vector<4x128xf32> to vector<2x2x128xf32>
    %c0_661 = arith.constant 0 : index
    %c0_662 = arith.constant 0 : index
    %c0_663 = arith.constant 0 : index
    %970 = vector.load %arg19[%c0_661, %c0_662, %c0_663] : memref<2x2x128xf32, #tpu.memory_space<vmem>>, vector<2x2x128xf32>
    tpu.vector_store %arg19[%c0_661, %c0_662, %c0_663], %969 {strides = array<i32>} : memref<2x2x128xf32, #tpu.memory_space<vmem>>, vector<2x2x128xf32>,
    %c0_664 = arith.constant 0 : index
    %c0_665 = arith.constant 0 : index
    %c0_666 = arith.constant 0 : index
    %971 = vector.load %arg19[%c0_664, %c0_665, %c0_666] : memref<2x2x128xf32, #tpu.memory_space<vmem>>, vector<2x2x128xf32>
    %972 = vector.shape_cast %971 : vector<2x2x128xf32> to vector<4x128xf32>
    %973 = arith.truncf %972 : vector<4x128xf32> to vector<4x128xbf16>
    %c13 = arith.constant 13 : index
    %c0_667 = arith.constant 0 : index
    %c0_668 = arith.constant 0 : index
    %974 = vector.load %arg4[%c13, %c0_667, %c0_668] : memref<15x128x128xbf16, #tpu.memory_space<vmem>>, vector<1x128x128xbf16>
    %975 = vector.shape_cast %974 : vector<1x128x128xbf16> to vector<128x128xbf16>
    %cst_669 = arith.constant dense<0.000000e+00> : vector<4x128xf32>
    %976 = tpu.matmul %973, %975, %cst_669 {dimension_numbers = #tpu.dot_dimension_numbers<[1], [0], [0], [1], [0, 0, 1, 1], [], []>} : vector<4x128xbf16>, vector<128x128xbf16>, vector<4x128xf32> -> vector<4x128xf32>
    %c13_670 = arith.constant 13 : index
    %c0_671 = arith.constant 0 : index
    %c0_672 = arith.constant 0 : index
    %977 = vector.load %arg5[%c13_670, %c0_671, %c0_672] : memref<15x1x128xf32, #tpu.memory_space<vmem>>, vector<1x1x128xf32>
    %978 = vector.shape_cast %977 : vector<1x1x128xf32> to vector<1x128xf32>
    %979 = vector.broadcast %978 : vector<1x128xf32> to vector<4x128xf32>
    %980 = arith.addf %976, %979 : vector<4x128xf32>
    %cst_673 = arith.constant 0.000000e+00 : f32
    %cst_674 = arith.constant 6.000000e+00 : f32
    %981 = vector.broadcast %cst_673 : f32 to vector<4x128xf32>
    %982 = arith.maximumf %981, %980 : vector<4x128xf32>
    %983 = vector.broadcast %cst_674 : f32 to vector<4x128xf32>
    %984 = arith.minimumf %983, %982 : vector<4x128xf32>
    %985 = vector.shape_cast %984 : vector<4x128xf32> to vector<2x2x128xf32>
    %c1_675 = arith.constant 1 : index
    %c8_676 = arith.constant 8 : index
    %c0_677 = arith.constant 0 : index
    %986 = vector.load %arg21[%c1_675, %c8_676, %c0_677] : memref<4x18x128xf32, #tpu.memory_space<vmem>>, vector<2x2x128xf32>
    tpu.vector_store %arg21[%c1_675, %c8_676, %c0_677], %985 {strides = array<i32>} : memref<4x18x128xf32, #tpu.memory_space<vmem>>, vector<2x2x128xf32>,
    %c7_678 = arith.constant 7 : index
    %c0_679 = arith.constant 0 : index
    %c0_680 = arith.constant 0 : index
    %987 = vector.load %arg6[%c7_678, %c0_679, %c0_680] : memref<8x9x128xf32, #tpu.memory_space<vmem>>, vector<1x9x128xf32>
    %988 = vector.shape_cast %987 : vector<1x9x128xf32> to vector<9x128xf32>
    %c7_681 = arith.constant 7 : index
    %c0_682 = arith.constant 0 : index
    %c0_683 = arith.constant 0 : index
    %989 = vector.load %arg7[%c7_681, %c0_682, %c0_683] : memref<8x1x128xf32, #tpu.memory_space<vmem>>, vector<1x1x128xf32>
    %990 = vector.shape_cast %989 : vector<1x1x128xf32> to vector<1x128xf32>
    %c14 = arith.constant 14 : index
    %c0_684 = arith.constant 0 : index
    %c0_685 = arith.constant 0 : index
    %991 = vector.load %arg4[%c14, %c0_684, %c0_685] : memref<15x128x128xbf16, #tpu.memory_space<vmem>>, vector<1x128x128xbf16>
    %992 = vector.shape_cast %991 : vector<1x128x128xbf16> to vector<128x128xbf16>
    %c14_686 = arith.constant 14 : index
    %c0_687 = arith.constant 0 : index
    %c0_688 = arith.constant 0 : index
    %993 = vector.load %arg5[%c14_686, %c0_687, %c0_688] : memref<15x1x128xf32, #tpu.memory_space<vmem>>, vector<1x1x128xf32>
    %994 = vector.shape_cast %993 : vector<1x1x128xf32> to vector<1x128xf32>
    %cst_689 = arith.constant 0.000000e+00 : f32
    %995 = vector.broadcast %cst_689 : f32 to vector<2x2x128xf32>
    %c0_690 = arith.constant 0 : index
    %c7_691 = arith.constant 7 : index
    %c0_692 = arith.constant 0 : index
    %996 = vector.load %arg21[%c0_690, %c7_691, %c0_692] : memref<4x18x128xf32, #tpu.memory_space<vmem>>, vector<2x2x128xf32>
    %997 = vector.extract_strided_slice %988 {offsets = [0, 0], sizes = [1, 128], strides = [1, 1]} : vector<9x128xf32> to vector<1x128xf32>
    %998 = vector.shape_cast %997 : vector<1x128xf32> to vector<128xf32>
    %999 = vector.shape_cast %998 : vector<128xf32> to vector<1x1x128xf32>
    %1000 = vector.broadcast %999 : vector<1x1x128xf32> to vector<2x2x128xf32>
    %1001 = arith.mulf %996, %1000 : vector<2x2x128xf32>
    %1002 = arith.addf %995, %1001 : vector<2x2x128xf32>
    %c0_693 = arith.constant 0 : index
    %c8_694 = arith.constant 8 : index
    %c0_695 = arith.constant 0 : index
    %1003 = vector.load %arg21[%c0_693, %c8_694, %c0_695] : memref<4x18x128xf32, #tpu.memory_space<vmem>>, vector<2x2x128xf32>
    %1004 = vector.extract_strided_slice %988 {offsets = [1, 0], sizes = [1, 128], strides = [1, 1]} : vector<9x128xf32> to vector<1x128xf32>
    %1005 = vector.shape_cast %1004 : vector<1x128xf32> to vector<128xf32>
    %1006 = vector.shape_cast %1005 : vector<128xf32> to vector<1x1x128xf32>
    %1007 = vector.broadcast %1006 : vector<1x1x128xf32> to vector<2x2x128xf32>
    %1008 = arith.mulf %1003, %1007 : vector<2x2x128xf32>
    %1009 = arith.addf %1002, %1008 : vector<2x2x128xf32>
    %c0_696 = arith.constant 0 : index
    %c9_697 = arith.constant 9 : index
    %c0_698 = arith.constant 0 : index
    %1010 = vector.load %arg21[%c0_696, %c9_697, %c0_698] : memref<4x18x128xf32, #tpu.memory_space<vmem>>, vector<2x2x128xf32>
    %1011 = vector.extract_strided_slice %988 {offsets = [2, 0], sizes = [1, 128], strides = [1, 1]} : vector<9x128xf32> to vector<1x128xf32>
    %1012 = vector.shape_cast %1011 : vector<1x128xf32> to vector<128xf32>
    %1013 = vector.shape_cast %1012 : vector<128xf32> to vector<1x1x128xf32>
    %1014 = vector.broadcast %1013 : vector<1x1x128xf32> to vector<2x2x128xf32>
    %1015 = arith.mulf %1010, %1014 : vector<2x2x128xf32>
    %1016 = arith.addf %1009, %1015 : vector<2x2x128xf32>
    %c1_699 = arith.constant 1 : index
    %c7_700 = arith.constant 7 : index
    %c0_701 = arith.constant 0 : index
    %1017 = vector.load %arg21[%c1_699, %c7_700, %c0_701] : memref<4x18x128xf32, #tpu.memory_space<vmem>>, vector<2x2x128xf32>
    %1018 = vector.extract_strided_slice %988 {offsets = [3, 0], sizes = [1, 128], strides = [1, 1]} : vector<9x128xf32> to vector<1x128xf32>
    %1019 = vector.shape_cast %1018 : vector<1x128xf32> to vector<128xf32>
    %1020 = vector.shape_cast %1019 : vector<128xf32> to vector<1x1x128xf32>
    %1021 = vector.broadcast %1020 : vector<1x1x128xf32> to vector<2x2x128xf32>
    %1022 = arith.mulf %1017, %1021 : vector<2x2x128xf32>
    %1023 = arith.addf %1016, %1022 : vector<2x2x128xf32>
    %c1_702 = arith.constant 1 : index
    %c8_703 = arith.constant 8 : index
    %c0_704 = arith.constant 0 : index
    %1024 = vector.load %arg21[%c1_702, %c8_703, %c0_704] : memref<4x18x128xf32, #tpu.memory_space<vmem>>, vector<2x2x128xf32>
    %1025 = vector.extract_strided_slice %988 {offsets = [4, 0], sizes = [1, 128], strides = [1, 1]} : vector<9x128xf32> to vector<1x128xf32>
    %1026 = vector.shape_cast %1025 : vector<1x128xf32> to vector<128xf32>
    %1027 = vector.shape_cast %1026 : vector<128xf32> to vector<1x1x128xf32>
    %1028 = vector.broadcast %1027 : vector<1x1x128xf32> to vector<2x2x128xf32>
    %1029 = arith.mulf %1024, %1028 : vector<2x2x128xf32>
    %1030 = arith.addf %1023, %1029 : vector<2x2x128xf32>
    %c1_705 = arith.constant 1 : index
    %c9_706 = arith.constant 9 : index
    %c0_707 = arith.constant 0 : index
    %1031 = vector.load %arg21[%c1_705, %c9_706, %c0_707] : memref<4x18x128xf32, #tpu.memory_space<vmem>>, vector<2x2x128xf32>
    %1032 = vector.extract_strided_slice %988 {offsets = [5, 0], sizes = [1, 128], strides = [1, 1]} : vector<9x128xf32> to vector<1x128xf32>
    %1033 = vector.shape_cast %1032 : vector<1x128xf32> to vector<128xf32>
    %1034 = vector.shape_cast %1033 : vector<128xf32> to vector<1x1x128xf32>
    %1035 = vector.broadcast %1034 : vector<1x1x128xf32> to vector<2x2x128xf32>
    %1036 = arith.mulf %1031, %1035 : vector<2x2x128xf32>
    %1037 = arith.addf %1030, %1036 : vector<2x2x128xf32>
    %c2_708 = arith.constant 2 : index
    %c7_709 = arith.constant 7 : index
    %c0_710 = arith.constant 0 : index
    %1038 = vector.load %arg21[%c2_708, %c7_709, %c0_710] : memref<4x18x128xf32, #tpu.memory_space<vmem>>, vector<2x2x128xf32>
    %1039 = vector.extract_strided_slice %988 {offsets = [6, 0], sizes = [1, 128], strides = [1, 1]} : vector<9x128xf32> to vector<1x128xf32>
    %1040 = vector.shape_cast %1039 : vector<1x128xf32> to vector<128xf32>
    %1041 = vector.shape_cast %1040 : vector<128xf32> to vector<1x1x128xf32>
    %1042 = vector.broadcast %1041 : vector<1x1x128xf32> to vector<2x2x128xf32>
    %1043 = arith.mulf %1038, %1042 : vector<2x2x128xf32>
    %1044 = arith.addf %1037, %1043 : vector<2x2x128xf32>
    %c2_711 = arith.constant 2 : index
    %c8_712 = arith.constant 8 : index
    %c0_713 = arith.constant 0 : index
    %1045 = vector.load %arg21[%c2_711, %c8_712, %c0_713] : memref<4x18x128xf32, #tpu.memory_space<vmem>>, vector<2x2x128xf32>
    %1046 = vector.extract_strided_slice %988 {offsets = [7, 0], sizes = [1, 128], strides = [1, 1]} : vector<9x128xf32> to vector<1x128xf32>
    %1047 = vector.shape_cast %1046 : vector<1x128xf32> to vector<128xf32>
    %1048 = vector.shape_cast %1047 : vector<128xf32> to vector<1x1x128xf32>
    %1049 = vector.broadcast %1048 : vector<1x1x128xf32> to vector<2x2x128xf32>
    %1050 = arith.mulf %1045, %1049 : vector<2x2x128xf32>
    %1051 = arith.addf %1044, %1050 : vector<2x2x128xf32>
    %c2_714 = arith.constant 2 : index
    %c9_715 = arith.constant 9 : index
    %c0_716 = arith.constant 0 : index
    %1052 = vector.load %arg21[%c2_714, %c9_715, %c0_716] : memref<4x18x128xf32, #tpu.memory_space<vmem>>, vector<2x2x128xf32>
    %1053 = vector.extract_strided_slice %988 {offsets = [8, 0], sizes = [1, 128], strides = [1, 1]} : vector<9x128xf32> to vector<1x128xf32>
    %1054 = vector.shape_cast %1053 : vector<1x128xf32> to vector<128xf32>
    %1055 = vector.shape_cast %1054 : vector<128xf32> to vector<1x1x128xf32>
    %1056 = vector.broadcast %1055 : vector<1x1x128xf32> to vector<2x2x128xf32>
    %1057 = arith.mulf %1052, %1056 : vector<2x2x128xf32>
    %1058 = arith.addf %1051, %1057 : vector<2x2x128xf32>
    %1059 = vector.shape_cast %990 : vector<1x128xf32> to vector<1x1x128xf32>
    %1060 = vector.broadcast %1059 : vector<1x1x128xf32> to vector<2x2x128xf32>
    %1061 = arith.addf %1058, %1060 : vector<2x2x128xf32>
    %cst_717 = arith.constant 0.000000e+00 : f32
    %cst_718 = arith.constant 6.000000e+00 : f32
    %1062 = vector.broadcast %cst_717 : f32 to vector<2x2x128xf32>
    %1063 = arith.maximumf %1062, %1061 : vector<2x2x128xf32>
    %1064 = vector.broadcast %cst_718 : f32 to vector<2x2x128xf32>
    %1065 = arith.minimumf %1064, %1063 : vector<2x2x128xf32>
    %1066 = vector.shape_cast %1065 : vector<2x2x128xf32> to vector<4x128xf32>
    %1067 = arith.truncf %1066 : vector<4x128xf32> to vector<4x128xbf16>
    %cst_719 = arith.constant dense<0.000000e+00> : vector<4x128xf32>
    %1068 = tpu.matmul %1067, %992, %cst_719 {dimension_numbers = #tpu.dot_dimension_numbers<[1], [0], [0], [1], [0, 0, 1, 1], [], []>} : vector<4x128xbf16>, vector<128x128xbf16>, vector<4x128xf32> -> vector<4x128xf32>
    %1069 = vector.broadcast %994 : vector<1x128xf32> to vector<4x128xf32>
    %1070 = arith.addf %1068, %1069 : vector<4x128xf32>
    %c0_720 = arith.constant 0 : index
    %c0_721 = arith.constant 0 : index
    %c0_722 = arith.constant 0 : index
    %1071 = vector.load %arg19[%c0_720, %c0_721, %c0_722] : memref<2x2x128xf32, #tpu.memory_space<vmem>>, vector<2x2x128xf32>
    %1072 = vector.shape_cast %1071 : vector<2x2x128xf32> to vector<4x128xf32>
    %1073 = arith.addf %1070, %1072 : vector<4x128xf32>
    %1074 = vector.shape_cast %1073 : vector<4x128xf32> to vector<2x2x128xf32>
    %c0_723 = arith.constant 0 : index
    %c0_724 = arith.constant 0 : index
    %c0_725 = arith.constant 0 : index
    %1075 = vector.load %arg20[%c0_723, %c0_724, %c0_725] : memref<2x2x128xf32, #tpu.memory_space<vmem>>, vector<2x2x128xf32>
    tpu.vector_store %arg20[%c0_723, %c0_724, %c0_725], %1074 {strides = array<i32>} : memref<2x2x128xf32, #tpu.memory_space<vmem>>, vector<2x2x128xf32>,
    %c0_726 = arith.constant 0 : index
    %c0_727 = arith.constant 0 : index
    %c0_728 = arith.constant 0 : index
    %1076 = vector.load %arg20[%c0_726, %c0_727, %c0_728] : memref<2x2x128xf32, #tpu.memory_space<vmem>>, vector<2x2x128xf32>
    %c0_729 = arith.constant 0 : index
    %c0_730 = arith.constant 0 : index
    %c0_731 = arith.constant 0 : index
    %c0_732 = arith.constant 0 : index
    %1077 = vector.load %arg8[%c0_729, %c0_730, %c0_731, %c0_732] : memref<1x2x2x128xf32, #tpu.memory_space<vmem>>, vector<1x2x2x128xf32>
    %1078 = vector.shape_cast %1077 : vector<1x2x2x128xf32> to vector<2x2x128xf32>
    %1079 = vector.shape_cast %1076 : vector<2x2x128xf32> to vector<1x2x2x128xf32>
    tpu.vector_store %arg8[%c0_729, %c0_730, %c0_731, %c0_732], %1079 {strides = array<i32>} : memref<1x2x2x128xf32, #tpu.memory_space<vmem>>, vector<1x2x2x128xf32>,
    return
  }
  func.func @transform_0(%arg0: i32) -> (i32, i32, i32, i32) {
    %c0_i32 = arith.constant 0 : i32
    %c0_i32_0 = arith.constant 0 : i32
    %c0_i32_1 = arith.constant 0 : i32
    %c0_i32_2 = arith.constant 0 : i32
    return %arg0, %c0_i32, %c0_i32_0, %c0_i32_1 : i32, i32, i32, i32
  }
  func.func @transform_1(%arg0: i32) -> (i32, i32, i32) {
    %c0_i32 = arith.constant 0 : i32
    %c0_i32_0 = arith.constant 0 : i32
    %c0_i32_1 = arith.constant 0 : i32
    %c0_i32_2 = arith.constant 0 : i32
    return %c0_i32, %c0_i32_0, %c0_i32_1 : i32, i32, i32
  }
  func.func @transform_2(%arg0: i32) -> (i32, i32) {
    %c0_i32 = arith.constant 0 : i32
    %c0_i32_0 = arith.constant 0 : i32
    %c0_i32_1 = arith.constant 0 : i32
    return %c0_i32, %c0_i32_0 : i32, i32
  }
  func.func @transform_3(%arg0: i32) -> (i32, i32, i32) {
    %c0_i32 = arith.constant 0 : i32
    %c0_i32_0 = arith.constant 0 : i32
    %c0_i32_1 = arith.constant 0 : i32
    %c0_i32_2 = arith.constant 0 : i32
    return %c0_i32, %c0_i32_0, %c0_i32_1 : i32, i32, i32
  }
  func.func @transform_4(%arg0: i32) -> (i32, i32, i32) {
    %c0_i32 = arith.constant 0 : i32
    %c0_i32_0 = arith.constant 0 : i32
    %c0_i32_1 = arith.constant 0 : i32
    %c0_i32_2 = arith.constant 0 : i32
    return %c0_i32, %c0_i32_0, %c0_i32_1 : i32, i32, i32
  }
  func.func @transform_5(%arg0: i32) -> (i32, i32, i32) {
    %c0_i32 = arith.constant 0 : i32
    %c0_i32_0 = arith.constant 0 : i32
    %c0_i32_1 = arith.constant 0 : i32
    %c0_i32_2 = arith.constant 0 : i32
    return %c0_i32, %c0_i32_0, %c0_i32_1 : i32, i32, i32
  }
  func.func @transform_6(%arg0: i32) -> (i32, i32, i32) {
    %c0_i32 = arith.constant 0 : i32
    %c0_i32_0 = arith.constant 0 : i32
    %c0_i32_1 = arith.constant 0 : i32
    %c0_i32_2 = arith.constant 0 : i32
    return %c0_i32, %c0_i32_0, %c0_i32_1 : i32, i32, i32
  }
  func.func @transform_7(%arg0: i32) -> (i32, i32, i32, i32) {
    %c0_i32 = arith.constant 0 : i32
    %c0_i32_0 = arith.constant 0 : i32
    %c0_i32_1 = arith.constant 0 : i32
    %c0_i32_2 = arith.constant 0 : i32
    return %arg0, %c0_i32, %c0_i32_0, %c0_i32_1 : i32, i32, i32, i32
  }
}

</mosaic_0001>

<bundles_post_ra>
// kernel: fna_yolof_forward.1
= control target key start
LH: loop header
LB: loop body
LE: loop exit
PB: predicated region body
PF: predicated region fallthrough
CT: control target
= control target key end

     0   :  { %s10568_s24 = smov 0   ;;  %s13540_s0 = inlined_call_operand.vmem [shape: f32[2,32,32,128], index: 0, kind: input, shape index: {}]   ;;  %s13541_s1 = inlined_call_operand.vmem [shape: bf16[9,128,128], index: 1, kind: input, shape index: {}]   ;;  %s13542_s2 = inlined_call_operand.vmem [shape: f32[1,128], index: 2, kind: input, shape index: {}]   ;;  %s13543_s3 = inlined_call_operand.vmem [shape: bf16[15,128,128], index: 3, kind: input, shape index: {}]   ;;  %s13544_s4 = inlined_call_operand.vmem [shape: f32[15,1,128], index: 4, kind: input, shape index: {}]   ;;  %s13545_s5 = inlined_call_operand.vmem [shape: f32[8,9,128], index: 5, kind: input, shape index: {}]   ;;  %s13546_s6 = inlined_call_operand.vmem [shape: f32[8,1,128], index: 6, kind: input, shape index: {}]   ;;  %s13547_s7 = inlined_call_operand.vmem [shape: f32[2,2,2,128], index: 7, kind: output, shape index: {}]  }
   0x1 LB: > { %s8588_s25 = sadd.s32 4294967295, %s10525_s24   ;;  %p8592_p0 = scmp.ge.s32.totalorder %s10525_s24, 1  ;;  %s10525_s24 = sphi %s10568_s24, %s17_s24  }
   0x2   : > { %p237_p1 = scmp.lt.s32.totalorder %s10525_s24, 3 }
   0x4   : > { %p238_p2 = pnand %p8592_p0, %p237_p1 }
   0x6   : > { %241 = sbr.rel (%p238_p2) target bundleno = 3417 (0xd59), region = 48 }
   0xb   : > { %v10187_v0 = vld [vmem:[%s13541_s1 + $0x78] sm:$0xff]  ;;  %v10527_v3 = vmov 0.0   ;;  %v10186_v4 = vld [vmem:[%s13541_s1 + $0x70] sm:$0xff]  ;;  %v10185_v7 = vld [vmem:[%s13541_s1 + $0x68] sm:$0xff]  ;;  %p269_p3 = scmp.lt.s32.totalorder %s8588_s25, 1 }
   0xc   : > { %v10179_v1 = vld [vmem:[%s13541_s1 + $0x38] sm:$0xff]  ;;  %279 = vst [vmem:[#allocation2 + $0x7] sm:$0xff] %v10527_v3  ;;  %871 = vmatpush.bf16.msra.mxu0 %v10187_v0  ;;  %10436 = vmatpush.bf16.msra.mxu3 %v10187_v0  ;;  %v10178_v5 = vld [vmem:[%s13541_s1 + $0x30] sm:$0xff]  ;;  %v10177_v8 = vld [vmem:[%s13541_s1 + $0x28] sm:$0xff] }
   0xd   : > { %v10195_v2 = vld [vmem:[%s13541_s1 + $0xb8] sm:$0xff]  ;;  %280 = vst [vmem:[#allocation2 + $0xf] sm:$0xff] %v10527_v3  ;;  %968 = vmatpush.bf16.msra.mxu1 %v10179_v1  ;;  %v10194_v6 = vld [vmem:[%s13541_s1 + $0xb0] sm:$0xff]  ;;  %v10193_v9 = vld [vmem:[%s13541_s1 + $0xa8] sm:$0xff]  ;;  %s13573_s25 = smov (!%p269_p3, %s8588_s25), 1 }
   0xe   : > { %1122 = vmatpush.bf16.msra.mxu2 %v10195_v2  ;;  %281 = vst [vmem:[#allocation2 + $0x17] sm:$0xff] %v10527_v3  ;;  %v10184_v10 = vld [vmem:[%s13541_s1 + $0x60] sm:$0xff]  ;;  %v10183_v13 = vld [vmem:[%s13541_s1 + $0x58] sm:$0xff]  ;;  %v10182_v16 = vld [vmem:[%s13541_s1 + $0x50] sm:$0xff]  ;;  %s10170_s11 = sshll.u32 %s13573_s25, 10 }
   0xf   : > { %282 = vst [vmem:[#allocation2 + $0x1f] sm:$0xff] %v10527_v3  ;;  %v10176_v11 = vld [vmem:[%s13541_s1 + $0x20] sm:$0xff]  ;;  %v10175_v14 = vld [vmem:[%s13541_s1 + $0x18] sm:$0xff]  ;;  %v10174_v17 = vld [vmem:[%s13541_s1 + $0x10] sm:$0xff]  ;;  %s10768_s14 = scalar_lea.vmem %s13540_s0, %s10170_s11  ;;  %s10171_s11 = sshll.u32 %s13573_s25, 2 }
  0x10   : > { %872 = vmatpush.bf16.msra.mxu0 %v10186_v4  ;;  %10437 = vmatpush.bf16.msra.mxu3 %v10186_v4  ;;  %v10192_v12 = vld [vmem:[%s13541_s1 + $0xa0] sm:$0xff]  ;;  %v10191_v15 = vld [vmem:[%s13541_s1 + $0x98] sm:$0xff]  ;;  %v10190_v18 = vld [vmem:[%s13541_s1 + $0x90] sm:$0xff]  ;;  %283 = vst [vmem:[#allocation2 + $0x27] sm:$0x3] %v10527_v3  ;;  %s278_s15 = scalar_lea.vmem %s13547_s7, %s10171_s11 }
  0x11   : > { %969 = vmatpush.bf16.msra.mxu1 %v10178_v5  ;;  %v10181_v19 = vld [vmem:[%s13541_s1 + $0x48] sm:$0xff]  ;;  %v10180_v22 = vld [vmem:[%s13541_s1 + $0x40] sm:$0xff]  ;;  %290 = vst [vmem:[#allocation2 + $0x7] sm:$0x1] %v10527_v3  ;;  %v10219_v34 = vld [vmem:[%s13541_s1 + $0x178] sm:$0xff] }
  0x12   : > { %1123 = vmatpush.bf16.msra.mxu2 %v10194_v6  ;;  %v10173_v20 = vld [vmem:[%s13541_s1 + $0x8] sm:$0xff]  ;;  %v10172_v25 = vld [vmem:[%s13541_s1] sm:$0xff]  ;;  %291 = vst [vmem:[#allocation2 + $0x37] sm:$0x1] %v10527_v3  ;;  %v482_v37 = vld [vmem:[%s10768_s14 + $0xf0] sm:$0xff] }
  0x13   : > { %v10189_v21 = vld [vmem:[%s13541_s1 + $0x88] sm:$0xff]  ;;  %v10188_v26 = vld [vmem:[%s13541_s1 + $0x80] sm:$0xff]  ;;  %292 = vst [vmem:[#allocation2 + $0x67] sm:$0x1] %v10527_v3  ;;  %v483_v38 = vld [vmem:[%s10768_s14 + $0xf8] sm:$0xff] }
  0x14   : > { %873 = vmatpush.bf16.msra.mxu0 %v10185_v7  ;;  %10438 = vmatpush.bf16.msra.mxu3 %v10185_v7  ;;  %v767_v23 = vld [vmem:[#allocation2 + $0x8] ss:$2 sm:$0xff]  ;;  %293 = vst [vmem:[#allocation2 + $0x97] sm:$0x1] %v10527_v3  ;;  %v480_v35 = vld [vmem:[%s10768_s14 + $0xe0] sm:$0xff]  ;;  %v481_v36 = vld [vmem:[%s10768_s14 + $0xe8] sm:$0xff] }
  0x15   : > { %970 = vmatpush.bf16.msra.mxu1 %v10177_v8  ;;  %294 = vst [vmem:[#allocation2 + $0xc7] sm:$0x1] %v10527_v3  ;;  %v1018_v31 = vld [vmem:[#allocation2 + $0x9] ss:$2 sm:$0xff]  ;;  %v456_v43 = vld [vmem:[%s10768_s14 + $0x20] sm:$0xff]  ;;  %v457_v44 = vld [vmem:[%s10768_s14 + $0x28] sm:$0xff] }
  0x16   : > { %1124 = vmatpush.bf16.msra.mxu2 %v10193_v9  ;;  %v769_v24 = vld [vmem:[#allocation2 + $0x18] ss:$2 sm:$0xff]  ;;  %295 = vst [vmem:[#allocation2 + $0xf7] sm:$0x1] %v10527_v3  ;;  %v713_v29 = vld [vmem:[#allocation2 + $0x17] ss:$2 sm:$0xff] }
  0x17   : > { %v798_v27 = vpack.c.bf16 %v769_v24, %v767_v23  ;;  %296 = vst [vmem:[#allocation2 + $0x127] sm:$0x1] %v10527_v3  ;;  %v1020_v32 = vld [vmem:[#allocation2 + $0x19] ss:$2 sm:$0xff]  ;;  %v10218_v39 = vld [vmem:[%s13541_s1 + $0x170] sm:$0xff]  ;;  %v459_v46 = vld [vmem:[%s10768_s14 + $0x38] sm:$0xff] }
  0x18   : > { %874 = vmatpush.bf16.msra.mxu0 %v10184_v10  ;;  %10439 = vmatpush.bf16.msra.mxu3 %v10184_v10  ;;  %297 = vst [vmem:[#allocation2 + $0x157] sm:$0x1] %v10527_v3  ;;  %v711_v28 = vld [vmem:[#allocation2 + $0x7] ss:$2 sm:$0xff]  ;;  %v1049_v33 = vpack.c.bf16 %v1020_v32, %v1018_v31  ;;  %v488_v48 = vld [vmem:[%s10768_s14 + $0x120] sm:$0xff] }
  0x19   : > { %971 = vmatpush.bf16.msra.mxu1 %v10176_v11  ;;  %298 = vst [vmem:[#allocation2 + $0x187] sm:$0x1] %v10527_v3  ;;  %v742_v30 = vpack.c.bf16 %v713_v29, %v711_v28  ;;  %v458_v45 = vld [vmem:[%s10768_s14 + $0x30] sm:$0xff]  ;;  %v10203_v47 = vld [vmem:[%s13541_s1 + $0xf8] sm:$0xff]  ;;  %v10217_v49 = vld [vmem:[%s13541_s1 + $0x168] sm:$0xff] }
  0x1a   : > { %1125 = vmatpush.bf16.msra.mxu2 %v10192_v12  ;;  %299 = vst [vmem:[#allocation2 + $0x1b7] sm:$0x1] %v10527_v3  ;;  %v489_v50 = vld [vmem:[%s10768_s14 + $0x128] sm:$0xff]  ;;  %v10202_v51 = vld [vmem:[%s13541_s1 + $0xf0] sm:$0xff]  ;;  %v10211_v52 = vld [vmem:[%s13541_s1 + $0x138] sm:$0xff] }
  0x1b   : > { %300 = vst [vmem:[#allocation2 + $0x1e7] sm:$0x1] %v10527_v3  ;;  %v490_v53 = vld [vmem:[%s10768_s14 + $0x130] sm:$0xff]  ;;  %v491_v54 = vld [vmem:[%s10768_s14 + $0x138] sm:$0xff]  ;;  %v464_v56 = vld [vmem:[%s10768_s14 + $0x60] sm:$0xff] }
  0x1c   : > { %875 = vmatpush.bf16.msra.mxu0 %v10183_v13  ;;  %10440 = vmatpush.bf16.msra.mxu3 %v10183_v13  ;;  %301 = vst [vmem:[#allocation2 + $0x217] sm:$0x1] %v10527_v3  ;;  %v10210_v55 = vld [vmem:[%s13541_s1 + $0x130] sm:$0xff]  ;;  %v10201_v57 = vld [vmem:[%s13541_s1 + $0xe8] sm:$0xff]  ;;  %v467_v63 = vld [vmem:[%s10768_s14 + $0x78] sm:$0xff] }
  0x1d   : > { %972 = vmatpush.bf16.msra.mxu1 %v10175_v14  ;;  %302 = vst [vmem:[#allocation2 + $0x247] sm:$0x1] %v10527_v3  ;;  %v465_v58 = vld [vmem:[%s10768_s14 + $0x68] sm:$0xff]  ;;  %v466_v62 = vld [vmem:[%s10768_s14 + $0x70] sm:$0xff]  ;;  %v10200_v0 = vld [vmem:[%s13541_s1 + $0xe0] sm:$0xff] }
  0x1e   : > { %1126 = vmatpush.bf16.msra.mxu2 %v10191_v15  ;;  %303 = vst [vmem:[#allocation2 + $0x277] sm:$0x1] %v10527_v3  ;;  %v496_v7 = vld [vmem:[%s10768_s14 + $0x160] sm:$0xff]  ;;  %v497_v9 = vld [vmem:[%s10768_s14 + $0x168] sm:$0xff]  ;;  %v498_v10 = vld [vmem:[%s10768_s14 + $0x170] sm:$0xff] }
  0x1f   : > { %304 = vst [vmem:[#allocation2 + $0x2a7] sm:$0x1] %v10527_v3  ;;  %v499_v12 = vld [vmem:[%s10768_s14 + $0x178] sm:$0xff]  ;;  %v472_v14 = vld [vmem:[%s10768_s14 + $0xa0] sm:$0xff]  ;;  %v10197_v28 = vld [vmem:[%s13541_s1 + $0xc8] sm:$0xff] }
  0x20   : > { %876 = vmatpush.bf16.msra.mxu0 %v10182_v16  ;;  %10441 = vmatpush.bf16.msra.mxu3 %v10182_v16  ;;  %305 = vst [vmem:[#allocation2 + $0x2d7] sm:$0x1] %v10527_v3  ;;  %v10199_v15 = vld [vmem:[%s13541_s1 + $0xd8] sm:$0xff]  ;;  %v10209_v16 = vld [vmem:[%s13541_s1 + $0x128] sm:$0xff]  ;;  %v504_v24 = vld [vmem:[%s10768_s14 + $0x1a0] sm:$0xff] }
  0x21   : > { %973 = vmatpush.bf16.msra.mxu1 %v10174_v17  ;;  %306 = vst [vmem:[#allocation2 + $0x307] sm:$0x1] %v10527_v3  ;;  %v10216_v17 = vld [vmem:[%s13541_s1 + $0x160] sm:$0xff]  ;;  %v475_v23 = vld [vmem:[%s10768_s14 + $0xb8] sm:$0xff] }
  0x22   : > { %1127 = vmatpush.bf16.msra.mxu2 %v10190_v18  ;;  %307 = vst [vmem:[#allocation2 + $0x337] sm:$0x1] %v10527_v3  ;;  %v473_v18 = vld [vmem:[%s10768_s14 + $0xa8] sm:$0xff]  ;;  %v10207_v31 = vld [vmem:[%s13541_s1 + $0x118] sm:$0xff] }
  0x23   : > { %308 = vst [vmem:[#allocation2 + $0x367] sm:$0x1] %v10527_v3 }
  0x24   : > { %877 = vmatpush.bf16.msra.mxu0 %v10181_v19  ;;  %10442 = vmatpush.bf16.msra.mxu3 %v10181_v19  ;;  %309 = vst [vmem:[#allocation2 + $0x397] sm:$0x1] %v10527_v3  ;;  %v10198_v19 = vld [vmem:[%s13541_s1 + $0xd0] sm:$0xff] }
  0x25   : > { %974 = vmatpush.bf16.msra.mxu1 %v10173_v20  ;;  %310 = vst [vmem:[#allocation2 + $0x3c7] sm:$0x1] %v10527_v3  ;;  %v10208_v20 = vld [vmem:[%s13541_s1 + $0x120] sm:$0xff] }
  0x26   : > { %1128 = vmatpush.bf16.msra.mxu2 %v10189_v21  ;;  %311 = vst [vmem:[#allocation2 + $0x3f7] sm:$0x1] %v10527_v3  ;;  %v474_v21 = vld [vmem:[%s10768_s14 + $0xb0] sm:$0xff] }
  0x27   : > { %312 = vst [vmem:[#allocation2 + $0x427] sm:$0x1] %v10527_v3 }
  0x28   : > { %878 = vmatpush.bf16.msra.mxu0 %v10180_v22  ;;  %10443 = vmatpush.bf16.msra.mxu3 %v10180_v22  ;;  %313 = vst [vmem:[#allocation2 + $0x457] sm:$0x1] %v10527_v3  ;;  %v10227_v22 = vld [vmem:[%s13541_s1 + $0x1b8] sm:$0xff] }
  0x29   : > { %975 = vmatpush.bf16.msra.mxu1 %v10172_v25  ;;  %314 = vst [vmem:[#allocation2 + $0x487] sm:$0x1] %v10527_v3  ;;  %v505_v25 = vld [vmem:[%s10768_s14 + $0x1a8] sm:$0xff] }
  0x2a   : > { %1129 = vmatpush.bf16.msra.mxu2 %v10188_v26  ;;  %315 = vst [vmem:[#allocation2 + $0x4b7] sm:$0x1] %v10527_v3 }
  0x2b   : > { %879 = vmatmul.bf16.vlgmr.msra.gmra.mxu0 %v798_v27  ;;  %316 = vst [vmem:[#allocation2 + $0x4e7] sm:$0x1] %v10527_v3 }
  0x2c   : > { %317 = vst [vmem:[#allocation2 + $0x517] sm:$0x1] %v10527_v3  ;;  %976 = vmatmul.bf16.vlgmr.msra.gmra.mxu1 %v742_v30  ;;  %1292 = vmatpush.bf16.msrb.mxu3 %v10203_v47  ;;  %v455_v47 = vld [vmem:[%s10768_s14 + $0x18] sm:$0xff] }
  0x2d   : > { %318 = vst [vmem:[#allocation2 + $0x547] sm:$0x1] %v10527_v3  ;;  %1130 = vmatmul.bf16.vlgmr.msra.gmra.mxu2 %v1049_v33  ;;  %1632 = vmatpush.bf16.msrb.mxu1 %v10219_v34  ;;  %v506_v34 = vld [vmem:[%s10768_s14 + $0x1b0] sm:$0xff] }
  0x2e   : > { %319 = vst [vmem:[#allocation2 + $0x577] sm:$0x1] %v10527_v3  ;;  %1462 = vmatpush.bf16.msrb.mxu0 %v10211_v52  ;;  %1803 = vmatpush.bf16.msrb.mxu2 %v10227_v22  ;;  %v10213_v22 = vld [vmem:[%s13541_s1 + $0x148] sm:$0xff] }
  0x2f   : > { %320 = vst [vmem:[#allocation2 + $0x5a7] sm:$0x1] %v10527_v3 }
  0x30   : > { %321 = vst [vmem:[#allocation2 + $0x5d7] sm:$0x1] %v10527_v3  ;;  %1293 = vmatpush.bf16.msrb.mxu3 %v10202_v51  ;;  %v10204_v51 = vld [vmem:[%s13541_s1 + $0x100] sm:$0xff] }
  0x31   : > { %322 = vst [vmem:[#allocation2 + $0x607] sm:$0x1] %v10527_v3  ;;  %1633 = vmatpush.bf16.msrb.mxu1 %v10218_v39 }
  0x32   : > { %358 = vst [vmem:[#allocation5 + $0x7] sm:$0xff] %v10527_v3  ;;  %1463 = vmatpush.bf16.msrb.mxu0 %v10210_v55 }
  0x33   : > { %359 = vst [vmem:[#allocation5 + $0xf] sm:$0xff] %v10527_v3 }
  0x34   : > { %360 = vst [vmem:[#allocation5 + $0x17] sm:$0x3] %v10527_v3  ;;  %1294 = vmatpush.bf16.msrb.mxu3 %v10201_v57 }
  0x35   : > { %362 = vst [vmem:[#allocation5 + $0x227] sm:$0xff] %v10527_v3  ;;  %1634 = vmatpush.bf16.msrb.mxu1 %v10217_v49  ;;  %v10215_v49 = vld [vmem:[%s13541_s1 + $0x158] sm:$0xff] }
  0x36   : > { %363 = vst [vmem:[#allocation5 + $0x22f] sm:$0xff] %v10527_v3  ;;  %1464 = vmatpush.bf16.msrb.mxu0 %v10209_v16 }
  0x37   : > { %364 = vst [vmem:[#allocation5 + $0x237] sm:$0x3] %v10527_v3 }
  0x38   : > { %366 = vst [vmem:[#allocation5 + $0x27] sm:$0x1] %v10527_v3  ;;  %1295 = vmatpush.bf16.msrb.mxu3 %v10200_v0 }
  0x39   : > { %367 = vst [vmem:[#allocation5 + $0x47] sm:$0x1] %v10527_v3  ;;  %1635 = vmatpush.bf16.msrb.mxu1 %v10216_v17 }
  0x3a   : > { %368 = vst [vmem:[#allocation5 + $0x67] sm:$0x1] %v10527_v3  ;;  %1465 = vmatpush.bf16.msrb.mxu0 %v10208_v20 }
  0x3b   : > { %369 = vst [vmem:[#allocation5 + $0x87] sm:$0x1] %v10527_v3 }
  0x3c   : > { %370 = vst [vmem:[#allocation5 + $0xa7] sm:$0x1] %v10527_v3  ;;  %1296 = vmatpush.bf16.msrb.mxu3 %v10199_v15  ;;  %v471_v15 = vld [vmem:[%s10768_s14 + $0x98] sm:$0xff] }
  0x3d   : > { %371 = vst [vmem:[#allocation5 + $0xc7] sm:$0x1] %v10527_v3  ;;  %1636 = vmatpush.bf16.msrb.mxu1 %v10215_v49 }
  0x3e   : > { %372 = vst [vmem:[#allocation5 + $0xe7] sm:$0x1] %v10527_v3  ;;  %1466 = vmatpush.bf16.msrb.mxu0 %v10207_v31 }
  0x3f   : > { %373 = vst [vmem:[#allocation5 + $0x107] sm:$0x1] %v10527_v3 }
  0x40   : > { %374 = vst [vmem:[#allocation5 + $0x127] sm:$0x1] %v10527_v3  ;;  %1297 = vmatpush.bf16.msrb.mxu3 %v10198_v19 }
  0x41   : > { %375 = vst [vmem:[#allocation5 + $0x147] sm:$0x1] %v10527_v3 }
  0x42   : > { %376 = vst [vmem:[#allocation5 + $0x167] sm:$0x1] %v10527_v3 }
  0x43   : > { %377 = vst [vmem:[#allocation5 + $0x187] sm:$0x1] %v10527_v3 }
  0x44   : > { %378 = vst [vmem:[#allocation5 + $0x1a7] sm:$0x1] %v10527_v3  ;;  %1298 = vmatpush.bf16.msrb.mxu3 %v10197_v28  ;;  %v476_v28 = vld [vmem:[%s10768_s14 + $0xc0] sm:$0xff] }
  0x45   : > { %379 = vst [vmem:[#allocation5 + $0x1c7] sm:$0x1] %v10527_v3 }
  0x46   : > { %380 = vst [vmem:[#allocation5 + $0x1e7] sm:$0x1] %v10527_v3 }
  0x47   : > { %381 = vst [vmem:[#allocation5 + $0x207] sm:$0x1] %v10527_v3 }
  0x48   : > { %384 = vst [vmem:[#allocation5 + $0x38] sm:$0x1] %v10527_v3 }
  0x49   : > { %385 = vst [vmem:[#allocation5 + $0x58] sm:$0x1] %v10527_v3 }
  0x4a   : > { %386 = vst [vmem:[#allocation5 + $0x78] sm:$0x1] %v10527_v3 }
  0x4b   : > { %387 = vst [vmem:[#allocation5 + $0x98] sm:$0x1] %v10527_v3 }
  0x4c   : > { %388 = vst [vmem:[#allocation5 + $0xb8] sm:$0x1] %v10527_v3 }
  0x4d   : > { %389 = vst [vmem:[#allocation5 + $0xd8] sm:$0x1] %v10527_v3 }
  0x4e   : > { %390 = vst [vmem:[#allocation5 + $0xf8] sm:$0x1] %v10527_v3 }
  0x4f   : > { %391 = vst [vmem:[#allocation5 + $0x118] sm:$0x1] %v10527_v3 }
  0x50   : > { %392 = vst [vmem:[#allocation5 + $0x138] sm:$0x1] %v10527_v3 }
  0x51   : > { %393 = vst [vmem:[#allocation5 + $0x158] sm:$0x1] %v10527_v3 }
  0x52   : > { %394 = vst [vmem:[#allocation5 + $0x178] sm:$0x1] %v10527_v3 }
  0x53   : > { %395 = vst [vmem:[#allocation5 + $0x198] sm:$0x1] %v10527_v3 }
  0x54   : > { %396 = vst [vmem:[#allocation5 + $0x1b8] sm:$0x1] %v10527_v3 }
  0x55   : > { %397 = vst [vmem:[#allocation5 + $0x1d8] sm:$0x1] %v10527_v3 }
  0x56   : > { %398 = vst [vmem:[#allocation5 + $0x1f8] sm:$0x1] %v10527_v3 }
  0x57   : > { %399 = vst [vmem:[#allocation5 + $0x218] sm:$0x1] %v10527_v3 }
  0x58   : > { %401 = vst [vmem:[#allocation8 + $0x7] sm:$0xff] %v10527_v3 }
  0x59   : > { %402 = vst [vmem:[#allocation8 + $0xf] sm:$0x3] %v10527_v3 }
  0x5a   : > { %404 = vst [vmem:[#allocation8 + $0xdf] sm:$0xff] %v10527_v3 }
  0x5b   : > { %405 = vst [vmem:[#allocation8 + $0xe7] sm:$0x3] %v10527_v3 }
  0x5c   : > { %407 = vst [vmem:[#allocation8 + $0x1f] sm:$0x1] %v10527_v3 }
  0x5d   : > { %408 = vst [vmem:[#allocation8 + $0x37] sm:$0x1] %v10527_v3 }
  0x5e   : > { %409 = vst [vmem:[#allocation8 + $0x4f] sm:$0x1] %v10527_v3 }
  0x5f   : > { %410 = vst [vmem:[#allocation8 + $0x67] sm:$0x1] %v10527_v3 }
  0x60   : > { %411 = vst [vmem:[#allocation8 + $0x7f] sm:$0x1] %v10527_v3 }
  0x61   : > { %412 = vst [vmem:[#allocation8 + $0x97] sm:$0x1] %v10527_v3 }
  0x62   : > { %413 = vst [vmem:[#allocation8 + $0xaf] sm:$0x1] %v10527_v3 }
  0x63   : > { %414 = vst [vmem:[#allocation8 + $0xc7] sm:$0x1] %v10527_v3 }
  0x64   : > { %417 = vst [vmem:[#allocation8 + $0x28] sm:$0x1] %v10527_v3 }
  0x65   : > { %418 = vst [vmem:[#allocation8 + $0x40] sm:$0x1] %v10527_v3 }
  0x66   : > { %419 = vst [vmem:[#allocation8 + $0x58] sm:$0x1] %v10527_v3 }
  0x67   : > { %420 = vst [vmem:[#allocation8 + $0x70] sm:$0x1] %v10527_v3 }
  0x68   : > { %421 = vst [vmem:[#allocation8 + $0x88] sm:$0x1] %v10527_v3 }
  0x69   : > { %422 = vst [vmem:[#allocation8 + $0xa0] sm:$0x1] %v10527_v3 }
  0x6a   : > { %423 = vst [vmem:[#allocation8 + $0xb8] sm:$0x1] %v10527_v3 }
  0x6b   : > { %424 = vst [vmem:[#allocation8 + $0xd0] sm:$0x1] %v10527_v3 }
  0x6c   : > { %426 = vst [vmem:[#allocation11 + $0x7] sm:$0x3f] %v10527_v3 }
  0x6d   : > { %428 = vst [vmem:[#allocation11 + $0x7f] sm:$0x3f] %v10527_v3 }
  0x6e   : > { %430 = vst [vmem:[#allocation11 + $0x1f] sm:$0x1] %v10527_v3 }
  0x6f   : > { %431 = vst [vmem:[#allocation11 + $0x37] sm:$0x1] %v10527_v3 }
  0x70   : > { %432 = vst [vmem:[#allocation11 + $0x4f] sm:$0x1] %v10527_v3 }
  0x71   : > { %433 = vst [vmem:[#allocation11 + $0x67] sm:$0x1] %v10527_v3 }
  0x72   : > { %436 = vst [vmem:[#allocation11 + $0x24] sm:$0x1] %v10527_v3 }
  0x73   : > { %437 = vst [vmem:[#allocation11 + $0x3c] sm:$0x1] %v10527_v3 }
  0x74   : > { %438 = vst [vmem:[#allocation11 + $0x54] sm:$0x1] %v10527_v3 }
  0x75   : > { %439 = vst [vmem:[#allocation11 + $0x6c] sm:$0x1] %v10527_v3 }
  0x76   : > { %441 = vst [vmem:[#allocation14 + $0x7] sm:$0xf] %v10527_v3 }
  0x77   : > { %443 = vst [vmem:[#allocation14 + $0x4f] sm:$0xf] %v10527_v3 }
  0x78   : > { %445 = vst [vmem:[#allocation14 + $0x1f] sm:$0x1] %v10527_v3 }
  0x79   : > { %446 = vst [vmem:[#allocation14 + $0x37] sm:$0x1] %v10527_v3 }
  0x7a   : > { %449 = vst [vmem:[#allocation14 + $0x22] sm:$0x1] %v10527_v3 }
  0x7b   : > { %450 = vst [vmem:[#allocation14 + $0x3a] sm:$0x1] %v10527_v3 }
  0x7c   : > { %609 = vst [vmem:[#allocation2 + $0x188] sm:$0xff] %v480_v35  ;;  %v507_v35 = vld [vmem:[%s10768_s14 + $0x1b8] sm:$0xff] }
  0x7d   : > { %610 = vst [vmem:[#allocation2 + $0x190] sm:$0xff] %v481_v36 }
  0x7e   : > { %611 = vst [vmem:[#allocation2 + $0x198] sm:$0xff] %v482_v37 }
  0x7f   : > { %612 = vst [vmem:[#allocation2 + $0x1a0] sm:$0xff] %v483_v38  ;;  %v10196_v38 = vld [vmem:[%s13541_s1 + $0xc0] sm:$0xff] }
  0x80   : > { %365 = vst [vmem:[#allocation5 + $0x7] sm:$0x1] %v10527_v3  ;;  %1299 = vmatpush.bf16.msrb.mxu3 %v10196_v38 }
  0x81   : > { %382 = vst [vmem:[#allocation5 + $0x227] sm:$0x1] %v10527_v3 }
  0x82   : > { %383 = vst [vmem:[#allocation5 + $0x18] sm:$0x1] %v10527_v3 }
  0x83   : > { %400 = vst [vmem:[#allocation5 + $0x238] sm:$0x1] %v10527_v3 }
  0x84   : > { %v783_v40 = vld [vmem:[#allocation2 + $0x188] ss:$2 sm:$0xff]  ;;  %406 = vst [vmem:[#allocation8 + $0x7] sm:$0x1] %v10527_v3 }
  0x85   : > { %415 = vst [vmem:[#allocation8 + $0xdf] sm:$0x1] %v10527_v3 }
  0x86   : > { %v785_v41 = vld [vmem:[#allocation2 + $0x198] ss:$2 sm:$0xff]  ;;  %416 = vst [vmem:[#allocation8 + $0x10] sm:$0x1] %v10527_v3 }
  0x87   : > { %v802_v42 = vpack.c.bf16 %v785_v41, %v783_v40  ;;  %425 = vst [vmem:[#allocation8 + $0xe8] sm:$0x1] %v10527_v3 }
  0x88   : > { %429 = vst [vmem:[#allocation11 + $0x7] sm:$0x1] %v10527_v3 }
  0x89   : > { %899 = vmatmul.bf16.vlgmr.msra.gmra.mxu3 %v802_v42  ;;  %434 = vst [vmem:[#allocation11 + $0x7f] sm:$0x1] %v10527_v3  ;;  %v452_v42 = vld [vmem:[%s10768_s14] sm:$0xff] }
  0x8a   : > { %435 = vst [vmem:[#allocation11 + $0xc] sm:$0x1] %v10527_v3 }
  0x8b   : > { %440 = vst [vmem:[#allocation11 + $0x84] sm:$0x1] %v10527_v3 }
  0x8c   : > { %444 = vst [vmem:[#allocation14 + $0x7] sm:$0x1] %v10527_v3 }
  0x8d   : > { %447 = vst [vmem:[#allocation14 + $0x4f] sm:$0x1] %v10527_v3 }
  0x8e   : > { %448 = vst [vmem:[#allocation14 + $0xa] sm:$0x1] %v10527_v3 }
  0x8f   : > { %451 = vst [vmem:[#allocation14 + $0x52] sm:$0x1] %v10527_v3 }
  0x90   : > { %585 = vst [vmem:[#allocation2 + $0x68] sm:$0xff] %v456_v43  ;;  %v10206_v43 = vld [vmem:[%s13541_s1 + $0x110] sm:$0xff] }
  0x91   : > { %586 = vst [vmem:[#allocation2 + $0x70] sm:$0xff] %v457_v44  ;;  %v453_v44 = vld [vmem:[%s10768_s14 + $0x8] sm:$0xff]  ;;  %1467 = vmatpush.bf16.msrb.mxu0 %v10206_v43  ;;  %v10235_v43 = vld [vmem:[%s13541_s1 + $0x1f8] sm:$0xff] }
  0x92   : > { %587 = vst [vmem:[#allocation2 + $0x78] sm:$0xff] %v458_v45  ;;  %1973 = vmatpush.bf16.msra.mxu3 %v10235_v43 }
  0x93   : > { %588 = vst [vmem:[#allocation2 + $0x80] sm:$0xff] %v459_v46  ;;  %v454_v46 = vld [vmem:[%s10768_s14 + $0x10] sm:$0xff] }
  0x94   : > { %617 = vst [vmem:[#allocation2 + $0x1e8] sm:$0xff] %v488_v48  ;;  %v10205_v48 = vld [vmem:[%s13541_s1 + $0x108] sm:$0xff] }
  0x95   : > { %618 = vst [vmem:[#allocation2 + $0x1f0] sm:$0xff] %v489_v50  ;;  %v10226_v50 = vld [vmem:[%s13541_s1 + $0x1b0] sm:$0xff]  ;;  %1468 = vmatpush.bf16.msrb.mxu0 %v10205_v48 }
  0x96   : > { %619 = vst [vmem:[#allocation2 + $0x1f8] sm:$0xff] %v490_v53  ;;  %1804 = vmatpush.bf16.msrb.mxu2 %v10226_v50  ;;  %v486_v48 = vld [vmem:[%s10768_s14 + $0x110] sm:$0xff] }
  0x97   : > { %620 = vst [vmem:[#allocation2 + $0x200] sm:$0xff] %v491_v54 }
  0x98   : > { %v771_v59 = vld [vmem:[#allocation2 + $0x68] ss:$2 sm:$0xff]  ;;  %v715_v60 = vld [vmem:[#allocation2 + $0x67] ss:$2 sm:$0xff]  ;;  %593 = vst [vmem:[#allocation2 + $0xc8] sm:$0xff] %v464_v56 }
  0x99   : > { %v1022_v61 = vld [vmem:[#allocation2 + $0x69] ss:$2 sm:$0xff]  ;;  %594 = vst [vmem:[#allocation2 + $0xd0] sm:$0xff] %v465_v58  ;;  %v460_v58 = vld [vmem:[%s10768_s14 + $0x40] sm:$0xff]  ;;  %1469 = vmatpush.bf16.msrb.mxu0 %v10204_v51 }
  0x9a   : > { %v773_v1 = vld [vmem:[#allocation2 + $0x78] ss:$2 sm:$0xff]  ;;  %v717_v2 = vld [vmem:[#allocation2 + $0x77] ss:$2 sm:$0xff]  ;;  %595 = vst [vmem:[#allocation2 + $0xd8] sm:$0xff] %v466_v62 }
  0x9b   : > { %v1024_v3 = vld [vmem:[#allocation2 + $0x79] ss:$2 sm:$0xff]  ;;  %v799_v4 = vpack.c.bf16 %v773_v1, %v771_v59  ;;  %v743_v5 = vpack.c.bf16 %v717_v2, %v715_v60  ;;  %596 = vst [vmem:[#allocation2 + $0xe0] sm:$0xff] %v467_v63  ;;  %v462_v60 = vld [vmem:[%s10768_s14 + $0x50] sm:$0xff] }
  0x9c   : > { %v1050_v6 = vpack.c.bf16 %v1024_v3, %v1022_v61  ;;  %v787_v8 = vld [vmem:[#allocation2 + $0x1e8] ss:$2 sm:$0xff]  ;;  %625 = vst [vmem:[#allocation2 + $0x248] sm:$0xff] %v496_v7  ;;  %v461_v59 = vld [vmem:[%s10768_s14 + $0x48] sm:$0xff]  ;;  %v1038_v31 = vld [vmem:[#allocation2 + $0x1e9] ss:$2 sm:$0xff] }
  0x9d   : > { %884 = vmatmul.bf16.gmra.mxu0 %v799_v4  ;;  %981 = vmatmul.bf16.gmra.mxu1 %v743_v5  ;;  %626 = vst [vmem:[#allocation2 + $0x250] sm:$0xff] %v497_v9  ;;  %v463_v61 = vld [vmem:[%s10768_s14 + $0x58] sm:$0xff]  ;;  %v10214_v4 = vld [vmem:[%s13541_s1 + $0x150] sm:$0xff]  ;;  %v10225_v5 = vld [vmem:[%s13541_s1 + $0x1a8] sm:$0xff] }
  0x9e   : > { %v789_v11 = vld [vmem:[#allocation2 + $0x1f8] ss:$2 sm:$0xff]  ;;  %1135 = vmatmul.bf16.gmra.mxu2 %v1050_v6  ;;  %627 = vst [vmem:[#allocation2 + $0x258] sm:$0xff] %v498_v10  ;;  %1637 = vmatpush.bf16.msrb.mxu1 %v10214_v4  ;;  %v727_v6 = vld [vmem:[#allocation2 + $0x187] ss:$2 sm:$0xff] }
  0x9f   : > { %v803_v13 = vpack.c.bf16 %v789_v11, %v787_v8  ;;  %628 = vst [vmem:[#allocation2 + $0x260] sm:$0xff] %v499_v12  ;;  %1805 = vmatpush.bf16.msrb.mxu2 %v10225_v5  ;;  %v729_v7 = vld [vmem:[#allocation2 + $0x197] ss:$2 sm:$0xff]  ;;  %v470_v12 = vld [vmem:[%s10768_s14 + $0x90] sm:$0xff] }
  0xa0   : > { %601 = vst [vmem:[#allocation2 + $0x128] sm:$0xff] %v472_v14  ;;  %v775_v26 = vld [vmem:[#allocation2 + $0xc8] ss:$2 sm:$0xff]  ;;  %v719_v27 = vld [vmem:[#allocation2 + $0xc7] ss:$2 sm:$0xff]  ;;  %v468_v10 = vld [vmem:[%s10768_s14 + $0x80] sm:$0xff]  ;;  %v746_v16 = vpack.c.bf16 %v729_v7, %v727_v6 }
  0xa1   : > { %904 = vmatmul.bf16.gmra.mxu3 %v803_v13  ;;  %602 = vst [vmem:[#allocation2 + $0x130] sm:$0xff] %v473_v18  ;;  %v1026_v32 = vld [vmem:[#allocation2 + $0xc9] ss:$2 sm:$0xff]  ;;  %v469_v11 = vld [vmem:[%s10768_s14 + $0x88] sm:$0xff] }
  0xa2   : > { %v777_v29 = vld [vmem:[#allocation2 + $0xd8] ss:$2 sm:$0xff]  ;;  %v721_v30 = vld [vmem:[#allocation2 + $0xd7] ss:$2 sm:$0xff]  ;;  %603 = vst [vmem:[#allocation2 + $0x138] sm:$0xff] %v474_v21  ;;  %1638 = vmatpush.bf16.msrb.mxu1 %v10213_v22  ;;  %v10234_v4 = vld [vmem:[%s13541_s1 + $0x1f0] sm:$0xff] }
  0xa3   : > { %v1028_v33 = vld [vmem:[#allocation2 + $0xd9] ss:$2 sm:$0xff]  ;;  %604 = vst [vmem:[#allocation2 + $0x140] sm:$0xff] %v475_v23  ;;  %v800_v36 = vpack.c.bf16 %v777_v29, %v775_v26  ;;  %v744_v37 = vpack.c.bf16 %v721_v30, %v719_v27  ;;  %v1034_v13 = vld [vmem:[#allocation2 + $0x189] ss:$2 sm:$0xff]  ;;  %1974 = vmatpush.bf16.msra.mxu3 %v10234_v4 }
  0xa4   : > { %633 = vst [vmem:[#allocation2 + $0x2a8] sm:$0xff] %v504_v24  ;;  %v791_v39 = vld [vmem:[#allocation2 + $0x248] ss:$2 sm:$0xff]  ;;  %v1051_v41 = vpack.c.bf16 %v1028_v33, %v1026_v32  ;;  %v1036_v14 = vld [vmem:[#allocation2 + $0x199] ss:$2 sm:$0xff] }
  0xa5   : > { %634 = vst [vmem:[#allocation2 + $0x2b0] sm:$0xff] %v505_v25  ;;  %v1053_v18 = vpack.c.bf16 %v1036_v14, %v1034_v13  ;;  %v10224_v23 = vld [vmem:[%s13541_s1 + $0x1a0] sm:$0xff]  ;;  %v731_v24 = vld [vmem:[#allocation2 + $0x1e7] ss:$2 sm:$0xff] }
  0xa6   : > { %v793_v40 = vld [vmem:[#allocation2 + $0x258] ss:$2 sm:$0xff]  ;;  %635 = vst [vmem:[#allocation2 + $0x2b8] sm:$0xff] %v506_v34  ;;  %1806 = vmatpush.bf16.msrb.mxu2 %v10224_v23  ;;  %v733_v25 = vld [vmem:[#allocation2 + $0x1f7] ss:$2 sm:$0xff]  ;;  %v478_v30 = vld [vmem:[%s10768_s14 + $0xd0] sm:$0xff] }
  0xa7   : > { %636 = vst [vmem:[#allocation2 + $0x2c0] sm:$0xff] %v507_v35  ;;  %v804_v45 = vpack.c.bf16 %v793_v40, %v791_v39  ;;  %v477_v29 = vld [vmem:[%s10768_s14 + $0xc8] sm:$0xff]  ;;  %v479_v33 = vld [vmem:[%s10768_s14 + $0xd8] sm:$0xff]  ;;  %v747_v34 = vpack.c.bf16 %v733_v25, %v731_v24  ;;  %v10258_v23 = vld [vmem:[%s13541_s1 + $0x70] sm:$0xff] }
  0xa8   : > { %581 = vst [vmem:[#allocation2 + $0x38] sm:$0xff] %v452_v42  ;;  %v779_v52 = vld [vmem:[#allocation2 + $0x128] ss:$2 sm:$0xff]  ;;  %v723_v54 = vld [vmem:[#allocation2 + $0x127] ss:$2 sm:$0xff] }
  0xa9   : > { %582 = vst [vmem:[#allocation2 + $0x40] sm:$0xff] %v453_v44  ;;  %v1030_v55 = vld [vmem:[#allocation2 + $0x129] ss:$2 sm:$0xff]  ;;  %v1040_v32 = vld [vmem:[#allocation2 + $0x1f9] ss:$2 sm:$0xff]  ;;  %v880_v44 = vpop.f32.mrf.mxu0  ;;  %v977_v51 = vpop.f32.mrf.mxu1 }
  0xaa   : > { %583 = vst [vmem:[#allocation2 + $0x48] sm:$0xff] %v454_v46  ;;  %v781_v53 = vld [vmem:[#allocation2 + $0x138] ss:$2 sm:$0xff]  ;;  %v725_v56 = vld [vmem:[#allocation2 + $0x137] ss:$2 sm:$0xff]  ;;  %v10222_v42 = vld [vmem:[%s13541_s1 + $0x190] sm:$0xff] }
  0xab   : > { %584 = vst [vmem:[#allocation2 + $0x50] sm:$0xff] %v455_v47  ;;  %v1032_v57 = vld [vmem:[#allocation2 + $0x139] ss:$2 sm:$0xff]  ;;  %v801_v62 = vpack.c.bf16 %v781_v53, %v779_v52  ;;  %v745_v63 = vpack.c.bf16 %v725_v56, %v723_v54  ;;  %v10223_v40 = vld [vmem:[%s13541_s1 + $0x198] sm:$0xff]  ;;  %v978_v56 = vadd.f32 %v977_v51, %v880_v44 }
  0xac   : > { %589 = vst [vmem:[#allocation2 + $0x98] sm:$0xff] %v460_v58  ;;  %v795_v0 = vld [vmem:[#allocation2 + $0x2a8] ss:$2 sm:$0xff]  ;;  %v1052_v2 = vpack.c.bf16 %v1032_v57, %v1030_v55  ;;  %1807 = vmatpush.bf16.msrb.mxu2 %v10223_v40  ;;  %v484_v46 = vld [vmem:[%s10768_s14 + $0x100] sm:$0xff]  ;;  %v485_v47 = vld [vmem:[%s10768_s14 + $0x108] sm:$0xff] }
  0xad   : > { %889 = vmatmul.bf16.gmra.mxu0 %v800_v36  ;;  %986 = vmatmul.bf16.gmra.mxu1 %v744_v37  ;;  %590 = vst [vmem:[#allocation2 + $0xa0] sm:$0xff] %v461_v59  ;;  %v1054_v36 = vpack.c.bf16 %v1040_v32, %v1038_v31  ;;  %v735_v49 = vld [vmem:[#allocation2 + $0x247] ss:$2 sm:$0xff]  ;;  %v737_v50 = vld [vmem:[#allocation2 + $0x257] ss:$2 sm:$0xff] }
  0xae   : > { %1140 = vmatmul.bf16.gmra.mxu2 %v1051_v41  ;;  %591 = vst [vmem:[#allocation2 + $0xa8] sm:$0xff] %v462_v60  ;;  %v797_v1 = vld [vmem:[#allocation2 + $0x2b8] ss:$2 sm:$0xff]  ;;  %v487_v52 = vld [vmem:[%s10768_s14 + $0x118] sm:$0xff]  ;;  %v1044_v58 = vld [vmem:[#allocation2 + $0x259] ss:$2 sm:$0xff]  ;;  %v748_v59 = vpack.c.bf16 %v737_v50, %v735_v49 }
  0xaf   : > { %592 = vst [vmem:[#allocation2 + $0xb0] sm:$0xff] %v463_v61  ;;  %v805_v3 = vpack.c.bf16 %v797_v1, %v795_v0  ;;  %v10212_v41 = vld [vmem:[%s13541_s1 + $0x140] sm:$0xff]  ;;  %v10221_v55 = vld [vmem:[%s13541_s1 + $0x188] sm:$0xff]  ;;  %v1042_v57 = vld [vmem:[#allocation2 + $0x249] ss:$2 sm:$0xff] }
  0xb0   : > { %v1358_v8 = vld [vmem:[#allocation2 + $0x38] ss:$2 sm:$0xff]  ;;  %597 = vst [vmem:[#allocation2 + $0xf8] sm:$0xff] %v468_v10  ;;  %v1188_v19 = vld [vmem:[#allocation2 + $0x37] ss:$2 sm:$0xff]  ;;  %1639 = vmatpush.bf16.msrb.mxu1 %v10212_v41  ;;  %1808 = vmatpush.bf16.msrb.mxu2 %v10222_v42  ;;  %v1055_v61 = vpack.c.bf16 %v1044_v58, %v1042_v57  ;;  %v502_v31 = vld [vmem:[%s10768_s14 + $0x190] sm:$0xff] }
  0xb1   : > { %909 = vmatmul.bf16.gmra.mxu3 %v804_v45  ;;  %598 = vst [vmem:[#allocation2 + $0x100] sm:$0xff] %v469_v11  ;;  %v10243_v45 = vld [vmem:[%s13541_s1 + $0x238] sm:$0xff]  ;;  %v10220_v0 = vld [vmem:[%s13541_s1 + $0x180] sm:$0xff]  ;;  %v493_v11 = vld [vmem:[%s10768_s14 + $0x148] sm:$0xff]  ;;  %v10968_v43 = vpop.f32.mrf.mxu0  ;;  %v10970_v44 = vpop.f32.mrf.mxu1 }
  0xb2   : > { %v1360_v9 = vld [vmem:[#allocation2 + $0x48] ss:$2 sm:$0xff]  ;;  %599 = vst [vmem:[#allocation2 + $0x108] sm:$0xff] %v470_v12  ;;  %v1190_v20 = vld [vmem:[#allocation2 + $0x47] ss:$2 sm:$0xff]  ;;  %2143 = vmatpush.bf16.msra.mxu0 %v10243_v45  ;;  %v492_v10 = vld [vmem:[%s10768_s14 + $0x140] sm:$0xff] }
  0xb3   : > { %v1389_v17 = vpack.c.bf16 %v1360_v9, %v1358_v8  ;;  %600 = vst [vmem:[#allocation2 + $0x110] sm:$0xff] %v471_v15  ;;  %v1219_v21 = vpack.c.bf16 %v1190_v20, %v1188_v19  ;;  %v739_v6 = vld [vmem:[#allocation2 + $0x2a7] ss:$2 sm:$0xff]  ;;  %v741_v7 = vld [vmem:[#allocation2 + $0x2b7] ss:$2 sm:$0xff] }
  0xb4   : > { %v1362_v26 = vld [vmem:[#allocation2 + $0x98] ss:$2 sm:$0xff]  ;;  %605 = vst [vmem:[#allocation2 + $0x158] sm:$0xff] %v476_v28  ;;  %v1192_v37 = vld [vmem:[#allocation2 + $0x97] ss:$2 sm:$0xff]  ;;  %1809 = vmatpush.bf16.msrb.mxu2 %v10221_v55  ;;  %v494_v12 = vld [vmem:[%s10768_s14 + $0x150] sm:$0xff] }
  0xb5   : > { %606 = vst [vmem:[#allocation2 + $0x160] sm:$0xff] %v477_v29  ;;  %v1046_v13 = vld [vmem:[#allocation2 + $0x2a9] ss:$2 sm:$0xff]  ;;  %v1048_v14 = vld [vmem:[#allocation2 + $0x2b9] ss:$2 sm:$0xff] }
  0xb6   : > { %v1364_v27 = vld [vmem:[#allocation2 + $0xa8] ss:$2 sm:$0xff]  ;;  %607 = vst [vmem:[#allocation2 + $0x168] sm:$0xff] %v478_v30  ;;  %v1194_v38 = vld [vmem:[#allocation2 + $0xa7] ss:$2 sm:$0xff]  ;;  %v500_v29 = vld [vmem:[%s10768_s14 + $0x180] sm:$0xff] }
  0xb7   : > { %v1390_v35 = vpack.c.bf16 %v1364_v27, %v1362_v26  ;;  %608 = vst [vmem:[#allocation2 + $0x170] sm:$0xff] %v479_v33  ;;  %v1220_v39 = vpack.c.bf16 %v1194_v38, %v1192_v37  ;;  %v495_v15 = vld [vmem:[%s10768_s14 + $0x158] sm:$0xff]  ;;  %v1528_v24 = vld [vmem:[#allocation2 + $0x39] ss:$2 sm:$0xff] }
  0xb8   : > { %613 = vst [vmem:[#allocation2 + $0x1b8] sm:$0xff] %v484_v46  ;;  %v1366_v53 = vld [vmem:[#allocation2 + $0xf8] ss:$2 sm:$0xff]  ;;  %1810 = vmatpush.bf16.msrb.mxu2 %v10220_v0  ;;  %v1530_v26 = vld [vmem:[#allocation2 + $0x49] ss:$2 sm:$0xff] }
  0xb9   : > { %614 = vst [vmem:[#allocation2 + $0x1c0] sm:$0xff] %v485_v47  ;;  %v10233_v25 = vld [vmem:[%s13541_s1 + $0x1e8] sm:$0xff]  ;;  %v10232_v47 = vld [vmem:[%s13541_s1 + $0x1e0] sm:$0xff]  ;;  %v511_v57 = vld [vmem:[%s10768_s14 + $0x1d8] sm:$0xff] }
  0xba   : > { %v1368_v54 = vld [vmem:[#allocation2 + $0x108] ss:$2 sm:$0xff]  ;;  %615 = vst [vmem:[#allocation2 + $0x1c8] sm:$0xff] %v486_v48  ;;  %1975 = vmatpush.bf16.msra.mxu3 %v10233_v25  ;;  %v501_v30 = vld [vmem:[%s10768_s14 + $0x188] sm:$0xff]  ;;  %v1534_v48 = vld [vmem:[#allocation2 + $0xa9] ss:$2 sm:$0xff] }
  0xbb   : > { %616 = vst [vmem:[#allocation2 + $0x1d0] sm:$0xff] %v487_v52  ;;  %v1391_v60 = vpack.c.bf16 %v1368_v54, %v1366_v53  ;;  %v1699_v32 = vld [vmem:[#allocation2 + $0x67] ss:$2 sm:$0xff]  ;;  %v1701_v33 = vld [vmem:[#allocation2 + $0x77] ss:$2 sm:$0xff] }
  0xbc   : > { %v1370_v8 = vld [vmem:[#allocation2 + $0x158] ss:$2 sm:$0xff]  ;;  %621 = vst [vmem:[#allocation2 + $0x218] sm:$0xff] %v492_v10  ;;  %v1200_v19 = vld [vmem:[#allocation2 + $0x157] ss:$2 sm:$0xff]  ;;  %v510_v53 = vld [vmem:[%s10768_s14 + $0x1d0] sm:$0xff] }
  0xbd   : > { %894 = vmatmul.bf16.gmra.mxu0 %v801_v62  ;;  %991 = vmatmul.bf16.gmra.mxu1 %v745_v63  ;;  %v1196_v62 = vld [vmem:[#allocation2 + $0xf7] ss:$2 sm:$0xff]  ;;  %v1198_v63 = vld [vmem:[#allocation2 + $0x107] ss:$2 sm:$0xff]  ;;  %622 = vst [vmem:[#allocation2 + $0x220] sm:$0xff] %v493_v11 }
  0xbe   : > { %1145 = vmatmul.bf16.gmra.mxu2 %v1052_v2  ;;  %v1221_v1 = vpack.c.bf16 %v1198_v63, %v1196_v62  ;;  %v10259_v2 = vld [vmem:[%s13541_s1 + $0x78] sm:$0xff]  ;;  %623 = vst [vmem:[#allocation2 + $0x228] sm:$0xff] %v494_v12  ;;  %v10241_v40 = vld [vmem:[%s13541_s1 + $0x228] sm:$0xff]  ;;  %1976 = vmatpush.bf16.msra.mxu3 %v10232_v47  ;;  %v508_v51 = vld [vmem:[%s10768_s14 + $0x1c0] sm:$0xff] }
  0xbf   : > { %2436 = vmatpush.bf16.msra.mxu1 %v10259_v2  ;;  %v1372_v9 = vld [vmem:[#allocation2 + $0x168] ss:$2 sm:$0xff]  ;;  %v1202_v20 = vld [vmem:[#allocation2 + $0x167] ss:$2 sm:$0xff]  ;;  %624 = vst [vmem:[#allocation2 + $0x230] sm:$0xff] %v495_v15 }
  0xc0   : > { %v1222_v22 = vpack.c.bf16 %v1202_v20, %v1200_v19  ;;  %v1374_v27 = vld [vmem:[#allocation2 + $0x1b8] ss:$2 sm:$0xff]  ;;  %629 = vst [vmem:[#allocation2 + $0x278] sm:$0xff] %v500_v29  ;;  %v1204_v37 = vld [vmem:[#allocation2 + $0x1b7] ss:$2 sm:$0xff] }
  0xc1   : > { %914 = vmatmul.bf16.gmra.mxu3 %v805_v3  ;;  %v1131_v3 = vpop.f32.mrf.mxu2  ;;  %630 = vst [vmem:[#allocation2 + $0x280] sm:$0xff] %v501_v30  ;;  %v10257_v45 = vld [vmem:[%s13541_s1 + $0x68] sm:$0xff]  ;;  %v10251_v15 = vld [vmem:[%s13541_s1 + $0x38] sm:$0xff] }
  0xc2   : > { %v10944_v5 = vadd.f32 %v1131_v3, %v978_v56  ;;  %v1376_v28 = vld [vmem:[#allocation2 + $0x1c8] ss:$2 sm:$0xff]  ;;  %631 = vst [vmem:[#allocation2 + $0x288] sm:$0xff] %v502_v31  ;;  %v1206_v38 = vld [vmem:[#allocation2 + $0x1c7] ss:$2 sm:$0xff]  ;;  %v10240_v3 = vld [vmem:[%s13541_s1 + $0x220] sm:$0xff]  ;;  %2533 = vmatpush.bf16.msra.mxu2 %v10251_v15 }
  0xc3   : > { %2437 = vmatpush.bf16.msra.mxu1 %v10258_v23  ;;  %v1223_v41 = vpack.c.bf16 %v1206_v38, %v1204_v37  ;;  %v1532_v46 = vld [vmem:[#allocation2 + $0x99] ss:$2 sm:$0xff]  ;;  %637 = vst [vmem:[#allocation2 + $0x2d8] sm:$0xff] %v508_v51  ;;  %v1542_v51 = vld [vmem:[#allocation2 + $0x169] ss:$2 sm:$0xff] }
  0xc4   : > { %v1378_v49 = vld [vmem:[#allocation2 + $0x218] ss:$2 sm:$0xff]  ;;  %v1703_v55 = vld [vmem:[#allocation2 + $0xc7] ss:$2 sm:$0xff]  ;;  %v1705_v56 = vld [vmem:[#allocation2 + $0xd7] ss:$2 sm:$0xff] }
  0xc5   : > { %v509_v52 = vld [vmem:[%s10768_s14 + $0x1c8] sm:$0xff]  ;;  %639 = vst [vmem:[#allocation2 + $0x2e8] sm:$0xff] %v510_v53 }
  0xc6   : > { %v1380_v50 = vld [vmem:[#allocation2 + $0x228] ss:$2 sm:$0xff]  ;;  %638 = vst [vmem:[#allocation2 + $0x2e0] sm:$0xff] %v509_v52  ;;  %v1208_v63 = vld [vmem:[#allocation2 + $0x217] ss:$2 sm:$0xff] }
  0xc7   : > { %2438 = vmatpush.bf16.msra.mxu1 %v10257_v45  ;;  %v1210_v0 = vld [vmem:[#allocation2 + $0x227] ss:$2 sm:$0xff]  ;;  %640 = vst [vmem:[#allocation2 + $0x2f0] sm:$0xff] %v511_v57  ;;  %v1709_v23 = vld [vmem:[#allocation2 + $0x137] ss:$2 sm:$0xff] }
  0xc8   : > { %v1224_v4 = vpack.c.bf16 %v1210_v0, %v1208_v63  ;;  %v1382_v19 = vld [vmem:[#allocation2 + $0x278] ss:$2 sm:$0xff]  ;;  %v1212_v30 = vld [vmem:[#allocation2 + $0x277] ss:$2 sm:$0xff]  ;;  %v10250_v57 = vld [vmem:[%s13541_s1 + $0x30] sm:$0xff] }
  0xc9   : > { %v10981_v54 = vpop.f32.mrf.mxu2  ;;  %v10237_v38 = vld [vmem:[%s13541_s1 + $0x208] sm:$0xff]  ;;  %2534 = vmatpush.bf16.msra.mxu2 %v10250_v57  ;;  %v512_v57 = vld [vmem:[%s10768_s14 + $0x1e0] sm:$0xff] }
  0xca   : > { %641 = vst [vmem:[#allocation2 + $0x308] sm:$0xff] %v512_v57 }
  0xcd   : > { %996 = vmatmul.bf16.gmra.mxu1 %v746_v16  ;;  %1470 = vmatmul.bf16.vlgmr.msrb.gmra.mxu0 %v1389_v17  ;;  %v749_v16 = vpack.c.bf16 %v741_v7, %v739_v6  ;;  %v1392_v17 = vpack.c.bf16 %v1372_v9, %v1370_v8  ;;  %v10231_v6 = vld [vmem:[%s13541_s1 + $0x1d8] sm:$0xff]  ;;  %v10256_v8 = vld [vmem:[%s13541_s1 + $0x60] sm:$0xff] }
  0xce   : > { %1150 = vmatmul.bf16.gmra.mxu2 %v1053_v18  ;;  %v1056_v18 = vpack.c.bf16 %v1048_v14, %v1046_v13  ;;  %1977 = vmatpush.bf16.msra.mxu3 %v10231_v6  ;;  %v10230_v14 = vld [vmem:[%s13541_s1 + $0x1d0] sm:$0xff]  ;;  %v1386_v52 = vld [vmem:[#allocation2 + $0x2d8] ss:$2 sm:$0xff] }
  0xcf   : > { %2439 = vmatpush.bf16.msra.mxu1 %v10256_v8  ;;  %v1388_v53 = vld [vmem:[#allocation2 + $0x2e8] ss:$2 sm:$0xff] }
  0xd1   : > { %1300 = vmatmul.bf16.vlgmr.msrb.gmra.mxu3 %v1219_v21  ;;  %v10242_v21 = vld [vmem:[%s13541_s1 + $0x230] sm:$0xff] }
  0xd2   : > { %2144 = vmatpush.bf16.msra.mxu0 %v10242_v21  ;;  %1978 = vmatpush.bf16.msra.mxu3 %v10230_v14  ;;  %v10229_v21 = vld [vmem:[%s13541_s1 + $0x1c8] sm:$0xff] }
  0xd6   : > { %2145 = vmatpush.bf16.msra.mxu0 %v10241_v40  ;;  %1979 = vmatpush.bf16.msra.mxu3 %v10229_v21  ;;  %v10255_v40 = vld [vmem:[%s13541_s1 + $0x58] sm:$0xff] }
  0xd7   : > { %2440 = vmatpush.bf16.msra.mxu1 %v10255_v40  ;;  %v1715_v21 = vld [vmem:[#allocation2 + $0x1e7] ss:$2 sm:$0xff] }
  0xda   : > { %2146 = vmatpush.bf16.msra.mxu0 %v10240_v3 }
  0xdd   : > { %1001 = vmatmul.bf16.gmra.mxu1 %v747_v34  ;;  %1475 = vmatmul.bf16.gmra.mxu0 %v1390_v35  ;;  %v503_v34 = vld [vmem:[%s10768_s14 + $0x198] sm:$0xff]  ;;  %v1559_v35 = vpack.c.bf16 %v1530_v26, %v1528_v24 }
  0xde   : > { %1155 = vmatmul.bf16.gmra.mxu2 %v1054_v36  ;;  %v1393_v36 = vpack.c.bf16 %v1376_v28, %v1374_v27  ;;  %632 = vst [vmem:[#allocation2 + $0x290] sm:$0xff] %v503_v34 }
  0xe1   : > { %1305 = vmatmul.bf16.gmra.mxu3 %v1220_v39  ;;  %v1730_v39 = vpack.c.bf16 %v1701_v33, %v1699_v32 }
  0xe5   : > { %v1384_v20 = vld [vmem:[#allocation2 + $0x288] ss:$2 sm:$0xff]  ;;  %v1214_v31 = vld [vmem:[#allocation2 + $0x287] ss:$2 sm:$0xff] }
  0xe6   : > { %v1395_v26 = vpack.c.bf16 %v1384_v20, %v1382_v19  ;;  %v1225_v37 = vpack.c.bf16 %v1214_v31, %v1212_v30  ;;  %v2039_v19 = vld [vmem:[#allocation2 + $0x69] ss:$2 sm:$0xff]  ;;  %v2041_v20 = vld [vmem:[#allocation2 + $0x79] ss:$2 sm:$0xff]  ;;  %v1869_v31 = vld [vmem:[#allocation2 + $0x68] ss:$2 sm:$0xff] }
  0xed   : > { %1006 = vmatmul.bf16.gmra.mxu1 %v748_v59  ;;  %1480 = vmatmul.bf16.gmra.mxu0 %v1391_v60  ;;  %v1560_v59 = vpack.c.bf16 %v1534_v48, %v1532_v46  ;;  %v1394_v60 = vpack.c.bf16 %v1380_v50, %v1378_v49  ;;  %v10236_v49 = vld [vmem:[%s13541_s1 + $0x200] sm:$0xff] }
  0xee   : > { %1160 = vmatmul.bf16.gmra.mxu2 %v1055_v61  ;;  %v1540_v50 = vld [vmem:[#allocation2 + $0x159] ss:$2 sm:$0xff] }
  0xf1   : > { %1310 = vmatmul.bf16.gmra.mxu3 %v1221_v1  ;;  %v1731_v1 = vpack.c.bf16 %v1705_v56, %v1703_v55  ;;  %v1711_v55 = vld [vmem:[#allocation2 + $0x187] ss:$2 sm:$0xff]  ;;  %v1713_v56 = vld [vmem:[#allocation2 + $0x197] ss:$2 sm:$0xff] }
  0xf2   : > { %v1733_v3 = vpack.c.bf16 %v1713_v56, %v1711_v55  ;;  %v2043_v55 = vld [vmem:[#allocation2 + $0xc9] ss:$2 sm:$0xff]  ;;  %v2045_v56 = vld [vmem:[#allocation2 + $0xd9] ss:$2 sm:$0xff] }
  0xfd   : > { %1011 = vmatmul.bf16.gmra.mxu1 %v749_v16  ;;  %1485 = vmatmul.bf16.gmra.mxu0 %v1392_v17  ;;  %v1536_v16 = vld [vmem:[#allocation2 + $0xf9] ss:$2 sm:$0xff]  ;;  %v1538_v17 = vld [vmem:[#allocation2 + $0x109] ss:$2 sm:$0xff] }
  0xfe   : > { %1165 = vmatmul.bf16.gmra.mxu2 %v1056_v18  ;;  %v10239_v18 = vld [vmem:[%s13541_s1 + $0x218] sm:$0xff]  ;;  %v1561_v25 = vpack.c.bf16 %v1538_v17, %v1536_v16  ;;  %v1544_v17 = vld [vmem:[#allocation2 + $0x1b9] ss:$2 sm:$0xff] }
  0xff   : > { %2147 = vmatpush.bf16.msra.mxu0 %v10239_v18  ;;  %v1546_v18 = vld [vmem:[#allocation2 + $0x1c9] ss:$2 sm:$0xff] }
 0x101   : > { %1315 = vmatmul.bf16.gmra.mxu3 %v1222_v22  ;;  %v1707_v22 = vld [vmem:[#allocation2 + $0x127] ss:$2 sm:$0xff] }
 0x102   : > { %v1732_v32 = vpack.c.bf16 %v1709_v23, %v1707_v22  ;;  %v1717_v22 = vld [vmem:[#allocation2 + $0x1f7] ss:$2 sm:$0xff] }
 0x103   : > { %v10249_v23 = vld [vmem:[%s13541_s1 + $0x28] sm:$0xff]  ;;  %v1734_v30 = vpack.c.bf16 %v1717_v22, %v1715_v21 }
 0x104   : > { %2535 = vmatpush.bf16.msra.mxu2 %v10249_v23 }
 0x10c   : > { %v10966_v42 = vpop.f32.mrf.mxu3 }
 0x10d   : > { %1640 = vmatmul.bf16.vlgmr.msrb.gmra.mxu1 %v1559_v35  ;;  %1490 = vmatmul.bf16.gmra.mxu0 %v1393_v36  ;;  %v10228_v35 = vld [vmem:[%s13541_s1 + $0x1c0] sm:$0xff]  ;;  %v10238_v36 = vld [vmem:[%s13541_s1 + $0x210] sm:$0xff] }
 0x10e   : > { %1811 = vmatmul.bf16.vlgmr.msrb.gmra.mxu2 %v1730_v39  ;;  %1980 = vmatpush.bf16.msra.mxu3 %v10228_v35 }
 0x10f   : > { %2148 = vmatpush.bf16.msra.mxu0 %v10238_v36 }
 0x111   : > { %1320 = vmatmul.bf16.gmra.mxu3 %v1223_v41 }
 0x113   : > { %2149 = vmatpush.bf16.msra.mxu0 %v10237_v38 }
 0x114   : > { %v10984_v58 = vpop.f32.mrf.mxu3 }
 0x117   : > { %2150 = vmatpush.bf16.msra.mxu0 %v10236_v49  ;;  %v1548_v49 = vld [vmem:[#allocation2 + $0x219] ss:$2 sm:$0xff] }
 0x11a   : > { %v885_v61 = vpop.f32.mrf.mxu0  ;;  %v982_v62 = vpop.f32.mrf.mxu1 }
 0x11b   : > { %v983_v2 = vadd.f32 %v982_v62, %v885_v61  ;;  %v1396_v61 = vpack.c.bf16 %v1388_v53, %v1386_v52  ;;  %v1719_v52 = vld [vmem:[#allocation2 + $0x247] ss:$2 sm:$0xff]  ;;  %v1721_v53 = vld [vmem:[#allocation2 + $0x257] ss:$2 sm:$0xff] }
 0x11d   : > { %1645 = vmatmul.bf16.gmra.mxu1 %v1560_v59  ;;  %1495 = vmatmul.bf16.gmra.mxu0 %v1394_v60  ;;  %v1562_v60 = vpack.c.bf16 %v1542_v51, %v1540_v50  ;;  %v1550_v51 = vld [vmem:[#allocation2 + $0x229] ss:$2 sm:$0xff] }
 0x11e   : > { %1816 = vmatmul.bf16.gmra.mxu2 %v1731_v1  ;;  %v1216_v1 = vld [vmem:[#allocation2 + $0x2d7] ss:$2 sm:$0xff] }
 0x121   : > { %1325 = vmatmul.bf16.gmra.mxu3 %v1224_v4  ;;  %v1136_v7 = vpop.f32.mrf.mxu2 }
 0x122   : > { %v10995_v9 = vadd.f32 %v1136_v7, %v983_v2  ;;  %v887_v10 = vpop.f32.mrf.mxu0  ;;  %v984_v11 = vpop.f32.mrf.mxu1  ;;  %v1218_v2 = vld [vmem:[#allocation2 + $0x2e7] ss:$2 sm:$0xff] }
 0x123   : > { %v985_v12 = vadd.f32 %v984_v11, %v887_v10  ;;  %v1226_v7 = vpack.c.bf16 %v1218_v2, %v1216_v1  ;;  %v10254_v10 = vld [vmem:[%s13541_s1 + $0x50] sm:$0xff]  ;;  %v1564_v1 = vpack.c.bf16 %v1550_v51, %v1548_v49  ;;  %v2071_v2 = vpack.c.bf16 %v2045_v56, %v2043_v55  ;;  %v10244_v55 = vld [vmem:[%s13541_s1] sm:$0xff] }
 0x124   : > { %v10997_v13 = vpop.f32.mrf.mxu3  ;;  %2441 = vmatpush.bf16.msra.mxu1 %v10254_v10  ;;  %v1875_v10 = vld [vmem:[#allocation2 + $0xd8] ss:$2 sm:$0xff]  ;;  %v1877_v49 = vld [vmem:[#allocation2 + $0x128] ss:$2 sm:$0xff] }
 0x129   : > { %v1138_v24 = vpop.f32.mrf.mxu2 }
 0x12a   : > { %v11011_v27 = vadd.f32 %v1138_v24, %v985_v12  ;;  %v890_v28 = vpop.f32.mrf.mxu0  ;;  %v987_v29 = vpop.f32.mrf.mxu1 }
 0x12b   : > { %v988_v33 = vadd.f32 %v987_v29, %v890_v28 }
 0x12c   : > { %v11013_v34 = vpop.f32.mrf.mxu3 }
 0x12d   : > { %1650 = vmatmul.bf16.gmra.mxu1 %v1561_v25  ;;  %1500 = vmatmul.bf16.gmra.mxu0 %v1395_v26  ;;  %v1563_v25 = vpack.c.bf16 %v1546_v18, %v1544_v17  ;;  %v2070_v26 = vpack.c.bf16 %v2041_v20, %v2039_v19  ;;  %v10247_v19 = vld [vmem:[%s13541_s1 + $0x18] sm:$0xff] }
 0x12e   : > { %1821 = vmatmul.bf16.gmra.mxu2 %v1732_v32  ;;  %v1871_v32 = vld [vmem:[#allocation2 + $0x78] ss:$2 sm:$0xff] }
 0x131   : > { %1330 = vmatmul.bf16.gmra.mxu3 %v1225_v37  ;;  %v1141_v39 = vpop.f32.mrf.mxu2  ;;  %v1900_v37 = vpack.c.bf16 %v1871_v32, %v1869_v31  ;;  %v1723_v31 = vld [vmem:[#allocation2 + $0x2a7] ss:$2 sm:$0xff] }
 0x132   : > { %v11027_v41 = vadd.f32 %v1141_v39, %v988_v33  ;;  %v892_v45 = vpop.f32.mrf.mxu0  ;;  %v989_v46 = vpop.f32.mrf.mxu1  ;;  %v10253_v39 = vld [vmem:[%s13541_s1 + $0x48] sm:$0xff]  ;;  %v2047_v32 = vld [vmem:[#allocation2 + $0x129] ss:$2 sm:$0xff] }
 0x133   : > { %v990_v47 = vadd.f32 %v989_v46, %v892_v45  ;;  %2442 = vmatpush.bf16.msra.mxu1 %v10253_v39 }
 0x134   : > { %v11029_v48 = vpop.f32.mrf.mxu3 }
 0x139   : > { %v1143_v59 = vpop.f32.mrf.mxu2 }
 0x13a   : > { %v11037_v62 = vadd.f32 %v1143_v59, %v990_v47  ;;  %v895_v63 = vpop.f32.mrf.mxu0  ;;  %v992_v0 = vpop.f32.mrf.mxu1 }
 0x13b   : > { %v993_v4 = vadd.f32 %v992_v0, %v895_v63  ;;  %v515_v63 = vld [vmem:[%s10768_s14 + $0x1f8] sm:$0xff] }
 0x13c   : > { %v11039_v6 = vpop.f32.mrf.mxu3  ;;  %644 = vst [vmem:[#allocation2 + $0x320] sm:$0xff] %v515_v63 }
 0x13d   : > { %1655 = vmatmul.bf16.gmra.mxu1 %v1562_v60  ;;  %1505 = vmatmul.bf16.gmra.mxu0 %v1396_v61  ;;  %v10248_v60 = vld [vmem:[%s13541_s1 + $0x20] sm:$0xff]  ;;  %v513_v61 = vld [vmem:[%s10768_s14 + $0x1e8] sm:$0xff] }
 0x13e   : > { %1826 = vmatmul.bf16.gmra.mxu2 %v1733_v3  ;;  %642 = vst [vmem:[#allocation2 + $0x310] sm:$0xff] %v513_v61  ;;  %v10275_v61 = vld [vmem:[%s13541_s1 + $0xf8] sm:$0xff] }
 0x13f   : > { %2536 = vmatpush.bf16.msra.mxu2 %v10248_v60  ;;  %2856 = vmatpush.bf16.msrb.mxu0 %v10275_v61  ;;  %v529_v61 = vld [vmem:[%s10768_s14 + $0x268] sm:$0xff] }
 0x140   : > { %658 = vst [vmem:[#allocation2 + $0x3d0] sm:$0xff] %v529_v61  ;;  %v10263_v61 = vld [vmem:[%s13541_s1 + $0x98] sm:$0xff] }
 0x141   : > { %1335 = vmatmul.bf16.gmra.mxu3 %v1226_v7  ;;  %v1146_v8 = vpop.f32.mrf.mxu2  ;;  %v1735_v7 = vpack.c.bf16 %v1721_v53, %v1719_v52 }
 0x142   : > { %v11044_v11 = vadd.f32 %v1146_v8, %v993_v4  ;;  %v897_v12 = vpop.f32.mrf.mxu0  ;;  %v994_v14 = vpop.f32.mrf.mxu1  ;;  %v1873_v8 = vld [vmem:[#allocation2 + $0xc8] ss:$2 sm:$0xff] }
 0x143   : > { %v995_v15 = vadd.f32 %v994_v14, %v897_v12  ;;  %2537 = vmatpush.bf16.msra.mxu2 %v10247_v19  ;;  %v523_v19 = vld [vmem:[%s10768_s14 + $0x238] sm:$0xff] }
 0x144   : > { %v11046_v16 = vpop.f32.mrf.mxu3  ;;  %652 = vst [vmem:[#allocation2 + $0x380] sm:$0xff] %v523_v19 }
 0x149   : > { %v1148_v24 = vpop.f32.mrf.mxu2 }
 0x14a   : > { %v11051_v28 = vadd.f32 %v1148_v24, %v995_v15  ;;  %v997_v29 = vpop.f32.mrf.mxu1  ;;  %v1471_v33 = vpop.f32.mrf.mxu0 }
 0x14b   : > { %v998_v35 = vadd.f32 %v997_v29, %v10966_v42  ;;  %v1552_v29 = vld [vmem:[#allocation2 + $0x279] ss:$2 sm:$0xff] }
 0x14c   : > { %v11054_v36 = vpop.f32.mrf.mxu3 }
 0x14d   : > { %1660 = vmatmul.bf16.gmra.mxu1 %v1563_v25  ;;  %2151 = vmatmul.bf16.vlgmr.msra.gmra.mxu0 %v2070_v26  ;;  %v10246_v25 = vld [vmem:[%s13541_s1 + $0x10] sm:$0xff] }
 0x14e   : > { %1831 = vmatmul.bf16.gmra.mxu2 %v1734_v30  ;;  %v1554_v30 = vld [vmem:[#allocation2 + $0x289] ss:$2 sm:$0xff] }
 0x14f   : > { %2538 = vmatpush.bf16.msra.mxu2 %v10246_v25  ;;  %v1883_v25 = vld [vmem:[#allocation2 + $0x198] ss:$2 sm:$0xff] }
 0x151   : > { %1981 = vmatmul.bf16.vlgmr.msra.gmra.mxu3 %v1900_v37  ;;  %v1151_v38 = vpop.f32.mrf.mxu2  ;;  %v1725_v37 = vld [vmem:[#allocation2 + $0x2b7] ss:$2 sm:$0xff] }
 0x152   : > { %v11059_v40 = vadd.f32 %v1151_v38, %v998_v35  ;;  %v999_v45 = vpop.f32.mrf.mxu1  ;;  %v1473_v46 = vpop.f32.mrf.mxu0  ;;  %v10245_v38 = vld [vmem:[%s13541_s1 + $0x8] sm:$0xff] }
 0x153   : > { %v1000_v42 = vadd.f32 %v999_v45, %v10984_v58  ;;  %v514_v58 = vld [vmem:[%s10768_s14 + $0x1f0] sm:$0xff]  ;;  %v1565_v45 = vpack.c.bf16 %v1554_v30, %v1552_v29  ;;  %2539 = vmatpush.bf16.msra.mxu2 %v10245_v38 }
 0x154   : > { %v1301_v47 = vpop.f32.mrf.mxu3  ;;  %643 = vst [vmem:[#allocation2 + $0x318] sm:$0xff] %v514_v58  ;;  %v10283_v58 = vld [vmem:[%s13541_s1 + $0x138] sm:$0xff] }
 0x155   : > { %v1341_v50 = vadd.f32 %v1301_v47, %v10944_v5  ;;  %v980_v5 = vadd.f32 %v10970_v44, %v10968_v43  ;;  %v1901_v43 = vpack.c.bf16 %v1875_v10, %v1873_v8  ;;  %v1736_v47 = vpack.c.bf16 %v1725_v37, %v1723_v31  ;;  %v1727_v8 = vld [vmem:[#allocation2 + $0x307] ss:$2 sm:$0xff] }
 0x156   : > { %v10274_v37 = vld [vmem:[%s13541_s1 + $0xf0] sm:$0xff] }
 0x157   : > { %v11064_v59 = vadd.f32 %v1471_v33, %v1341_v50  ;;  %v1172_v14 = vadd.f32 %v10981_v54, %v980_v5  ;;  %v10252_v54 = vld [vmem:[%s13541_s1 + $0x40] sm:$0xff]  ;;  %2540 = vmatpush.bf16.msra.mxu2 %v10244_v55  ;;  %2857 = vmatpush.bf16.msrb.mxu0 %v10274_v37  ;;  %v537_v37 = vld [vmem:[%s10768_s14 + $0x2a8] sm:$0xff] }
 0x158   : > { %2443 = vmatpush.bf16.msra.mxu1 %v10252_v54  ;;  %v2049_v33 = vld [vmem:[#allocation2 + $0x139] ss:$2 sm:$0xff]  ;;  %v1879_v50 = vld [vmem:[#allocation2 + $0x138] ss:$2 sm:$0xff]  ;;  %666 = vst [vmem:[#allocation2 + $0x430] sm:$0xff] %v537_v37 }
 0x159   : > { %v1153_v0 = vpop.f32.mrf.mxu2  ;;  %v1902_v57 = vpack.c.bf16 %v1879_v50, %v1877_v49  ;;  %v2277_v50 = vld [vmem:[#allocation2 + $0x307] ss:$2 sm:$0xff]  ;;  %v528_v55 = vld [vmem:[%s10768_s14 + $0x260] sm:$0xff] }
 0x15a   : > { %v11074_v3 = vadd.f32 %v1153_v0, %v1000_v42  ;;  %v1002_v4 = vpop.f32.mrf.mxu1  ;;  %v1476_v12 = vpop.f32.mrf.mxu0  ;;  %657 = vst [vmem:[#allocation2 + $0x3c8] sm:$0xff] %v528_v55  ;;  %v10260_v37 = vld [vmem:[%s13541_s1 + $0x80] sm:$0xff] }
 0x15b   : > { %v1003_v15 = vadd.f32 %v1002_v4, %v10997_v13  ;;  %v1729_v10 = vld [vmem:[#allocation2 + $0x317] ss:$2 sm:$0xff]  ;;  %v2335_v49 = vld [vmem:[#allocation2 + $0x318] ss:$2 sm:$0xff] }
 0x15c   : > { %v1303_v17 = vpop.f32.mrf.mxu3  ;;  %3025 = vmatpush.bf16.msrb.mxu1 %v10283_v58 }
 0x15d   : > { %v1342_v18 = vadd.f32 %v1303_v17, %v1172_v14  ;;  %1665 = vmatmul.bf16.gmra.mxu1 %v1564_v1  ;;  %2156 = vmatmul.bf16.gmra.mxu0 %v2071_v2  ;;  %v1556_v2 = vld [vmem:[#allocation2 + $0x2d9] ss:$2 sm:$0xff] }
 0x15e   : > { %1836 = vmatmul.bf16.gmra.mxu2 %v1735_v7  ;;  %v1558_v7 = vld [vmem:[#allocation2 + $0x2e9] ss:$2 sm:$0xff]  ;;  %v2053_v14 = vld [vmem:[#allocation2 + $0x199] ss:$2 sm:$0xff] }
 0x15f   : > { %v11078_v44 = vadd.f32 %v1473_v46, %v1342_v18  ;;  %v10266_v18 = vld [vmem:[%s13541_s1 + $0xb0] sm:$0xff]  ;;  %v1566_v54 = vpack.c.bf16 %v1558_v7, %v1556_v2  ;;  %v1887_v2 = vld [vmem:[#allocation2 + $0x1f8] ss:$2 sm:$0xff] }
 0x161   : > { %1986 = vmatmul.bf16.gmra.mxu3 %v1901_v43  ;;  %v1156_v20 = vpop.f32.mrf.mxu2  ;;  %v521_v43 = vld [vmem:[%s10768_s14 + $0x228] sm:$0xff] }
 0x162   : > { %v11086_v21 = vadd.f32 %v1156_v20, %v1003_v15  ;;  %v1004_v13 = vpop.f32.mrf.mxu1  ;;  %v1478_v22 = vpop.f32.mrf.mxu0  ;;  %v520_v15 = vld [vmem:[%s10768_s14 + $0x220] sm:$0xff]  ;;  %650 = vst [vmem:[#allocation2 + $0x370] sm:$0xff] %v521_v43 }
 0x163   : > { %v1005_v23 = vadd.f32 %v1004_v13, %v11013_v34  ;;  %v10267_v34 = vld [vmem:[%s13541_s1 + $0xb8] sm:$0xff]  ;;  %649 = vst [vmem:[#allocation2 + $0x368] sm:$0xff] %v520_v15 }
 0x164   : > { %v1306_v24 = vpop.f32.mrf.mxu3  ;;  %2686 = vmatpush.bf16.msrb.mxu3 %v10267_v34 }
 0x165   : > { %v1343_v26 = vadd.f32 %v1306_v24, %v10995_v9  ;;  %v2072_v9 = vpack.c.bf16 %v2049_v33, %v2047_v32  ;;  %v1881_v24 = vld [vmem:[#allocation2 + $0x188] ss:$2 sm:$0xff] }
 0x166   : > { %v1903_v32 = vpack.c.bf16 %v1883_v25, %v1881_v24 }
 0x167   : > { %v11093_v35 = vadd.f32 %v1476_v12, %v1343_v26  ;;  %v2051_v12 = vld [vmem:[#allocation2 + $0x189] ss:$2 sm:$0xff] }
 0x168   : > { %2687 = vmatpush.bf16.msrb.mxu3 %v10266_v18  ;;  %v10273_v18 = vld [vmem:[%s13541_s1 + $0xe8] sm:$0xff] }
 0x169   : > { %v1158_v39 = vpop.f32.mrf.mxu2  ;;  %2858 = vmatpush.bf16.msrb.mxu0 %v10273_v18  ;;  %v10291_v18 = vld [vmem:[%s13541_s1 + $0x178] sm:$0xff] }
 0x16a   : > { %v11101_v46 = vadd.f32 %v1158_v39, %v1005_v23  ;;  %v1007_v42 = vpop.f32.mrf.mxu1  ;;  %v1481_v51 = vpop.f32.mrf.mxu0  ;;  %v1737_v23 = vpack.c.bf16 %v1729_v10, %v1727_v8  ;;  %v2281_v24 = vld [vmem:[#allocation2 + $0x367] ss:$2 sm:$0xff]  ;;  %3194 = vmatpush.bf16.msrb.mxu2 %v10291_v18  ;;  %v1899_v18 = vld [vmem:[#allocation2 + $0x318] ss:$2 sm:$0xff] }
 0x16b   : > { %v1008_v52 = vadd.f32 %v1007_v42, %v11029_v48  ;;  %v2333_v42 = vld [vmem:[#allocation2 + $0x308] ss:$2 sm:$0xff] }
 0x16c   : > { %v1308_v53 = vpop.f32.mrf.mxu3 }
 0x16d   : > { %v1344_v56 = vadd.f32 %v1308_v53, %v11011_v27  ;;  %1670 = vmatmul.bf16.gmra.mxu1 %v1565_v45  ;;  %2161 = vmatmul.bf16.gmra.mxu0 %v2072_v9  ;;  %v2057_v53 = vld [vmem:[#allocation2 + $0x1f9] ss:$2 sm:$0xff] }
 0x16e   : > { %1841 = vmatmul.bf16.gmra.mxu2 %v1736_v47 }
 0x16f   : > { %v11108_v60 = vadd.f32 %v1478_v22, %v1344_v56 }
 0x171   : > { %1991 = vmatmul.bf16.gmra.mxu3 %v1902_v57  ;;  %v1161_v48 = vpop.f32.mrf.mxu2  ;;  %v10265_v57 = vld [vmem:[%s13541_s1 + $0xa8] sm:$0xff] }
 0x172   : > { %v11116_v27 = vadd.f32 %v1161_v48, %v1008_v52  ;;  %v1009_v63 = vpop.f32.mrf.mxu1  ;;  %v1483_v5 = vpop.f32.mrf.mxu0  ;;  %v2055_v52 = vld [vmem:[#allocation2 + $0x1e9] ss:$2 sm:$0xff]  ;;  %2688 = vmatpush.bf16.msrb.mxu3 %v10265_v57  ;;  %v10272_v57 = vld [vmem:[%s13541_s1 + $0xe0] sm:$0xff] }
 0x173   : > { %v1010_v0 = vadd.f32 %v1009_v63, %v11039_v6  ;;  %v522_v6 = vld [vmem:[%s10768_s14 + $0x230] sm:$0xff]  ;;  %v531_v48 = vld [vmem:[%s10768_s14 + $0x278] sm:$0xff]  ;;  %v2364_v63 = vpack.c.bf16 %v2335_v49, %v2333_v42  ;;  %v1891_v42 = vld [vmem:[#allocation2 + $0x258] ss:$2 sm:$0xff]  ;;  %2859 = vmatpush.bf16.msrb.mxu0 %v10272_v57 }
 0x174   : > { %v1311_v1 = vpop.f32.mrf.mxu3  ;;  %651 = vst [vmem:[#allocation2 + $0x378] sm:$0xff] %v522_v6 }
 0x175   : > { %v1345_v4 = vadd.f32 %v1311_v1, %v11027_v41  ;;  %v2073_v41 = vpack.c.bf16 %v2053_v14, %v2051_v12  ;;  %v1885_v1 = vld [vmem:[#allocation2 + $0x1e8] ss:$2 sm:$0xff]  ;;  %660 = vst [vmem:[#allocation2 + $0x3e0] sm:$0xff] %v531_v48 }
 0x176   : > { %v1904_v14 = vpack.c.bf16 %v1887_v2, %v1885_v1  ;;  %v10262_v1 = vld [vmem:[%s13541_s1 + $0x90] sm:$0xff] }
 0x177   : > { %v11121_v17 = vadd.f32 %v1481_v51, %v1345_v4  ;;  %v2279_v51 = vld [vmem:[#allocation2 + $0x317] ss:$2 sm:$0xff] }
 0x178   : > { %v2308_v4 = vpack.c.bf16 %v2279_v51, %v2277_v50 }
 0x179   : > { %v1163_v20 = vpop.f32.mrf.mxu2 }
 0x17a   : > { %v11129_v13 = vadd.f32 %v1163_v20, %v1010_v0  ;;  %v1012_v22 = vpop.f32.mrf.mxu1  ;;  %v1486_v26 = vpop.f32.mrf.mxu0 }
 0x17b   : > { %v1013_v29 = vadd.f32 %v1012_v22, %v11046_v16  ;;  %v10282_v16 = vld [vmem:[%s13541_s1 + $0x130] sm:$0xff]  ;;  %v2283_v25 = vld [vmem:[#allocation2 + $0x377] ss:$2 sm:$0xff] }
 0x17c   : > { %v1313_v30 = vpop.f32.mrf.mxu3  ;;  %3026 = vmatpush.bf16.msrb.mxu1 %v10282_v16 }
 0x17d   : > { %v1346_v31 = vadd.f32 %v1313_v30, %v11037_v62  ;;  %1675 = vmatmul.bf16.gmra.mxu1 %v1566_v54  ;;  %2166 = vmatmul.bf16.gmra.mxu0 %v2073_v41  ;;  %v2337_v41 = vld [vmem:[#allocation2 + $0x368] ss:$2 sm:$0xff]  ;;  %v536_v30 = vld [vmem:[%s10768_s14 + $0x2a0] sm:$0xff] }
 0x17e   : > { %1846 = vmatmul.bf16.gmra.mxu2 %v1737_v23  ;;  %v2339_v23 = vld [vmem:[#allocation2 + $0x378] ss:$2 sm:$0xff]  ;;  %665 = vst [vmem:[#allocation2 + $0x428] sm:$0xff] %v536_v30 }
 0x17f   : > { %v11133_v33 = vadd.f32 %v1483_v5, %v1346_v31 }
 0x181   : > { %1996 = vmatmul.bf16.gmra.mxu3 %v1903_v32  ;;  %v1166_v34 = vpop.f32.mrf.mxu2  ;;  %v10264_v32 = vld [vmem:[%s13541_s1 + $0xa0] sm:$0xff] }
 0x182   : > { %v11141_v38 = vadd.f32 %v1166_v34, %v1013_v29  ;;  %v1014_v62 = vpop.f32.mrf.mxu1  ;;  %v1488_v39 = vpop.f32.mrf.mxu0  ;;  %v2061_v29 = vld [vmem:[#allocation2 + $0x259] ss:$2 sm:$0xff]  ;;  %v539_v34 = vld [vmem:[%s10768_s14 + $0x2b8] sm:$0xff]  ;;  %2689 = vmatpush.bf16.msrb.mxu3 %v10264_v32 }
 0x183   : > { %v1015_v45 = vadd.f32 %v1014_v62, %v11054_v36  ;;  %v530_v36 = vld [vmem:[%s10768_s14 + $0x270] sm:$0xff]  ;;  %v2365_v62 = vpack.c.bf16 %v2339_v23, %v2337_v41  ;;  %668 = vst [vmem:[#allocation2 + $0x440] sm:$0xff] %v539_v34 }
 0x184   : > { %v1316_v9 = vpop.f32.mrf.mxu3  ;;  %659 = vst [vmem:[#allocation2 + $0x3d8] sm:$0xff] %v530_v36 }
 0x185   : > { %v1347_v47 = vadd.f32 %v1316_v9, %v11044_v11  ;;  %v2074_v11 = vpack.c.bf16 %v2057_v53, %v2055_v52  ;;  %v1889_v9 = vld [vmem:[#allocation2 + $0x248] ss:$2 sm:$0xff] }
 0x186   : > { %v1905_v53 = vpack.c.bf16 %v1891_v42, %v1889_v9  ;;  %2690 = vmatpush.bf16.msrb.mxu3 %v10263_v61  ;;  %v519_v9 = vld [vmem:[%s10768_s14 + $0x218] sm:$0xff]  ;;  %v10269_v42 = vld [vmem:[%s13541_s1 + $0xc8] sm:$0xff]  ;;  %v10268_v61 = vld [vmem:[%s13541_s1 + $0xc0] sm:$0xff] }
 0x187   : > { %v11146_v56 = vadd.f32 %v1486_v26, %v1347_v47  ;;  %v2059_v26 = vld [vmem:[#allocation2 + $0x249] ss:$2 sm:$0xff]  ;;  %v2309_v47 = vpack.c.bf16 %v2283_v25, %v2281_v24  ;;  %v1893_v24 = vld [vmem:[#allocation2 + $0x2a8] ss:$2 sm:$0xff]  ;;  %v1895_v25 = vld [vmem:[#allocation2 + $0x2b8] ss:$2 sm:$0xff] }
 0x188   : > { %648 = vst [vmem:[#allocation2 + $0x350] sm:$0xff] %v519_v9  ;;  %v2345_v57 = vld [vmem:[#allocation2 + $0x428] ss:$2 sm:$0xff]  ;;  %v560_v9 = vld [vmem:[%s10768_s14 + $0x360] sm:$0xff] }
 0x189   : > { %v1168_v58 = vpop.f32.mrf.mxu2  ;;  %689 = vst [vmem:[#allocation2 + $0x548] sm:$0xff] %v560_v9  ;;  %v2589_v9 = vld [vmem:[#allocation2 + $0x379] ss:$2 sm:$0xff] }
 0x18a   : > { %v11154_v5 = vadd.f32 %v1168_v58, %v1015_v45  ;;  %v1641_v0 = vpop.f32.mrf.mxu1  ;;  %v1491_v7 = vpop.f32.mrf.mxu0  ;;  %2691 = vmatpush.bf16.msrb.mxu3 %v10262_v1 }
 0x18b   : > { %v1681_v8 = vadd.f32 %v1641_v0, %v11064_v59  ;;  %v10281_v59 = vld [vmem:[%s13541_s1 + $0x128] sm:$0xff]  ;;  %v2341_v0 = vld [vmem:[#allocation2 + $0x3c8] ss:$2 sm:$0xff] }
 0x18c   : > { %v1318_v10 = vpop.f32.mrf.mxu3  ;;  %3027 = vmatpush.bf16.msrb.mxu1 %v10281_v59  ;;  %v545_v59 = vld [vmem:[%s10768_s14 + $0x2e8] sm:$0xff] }
 0x18d   : > { %v1348_v12 = vadd.f32 %v1318_v10, %v11051_v28  ;;  %2444 = vmatmul.bf16.vlgmr.msra.gmra.mxu1 %v2364_v63  ;;  %2171 = vmatmul.bf16.gmra.mxu0 %v2074_v11  ;;  %v2063_v10 = vld [vmem:[#allocation2 + $0x2a9] ss:$2 sm:$0xff]  ;;  %674 = vst [vmem:[#allocation2 + $0x490] sm:$0xff] %v545_v59 }
 0x18e   : > { %2541 = vmatmul.bf16.vlgmr.msra.gmra.mxu2 %v2308_v4  ;;  %v2343_v4 = vld [vmem:[#allocation2 + $0x3d8] ss:$2 sm:$0xff] }
 0x18f   : > { %v11158_v15 = vadd.f32 %v1488_v39, %v1348_v12  ;;  %v2065_v12 = vld [vmem:[#allocation2 + $0x2b9] ss:$2 sm:$0xff] }
 0x190   : > { %v2076_v41 = vpack.c.bf16 %v2065_v12, %v2063_v10 }
 0x191   : > { %2001 = vmatmul.bf16.gmra.mxu3 %v1904_v14  ;;  %v1812_v43 = vpop.f32.mrf.mxu2  ;;  %v544_v14 = vld [vmem:[%s10768_s14 + $0x2e0] sm:$0xff] }
 0x192   : > { %v11166_v6 = vadd.f32 %v1812_v43, %v1681_v8  ;;  %v1643_v28 = vpop.f32.mrf.mxu1  ;;  %v1493_v19 = vpop.f32.mrf.mxu0  ;;  %v2287_v8 = vld [vmem:[#allocation2 + $0x3d7] ss:$2 sm:$0xff]  ;;  %673 = vst [vmem:[#allocation2 + $0x488] sm:$0xff] %v544_v14  ;;  %v1897_v14 = vld [vmem:[#allocation2 + $0x308] ss:$2 sm:$0xff] }
 0x193   : > { %v1682_v20 = vadd.f32 %v1643_v28, %v11078_v44  ;;  %v538_v44 = vld [vmem:[%s10768_s14 + $0x2b0] sm:$0xff]  ;;  %v10261_v43 = vld [vmem:[%s13541_s1 + $0x88] sm:$0xff] }
 0x194   : > { %v1321_v54 = vpop.f32.mrf.mxu3  ;;  %667 = vst [vmem:[#allocation2 + $0x438] sm:$0xff] %v538_v44  ;;  %v546_v28 = vld [vmem:[%s10768_s14 + $0x2f0] sm:$0xff]  ;;  %2692 = vmatpush.bf16.msrb.mxu3 %v10261_v43 }
 0x195   : > { %v1349_v22 = vadd.f32 %v1321_v54, %v11059_v40  ;;  %v2075_v40 = vpack.c.bf16 %v2061_v29, %v2059_v26  ;;  %v2366_v54 = vpack.c.bf16 %v2343_v4, %v2341_v0  ;;  %675 = vst [vmem:[#allocation2 + $0x498] sm:$0xff] %v546_v28  ;;  %v10270_v44 = vld [vmem:[%s13541_s1 + $0xd0] sm:$0xff]  ;;  %v555_v4 = vld [vmem:[%s10768_s14 + $0x338] sm:$0xff] }
 0x196   : > { %v554_v0 = vld [vmem:[%s10768_s14 + $0x330] sm:$0xff]  ;;  %684 = vst [vmem:[#allocation2 + $0x500] sm:$0xff] %v555_v4 }
 0x197   : > { %v11171_v31 = vadd.f32 %v1491_v7, %v1349_v22  ;;  %v2285_v7 = vld [vmem:[#allocation2 + $0x3c7] ss:$2 sm:$0xff]  ;;  %683 = vst [vmem:[#allocation2 + $0x4f8] sm:$0xff] %v554_v0 }
 0x198   : > { %v2310_v26 = vpack.c.bf16 %v2287_v8, %v2285_v7  ;;  %2693 = vmatpush.bf16.msrb.mxu3 %v10260_v37 }
 0x199   : > { %v1814_v16 = vpop.f32.mrf.mxu2 }
 0x19a   : > { %v11179_v39 = vadd.f32 %v1814_v16, %v1682_v20  ;;  %v1646_v45 = vpop.f32.mrf.mxu1  ;;  %v1496_v49 = vpop.f32.mrf.mxu0  ;;  %v1906_v16 = vpack.c.bf16 %v1895_v25, %v1893_v24  ;;  %v525_v24 = vld [vmem:[%s10768_s14 + $0x248] sm:$0xff]  ;;  %v526_v25 = vld [vmem:[%s10768_s14 + $0x250] sm:$0xff] }
 0x19b   : > { %v1683_v50 = vadd.f32 %v1646_v45, %v11093_v35  ;;  %v518_v45 = vld [vmem:[%s10768_s14 + $0x210] sm:$0xff]  ;;  %654 = vst [vmem:[#allocation2 + $0x3a0] sm:$0xff] %v525_v24 }
 0x19c   : > { %v1323_v51 = vpop.f32.mrf.mxu3  ;;  %647 = vst [vmem:[#allocation2 + $0x348] sm:$0xff] %v518_v45 }
 0x19d   : > { %v1350_v52 = vadd.f32 %v1323_v51, %v11074_v3  ;;  %2449 = vmatmul.bf16.gmra.mxu1 %v2365_v62  ;;  %2176 = vmatmul.bf16.gmra.mxu0 %v2075_v40  ;;  %v10280_v3 = vld [vmem:[%s13541_s1 + $0x120] sm:$0xff]  ;;  %v517_v40 = vld [vmem:[%s10768_s14 + $0x208] sm:$0xff]  ;;  %655 = vst [vmem:[#allocation2 + $0x3a8] sm:$0xff] %v526_v25 }
 0x19e   : > { %2546 = vmatmul.bf16.gmra.mxu2 %v2309_v47  ;;  %3028 = vmatpush.bf16.msrb.mxu1 %v10280_v3  ;;  %v516_v62 = vld [vmem:[%s10768_s14 + $0x200] sm:$0xff]  ;;  %646 = vst [vmem:[#allocation2 + $0x340] sm:$0xff] %v517_v40  ;;  %v10279_v47 = vld [vmem:[%s13541_s1 + $0x118] sm:$0xff] }
 0x19f   : > { %v11183_v55 = vadd.f32 %v1493_v19, %v1350_v52  ;;  %v547_v19 = vld [vmem:[%s10768_s14 + $0x2f8] sm:$0xff]  ;;  %645 = vst [vmem:[#allocation2 + $0x338] sm:$0xff] %v516_v62  ;;  %v2347_v3 = vld [vmem:[#allocation2 + $0x438] ss:$2 sm:$0xff] }
 0x1a0   : > { %676 = vst [vmem:[#allocation2 + $0x4a0] sm:$0xff] %v547_v19  ;;  %v2367_v8 = vpack.c.bf16 %v2347_v3, %v2345_v57  ;;  %v2293_v62 = vld [vmem:[#allocation2 + $0x487] ss:$2 sm:$0xff]  ;;  %v568_v25 = vld [vmem:[%s10768_s14 + $0x3a0] sm:$0xff] }
 0x1a1   : > { %2006 = vmatmul.bf16.gmra.mxu3 %v1905_v53  ;;  %v1817_v36 = vpop.f32.mrf.mxu2  ;;  %v2583_v3 = vld [vmem:[#allocation2 + $0x309] ss:$2 sm:$0xff]  ;;  %697 = vst [vmem:[#allocation2 + $0x5a8] sm:$0xff] %v568_v25 }
 0x1a2   : > { %v11194_v35 = vadd.f32 %v1817_v36, %v1683_v50  ;;  %v1648_v48 = vpop.f32.mrf.mxu1  ;;  %v1498_v58 = vpop.f32.mrf.mxu0  ;;  %3029 = vmatpush.bf16.msrb.mxu1 %v10279_v47 }
 0x1a3   : > { %v1684_v63 = vadd.f32 %v1648_v48, %v11108_v60  ;;  %v2067_v48 = vld [vmem:[#allocation2 + $0x309] ss:$2 sm:$0xff] }
 0x1a4   : > { %v1326_v11 = vpop.f32.mrf.mxu3 }
 0x1a5   : > { %v1351_v2 = vadd.f32 %v1326_v11, %v11086_v21  ;;  %v10271_v21 = vld [vmem:[%s13541_s1 + $0xd8] sm:$0xff]  ;;  %v553_v11 = vld [vmem:[%s10768_s14 + $0x328] sm:$0xff] }
 0x1a6   : > { %2860 = vmatpush.bf16.msrb.mxu0 %v10271_v21  ;;  %682 = vst [vmem:[#allocation2 + $0x4f0] sm:$0xff] %v553_v11  ;;  %v2753_v40 = vld [vmem:[#allocation2 + $0x337] ss:$2 sm:$0xff]  ;;  %v2755_v45 = vld [vmem:[#allocation2 + $0x347] ss:$2 sm:$0xff] }
 0x1a7   : > { %v11202_v60 = vadd.f32 %v1496_v49, %v1351_v2  ;;  %v2291_v2 = vld [vmem:[#allocation2 + $0x437] ss:$2 sm:$0xff] }
 0x1a9   : > { %v1819_v20 = vpop.f32.mrf.mxu2 }
 0x1aa   : > { %v11216_v22 = vadd.f32 %v1819_v20, %v1684_v63  ;;  %v1651_v23 = vpop.f32.mrf.mxu1  ;;  %v1501_v29 = vpop.f32.mrf.mxu0  ;;  %2861 = vmatpush.bf16.msrb.mxu0 %v10270_v44  ;;  %v552_v63 = vld [vmem:[%s10768_s14 + $0x320] sm:$0xff]  ;;  %v1907_v20 = vpack.c.bf16 %v1899_v18, %v1897_v14  ;;  %v2349_v44 = vld [vmem:[#allocation2 + $0x488] ss:$2 sm:$0xff] }
 0x1ab   : > { %v1685_v30 = vadd.f32 %v1651_v23, %v11121_v17  ;;  %681 = vst [vmem:[#allocation2 + $0x4e8] sm:$0xff] %v552_v63  ;;  %v10290_v23 = vld [vmem:[%s13541_s1 + $0x170] sm:$0xff] }
 0x1ac   : > { %v1328_v32 = vpop.f32.mrf.mxu3  ;;  %3195 = vmatpush.bf16.msrb.mxu2 %v10290_v23 }
 0x1ad   : > { %v1352_v34 = vadd.f32 %v1328_v32, %v11101_v46  ;;  %2454 = vmatmul.bf16.gmra.mxu1 %v2366_v54  ;;  %2181 = vmatmul.bf16.gmra.mxu0 %v2076_v41  ;;  %v524_v54 = vld [vmem:[%s10768_s14 + $0x240] sm:$0xff] }
 0x1ae   : > { %2551 = vmatmul.bf16.gmra.mxu2 %v2310_v26  ;;  %2862 = vmatpush.bf16.msrb.mxu0 %v10269_v42  ;;  %653 = vst [vmem:[#allocation2 + $0x398] sm:$0xff] %v524_v54  ;;  %v527_v26 = vld [vmem:[%s10768_s14 + $0x258] sm:$0xff]  ;;  %v561_v42 = vld [vmem:[%s10768_s14 + $0x368] sm:$0xff] }
 0x1af   : > { %v11227_v17 = vadd.f32 %v1498_v58, %v1352_v34  ;;  %v2069_v58 = vld [vmem:[#allocation2 + $0x319] ss:$2 sm:$0xff]  ;;  %656 = vst [vmem:[#allocation2 + $0x3b0] sm:$0xff] %v527_v26 }
 0x1b0   : > { %v2077_v10 = vpack.c.bf16 %v2069_v58, %v2067_v48  ;;  %690 = vst [vmem:[#allocation2 + $0x550] sm:$0xff] %v561_v42  ;;  %v2585_v48 = vld [vmem:[#allocation2 + $0x319] ss:$2 sm:$0xff] }
 0x1b1   : > { %2011 = vmatmul.bf16.gmra.mxu3 %v1906_v16  ;;  %v1822_v46 = vpop.f32.mrf.mxu2  ;;  %v2351_v16 = vld [vmem:[#allocation2 + $0x498] ss:$2 sm:$0xff] }
 0x1b2   : > { %v11238_v49 = vadd.f32 %v1822_v46, %v1685_v30  ;;  %v1653_v50 = vpop.f32.mrf.mxu1  ;;  %v1503_v51 = vpop.f32.mrf.mxu0  ;;  %2863 = vmatpush.bf16.msrb.mxu0 %v10268_v61  ;;  %v562_v46 = vld [vmem:[%s10768_s14 + $0x370] sm:$0xff]  ;;  %v569_v26 = vld [vmem:[%s10768_s14 + $0x3a8] sm:$0xff] }
 0x1b3   : > { %v1686_v52 = vadd.f32 %v1653_v50, %v11133_v33  ;;  %v2289_v33 = vld [vmem:[#allocation2 + $0x427] ss:$2 sm:$0xff]  ;;  %v2295_v50 = vld [vmem:[#allocation2 + $0x497] ss:$2 sm:$0xff]  ;;  %691 = vst [vmem:[#allocation2 + $0x558] sm:$0xff] %v562_v46 }
 0x1b4   : > { %v1331_v53 = vpop.f32.mrf.mxu3  ;;  %v2311_v43 = vpack.c.bf16 %v2291_v2, %v2289_v33  ;;  %v2614_v33 = vpack.c.bf16 %v2585_v48, %v2583_v3  ;;  %v532_v2 = vld [vmem:[%s10768_s14 + $0x280] sm:$0xff]  ;;  %v2297_v54 = vld [vmem:[#allocation2 + $0x4e7] ss:$2 sm:$0xff]  ;;  %698 = vst [vmem:[#allocation2 + $0x5b0] sm:$0xff] %v569_v26 }
 0x1b5   : > { %v1353_v36 = vadd.f32 %v1331_v53, %v11116_v27  ;;  %v2368_v53 = vpack.c.bf16 %v2351_v16, %v2349_v44  ;;  %661 = vst [vmem:[#allocation2 + $0x3f8] sm:$0xff] %v532_v2  ;;  %v2757_v23 = vld [vmem:[#allocation2 + $0x397] ss:$2 sm:$0xff]  ;;  %v542_v48 = vld [vmem:[%s10768_s14 + $0x2d0] sm:$0xff] }
 0x1b6   : > { %v2759_v24 = vld [vmem:[#allocation2 + $0x3a7] ss:$2 sm:$0xff]  ;;  %671 = vst [vmem:[#allocation2 + $0x468] sm:$0xff] %v542_v48 }
 0x1b7   : > { %v11248_v1 = vadd.f32 %v1501_v29, %v1353_v36  ;;  %v2312_v36 = vpack.c.bf16 %v2295_v50, %v2293_v62  ;;  %v541_v3 = vld [vmem:[%s10768_s14 + $0x2c8] sm:$0xff] }
 0x1b8   : > { %670 = vst [vmem:[#allocation2 + $0x460] sm:$0xff] %v541_v3 }
 0x1b9   : > { %v1824_v7 = vpop.f32.mrf.mxu2 }
 0x1ba   : > { %v11251_v27 = vadd.f32 %v1824_v7, %v1686_v52  ;;  %v1656_v12 = vpop.f32.mrf.mxu1  ;;  %v1506_v21 = vpop.f32.mrf.mxu0  ;;  %v10289_v7 = vld [vmem:[%s13541_s1 + $0x168] sm:$0xff] }
 0x1bb   : > { %v1687_v59 = vadd.f32 %v1656_v12, %v11146_v56  ;;  %v535_v12 = vld [vmem:[%s10768_s14 + $0x298] sm:$0xff]  ;;  %3196 = vmatpush.bf16.msrb.mxu2 %v10289_v7 }
 0x1bc   : > { %v1333_v28 = vpop.f32.mrf.mxu3  ;;  %664 = vst [vmem:[#allocation2 + $0x410] sm:$0xff] %v535_v12 }
 0x1bd   : > { %v1354_v19 = vadd.f32 %v1333_v28, %v11129_v13  ;;  %2459 = vmatmul.bf16.gmra.mxu1 %v2367_v8  ;;  %2186 = vmatmul.bf16.gmra.mxu0 %v2077_v10  ;;  %v533_v8 = vld [vmem:[%s10768_s14 + $0x288] sm:$0xff]  ;;  %v534_v10 = vld [vmem:[%s10768_s14 + $0x290] sm:$0xff] }
 0x1be   : > { %2556 = vmatmul.bf16.gmra.mxu2 %v2311_v43  ;;  %662 = vst [vmem:[#allocation2 + $0x400] sm:$0xff] %v533_v8  ;;  %v2353_v28 = vld [vmem:[#allocation2 + $0x4e8] ss:$2 sm:$0xff] }
 0x1bf   : > { %v11256_v41 = vadd.f32 %v1503_v51, %v1354_v19  ;;  %v10278_v51 = vld [vmem:[%s13541_s1 + $0x110] sm:$0xff]  ;;  %663 = vst [vmem:[#allocation2 + $0x408] sm:$0xff] %v534_v10 }
 0x1c0   : > { %3030 = vmatpush.bf16.msrb.mxu1 %v10278_v51  ;;  %v10286_v10 = vld [vmem:[%s13541_s1 + $0x150] sm:$0xff] }
 0x1c1   : > { %2016 = vmatmul.bf16.gmra.mxu3 %v1907_v20  ;;  %v1827_v56 = vpop.f32.mrf.mxu2  ;;  %v2355_v20 = vld [vmem:[#allocation2 + $0x4f8] ss:$2 sm:$0xff] }
 0x1c2   : > { %v11264_v13 = vadd.f32 %v1827_v56, %v1687_v59  ;;  %v1658_v29 = vpop.f32.mrf.mxu1  ;;  %v1508_v30 = vpop.f32.mrf.mxu0  ;;  %v11296_v59 = vld [vmem:[%s13542_s2] ss:$0 sm:$0xff]  ;;  %v570_v56 = vld [vmem:[%s10768_s14 + $0x3b0] sm:$0xff] }
 0x1c3   : > { %v1688_v32 = vadd.f32 %v1658_v29, %v11158_v15  ;;  %v563_v15 = vld [vmem:[%s10768_s14 + $0x378] sm:$0xff]  ;;  %699 = vst [vmem:[#allocation2 + $0x5b8] sm:$0xff] %v570_v56 }
 0x1c4   : > { %v1336_v37 = vpop.f32.mrf.mxu3  ;;  %692 = vst [vmem:[#allocation2 + $0x560] sm:$0xff] %v563_v15  ;;  %v10288_v15 = vld [vmem:[%s13541_s1 + $0x160] sm:$0xff] }
 0x1c5   : > { %v1355_v34 = vadd.f32 %v1336_v37, %v11141_v38  ;;  %v2784_v38 = vpack.c.bf16 %v2755_v45, %v2753_v40  ;;  %v2587_v45 = vld [vmem:[#allocation2 + $0x369] ss:$2 sm:$0xff]  ;;  %3197 = vmatpush.bf16.msrb.mxu2 %v10288_v15 }
 0x1c6   : > { %v550_v15 = vld [vmem:[%s10768_s14 + $0x310] sm:$0xff] }
 0x1c7   : > { %v11271_v47 = vadd.f32 %v1506_v21, %v1355_v34  ;;  %v2785_v34 = vpack.c.bf16 %v2759_v24, %v2757_v23  ;;  %679 = vst [vmem:[#allocation2 + $0x4c8] sm:$0xff] %v550_v15 }
 0x1c9   : > { %v1829_v52 = vpop.f32.mrf.mxu2 }
 0x1ca   : > { %v11277_v57 = vadd.f32 %v1829_v52, %v1688_v32  ;;  %v1661_v61 = vpop.f32.mrf.mxu1  ;;  %v2152_v58 = vpop.f32.mrf.mxu0  ;;  %v571_v32 = vld [vmem:[%s10768_s14 + $0x3b8] sm:$0xff] }
 0x1cb   : > { %v1689_v63 = vadd.f32 %v1661_v61, %v11171_v31  ;;  %700 = vst [vmem:[#allocation2 + $0x5c0] sm:$0xff] %v571_v32  ;;  %v540_v61 = vld [vmem:[%s10768_s14 + $0x2c0] sm:$0xff] }
 0x1cc   : > { %v1338_v11 = vpop.f32.mrf.mxu3  ;;  %669 = vst [vmem:[#allocation2 + $0x458] sm:$0xff] %v540_v61 }
 0x1cd   : > { %v1356_v0 = vadd.f32 %v1338_v11, %v11154_v5  ;;  %2464 = vmatmul.bf16.gmra.mxu1 %v2368_v53  ;;  %2864 = vmatmul.bf16.vlgmr.msrb.gmra.mxu0 %v2784_v38  ;;  %v2615_v38 = vpack.c.bf16 %v2589_v9, %v2587_v45 }
 0x1ce   : > { %2561 = vmatmul.bf16.gmra.mxu2 %v2312_v36 }
 0x1cf   : > { %v11282_v4 = vadd.f32 %v1508_v30, %v1356_v0  ;;  %v10277_v30 = vld [vmem:[%s13541_s1 + $0x108] sm:$0xff] }
 0x1d0   : > { %3031 = vmatpush.bf16.msrb.mxu1 %v10277_v30  ;;  %v2593_v30 = vld [vmem:[#allocation2 + $0x3d9] ss:$2 sm:$0xff] }
 0x1d1   : > { %2694 = vmatmul.bf16.vlgmr.msrb.gmra.mxu3 %v2614_v33  ;;  %v1832_v31 = vpop.f32.mrf.mxu2 }
 0x1d2   : > { %v11290_v5 = vadd.f32 %v1832_v31, %v1689_v63  ;;  %v1663_v14 = vpop.f32.mrf.mxu1  ;;  %v2154_v18 = vpop.f32.mrf.mxu0 }
 0x1d3   : > { %v1690_v43 = vadd.f32 %v1663_v14, %v11183_v55  ;;  %v2299_v55 = vld [vmem:[#allocation2 + $0x4f7] ss:$2 sm:$0xff]  ;;  %v2357_v14 = vld [vmem:[#allocation2 + $0x548] ss:$2 sm:$0xff] }
 0x1d4   : > { %v1982_v21 = vpop.f32.mrf.mxu3  ;;  %v2313_v40 = vpack.c.bf16 %v2299_v55, %v2297_v54  ;;  %v10285_v54 = vld [vmem:[%s13541_s1 + $0x148] sm:$0xff]  ;;  %v2591_v55 = vld [vmem:[#allocation2 + $0x3c9] ss:$2 sm:$0xff] }
 0x1d5   : > { %v2022_v19 = vadd.f32 %v1982_v21, %v11166_v6  ;;  %v2369_v6 = vpack.c.bf16 %v2355_v20, %v2353_v28  ;;  %v2763_v21 = vld [vmem:[#allocation2 + $0x407] ss:$2 sm:$0xff]  ;;  %v2303_v20 = vld [vmem:[#allocation2 + $0x557] ss:$2 sm:$0xff]  ;;  %v2616_v45 = vpack.c.bf16 %v2593_v30, %v2591_v55 }
 0x1d6   : > { %v557_v55 = vld [vmem:[%s10768_s14 + $0x348] sm:$0xff] }
 0x1d7   : > { %v2192_v29 = vadd.f32 %v2152_v58, %v2022_v19  ;;  %v543_v58 = vld [vmem:[%s10768_s14 + $0x2d8] sm:$0xff]  ;;  %686 = vst [vmem:[#allocation2 + $0x520] sm:$0xff] %v557_v55 }
 0x1d8   : > { %672 = vst [vmem:[#allocation2 + $0x470] sm:$0xff] %v543_v58  ;;  %v2301_v19 = vld [vmem:[#allocation2 + $0x547] ss:$2 sm:$0xff]  ;;  %v2361_v58 = vld [vmem:[#allocation2 + $0x5a8] ss:$2 sm:$0xff] }
 0x1d9   : > { %v2211_v37 = vadd.f32 %v11296_v59, %v2192_v29  ;;  %v1834_v44 = vpop.f32.mrf.mxu2  ;;  %v2314_v29 = vpack.c.bf16 %v2303_v20, %v2301_v19 }
 0x1da   : > { %v11307_v16 = vadd.f32 %v1834_v44, %v1690_v43  ;;  %v1666_v62 = vpop.f32.mrf.mxu1  ;;  %v2157_v42 = vpop.f32.mrf.mxu0  ;;  %v2761_v43 = vld [vmem:[#allocation2 + $0x3f7] ss:$2 sm:$0xff] }
 0x1db   : > { %v2227_v46 = vmax.f32 %v2211_v37, 0.0  ;;  %v1691_v50 = vadd.f32 %v1666_v62, %v11202_v60  ;;  %v10287_v60 = vld [vmem:[%s13541_s1 + $0x158] sm:$0xff]  ;;  %v2786_v25 = vpack.c.bf16 %v2763_v21, %v2761_v43 }
 0x1dc   : > { %v1984_v51 = vpop.f32.mrf.mxu3  ;;  %3198 = vmatpush.bf16.msrb.mxu2 %v10287_v60  ;;  %v2595_v21 = vld [vmem:[#allocation2 + $0x429] ss:$2 sm:$0xff] }
 0x1dd   : > { %v2243_v52 = vmin.f32 %v2227_v46, 6.0  ;;  %v2023_v53 = vadd.f32 %v1984_v51, %v11179_v39  ;;  %2469 = vmatmul.bf16.gmra.mxu1 %v2369_v6  ;;  %2869 = vmatmul.bf16.gmra.mxu0 %v2785_v34  ;;  %v10284_v34 = vld [vmem:[%s13541_s1 + $0x140] sm:$0xff]  ;;  %v549_v46 = vld [vmem:[%s10768_s14 + $0x308] sm:$0xff] }
 0x1de   : > { %2566 = vmatmul.bf16.gmra.mxu2 %v2313_v40  ;;  %678 = vst [vmem:[#allocation2 + $0x4c0] sm:$0xff] %v549_v46  ;;  %v3091_v46 = vld [vmem:[#allocation2 + $0x339] ss:$2 sm:$0xff] }
 0x1df   : > { %3865 = vst [vmem:[#allocation5 + $0x28] sm:$0xff] %v2243_v52  ;;  %v2193_v36 = vadd.f32 %v2154_v18, %v2023_v53  ;;  %v2359_v18 = vld [vmem:[#allocation2 + $0x558] ss:$2 sm:$0xff]  ;;  %v551_v52 = vld [vmem:[%s10768_s14 + $0x318] sm:$0xff] }
 0x1e0   : > { %3199 = vmatpush.bf16.msrb.mxu2 %v10286_v10  ;;  %v2370_v24 = vpack.c.bf16 %v2359_v18, %v2357_v14  ;;  %680 = vst [vmem:[#allocation2 + $0x4d0] sm:$0xff] %v551_v52  ;;  %v3093_v52 = vld [vmem:[#allocation2 + $0x349] ss:$2 sm:$0xff] }
 0x1e1   : > { %v2212_v63 = vadd.f32 %v11296_v59, %v2193_v36  ;;  %2699 = vmatmul.bf16.gmra.mxu3 %v2615_v38  ;;  %v1837_v39 = vpop.f32.mrf.mxu2 }
 0x1e2   : > { %v11322_v11 = vadd.f32 %v1837_v39, %v1691_v50  ;;  %v1668_v0 = vpop.f32.mrf.mxu1  ;;  %v2159_v33 = vpop.f32.mrf.mxu0  ;;  %v2363_v39 = vld [vmem:[#allocation2 + $0x5b8] ss:$2 sm:$0xff] }
 0x1e3   : > { %v2228_v2 = vmax.f32 %v2212_v63, 0.0  ;;  %v1692_v7 = vadd.f32 %v1668_v0, %v11227_v17  ;;  %v10276_v17 = vld [vmem:[%s13541_s1 + $0x100] sm:$0xff]  ;;  %v2305_v63 = vld [vmem:[#allocation2 + $0x5a7] ss:$2 sm:$0xff] }
 0x1e4   : > { %v1987_v8 = vpop.f32.mrf.mxu3  ;;  %3032 = vmatpush.bf16.msrb.mxu1 %v10276_v17  ;;  %3200 = vmatpush.bf16.msrb.mxu2 %v10285_v54  ;;  %v2765_v0 = vld [vmem:[#allocation2 + $0x457] ss:$2 sm:$0xff] }
 0x1e5   : > { %v2244_v12 = vmin.f32 %v2228_v2, 6.0  ;;  %v2024_v31 = vadd.f32 %v1987_v8, %v11194_v35  ;;  %v10307_v8 = vld [vmem:[%s13541_s1 + $0x1f8] sm:$0xff] }
 0x1e6   : > { %3533 = vmatpush.bf16.msra.mxu0 %v10307_v8 }
 0x1e7   : > { %3866 = vst [vmem:[#allocation5 + $0x30] sm:$0xff] %v2244_v12  ;;  %v2194_v28 = vadd.f32 %v2157_v42, %v2024_v31  ;;  %v548_v42 = vld [vmem:[%s10768_s14 + $0x300] sm:$0xff] }
 0x1e8   : > { %3201 = vmatpush.bf16.msrb.mxu2 %v10284_v34  ;;  %677 = vst [vmem:[#allocation2 + $0x4b8] sm:$0xff] %v548_v42  ;;  %v2924_v42 = vld [vmem:[#allocation2 + $0x348] ss:$2 sm:$0xff] }
 0x1e9   : > { %v2213_v23 = vadd.f32 %v11296_v59, %v2194_v28  ;;  %v1839_v35 = vpop.f32.mrf.mxu2  ;;  %v2597_v28 = vld [vmem:[#allocation2 + $0x439] ss:$2 sm:$0xff] }
 0x1ea   : > { %v11336_v26 = vadd.f32 %v1839_v35, %v1692_v7  ;;  %v1671_v56 = vpop.f32.mrf.mxu1  ;;  %v2162_v32 = vpop.f32.mrf.mxu0  ;;  %v2307_v7 = vld [vmem:[#allocation2 + $0x5b7] ss:$2 sm:$0xff] }
 0x1eb   : > { %v2229_v37 = vmax.f32 %v2213_v23, 0.0  ;;  %v1693_v44 = vadd.f32 %v1671_v56, %v11248_v1  ;;  %v10299_v1 = vld [vmem:[%s13541_s1 + $0x1b8] sm:$0xff]  ;;  %v2315_v43 = vpack.c.bf16 %v2307_v7, %v2305_v63  ;;  %v10298_v56 = vld [vmem:[%s13541_s1 + $0x1b0] sm:$0xff]  ;;  %v3122_v63 = vpack.c.bf16 %v3093_v52, %v3091_v46 }
 0x1ec   : > { %v1989_v6 = vpop.f32.mrf.mxu3  ;;  %3364 = vmatpush.bf16.msra.mxu3 %v10299_v1  ;;  %v2922_v1 = vld [vmem:[#allocation2 + $0x338] ss:$2 sm:$0xff] }
 0x1ed   : > { %v2245_v62 = vmin.f32 %v2229_v37, 6.0  ;;  %v2025_v40 = vadd.f32 %v1989_v6, %v11216_v22  ;;  %2474 = vmatmul.bf16.gmra.mxu1 %v2370_v24  ;;  %2874 = vmatmul.bf16.gmra.mxu0 %v2786_v25  ;;  %v2617_v24 = vpack.c.bf16 %v2597_v28, %v2595_v21  ;;  %v559_v37 = vld [vmem:[%s10768_s14 + $0x358] sm:$0xff] }
 0x1ee   : > { %2571 = vmatmul.bf16.gmra.mxu2 %v2314_v29  ;;  %v556_v29 = vld [vmem:[%s10768_s14 + $0x340] sm:$0xff]  ;;  %688 = vst [vmem:[#allocation2 + $0x530] sm:$0xff] %v559_v37  ;;  %v567_v21 = vld [vmem:[%s10768_s14 + $0x398] sm:$0xff] }
 0x1ef   : > { %3867 = vst [vmem:[#allocation5 + $0x48] sm:$0xff] %v2245_v62  ;;  %v2195_v9 = vadd.f32 %v2159_v33, %v2025_v40  ;;  %v2767_v33 = vld [vmem:[#allocation2 + $0x467] ss:$2 sm:$0xff] }
 0x1f0   : > { %v2787_v31 = vpack.c.bf16 %v2767_v33, %v2765_v0  ;;  %685 = vst [vmem:[#allocation2 + $0x518] sm:$0xff] %v556_v29  ;;  %3365 = vmatpush.bf16.msra.mxu3 %v10298_v56 }
 0x1f1   : > { %v2214_v50 = vadd.f32 %v11296_v59, %v2195_v9  ;;  %2704 = vmatmul.bf16.gmra.mxu3 %v2616_v45  ;;  %v1842_v51 = vpop.f32.mrf.mxu2  ;;  %696 = vst [vmem:[#allocation2 + $0x590] sm:$0xff] %v567_v21  ;;  %v10312_v21 = vld [vmem:[%s13541_s1 + $0x220] sm:$0xff] }
 0x1f2   : > { %v11351_v22 = vadd.f32 %v1842_v51, %v1693_v44  ;;  %v1673_v53 = vpop.f32.mrf.mxu1  ;;  %v2164_v38 = vpop.f32.mrf.mxu0  ;;  %v2771_v51 = vld [vmem:[#allocation2 + $0x4c7] ss:$2 sm:$0xff] }
 0x1f3   : > { %v2230_v61 = vmax.f32 %v2214_v50, 0.0  ;;  %v1694_v36 = vadd.f32 %v1673_v53, %v11256_v41  ;;  %v10315_v41 = vld [vmem:[%s13541_s1 + $0x238] sm:$0xff]  ;;  %v10306_v53 = vld [vmem:[%s13541_s1 + $0x1f0] sm:$0xff] }
 0x1f4   : > { %v1992_v3 = vpop.f32.mrf.mxu3  ;;  %3702 = vmatpush.bf16.msra.mxu1 %v10315_v41  ;;  %v2769_v50 = vld [vmem:[#allocation2 + $0x4b7] ss:$2 sm:$0xff]  ;;  %3534 = vmatpush.bf16.msra.mxu0 %v10306_v53 }
 0x1f5   : > { %v2246_v60 = vmin.f32 %v2230_v61, 6.0  ;;  %v2026_v48 = vadd.f32 %v1992_v3, %v11238_v49  ;;  %v2371_v49 = vpack.c.bf16 %v2363_v39, %v2361_v58  ;;  %v2601_v58 = vld [vmem:[#allocation2 + $0x499] ss:$2 sm:$0xff] }
 0x1f7   : > { %3868 = vst [vmem:[#allocation5 + $0x50] sm:$0xff] %v2246_v60  ;;  %v2196_v2 = vadd.f32 %v2162_v32, %v2026_v48  ;;  %v558_v32 = vld [vmem:[%s10768_s14 + $0x350] sm:$0xff]  ;;  %v2773_v56 = vld [vmem:[#allocation2 + $0x517] ss:$2 sm:$0xff] }
 0x1f8   : > { %687 = vst [vmem:[#allocation2 + $0x528] sm:$0xff] %v558_v32  ;;  %v2599_v48 = vld [vmem:[#allocation2 + $0x489] ss:$2 sm:$0xff]  ;;  %v10313_v32 = vld [vmem:[%s13541_s1 + $0x228] sm:$0xff] }
 0x1f9   : > { %v2215_v10 = vadd.f32 %v11296_v59, %v2196_v2  ;;  %v1844_v12 = vpop.f32.mrf.mxu2  ;;  %v2618_v8 = vpack.c.bf16 %v2601_v58, %v2599_v48 }
 0x1fa   : > { %v11362_v14 = vadd.f32 %v1844_v12, %v1694_v36  ;;  %v1676_v18 = vpop.f32.mrf.mxu1  ;;  %v2167_v19 = vpop.f32.mrf.mxu0  ;;  %v2788_v36 = vpack.c.bf16 %v2771_v51, %v2769_v50  ;;  %v564_v12 = vld [vmem:[%s10768_s14 + $0x380] sm:$0xff] }
 0x1fb   : > { %v2231_v20 = vmax.f32 %v2215_v10, 0.0  ;;  %v1695_v17 = vadd.f32 %v1676_v18, %v11271_v47  ;;  %v10297_v10 = vld [vmem:[%s13541_s1 + $0x1a8] sm:$0xff]  ;;  %693 = vst [vmem:[#allocation2 + $0x578] sm:$0xff] %v564_v12  ;;  %v10296_v50 = vld [vmem:[%s13541_s1 + $0x1a0] sm:$0xff] }
 0x1fc   : > { %v1994_v54 = vpop.f32.mrf.mxu3  ;;  %3366 = vmatpush.bf16.msra.mxu3 %v10297_v10  ;;  %v2932_v10 = vld [vmem:[#allocation2 + $0x408] ss:$2 sm:$0xff] }
 0x1fd   : > { %v2247_v23 = vmin.f32 %v2231_v20, 6.0  ;;  %v2027_v35 = vadd.f32 %v1994_v54, %v11251_v27  ;;  %2479 = vmatmul.bf16.gmra.mxu1 %v2371_v49  ;;  %2879 = vmatmul.bf16.gmra.mxu0 %v2787_v31  ;;  %v565_v49 = vld [vmem:[%s10768_s14 + $0x388] sm:$0xff] }
 0x1fe   : > { %2576 = vmatmul.bf16.gmra.mxu2 %v2315_v43  ;;  %v566_v43 = vld [vmem:[%s10768_s14 + $0x390] sm:$0xff]  ;;  %694 = vst [vmem:[#allocation2 + $0x580] sm:$0xff] %v565_v49 }
 0x1ff   : > { %3869 = vst [vmem:[#allocation5 + $0x68] sm:$0xff] %v2247_v23  ;;  %v2197_v25 = vadd.f32 %v2164_v38, %v2027_v35  ;;  %v2926_v35 = vld [vmem:[#allocation2 + $0x398] ss:$2 sm:$0xff]  ;;  %v2775_v29 = vld [vmem:[#allocation2 + $0x527] ss:$2 sm:$0xff] }
 0x200   : > { %695 = vst [vmem:[#allocation2 + $0x588] sm:$0xff] %v566_v43  ;;  %3367 = vmatpush.bf16.msra.mxu3 %v10296_v50  ;;  %v3101_v43 = vld [vmem:[#allocation2 + $0x409] ss:$2 sm:$0xff] }
 0x201   : > { %v2216_v47 = vadd.f32 %v11296_v59, %v2197_v25  ;;  %2709 = vmatmul.bf16.gmra.mxu3 %v2617_v24  ;;  %v1847_v30 = vpop.f32.mrf.mxu2  ;;  %v2928_v24 = vld [vmem:[#allocation2 + $0x3a8] ss:$2 sm:$0xff]  ;;  %v3095_v25 = vld [vmem:[#allocation2 + $0x399] ss:$2 sm:$0xff] }
 0x202   : > { %v11374_v27 = vadd.f32 %v1847_v30, %v1695_v17  ;;  %v1678_v44 = vpop.f32.mrf.mxu1  ;;  %v2169_v6 = vpop.f32.mrf.mxu0  ;;  %v10305_v30 = vld [vmem:[%s13541_s1 + $0x1e8] sm:$0xff] }
 0x203   : > { %v2232_v34 = vmax.f32 %v2216_v47, 0.0  ;;  %v1696_v62 = vadd.f32 %v1678_v44, %v11282_v4  ;;  %v10314_v4 = vld [vmem:[%s13541_s1 + $0x230] sm:$0xff]  ;;  %3535 = vmatpush.bf16.msra.mxu0 %v10305_v30  ;;  %v10292_v30 = vld [vmem:[%s13541_s1 + $0x180] sm:$0xff] }
 0x204   : > { %v1997_v40 = vpop.f32.mrf.mxu3  ;;  %3703 = vmatpush.bf16.msra.mxu1 %v10314_v4  ;;  %v3097_v47 = vld [vmem:[#allocation2 + $0x3a9] ss:$2 sm:$0xff]  ;;  %v572_v4 = vld [vmem:[%s10768_s14 + $0x3c0] sm:$0xff] }
 0x205   : > { %v2248_v45 = vmin.f32 %v2232_v34, 6.0  ;;  %v2028_v9 = vadd.f32 %v1997_v40, %v11264_v13  ;;  %v2953_v13 = vpack.c.bf16 %v2924_v42, %v2922_v1  ;;  %v2603_v40 = vld [vmem:[#allocation2 + $0x4e9] ss:$2 sm:$0xff]  ;;  %701 = vst [vmem:[#allocation2 + $0x5d8] sm:$0xff] %v572_v4  ;;  %v2936_v4 = vld [vmem:[#allocation2 + $0x468] ss:$2 sm:$0xff] }
 0x206   : > { %v2777_v12 = vld [vmem:[#allocation2 + $0x577] ss:$2 sm:$0xff] }
 0x207   : > { %3870 = vst [vmem:[#allocation5 + $0x70] sm:$0xff] %v2248_v45  ;;  %v2198_v15 = vadd.f32 %v2167_v19, %v2028_v9  ;;  %v2605_v45 = vld [vmem:[#allocation2 + $0x4f9] ss:$2 sm:$0xff]  ;;  %v3123_v9 = vpack.c.bf16 %v3097_v47, %v3095_v25 }
 0x208   : > { %3704 = vmatpush.bf16.msra.mxu1 %v10313_v32  ;;  %v2619_v52 = vpack.c.bf16 %v2605_v45, %v2603_v40  ;;  %v2779_v49 = vld [vmem:[#allocation2 + $0x587] ss:$2 sm:$0xff] }
 0x209   : > { %v2217_v38 = vadd.f32 %v11296_v59, %v2198_v15  ;;  %v1849_v61 = vpop.f32.mrf.mxu2  ;;  %v2609_v25 = vld [vmem:[#allocation2 + $0x559] ss:$2 sm:$0xff]  ;;  %v10302_v32 = vld [vmem:[%s13541_s1 + $0x1d0] sm:$0xff] }
 0x20a   : > { %v11385_v3 = vadd.f32 %v1849_v61, %v1696_v62  ;;  %v2445_v60 = vpop.f32.mrf.mxu1  ;;  %v2172_v39 = vpop.f32.mrf.mxu0  ;;  %v573_v61 = vld [vmem:[%s10768_s14 + $0x3c8] sm:$0xff] }
 0x20b   : > { %v2233_v0 = vmax.f32 %v2217_v38, 0.0  ;;  %v10295_v38 = vld [vmem:[%s13541_s1 + $0x198] sm:$0xff]  ;;  %702 = vst [vmem:[#allocation2 + $0x5e0] sm:$0xff] %v573_v61  ;;  %v10301_v40 = vld [vmem:[%s13541_s1 + $0x1c8] sm:$0xff] }
 0x20c   : > { %v1999_v33 = vpop.f32.mrf.mxu3  ;;  %3368 = vmatpush.bf16.msra.mxu3 %v10295_v38  ;;  %3705 = vmatpush.bf16.msra.mxu1 %v10312_v21  ;;  %v3103_v38 = vld [vmem:[#allocation2 + $0x459] ss:$2 sm:$0xff] }
 0x20d   : > { %v2249_v2 = vmin.f32 %v2233_v0, 6.0  ;;  %v2029_v7 = vadd.f32 %v1999_v33, %v11277_v57  ;;  %3033 = vmatmul.bf16.vlgmr.msrb.gmra.mxu1 %v2953_v13  ;;  %2884 = vmatmul.bf16.gmra.mxu0 %v2788_v36  ;;  %v10304_v33 = vld [vmem:[%s13541_s1 + $0x1e0] sm:$0xff] }
 0x20e   : > { %3202 = vmatmul.bf16.vlgmr.msrb.gmra.mxu2 %v3122_v63  ;;  %3536 = vmatpush.bf16.msra.mxu0 %v10304_v33 }
 0x20f   : > { %3871 = vst [vmem:[#allocation5 + $0x88] sm:$0xff] %v2249_v2  ;;  %v2199_v41 = vadd.f32 %v2169_v6, %v2029_v7  ;;  %v2789_v6 = vpack.c.bf16 %v2775_v29, %v2773_v56  ;;  %v10294_v2 = vld [vmem:[%s13541_s1 + $0x190] sm:$0xff] }
 0x210   : > { %3369 = vmatpush.bf16.msra.mxu3 %v10294_v2 }
 0x211   : > { %v2218_v31 = vadd.f32 %v11296_v59, %v2199_v41  ;;  %2714 = vmatmul.bf16.gmra.mxu3 %v2618_v8  ;;  %v2542_v18 = vpop.f32.mrf.mxu2  ;;  %v2930_v41 = vld [vmem:[#allocation2 + $0x3f8] ss:$2 sm:$0xff] }
 0x212   : > { %v11396_v57 = vadd.f32 %v2542_v18, %v2445_v60  ;;  %v2447_v28 = vpop.f32.mrf.mxu1  ;;  %v2174_v19 = vpop.f32.mrf.mxu0  ;;  %v575_v60 = vld [vmem:[%s10768_s14 + $0x3d8] sm:$0xff]  ;;  %v3099_v18 = vld [vmem:[#allocation2 + $0x3f9] ss:$2 sm:$0xff] }
 0x213   : > { %v2234_v20 = vmax.f32 %v2218_v31, 0.0  ;;  %704 = vst [vmem:[#allocation2 + $0x5f0] sm:$0xff] %v575_v60  ;;  %v3124_v56 = vpack.c.bf16 %v3101_v43, %v3099_v18  ;;  %v2781_v61 = vld [vmem:[#allocation2 + $0x5d7] ss:$2 sm:$0xff] }
 0x214   : > { %v2002_v17 = vpop.f32.mrf.mxu3  ;;  %v10311_v60 = vld [vmem:[%s13541_s1 + $0x218] sm:$0xff] }
 0x215   : > { %v2250_v54 = vmin.f32 %v2234_v20, 6.0  ;;  %v2030_v23 = vadd.f32 %v2002_v17, %v11290_v5  ;;  %v2954_v5 = vpack.c.bf16 %v2928_v24, %v2926_v35  ;;  %v2955_v17 = vpack.c.bf16 %v2932_v10, %v2930_v41  ;;  %v2607_v24 = vld [vmem:[#allocation2 + $0x549] ss:$2 sm:$0xff]  ;;  %3706 = vmatpush.bf16.msra.mxu1 %v10311_v60 }
 0x217   : > { %3872 = vst [vmem:[#allocation5 + $0x90] sm:$0xff] %v2250_v54  ;;  %v2200_v55 = vadd.f32 %v2172_v39, %v2030_v23  ;;  %v2790_v54 = vpack.c.bf16 %v2779_v49, %v2777_v12 }
 0x219   : > { %v2219_v37 = vadd.f32 %v11296_v59, %v2200_v55  ;;  %v2544_v44 = vpop.f32.mrf.mxu2 }
 0x21a   : > { %v11406_v34 = vadd.f32 %v2544_v44, %v2447_v28  ;;  %v2450_v62 = vpop.f32.mrf.mxu1  ;;  %v2177_v1 = vpop.f32.mrf.mxu0  ;;  %v10293_v28 = vld [vmem:[%s13541_s1 + $0x188] sm:$0xff] }
 0x21b   : > { %v2235_v42 = vmax.f32 %v2219_v37, 0.0  ;;  %3370 = vmatpush.bf16.msra.mxu3 %v10293_v28 }
 0x21c   : > { %v2004_v46 = vpop.f32.mrf.mxu3 }
 0x21d   : > { %v2251_v51 = vmin.f32 %v2235_v42, 6.0  ;;  %v2031_v15 = vadd.f32 %v2004_v46, %v11307_v16  ;;  %3038 = vmatmul.bf16.gmra.mxu1 %v2954_v5  ;;  %2889 = vmatmul.bf16.gmra.mxu0 %v2789_v6  ;;  %v574_v16 = vld [vmem:[%s10768_s14 + $0x3d0] sm:$0xff]  ;;  %v2620_v5 = vpack.c.bf16 %v2609_v25, %v2607_v24 }
 0x21e   : > { %3207 = vmatmul.bf16.gmra.mxu2 %v3123_v9  ;;  %703 = vst [vmem:[#allocation2 + $0x5e8] sm:$0xff] %v574_v16  ;;  %v3105_v16 = vld [vmem:[#allocation2 + $0x469] ss:$2 sm:$0xff] }
 0x21f   : > { %3873 = vst [vmem:[#allocation5 + $0xa8] sm:$0xff] %v2251_v51  ;;  %v2201_v53 = vadd.f32 %v2174_v19, %v2031_v15  ;;  %3371 = vmatpush.bf16.msra.mxu3 %v10292_v30  ;;  %v10300_v51 = vld [vmem:[%s13541_s1 + $0x1c0] sm:$0xff]  ;;  %v3125_v41 = vpack.c.bf16 %v3105_v16, %v3103_v38 }
 0x221   : > { %v2220_v13 = vadd.f32 %v11296_v59, %v2201_v53  ;;  %2719 = vmatmul.bf16.gmra.mxu3 %v2619_v52  ;;  %v2547_v36 = vpop.f32.mrf.mxu2  ;;  %v2934_v53 = vld [vmem:[#allocation2 + $0x458] ss:$2 sm:$0xff] }
 0x222   : > { %v11420_v48 = vadd.f32 %v2547_v36, %v2450_v62  ;;  %v2452_v58 = vpop.f32.mrf.mxu1  ;;  %v2179_v63 = vpop.f32.mrf.mxu0  ;;  %v10323_v62 = vld [vmem:[%s13543_s3 + $0x38] sm:$0xff] }
 0x223   : > { %v2236_v39 = vmax.f32 %v2220_v13, 0.0  ;;  %4469 = vmatpush.bf16.msra.mxu2 %v10323_v62  ;;  %5057 = vmatpush.bf16.msrb.mxu3 %v10323_v62 }
 0x224   : > { %v2007_v0 = vpop.f32.mrf.mxu3 }
 0x225   : > { %v2252_v7 = vmin.f32 %v2236_v39, 6.0  ;;  %v2032_v8 = vadd.f32 %v2007_v0, %v11322_v11  ;;  %v10303_v11 = vld [vmem:[%s13541_s1 + $0x1d8] sm:$0xff]  ;;  %v2956_v39 = vpack.c.bf16 %v2936_v4, %v2934_v53 }
 0x226   : > { %3537 = vmatpush.bf16.msra.mxu0 %v10303_v11  ;;  %v2783_v13 = vld [vmem:[#allocation2 + $0x5e7] ss:$2 sm:$0xff] }
 0x227   : > { %3874 = vst [vmem:[#allocation5 + $0xb0] sm:$0xff] %v2252_v7  ;;  %v2202_v31 = vadd.f32 %v2177_v1, %v2032_v8  ;;  %v2791_v0 = vpack.c.bf16 %v2783_v13, %v2781_v61  ;;  %v2611_v7 = vld [vmem:[#allocation2 + $0x5a9] ss:$2 sm:$0xff]  ;;  %v2613_v8 = vld [vmem:[#allocation2 + $0x5b9] ss:$2 sm:$0xff] }
 0x228   : > { %v2621_v43 = vpack.c.bf16 %v2613_v8, %v2611_v7  ;;  %v10309_v13 = vld [vmem:[%s13541_s1 + $0x208] sm:$0xff] }
 0x229   : > { %v2221_v19 = vadd.f32 %v11296_v59, %v2202_v31  ;;  %v2549_v20 = vpop.f32.mrf.mxu2  ;;  %v3111_v8 = vld [vmem:[#allocation2 + $0x519] ss:$2 sm:$0xff] }
 0x22a   : > { %v11439_v23 = vadd.f32 %v2549_v20, %v2452_v58  ;;  %v2455_v35 = vpop.f32.mrf.mxu1  ;;  %v2182_v29 = vpop.f32.mrf.mxu0  ;;  %3538 = vmatpush.bf16.msra.mxu0 %v10302_v32  ;;  %v10322_v58 = vld [vmem:[%s13543_s3 + $0x30] sm:$0xff]  ;;  %v3107_v32 = vld [vmem:[#allocation2 + $0x4b9] ss:$2 sm:$0xff] }
 0x22b   : > { %v2237_v55 = vmax.f32 %v2221_v19, 0.0  ;;  %4470 = vmatpush.bf16.msra.mxu2 %v10322_v58  ;;  %5058 = vmatpush.bf16.msrb.mxu3 %v10322_v58  ;;  %v10310_v19 = vld [vmem:[%s13541_s1 + $0x210] sm:$0xff] }
 0x22c   : > { %v2009_v47 = vpop.f32.mrf.mxu3  ;;  %3707 = vmatpush.bf16.msra.mxu1 %v10310_v19 }
 0x22d   : > { %v2253_v37 = vmin.f32 %v2237_v55, 6.0  ;;  %v2033_v44 = vadd.f32 %v2009_v47, %v11336_v26  ;;  %3043 = vmatmul.bf16.gmra.mxu1 %v2955_v17  ;;  %2894 = vmatmul.bf16.gmra.mxu0 %v2790_v54  ;;  %v3430_v55 = vld [vmem:[#allocation2 + $0x368] ss:$2 sm:$0xff]  ;;  %v3432_v47 = vld [vmem:[#allocation2 + $0x378] ss:$2 sm:$0xff] }
 0x22e   : > { %3212 = vmatmul.bf16.gmra.mxu2 %v3124_v56  ;;  %3539 = vmatpush.bf16.msra.mxu0 %v10301_v40  ;;  %v2938_v56 = vld [vmem:[#allocation2 + $0x4b8] ss:$2 sm:$0xff]  ;;  %v3461_v40 = vpack.c.bf16 %v3432_v47, %v3430_v55 }
 0x22f   : > { %3875 = vst [vmem:[#allocation5 + $0xc8] sm:$0xff] %v2253_v37  ;;  %v2203_v6 = vadd.f32 %v2179_v63, %v2033_v44  ;;  %v3109_v37 = vld [vmem:[#allocation2 + $0x4c9] ss:$2 sm:$0xff]  ;;  %v10321_v44 = vld [vmem:[%s13543_s3 + $0x28] sm:$0xff] }
 0x230   : > { %4471 = vmatpush.bf16.msra.mxu2 %v10321_v44  ;;  %5059 = vmatpush.bf16.msrb.mxu3 %v10321_v44  ;;  %v3966_v44 = vld [vmem:[#allocation5 + $0x8] sm:$0xff] }
 0x231   : > { %v2222_v45 = vadd.f32 %v11296_v59, %v2203_v6  ;;  %2724 = vmatmul.bf16.gmra.mxu3 %v2620_v5  ;;  %v2552_v26 = vpop.f32.mrf.mxu2  ;;  %3708 = vmatpush.bf16.msra.mxu1 %v10309_v13  ;;  %v3438_v13 = vld [vmem:[#allocation2 + $0x428] ss:$2 sm:$0xff] }
 0x232   : > { %v11455_v9 = vadd.f32 %v2552_v26, %v2455_v35  ;;  %v2457_v1 = vpop.f32.mrf.mxu1  ;;  %v2184_v42 = vpop.f32.mrf.mxu0  ;;  %3540 = vmatpush.bf16.msra.mxu0 %v10300_v51  ;;  %v3126_v26 = vpack.c.bf16 %v3109_v37, %v3107_v32  ;;  %v10319_v32 = vld [vmem:[%s13543_s3 + $0x18] sm:$0xff]  ;;  %v3917_v37 = vld [vmem:[#allocation5 + $0x7] sm:$0xff] }
 0x233   : > { %v2238_v46 = vmax.f32 %v2222_v45, 0.0 }
 0x234   : > { %v2012_v50 = vpop.f32.mrf.mxu3 }
 0x235   : > { %v2254_v15 = vmin.f32 %v2238_v46, 6.0  ;;  %v2034_v52 = vadd.f32 %v2012_v50, %v11351_v22 }
 0x237   : > { %3876 = vst [vmem:[#allocation5 + $0xd0] sm:$0xff] %v2254_v15  ;;  %v2204_v36 = vadd.f32 %v2182_v29, %v2034_v52  ;;  %v2940_v29 = vld [vmem:[#allocation2 + $0x4c8] ss:$2 sm:$0xff] }
 0x238   : > { %v2957_v62 = vpack.c.bf16 %v2940_v29, %v2938_v56  ;;  %v10485_v56 = vld [vmem:[#allocation2 + $0xf] sm:$0xff] }
 0x239   : > { %v2223_v63 = vadd.f32 %v11296_v59, %v2204_v36  ;;  %v2554_v22 = vpop.f32.mrf.mxu2 }
 0x23a   : > { %v11468_v33 = vadd.f32 %v2554_v22, %v2457_v1  ;;  %v2460_v2 = vpop.f32.mrf.mxu1  ;;  %v2187_v10 = vpop.f32.mrf.mxu0  ;;  %v3261_v1 = vld [vmem:[#allocation2 + $0x367] ss:$2 sm:$0xff] }
 0x23b   : > { %v2239_v12 = vmax.f32 %v2223_v63, 0.0 }
 0x23c   : > { %v2014_v49 = vpop.f32.mrf.mxu3 }
 0x23d   : > { %v2255_v31 = vmin.f32 %v2239_v12, 6.0  ;;  %v2035_v18 = vadd.f32 %v2014_v49, %v11362_v14  ;;  %3048 = vmatmul.bf16.gmra.mxu1 %v2956_v39  ;;  %2899 = vmatmul.bf16.gmra.mxu0 %v2791_v0  ;;  %v2942_v39 = vld [vmem:[#allocation2 + $0x518] ss:$2 sm:$0xff]  ;;  %v2944_v0 = vld [vmem:[#allocation2 + $0x528] ss:$2 sm:$0xff] }
 0x23e   : > { %3217 = vmatmul.bf16.gmra.mxu2 %v3125_v41  ;;  %v3113_v41 = vld [vmem:[#allocation2 + $0x529] ss:$2 sm:$0xff]  ;;  %v2958_v49 = vpack.c.bf16 %v2944_v0, %v2942_v39  ;;  %v10317_v39 = vld [vmem:[%s13543_s3 + $0x8] sm:$0xff] }
 0x23f   : > { %3877 = vst [vmem:[#allocation5 + $0xe8] sm:$0xff] %v2255_v31  ;;  %v2205_v21 = vadd.f32 %v2184_v42, %v2035_v18  ;;  %v3263_v42 = vld [vmem:[#allocation2 + $0x377] ss:$2 sm:$0xff] }
 0x240   : > { %v3292_v53 = vpack.c.bf16 %v3263_v42, %v3261_v1 }
 0x241   : > { %v2224_v28 = vadd.f32 %v11296_v59, %v2205_v21  ;;  %2729 = vmatmul.bf16.gmra.mxu3 %v2621_v43  ;;  %v2557_v11 = vpop.f32.mrf.mxu2  ;;  %v3127_v21 = vpack.c.bf16 %v3113_v41, %v3111_v8 }
 0x242   : > { %v11475_v20 = vadd.f32 %v2557_v11, %v2460_v2  ;;  %v2462_v17 = vpop.f32.mrf.mxu1  ;;  %v2189_v54 = vpop.f32.mrf.mxu0  ;;  %v3434_v2 = vld [vmem:[#allocation2 + $0x3c8] ss:$2 sm:$0xff]  ;;  %v3267_v11 = vld [vmem:[#allocation2 + $0x3d7] ss:$2 sm:$0xff] }
 0x243   : > { %v2240_v35 = vmax.f32 %v2224_v28, 0.0  ;;  %v3265_v28 = vld [vmem:[#allocation2 + $0x3c7] ss:$2 sm:$0xff] }
 0x244   : > { %v2017_v14 = vpop.f32.mrf.mxu3 }
 0x245   : > { %v2256_v24 = vmin.f32 %v2240_v35, 6.0  ;;  %v2036_v25 = vadd.f32 %v2017_v14, %v11374_v27 }
 0x247   : > { %3878 = vst [vmem:[#allocation5 + $0xf0] sm:$0xff] %v2256_v24  ;;  %v2206_v30 = vadd.f32 %v2187_v10, %v2036_v25  ;;  %v10320_v10 = vld [vmem:[%s13543_s3 + $0x20] sm:$0xff]  ;;  %v3293_v25 = vpack.c.bf16 %v3267_v11, %v3265_v28 }
 0x248   : > { %4472 = vmatpush.bf16.msra.mxu2 %v10320_v10  ;;  %5060 = vmatpush.bf16.msrb.mxu3 %v10320_v10  ;;  %v4114_v10 = vld [vmem:[#allocation5 + $0x30] sm:$0xff] }
 0x249   : > { %v2225_v5 = vadd.f32 %v11296_v59, %v2206_v30  ;;  %v2559_v6 = vpop.f32.mrf.mxu2  ;;  %v4016_v30 = vld [vmem:[#allocation5 + $0x11] sm:$0xff] }
 0x24a   : > { %v11482_v27 = vadd.f32 %v2559_v6, %v2462_v17  ;;  %v2465_v45 = vpop.f32.mrf.mxu1  ;;  %v2865_v46 = vpop.f32.mrf.mxu0  ;;  %v3967_v17 = vld [vmem:[#allocation5 + $0x10] sm:$0xff]  ;;  %v10308_v6 = vld [vmem:[%s13541_s1 + $0x200] sm:$0xff] }
 0x24b   : > { %v2241_v50 = vmax.f32 %v2225_v5, 0.0  ;;  %3709 = vmatpush.bf16.msra.mxu1 %v10308_v6  ;;  %v4162_v6 = vld [vmem:[#allocation5 + $0x29] sm:$0xff] }
 0x24c   : > { %v2019_v51 = vpop.f32.mrf.mxu3  ;;  %4473 = vmatpush.bf16.msra.mxu2 %v10319_v32  ;;  %5061 = vmatpush.bf16.msrb.mxu3 %v10319_v32  ;;  %v4163_v32 = vld [vmem:[#allocation5 + $0x31] sm:$0xff] }
 0x24d   : > { %v2257_v15 = vmin.f32 %v2241_v50, 6.0  ;;  %v2037_v52 = vadd.f32 %v2019_v51, %v11385_v3  ;;  %3053 = vmatmul.bf16.gmra.mxu1 %v2957_v62  ;;  %3541 = vmatmul.bf16.vlgmr.msra.gmra.mxu0 %v3461_v40  ;;  %v4065_v50 = vld [vmem:[#allocation5 + $0x2f] sm:$0xff] }
 0x24e   : > { %3222 = vmatmul.bf16.gmra.mxu2 %v3126_v26 }
 0x24f   : > { %3879 = vst [vmem:[#allocation5 + $0x108] sm:$0xff] %v2257_v15  ;;  %v2207_v4 = vadd.f32 %v2189_v54, %v2037_v52  ;;  %v10318_v15 = vld [vmem:[%s13543_s3 + $0x10] sm:$0xff] }
 0x250   : > { %v4015_v52 = vld [vmem:[#allocation5 + $0x9] sm:$0xff]  ;;  %4474 = vmatpush.bf16.msra.mxu2 %v10318_v15  ;;  %5062 = vmatpush.bf16.msrb.mxu3 %v10318_v15 }
 0x251   : > { %v2226_v38 = vadd.f32 %v11296_v59, %v2207_v4  ;;  %3372 = vmatmul.bf16.vlgmr.msra.gmra.mxu3 %v3292_v53  ;;  %v2562_v61 = vpop.f32.mrf.mxu2  ;;  %v3436_v59 = vld [vmem:[#allocation2 + $0x3d8] ss:$2 sm:$0xff] }
 0x252   : > { %v11489_v36 = vadd.f32 %v2562_v61, %v2465_v45  ;;  %v2467_v16 = vpop.f32.mrf.mxu1  ;;  %v2867_v60 = vpop.f32.mrf.mxu0  ;;  %v3462_v31 = vpack.c.bf16 %v3436_v59, %v3434_v2  ;;  %v2948_v61 = vld [vmem:[#allocation2 + $0x588] ss:$2 sm:$0xff] }
 0x253   : > { %v2242_v58 = vmax.f32 %v2226_v38, 0.0  ;;  %v2946_v38 = vld [vmem:[#allocation2 + $0x578] ss:$2 sm:$0xff]  ;;  %v4064_v2 = vld [vmem:[#allocation5 + $0x27] sm:$0xff] }
 0x254   : > { %v2695_v3 = vpop.f32.mrf.mxu3  ;;  %v2959_v8 = vpack.c.bf16 %v2948_v61, %v2946_v38  ;;  %4475 = vmatpush.bf16.msra.mxu2 %v10317_v39  ;;  %5063 = vmatpush.bf16.msrb.mxu3 %v10317_v39 }
 0x255   : > { %v2258_v63 = vmin.f32 %v2242_v58, 6.0  ;;  %v2735_v22 = vadd.f32 %v2695_v3, %v11396_v57  ;;  %v11500_v57 = vld [vmem:[%s13545_s5] sm:$0xff] }
 0x256   : > { %v11505_v35 = vperm.slane %v11500_v57, 0  ;;  %v11508_v14 = vperm.slane %v11500_v57, 1  ;;  %v11533_v53 = vperm.slane %v11500_v57, 3 }
 0x257   : > { %3880 = vst [vmem:[#allocation5 + $0x110] sm:$0xff] %v2258_v63  ;;  %v11492_v7 = vadd.f32 %v2865_v46, %v2735_v22  ;;  %v3115_v63 = vld [vmem:[#allocation2 + $0x579] ss:$2 sm:$0xff]  ;;  %v3117_v22 = vld [vmem:[#allocation2 + $0x589] ss:$2 sm:$0xff] }
 0x258   : > { %v3935_v29 = vmul.f32 %v10485_v56, %v11505_v35  ;;  %v3984_v55 = vmul.f32 %v11508_v14, %v3967_v17  ;;  %v3934_v42 = vmul.f32 %v11505_v35, %v3917_v37  ;;  %v3983_v46 = vmul.f32 %v11508_v14, %v3966_v44  ;;  %v11557_v37 = vld [vmem:[#allocation5 + $0x4f] sm:$0xff] }
 0x259   : > { %v2564_v12 = vpop.f32.mrf.mxu2  ;;  %v4082_v58 = vmul.f32 %v11533_v53, %v4065_v50  ;;  %v4113_v44 = vld [vmem:[#allocation5 + $0x28] sm:$0xff]  ;;  %v3986_v15 = vmul.f32 %v4114_v10, %v11508_v14 }
 0x25a   : > { %v11502_v18 = vadd.f32 %v2564_v12, %v2467_v16  ;;  %v2470_v43 = vpop.f32.mrf.mxu1  ;;  %v2870_v19 = vpop.f32.mrf.mxu0  ;;  %v4000_v26 = vadd.f32 %v3984_v55, %v3935_v29  ;;  %v3440_v16 = vld [vmem:[#allocation2 + $0x438] ss:$2 sm:$0xff]  ;;  %v3999_v0 = vadd.f32 %v3983_v46, %v3934_v42  ;;  %v11554_v29 = vperm.slane %v11500_v57, 5  ;;  %v11565_v42 = vld [vmem:[#allocation5 + $0x47] sm:$0xff] }
 0x25b   : > { %v3463_v41 = vpack.c.bf16 %v3440_v16, %v3438_v13 }
 0x25c   : > { %v2697_v54 = vpop.f32.mrf.mxu3 }
 0x25d   : > { %v2736_v24 = vadd.f32 %v2697_v54, %v11406_v34  ;;  %3058 = vmatmul.bf16.gmra.mxu1 %v2958_v49  ;;  %3546 = vmatmul.bf16.gmra.mxu0 %v3462_v31  ;;  %v11519_v34 = vperm.slane %v11500_v57, 2  ;;  %v3128_v31 = vpack.c.bf16 %v3117_v22, %v3115_v63  ;;  %v4081_v54 = vmul.f32 %v11533_v53, %v4064_v2  ;;  %v11577_v63 = vld [vmem:[#allocation5 + $0x50] sm:$0xff] }
 0x25e   : > { %3227 = vmatmul.bf16.gmra.mxu2 %v3127_v21  ;;  %v3271_v21 = vld [vmem:[#allocation2 + $0x437] ss:$2 sm:$0xff] }
 0x25f   : > { %v11513_v47 = vadd.f32 %v2867_v60, %v2736_v24  ;;  %v4033_v1 = vmul.f32 %v11519_v34, %v4016_v30 }
 0x261   : > { %3377 = vmatmul.bf16.gmra.mxu3 %v3293_v25  ;;  %v2567_v5 = vpop.f32.mrf.mxu2  ;;  %v4049_v60 = vadd.f32 %v4033_v1, %v4000_v26  ;;  %v10316_v25 = vld [vmem:[%s13543_s3] sm:$0xff] }
 0x262   : > { %v11524_v62 = vadd.f32 %v2567_v5, %v2470_v43  ;;  %v2472_v40 = vpop.f32.mrf.mxu1  ;;  %v2872_v45 = vpop.f32.mrf.mxu0  ;;  %v3269_v43 = vld [vmem:[#allocation2 + $0x427] ss:$2 sm:$0xff]  ;;  %5064 = vmatpush.bf16.msrb.mxu3 %v10316_v25  ;;  %4476 = vmatpush.bf16.msra.mxu2 %v10316_v25 }
 0x263   : > { %v4098_v11 = vadd.f32 %v4082_v58, %v4049_v60  ;;  %v3294_v30 = vpack.c.bf16 %v3271_v21, %v3269_v43  ;;  %v2952_v43 = vld [vmem:[#allocation2 + $0x5e8] ss:$2 sm:$0xff]  ;;  %v3121_v25 = vld [vmem:[#allocation2 + $0x5e9] ss:$2 sm:$0xff] }
 0x264   : > { %v2700_v51 = vpop.f32.mrf.mxu3  ;;  %v3442_v21 = vld [vmem:[#allocation2 + $0x488] ss:$2 sm:$0xff] }
 0x265   : > { %v2737_v4 = vadd.f32 %v2700_v51, %v11420_v48  ;;  %v4032_v48 = vmul.f32 %v11519_v34, %v4015_v52  ;;  %v3937_v51 = vmul.f32 %v4065_v50, %v11505_v35  ;;  %v11580_v50 = vperm.slane %v11500_v57, 7 }
 0x267   : > { %v11537_v3 = vadd.f32 %v2870_v19, %v2737_v4  ;;  %v11546_v19 = vperm.slane %v11500_v57, 4  ;;  %v4048_v17 = vadd.f32 %v4032_v48, %v3999_v0  ;;  %v11585_v0 = vld [vmem:[%s13545_s5 + $0x8] ss:$0 sm:$0xff]  ;;  %v3936_v48 = vmul.f32 %v4064_v2, %v11505_v35 }
 0x268   : > { %v4084_v2 = vmul.f32 %v11557_v37, %v11533_v53 }
 0x269   : > { %v2569_v59 = vpop.f32.mrf.mxu2  ;;  %v4131_v56 = vmul.f32 %v11546_v19, %v4114_v10  ;;  %v4097_v1 = vadd.f32 %v4081_v54, %v4048_v17  ;;  %v4130_v4 = vmul.f32 %v11546_v19, %v4113_v44  ;;  %v2950_v10 = vld [vmem:[#allocation2 + $0x5d8] ss:$2 sm:$0xff]  ;;  %v4279_v17 = vmul.f32 %v11580_v50, %v11577_v63 }
 0x26a   : > { %v11543_v12 = vadd.f32 %v2569_v59, %v2472_v40  ;;  %v2475_v49 = vpop.f32.mrf.mxu1  ;;  %v2875_v28 = vpop.f32.mrf.mxu0  ;;  %v11560_v40 = vperm.slane %v11500_v57, 6  ;;  %v3985_v59 = vmul.f32 %v4113_v44, %v11508_v14  ;;  %v11592_v57 = vld [vmem:[#allocation5 + $0x49] sm:$0xff]  ;;  %v4035_v54 = vmul.f32 %v4163_v32, %v11519_v34 }
 0x26b   : > { %v4147_v5 = vadd.f32 %v4131_v56, %v4098_v11  ;;  %v4146_v60 = vadd.f32 %v4130_v4, %v4097_v1  ;;  %v3444_v11 = vld [vmem:[#allocation2 + $0x498] ss:$2 sm:$0xff] }
 0x26c   : > { %13548 = vst [vmem:[#allocation15_spill] sm:$0xff] %v11543_v12  ;;  %v2702_v24 = vpop.f32.mrf.mxu3  ;;  %v4230_v46 = vmul.f32 %v11560_v40, %v11557_v37  ;;  %v4229_v58 = vmul.f32 %v11560_v40, %v11565_v42  ;;  %v4001_v44 = vadd.f32 %v3985_v59, %v3936_v48 }
 0x26d   : > { %v2738_v55 = vadd.f32 %v2702_v24, %v11439_v23  ;;  %3063 = vmatmul.bf16.gmra.mxu1 %v2959_v8  ;;  %3551 = vmatmul.bf16.gmra.mxu0 %v3463_v41  ;;  %v4180_v23 = vmul.f32 %v11554_v29, %v4163_v32  ;;  %v4002_v8 = vadd.f32 %v3986_v15, %v3937_v51 }
 0x26e   : > { %3232 = vmatmul.bf16.gmra.mxu2 %v3128_v31  ;;  %v11590_v31 = vld [vmem:[#allocation5 + $0x48] sm:$0xff]  ;;  %v3464_v51 = vpack.c.bf16 %v3444_v11, %v3442_v21 }
 0x26f   : > { %v11562_v26 = vadd.f32 %v2872_v45, %v2738_v55  ;;  %v4179_v45 = vmul.f32 %v11554_v29, %v4162_v6  ;;  %v4196_v16 = vadd.f32 %v4180_v23, %v4147_v5  ;;  %v11601_v55 = vld [vmem:[#allocation5 + $0x51] sm:$0xff]  ;;  %v4034_v5 = vmul.f32 %v4162_v6, %v11519_v34 }
 0x270   : > { %v4051_v1 = vadd.f32 %v4035_v54, %v4002_v8  ;;  %v4278_v32 = vmul.f32 %v11580_v50, %v11590_v31  ;;  %v4328_v6 = vmul.f32 %v11585_v0, %v11601_v55  ;;  %v11622_v21 = vld [vmem:[#allocation5 + $0x6f] sm:$0xff] }
 0x271   : > { %3382 = vmatmul.bf16.gmra.mxu3 %v3294_v30  ;;  %v2572_v52 = vpop.f32.mrf.mxu2  ;;  %v4246_v39 = vadd.f32 %v4230_v46, %v4196_v16  ;;  %v2960_v46 = vpack.c.bf16 %v2952_v43, %v2950_v10  ;;  %v3275_v16 = vld [vmem:[#allocation2 + $0x497] ss:$2 sm:$0xff]  ;;  %v4050_v8 = vadd.f32 %v4034_v5, %v4001_v44  ;;  %v11620_v43 = vld [vmem:[%s13546_s6] ss:$0 sm:$0xff]  ;;  %v4132_v5 = vmul.f32 %v11590_v31, %v11546_v19 }
 0x272   : > { %v11573_v38 = vadd.f32 %v2572_v52, %v2475_v49  ;;  %v2477_v61 = vpop.f32.mrf.mxu1  ;;  %v2877_v13 = vpop.f32.mrf.mxu0  ;;  %v4195_v49 = vadd.f32 %v4179_v45, %v4146_v60  ;;  %v3273_v45 = vld [vmem:[#allocation2 + $0x487] ss:$2 sm:$0xff] }
 0x273   : > { %v4295_v30 = vadd.f32 %v4279_v17, %v4246_v39  ;;  %v4083_v39 = vmul.f32 %v11565_v42, %v11533_v53  ;;  %v3295_v10 = vpack.c.bf16 %v3275_v16, %v3273_v45  ;;  %v3987_v45 = vmul.f32 %v11590_v31, %v11508_v14 }
 0x274   : > { %v2705_v22 = vpop.f32.mrf.mxu3  ;;  %v4245_v56 = vadd.f32 %v4229_v58, %v4195_v49  ;;  %v4100_v58 = vadd.f32 %v4084_v2, %v4051_v1  ;;  %v4182_v2 = vmul.f32 %v11601_v55, %v11554_v29  ;;  %v4181_v1 = vmul.f32 %v11592_v57, %v11554_v29 }
 0x275   : > { %v2739_v41 = vadd.f32 %v2705_v22, %v11455_v9  ;;  %v3119_v9 = vld [vmem:[#allocation2 + $0x5d9] ss:$2 sm:$0xff]  ;;  %v4344_v59 = vadd.f32 %v4328_v6, %v4295_v30  ;;  %v4099_v54 = vadd.f32 %v4083_v39, %v4050_v8  ;;  %v3988_v30 = vmul.f32 %v11577_v63, %v11508_v14  ;;  %v3599_v39 = vld [vmem:[#allocation2 + $0x369] ss:$2 sm:$0xff] }
 0x276   : > { %v3129_v4 = vpack.c.bf16 %v3121_v25, %v3119_v9  ;;  %v4294_v22 = vadd.f32 %v4278_v32, %v4245_v56  ;;  %v11629_v9 = vld [vmem:[#allocation5 + $0x67] sm:$0xff]  ;;  %v4232_v25 = vmul.f32 %v11560_v40, %v11622_v21  ;;  %v3939_v56 = vmul.f32 %v11557_v37, %v11505_v35 }
 0x277   : > { %v11599_v24 = vadd.f32 %v2875_v28, %v2739_v41  ;;  %v4327_v28 = vmul.f32 %v11585_v0, %v11592_v57  ;;  %v4231_v37 = vmul.f32 %v11560_v40, %v11629_v9  ;;  %v11653_v8 = vld [vmem:[#allocation5 + $0x68] sm:$0xff]  ;;  %v4037_v31 = vmul.f32 %v11601_v55, %v11519_v34 }
 0x278   : > { %v4280_v55 = vmul.f32 %v11580_v50, %v11653_v8 }
 0x279   : > { %v2574_v23 = vpop.f32.mrf.mxu2  ;;  %v4343_v49 = vadd.f32 %v4327_v28, %v4294_v22  ;;  %v4148_v28 = vadd.f32 %v4132_v5, %v4099_v54 }
 0x27a   : > { %v11608_v15 = vadd.f32 %v2574_v23, %v2477_v61  ;;  %v2480_v52 = vpop.f32.mrf.mxu1  ;;  %v2880_v60 = vpop.f32.mrf.mxu0  ;;  %v4133_v61 = vmul.f32 %v11577_v63, %v11546_v19  ;;  %v11646_v63 = vld [vmem:[#allocation5 + $0x70] sm:$0xff] }
 0x27b   : > { %v4362_v44 = vadd.f32 %v11620_v43, %v4343_v49  ;;  %v3448_v49 = vld [vmem:[#allocation2 + $0x4f8] ss:$2 sm:$0xff] }
 0x27c   : > { %13549 = vst [vmem:[#allocation16_spill] sm:$0xff] %v11608_v15  ;;  %v2707_v48 = vpop.f32.mrf.mxu3  ;;  %v4149_v11 = vadd.f32 %v4133_v61, %v4100_v58  ;;  %v11655_v61 = vld [vmem:[#allocation5 + $0x69] sm:$0xff] }
 0x27d   : > { %v2740_v41 = vadd.f32 %v2707_v48, %v11468_v33  ;;  %3068 = vmatmul.bf16.gmra.mxu1 %v2960_v46  ;;  %3556 = vmatmul.bf16.gmra.mxu0 %v3464_v51  ;;  %v4363_v33 = vadd.f32 %v11620_v43, %v4344_v59  ;;  %v4378_v48 = vmax.f32 %v4362_v44, 0.0  ;;  %v4197_v59 = vadd.f32 %v4181_v1, %v4148_v28 }
 0x27e   : > { %3237 = vmatmul.bf16.gmra.mxu2 %v3129_v4  ;;  %v4198_v32 = vadd.f32 %v4182_v2, %v4149_v11  ;;  %v3938_v4 = vmul.f32 %v11565_v42, %v11505_v35  ;;  %v4281_v42 = vmul.f32 %v11580_v50, %v11646_v63  ;;  %v4086_v11 = vmul.f32 %v11622_v21, %v11533_v53  ;;  %v11665_v2 = vld [vmem:[#allocation5 + $0x71] sm:$0xff] }
 0x27f   : > { %v11624_v17 = vadd.f32 %v2877_v13, %v2740_v41  ;;  %v4379_v6 = vmax.f32 %v4363_v33, 0.0  ;;  %v3601_v41 = vld [vmem:[#allocation2 + $0x379] ss:$2 sm:$0xff]  ;;  %v4247_v54 = vadd.f32 %v4231_v37, %v4197_v59 }
 0x280   : > { %v4248_v58 = vadd.f32 %v4232_v25, %v4198_v32  ;;  %v4003_v33 = vadd.f32 %v3987_v45, %v3938_v4  ;;  %v3630_v5 = vpack.c.bf16 %v3601_v41, %v3599_v39  ;;  %v3277_v37 = vld [vmem:[#allocation2 + $0x4e7] ss:$2 sm:$0xff]  ;;  %v3279_v4 = vld [vmem:[#allocation2 + $0x4f7] ss:$2 sm:$0xff]  ;;  %v4394_v45 = vmin.f32 %v4378_v48, 6.0 }
 0x281   : > { %3387 = vmatmul.bf16.gmra.mxu3 %v3295_v10  ;;  %v2577_v13 = vpop.f32.mrf.mxu2  ;;  %v3446_v10 = vld [vmem:[#allocation2 + $0x4e8] ss:$2 sm:$0xff]  ;;  %v4395_v25 = vmin.f32 %v4379_v6, 6.0 }
 0x282   : > { %v11642_v23 = vadd.f32 %v2577_v13, %v2480_v52  ;;  %v2482_v46 = vpop.f32.mrf.mxu1  ;;  %v2882_v51 = vpop.f32.mrf.mxu0  ;;  %v4004_v52 = vadd.f32 %v3988_v30, %v3939_v56  ;;  %v4297_v56 = vadd.f32 %v4281_v42, %v4248_v58  ;;  %v4036_v30 = vmul.f32 %v11592_v57, %v11519_v34 }
 0x283   : > { %v3465_v1 = vpack.c.bf16 %v3448_v49, %v3446_v10  ;;  %v4330_v57 = vmul.f32 %v11585_v0, %v11665_v2  ;;  %v4410_v59 = vpack.c.bf16 %v4395_v25, %v4394_v45  ;;  %v4135_v10 = vmul.f32 %v11646_v63, %v11546_v19  ;;  %v11710_v45 = vld [vmem:[#allocation5 + $0x90] sm:$0xff] }
 0x284   : > { %v2710_v16 = vpop.f32.mrf.mxu3  ;;  %v4053_v13 = vadd.f32 %v4037_v31, %v4004_v52  ;;  %v4296_v52 = vadd.f32 %v4280_v55, %v4247_v54  ;;  %v3296_v49 = vpack.c.bf16 %v3279_v4, %v3277_v37  ;;  %v11683_v31 = vld [vmem:[#allocation5 + $0x8f] sm:$0xff]  ;;  %v4184_v25 = vmul.f32 %v11665_v2, %v11554_v29 }
 0x285   : > { %v2741_v22 = vadd.f32 %v2710_v16, %v11475_v20  ;;  %v4346_v41 = vadd.f32 %v4330_v57, %v4297_v56  ;;  %v11690_v56 = vld [vmem:[#allocation5 + $0x87] sm:$0xff] }
 0x286   : > { %v4102_v6 = vadd.f32 %v4086_v11, %v4053_v13  ;;  %v3990_v13 = vmul.f32 %v11646_v63, %v11508_v14  ;;  %v4233_v63 = vmul.f32 %v11560_v40, %v11690_v56 }
 0x287   : > { %v11663_v20 = vadd.f32 %v2880_v60, %v2741_v22  ;;  %v4329_v60 = vmul.f32 %v11585_v0, %v11655_v61  ;;  %v4085_v22 = vmul.f32 %v11629_v9, %v11533_v53 }
 0x289   : > { %v2579_v44 = vpop.f32.mrf.mxu2  ;;  %v4345_v42 = vadd.f32 %v4329_v60, %v4296_v52 }
 0x28a   : > { %v11673_v32 = vadd.f32 %v2579_v44, %v2482_v46  ;;  %v3034_v28 = vpop.f32.mrf.mxu1  ;;  %v2885_v16 = vpop.f32.mrf.mxu0  ;;  %v4052_v46 = vadd.f32 %v4036_v30, %v4003_v33  ;;  %v4365_v33 = vadd.f32 %v11620_v43, %v4346_v41  ;;  %v3941_v30 = vmul.f32 %v11622_v21, %v11505_v35 }
 0x28b   : > { %v3074_v58 = vadd.f32 %v3034_v28, %v11492_v7  ;;  %v4151_v7 = vadd.f32 %v4135_v10, %v4102_v6  ;;  %v4364_v44 = vadd.f32 %v11620_v43, %v4345_v42  ;;  %v11715_v10 = vld [vmem:[#allocation5 + $0x89] sm:$0xff]  ;;  %v4283_v42 = vmul.f32 %v11580_v50, %v11710_v45 }
 0x28c   : > { %13550 = vst [vmem:[#allocation17_spill] sm:$0xff] %v11673_v32  ;;  %v2712_v39 = vpop.f32.mrf.mxu3  ;;  %v4101_v54 = vadd.f32 %v4085_v22, %v4052_v46  ;;  %v4381_v6 = vmax.f32 %v4365_v33, 0.0  ;;  %v4006_v22 = vadd.f32 %v3990_v13, %v3941_v30  ;;  %v11713_v46 = vld [vmem:[#allocation5 + $0x88] sm:$0xff]  ;;  %v11725_v33 = vld [vmem:[#allocation5 + $0x91] sm:$0xff]  ;;  %v3989_v30 = vmul.f32 %v11653_v8, %v11508_v14 }
 0x28d   : > { %v2742_v48 = vadd.f32 %v2712_v39, %v11482_v27  ;;  %3710 = vmatmul.bf16.vlgmr.msra.gmra.mxu1 %v3630_v5  ;;  %3561 = vmatmul.bf16.gmra.mxu0 %v3465_v1  ;;  %v4234_v27 = vmul.f32 %v11560_v40, %v11683_v31  ;;  %v4134_v5 = vmul.f32 %v11653_v8, %v11546_v19  ;;  %v3283_v8 = vld [vmem:[#allocation2 + $0x557] ss:$2 sm:$0xff]  ;;  %v11811_v32 = vld [vmem:[#allocation5 + $0xcf] sm:$0xff] }
 0x28e   : > { %4477 = vmatmul.bf16.vlgmr.msra.gmra.mxu2 %v4410_v59  ;;  %v4183_v1 = vmul.f32 %v11655_v61, %v11554_v29  ;;  %v4200_v37 = vadd.f32 %v4184_v25, %v4151_v7  ;;  %v4380_v59 = vmax.f32 %v4364_v44, 0.0  ;;  %v4039_v7 = vmul.f32 %v11665_v2, %v11519_v34 }
 0x28f   : > { %v11685_v11 = vadd.f32 %v2882_v51, %v2742_v48  ;;  %v4150_v4 = vadd.f32 %v4134_v5, %v4101_v54  ;;  %v3450_v48 = vld [vmem:[#allocation2 + $0x548] ss:$2 sm:$0xff]  ;;  %v4088_v54 = vmul.f32 %v11683_v31, %v11533_v53  ;;  %v4397_v13 = vmin.f32 %v4381_v6, 6.0 }
 0x290   : > { %v4250_v52 = vadd.f32 %v4234_v27, %v4200_v37  ;;  %v3940_v27 = vmul.f32 %v11629_v9, %v11505_v35  ;;  %v4055_v2 = vadd.f32 %v4039_v7, %v4006_v22  ;;  %v4038_v37 = vmul.f32 %v11655_v61, %v11519_v34  ;;  %v11748_v7 = vld [vmem:[#allocation5 + $0xaf] sm:$0xff] }
 0x291   : > { %3392 = vmatmul.bf16.gmra.mxu3 %v3296_v49  ;;  %v3203_v51 = vpop.f32.mrf.mxu2  ;;  %v4199_v41 = vadd.f32 %v4183_v1, %v4150_v4  ;;  %v3452_v49 = vld [vmem:[#allocation2 + $0x558] ss:$2 sm:$0xff]  ;;  %v4332_v6 = vmul.f32 %v11585_v0, %v11725_v33 }
 0x292   : > { %v11703_v55 = vadd.f32 %v3203_v51, %v3074_v58  ;;  %v3036_v60 = vpop.f32.mrf.mxu1  ;;  %v11705_v28 = vpop.f32.mrf.mxu0  ;;  %v3603_v58 = vld [vmem:[#allocation2 + $0x3c9] ss:$2 sm:$0xff]  ;;  %v4282_v51 = vmul.f32 %v11580_v50, %v11713_v46  ;;  %v4299_v44 = vadd.f32 %v4283_v42, %v4250_v52  ;;  %v4104_v52 = vadd.f32 %v4088_v54, %v4055_v2 }
 0x293   : > { %v3075_v21 = vadd.f32 %v3036_v60, %v11513_v47  ;;  %v3605_v47 = vld [vmem:[#allocation2 + $0x3d9] ss:$2 sm:$0xff]  ;;  %v4249_v25 = vadd.f32 %v4233_v63, %v4199_v41  ;;  %v3466_v60 = vpack.c.bf16 %v3452_v49, %v3450_v48  ;;  %v4087_v41 = vmul.f32 %v11690_v56, %v11533_v53  ;;  %v579_v2 = vld [vmem:[%s10768_s14 + $0x3f8] sm:$0xff] }
 0x294   : > { %v2715_v57 = vpop.f32.mrf.mxu3  ;;  %v3631_v1 = vpack.c.bf16 %v3605_v47, %v3603_v58  ;;  %v3281_v63 = vld [vmem:[#allocation2 + $0x547] ss:$2 sm:$0xff]  ;;  %v4005_v58 = vadd.f32 %v3989_v30, %v3940_v27  ;;  %v4348_v48 = vadd.f32 %v4332_v6, %v4299_v44  ;;  %708 = vst [vmem:[#allocation2 + $0x620] sm:$0xff] %v579_v2 }
 0x295   : > { %v2743_v39 = vadd.f32 %v2715_v57, %v11489_v36  ;;  %v4396_v57 = vmin.f32 %v4380_v59, 6.0  ;;  %v4137_v59 = vmul.f32 %v11710_v45, %v11546_v19  ;;  %v3297_v49 = vpack.c.bf16 %v3283_v8, %v3281_v63  ;;  %v577_v27 = vld [vmem:[%s10768_s14 + $0x3e8] sm:$0xff]  ;;  %v578_v30 = vld [vmem:[%s10768_s14 + $0x3f0] sm:$0xff] }
 0x296   : > { %v4054_v42 = vadd.f32 %v4038_v37, %v4005_v58  ;;  %v4367_v44 = vadd.f32 %v11620_v43, %v4348_v48  ;;  %706 = vst [vmem:[#allocation2 + $0x610] sm:$0xff] %v577_v27  ;;  %v4136_v63 = vmul.f32 %v11713_v46, %v11546_v19  ;;  %v4185_v8 = vmul.f32 %v11715_v10, %v11554_v29  ;;  %v4268_v58 = vld [vmem:[#allocation5 + $0xb0] sm:$0xff]  ;;  %v3609_v27 = vld [vmem:[#allocation2 + $0x439] ss:$2 sm:$0xff] }
 0x297   : > { %v11723_v36 = vadd.f32 %v2885_v16, %v2743_v39  ;;  %v4331_v16 = vmul.f32 %v11585_v0, %v11715_v10  ;;  %v4298_v39 = vadd.f32 %v4282_v51, %v4249_v25  ;;  %v4153_v54 = vadd.f32 %v4137_v59, %v4104_v52  ;;  %v576_v25 = vld [vmem:[%s10768_s14 + $0x3e0] sm:$0xff]  ;;  %707 = vst [vmem:[#allocation2 + $0x618] sm:$0xff] %v578_v30  ;;  %v3454_v30 = vld [vmem:[#allocation2 + $0x5a8] ss:$2 sm:$0xff] }
 0x298   : > { %v4103_v51 = vadd.f32 %v4087_v41, %v4054_v42  ;;  %705 = vst [vmem:[#allocation2 + $0x608] sm:$0xff] %v576_v25  ;;  %v11776_v25 = vld [vmem:[#allocation5 + $0xa8] sm:$0xff] }
 0x299   : > { %v3205_v5 = vpop.f32.mrf.mxu2 }
 0x29a   : > { %v11737_v4 = vadd.f32 %v3205_v5, %v3075_v21  ;;  %v3039_v9 = vpop.f32.mrf.mxu1  ;;  %v4411_v21 = vpack.c.bf16 %v4397_v13, %v4396_v57  ;;  %v2890_v47 = vpop.f32.mrf.mxu0  ;;  %v4186_v13 = vmul.f32 %v11725_v33, %v11554_v29  ;;  %v11757_v5 = vld [vmem:[#allocation5 + $0xa7] sm:$0xff] }
 0x29b   : > { %v3076_v22 = vadd.f32 %v3039_v9, %v11537_v3  ;;  %v4347_v3 = vadd.f32 %v4331_v16, %v4298_v39  ;;  %v3992_v16 = vmul.f32 %v11710_v45, %v11508_v14  ;;  %v4152_v45 = vadd.f32 %v4136_v63, %v4103_v51  ;;  %v3456_v51 = vld [vmem:[#allocation2 + $0x5b8] ss:$2 sm:$0xff] }
 0x29c   : > { %v11744_v61 = vpop.f32.mrf.mxu3  ;;  %v4202_v52 = vadd.f32 %v4186_v13, %v4153_v54  ;;  %v4235_v39 = vmul.f32 %v11560_v40, %v11757_v5  ;;  %v11778_v54 = vld [vmem:[#allocation5 + $0xa9] sm:$0xff]  ;;  %v4285_v13 = vmul.f32 %v11580_v50, %v4268_v58  ;;  %v4284_v63 = vmul.f32 %v11580_v50, %v11776_v25 }
 0x29d   : > { %3715 = vmatmul.bf16.gmra.mxu1 %v3631_v1  ;;  %3566 = vmatmul.bf16.gmra.mxu0 %v3466_v60  ;;  %v4236_v1 = vmul.f32 %v11560_v40, %v11748_v7  ;;  %v3943_v60 = vmul.f32 %v11683_v31, %v11505_v35  ;;  %v4366_v9 = vadd.f32 %v11620_v43, %v4347_v3  ;;  %v3607_v3 = vld [vmem:[#allocation2 + $0x429] ss:$2 sm:$0xff] }
 0x29e   : > { %4482 = vmatmul.bf16.gmra.mxu2 %v4411_v21  ;;  %v4383_v21 = vmax.f32 %v4367_v44, 0.0  ;;  %v4201_v42 = vadd.f32 %v4185_v8, %v4152_v45  ;;  %v4041_v44 = vmul.f32 %v11725_v33, %v11519_v34  ;;  %v3467_v45 = vpack.c.bf16 %v3456_v51, %v3454_v30  ;;  %v3291_v12 = vld [vmem:[#allocation2 + $0x617] ss:$2 sm:$0xff] }
 0x29f   : > { %v4252_v48 = vadd.f32 %v4236_v1, %v4202_v52  ;;  %v4008_v59 = vadd.f32 %v3992_v16, %v3943_v60  ;;  %v11789_v60 = vld [vmem:[#allocation5 + $0xb1] sm:$0xff]  ;;  %v3942_v16 = vmul.f32 %v11690_v56, %v11505_v35  ;;  %v3632_v52 = vpack.c.bf16 %v3609_v27, %v3607_v3 }
 0x2a0   : > { %v4251_v1 = vadd.f32 %v4235_v39, %v4201_v42  ;;  %v4040_v39 = vmul.f32 %v11715_v10, %v11519_v34  ;;  %v4334_v42 = vmul.f32 %v11585_v0, %v11789_v60  ;;  %v4089_v30 = vmul.f32 %v11757_v5, %v11533_v53 }
 0x2a1   : > { %3397 = vmatmul.bf16.gmra.mxu3 %v3297_v49  ;;  %v3208_v37 = vpop.f32.mrf.mxu2  ;;  %v4301_v8 = vadd.f32 %v4285_v13, %v4252_v48  ;;  %v4057_v33 = vadd.f32 %v4041_v44, %v4008_v59  ;;  %v4139_v13 = vmul.f32 %v4268_v58, %v11546_v19 }
 0x2a2   : > { %v11770_v57 = vadd.f32 %v3208_v37, %v3076_v22  ;;  %v3041_v6 = vpop.f32.mrf.mxu1  ;;  %v4382_v22 = vmax.f32 %v4366_v9, 0.0  ;;  %v3991_v37 = vmul.f32 %v11713_v46, %v11508_v14  ;;  %v4399_v9 = vmin.f32 %v4383_v21, 6.0  ;;  %v3287_v46 = vld [vmem:[#allocation2 + $0x5b7] ss:$2 sm:$0xff] }
 0x2a3   : > { %v3077_v31 = vadd.f32 %v3041_v6, %v11562_v26  ;;  %v11780_v26 = vpop.f32.mrf.mxu0  ;;  %v4300_v3 = vadd.f32 %v4284_v63, %v4251_v1  ;;  %v4188_v1 = vmul.f32 %v11789_v60, %v11554_v29  ;;  %v3945_v63 = vmul.f32 %v11748_v7, %v11505_v35 }
 0x2a4   : > { %v2720_v41 = vpop.f32.mrf.mxu3  ;;  %13551 = vst [vmem:[#allocation18_spill] sm:$0xff] %v11780_v26  ;;  %v4398_v21 = vmin.f32 %v4382_v22, 6.0  ;;  %v4007_v27 = vadd.f32 %v3991_v37, %v3942_v16 }
 0x2a5   : > { %v2745_v49 = vadd.f32 %v2720_v41, %v11524_v62  ;;  %v4090_v62 = vmul.f32 %v11748_v7, %v11533_v53 }
 0x2a6   : > { %v4412_v10 = vpack.c.bf16 %v4399_v9, %v4398_v21  ;;  %v4238_v9 = vmul.f32 %v11560_v40, %v11811_v32 }
 0x2a7   : > { %v11787_v2 = vadd.f32 %v2890_v47, %v2745_v49  ;;  %v4333_v47 = vmul.f32 %v11585_v0, %v11778_v54  ;;  %v3285_v49 = vld [vmem:[#allocation2 + $0x5a7] ss:$2 sm:$0xff]  ;;  %v4106_v48 = vadd.f32 %v4090_v62, %v4057_v33 }
 0x2a8   : > { %v3298_v44 = vpack.c.bf16 %v3287_v46, %v3285_v49  ;;  %v4187_v49 = vmul.f32 %v11778_v54, %v11554_v29 }
 0x2a9   : > { %v3210_v6 = vpop.f32.mrf.mxu2  ;;  %v4349_v22 = vadd.f32 %v4333_v47, %v4300_v3  ;;  %v11824_v47 = vld [vmem:[#allocation5 + $0xc7] sm:$0xff] }
 0x2aa   : > { %v11801_v41 = vadd.f32 %v3210_v6, %v3077_v31  ;;  %v3044_v56 = vpop.f32.mrf.mxu1  ;;  %v4350_v31 = vadd.f32 %v4334_v42, %v4301_v8  ;;  %v4056_v6 = vadd.f32 %v4040_v39, %v4007_v27  ;;  %v3994_v8 = vmul.f32 %v4268_v58, %v11508_v14  ;;  %v11831_v58 = vld [vmem:[#allocation5 + $0xd0] sm:$0xff] }
 0x2ab   : > { %v3078_v59 = vadd.f32 %v3044_v56, %v11599_v24  ;;  %v4155_v24 = vadd.f32 %v4139_v13, %v4106_v48  ;;  %v2895_v16 = vpop.f32.mrf.mxu0  ;;  %v4237_v3 = vmul.f32 %v11560_v40, %v11824_v47 }
 0x2ac   : > { %v11808_v51 = vpop.f32.mrf.mxu3  ;;  %v4105_v62 = vadd.f32 %v4089_v30, %v4056_v6  ;;  %v4369_v37 = vadd.f32 %v11620_v43, %v4350_v31  ;;  %v11835_v30 = vld [vmem:[#allocation5 + $0xc8] sm:$0xff]  ;;  %v3460_v6 = vld [vmem:[#allocation2 + $0x618] ss:$2 sm:$0xff] }
 0x2ad   : > { %13552 = vst [vmem:[#allocation19_spill] sm:$0xff] %v11808_v51  ;;  %3720 = vmatmul.bf16.gmra.mxu1 %v3632_v52  ;;  %3571 = vmatmul.bf16.gmra.mxu0 %v3467_v45  ;;  %v4368_v52 = vadd.f32 %v11620_v43, %v4349_v22  ;;  %v4138_v45 = vmul.f32 %v11776_v25, %v11546_v19  ;;  %v3611_v31 = vld [vmem:[#allocation2 + $0x489] ss:$2 sm:$0xff]  ;;  %v3458_v22 = vld [vmem:[#allocation2 + $0x608] ss:$2 sm:$0xff] }
 0x2ae   : > { %4487 = vmatmul.bf16.gmra.mxu2 %v4412_v10  ;;  %v4204_v46 = vadd.f32 %v4188_v1, %v4155_v24  ;;  %v4385_v48 = vmax.f32 %v4369_v37, 0.0  ;;  %v4287_v24 = vmul.f32 %v11580_v50, %v11831_v58  ;;  %v4092_v1 = vmul.f32 %v11811_v32, %v11533_v53  ;;  %v3289_v51 = vld [vmem:[#allocation2 + $0x607] ss:$2 sm:$0xff] }
 0x2af   : > { %v4154_v21 = vadd.f32 %v4138_v45, %v4105_v62  ;;  %v4384_v13 = vmax.f32 %v4368_v52, 0.0  ;;  %v4043_v62 = vmul.f32 %v11789_v60, %v11519_v34  ;;  %v3993_v60 = vmul.f32 %v11776_v25, %v11508_v14 }
 0x2b0   : > { %v4254_v27 = vadd.f32 %v4238_v9, %v4204_v46  ;;  %v11848_v9 = vld [vmem:[#allocation5 + $0xc9] sm:$0xff]  ;;  %v4401_v52 = vmin.f32 %v4385_v48, 6.0 }
 0x2b1   : > { %3402 = vmatmul.bf16.gmra.mxu3 %v3298_v44  ;;  %v3213_v33 = vpop.f32.mrf.mxu2  ;;  %v3613_v44 = vld [vmem:[#allocation2 + $0x499] ss:$2 sm:$0xff]  ;;  %v4335_v25 = vmul.f32 %v11585_v0, %v11848_v9 }
 0x2b2   : > { %v11826_v39 = vadd.f32 %v3213_v33, %v3078_v59  ;;  %v3046_v56 = vpop.f32.mrf.mxu1  ;;  %v4010_v59 = vadd.f32 %v3994_v8, %v3945_v63  ;;  %v11850_v63 = vld [vmem:[#allocation5 + $0xd1] sm:$0xff]  ;;  %v3944_v33 = vmul.f32 %v11757_v5, %v11505_v35  ;;  %v4303_v45 = vadd.f32 %v4287_v24, %v4254_v27 }
 0x2b3   : > { %v3079_v7 = vadd.f32 %v3046_v56, %v11624_v17  ;;  %v4203_v17 = vadd.f32 %v4187_v49, %v4154_v21  ;;  %v10331_v8 = vld [vmem:[%s13543_s3 + $0x78] sm:$0xff]  ;;  %v3633_v46 = vpack.c.bf16 %v3613_v44, %v3611_v31  ;;  %v4400_v21 = vmin.f32 %v4384_v13, 6.0  ;;  %v11863_v26 = vpop.f32.mrf.mxu0 }
 0x2b4   : > { %v2725_v42 = vpop.f32.mrf.mxu3  ;;  %v4059_v56 = vadd.f32 %v4043_v62, %v4010_v59  ;;  %5273 = vmatpush.bf16.msrb.mxu0 %v10331_v8  ;;  %v4336_v48 = vmul.f32 %v11585_v0, %v11850_v63  ;;  %v4009_v59 = vadd.f32 %v3993_v60, %v3944_v33  ;;  %v11876_v24 = vld [vmem:[#allocation5 + $0xef] sm:$0xff]  ;;  %v3947_v8 = vmul.f32 %v11811_v32, %v11505_v35  ;;  %v11891_v32 = vld [vmem:[#allocation5 + $0xe7] sm:$0xff] }
 0x2b5   : > { %v2747_v10 = vadd.f32 %v2725_v42, %v11573_v38  ;;  %v4286_v38 = vmul.f32 %v11580_v50, %v11835_v30  ;;  %v3468_v42 = vpack.c.bf16 %v3460_v6, %v3458_v22  ;;  %v4413_v31 = vpack.c.bf16 %v4401_v52, %v4400_v21 }
 0x2b6   : > { %v4352_v44 = vadd.f32 %v4336_v48, %v4303_v45  ;;  %v4141_v22 = vmul.f32 %v11831_v58, %v11546_v19  ;;  %v3299_v6 = vpack.c.bf16 %v3291_v12, %v3289_v51  ;;  %v4240_v12 = vmul.f32 %v11560_v40, %v11876_v24 }
 0x2b7   : > { %v11844_v37 = vadd.f32 %v2895_v16, %v2747_v10  ;;  %v4253_v16 = vadd.f32 %v4237_v3, %v4203_v17  ;;  %v4042_v10 = vmul.f32 %v11778_v54, %v11519_v34  ;;  %v4108_v3 = vadd.f32 %v4092_v1, %v4059_v56 }
 0x2b8   : > { %v4091_v54 = vmul.f32 %v11824_v47, %v11533_v53  ;;  %v4371_v33 = vadd.f32 %v11620_v43, %v4352_v44  ;;  %v3996_v51 = vmul.f32 %v11831_v58, %v11508_v14  ;;  %v4140_v52 = vmul.f32 %v11835_v30, %v11546_v19 }
 0x2b9   : > { %v3215_v49 = vpop.f32.mrf.mxu2  ;;  %v4302_v13 = vadd.f32 %v4286_v38, %v4253_v16  ;;  %v4058_v17 = vadd.f32 %v4042_v10, %v4009_v59  ;;  %v4157_v62 = vadd.f32 %v4141_v22, %v4108_v3  ;;  %v4190_v38 = vmul.f32 %v11850_v63, %v11554_v29  ;;  %v11904_v22 = vld [vmem:[#allocation5 + $0xe8] sm:$0xff] }
 0x2ba   : > { %v11861_v15 = vadd.f32 %v3215_v49, %v3079_v7  ;;  %v3049_v5 = vpop.f32.mrf.mxu1  ;;  %v4189_v16 = vmul.f32 %v11848_v9, %v11554_v29  ;;  %v4239_v48 = vmul.f32 %v11560_v40, %v11891_v32  ;;  %v4012_v59 = vadd.f32 %v3996_v51, %v3947_v8 }
 0x2bb   : > { %v3080_v27 = vadd.f32 %v3049_v5, %v11663_v20  ;;  %v4351_v20 = vadd.f32 %v4335_v25, %v4302_v13  ;;  %v4107_v1 = vadd.f32 %v4091_v54, %v4058_v17  ;;  %v2900_v5 = vpop.f32.mrf.mxu0  ;;  %v4387_v25 = vmax.f32 %v4371_v33, 0.0  ;;  %v3617_v13 = vld [vmem:[#allocation2 + $0x4f9] ss:$2 sm:$0xff] }
 0x2bc   : > { %v11872_v7 = vpop.f32.mrf.mxu3  ;;  %v4094_v17 = vmul.f32 %v11876_v24, %v11533_v53  ;;  %v3946_v8 = vmul.f32 %v11824_v47, %v11505_v35  ;;  %v3995_v33 = vmul.f32 %v11835_v30, %v11508_v14 }
 0x2bd   : > { %3725 = vmatmul.bf16.gmra.mxu1 %v3633_v46  ;;  %3576 = vmatmul.bf16.gmra.mxu0 %v3468_v42  ;;  %v4370_v49 = vadd.f32 %v11620_v43, %v4351_v20  ;;  %v4206_v46 = vadd.f32 %v4190_v38, %v4157_v62  ;;  %v4156_v58 = vadd.f32 %v4140_v52, %v4107_v1  ;;  %v11899_v42 = vld [vmem:[#allocation5 + $0xf0] sm:$0xff]  ;;  %v10330_v1 = vld [vmem:[%s13543_s3 + $0x70] sm:$0xff] }
 0x2be   : > { %4492 = vmatmul.bf16.gmra.mxu2 %v4413_v31  ;;  %v3615_v31 = vld [vmem:[#allocation2 + $0x4e9] ss:$2 sm:$0xff]  ;;  %5274 = vmatpush.bf16.msrb.mxu0 %v10330_v1  ;;  %v4142_v1 = vmul.f32 %v11904_v22, %v11546_v19 }
 0x2bf   : > { %v4256_v3 = vadd.f32 %v4240_v12, %v4206_v46  ;;  %v4205_v54 = vadd.f32 %v4189_v16, %v4156_v58  ;;  %v4386_v44 = vmax.f32 %v4370_v49, 0.0  ;;  %v11914_v62 = vld [vmem:[#allocation5 + $0xe9] sm:$0xff]  ;;  %v3634_v52 = vpack.c.bf16 %v3617_v13, %v3615_v31 }
 0x2c0   : > { %v4288_v16 = vmul.f32 %v11580_v50, %v11904_v22  ;;  %v4337_v47 = vmul.f32 %v11585_v0, %v11914_v62 }
 0x2c1   : > { %3407 = vmatmul.bf16.gmra.mxu3 %v3299_v6  ;;  %v3218_v60 = vpop.f32.mrf.mxu2  ;;  %v4045_v6 = vmul.f32 %v11850_v63, %v11519_v34  ;;  %v4403_v63 = vmin.f32 %v4387_v25, 6.0  ;;  %v4255_v38 = vadd.f32 %v4239_v48, %v4205_v54  ;;  %v4402_v46 = vmin.f32 %v4386_v44, 6.0 }
 0x2c2   : > { %v11893_v45 = vadd.f32 %v3218_v60, %v3080_v27  ;;  %v3051_v56 = vpop.f32.mrf.mxu1  ;;  %v4093_v25 = vmul.f32 %v11891_v32, %v11533_v53 }
 0x2c3   : > { %v11897_v21 = vadd.f32 %v3051_v56, %v11685_v11  ;;  %v4289_v11 = vmul.f32 %v11580_v50, %v11899_v42  ;;  %v4061_v51 = vadd.f32 %v4045_v6, %v4012_v59  ;;  %v4044_v56 = vmul.f32 %v11848_v9, %v11519_v34 }
 0x2c4   : > { %v2730_v10 = vpop.f32.mrf.mxu3  ;;  %v4414_v48 = vpack.c.bf16 %v4403_v63, %v4402_v46  ;;  %v4143_v9 = vmul.f32 %v11899_v42, %v11546_v19 }
 0x2c5   : > { %v2749_v27 = vadd.f32 %v2730_v10, %v11642_v23  ;;  %v11916_v23 = vld [vmem:[#allocation5 + $0xf1] sm:$0xff]  ;;  %v4305_v12 = vadd.f32 %v4289_v11, %v4256_v3  ;;  %v4110_v58 = vadd.f32 %v4094_v17, %v4061_v51  ;;  %v4304_v3 = vadd.f32 %v4288_v16, %v4255_v38 }
 0x2c6   : > { %v4338_v30 = vmul.f32 %v11585_v0, %v11916_v23  ;;  %v4192_v11 = vmul.f32 %v11916_v23, %v11554_v29 }
 0x2c7   : > { %v11912_v20 = vadd.f32 %v2900_v5, %v2749_v27  ;;  %v4011_v5 = vadd.f32 %v3995_v33, %v3946_v8  ;;  %v11940_v27 = vld [vmem:[#allocation5 + $0x10f] sm:$0xff]  ;;  %v4353_v54 = vadd.f32 %v4337_v47, %v4304_v3  ;;  %v4159_v13 = vadd.f32 %v4143_v9, %v4110_v58  ;;  %v11949_v8 = vld [vmem:[#allocation5 + $0x107] sm:$0xff] }
 0x2c8   : > { %v4354_v59 = vadd.f32 %v4338_v30, %v4305_v12  ;;  %v4242_v6 = vmul.f32 %v11560_v40, %v11940_v27  ;;  %v4191_v12 = vmul.f32 %v11914_v62, %v11554_v29  ;;  %v3619_v47 = vld [vmem:[#allocation2 + $0x549] ss:$2 sm:$0xff]  ;;  %v3621_v30 = vld [vmem:[#allocation2 + $0x559] ss:$2 sm:$0xff] }
 0x2c9   : > { %v11925_v60 = vpop.f32.mrf.mxu2  ;;  %v4060_v31 = vadd.f32 %v4044_v56, %v4011_v5  ;;  %v4372_v38 = vadd.f32 %v11620_v43, %v4353_v54  ;;  %v4208_v51 = vadd.f32 %v4192_v11, %v4159_v13  ;;  %v11962_v5 = vld [vmem:[#allocation5 + $0x108] sm:$0xff]  ;;  %v11968_v3 = vld [vmem:[#allocation5 + $0x111] sm:$0xff] }
 0x2ca   : > { %v3054_v49 = vpop.f32.mrf.mxu1  ;;  %v4373_v44 = vadd.f32 %v11620_v43, %v4354_v59  ;;  %v10329_v59 = vld [vmem:[%s13543_s3 + $0x68] sm:$0xff] }
 0x2cb   : > { %v3082_v10 = vadd.f32 %v3054_v49, %v11723_v36  ;;  %v4109_v36 = vadd.f32 %v4093_v25, %v4060_v31  ;;  %v4241_v49 = vmul.f32 %v11560_v40, %v11949_v8  ;;  %v4258_v46 = vadd.f32 %v4242_v6, %v4208_v51  ;;  %5275 = vmatpush.bf16.msrb.mxu0 %v10329_v59 }
 0x2cc   : > { %v4389_v16 = vmax.f32 %v4373_v44, 0.0  ;;  %v4388_v58 = vmax.f32 %v4372_v38, 0.0  ;;  %v3635_v44 = vpack.c.bf16 %v3621_v30, %v3619_v47  ;;  %v4340_v38 = vmul.f32 %v11585_v0, %v11968_v3 }
 0x2cd   : > { %3730 = vmatmul.bf16.gmra.mxu1 %v3634_v52  ;;  %v11958_v52 = vld [vmem:[#allocation5 + $0x110] sm:$0xff]  ;;  %v4158_v56 = vadd.f32 %v4142_v1, %v4109_v36  ;;  %v11975_v36 = vpop.f32.mrf.mxu3 }
 0x2ce   : > { %4497 = vmatmul.bf16.gmra.mxu2 %v4414_v48  ;;  %v4291_v25 = vmul.f32 %v11580_v50, %v11958_v52  ;;  %v11966_v48 = vld [vmem:[#allocation5 + $0x109] sm:$0xff]  ;;  %v4405_v9 = vmin.f32 %v4389_v16, 6.0  ;;  %13553 = vst [vmem:[#allocation20_spill] sm:$0xff] %v11975_v36  ;;  %v4404_v6 = vmin.f32 %v4388_v58, 6.0 }
 0x2cf   : > { %v4339_v1 = vmul.f32 %v11585_v0, %v11966_v48 }
 0x2d0   : > { %v4307_v31 = vadd.f32 %v4291_v25, %v4258_v46  ;;  %v4415_v51 = vpack.c.bf16 %v4405_v9, %v4404_v6  ;;  %v3625_v9 = vld [vmem:[#allocation2 + $0x5b9] ss:$2 sm:$0xff] }
 0x2d1   : > { %v3223_v17 = vpop.f32.mrf.mxu2 }
 0x2d2   : > { %v11951_v33 = vadd.f32 %v3223_v17, %v3082_v10  ;;  %v11953_v63 = vpop.f32.mrf.mxu1  ;;  %v4207_v10 = vadd.f32 %v4191_v12, %v4158_v56  ;;  %v4290_v17 = vmul.f32 %v11580_v50, %v11962_v5  ;;  %v4356_v56 = vadd.f32 %v4340_v38, %v4307_v31  ;;  %v10328_v31 = vld [vmem:[%s13543_s3 + $0x60] sm:$0xff] }
 0x2d3   : > { %5276 = vmatpush.bf16.msrb.mxu0 %v10328_v31 }
 0x2d4   : > { %v4257_v54 = vadd.f32 %v4241_v49, %v4207_v10  ;;  %v11984_v49 = vpop.f32.mrf.mxu0  ;;  %v4375_v47 = vadd.f32 %v11620_v43, %v4356_v56 }
 0x2d5   : > { %13554 = vst [vmem:[#allocation21_spill] sm:$0xff] %v11984_v49  ;;  %v3373_v0 = vpop.f32.mrf.mxu3 }
 0x2d6   : > { %v4306_v16 = vadd.f32 %v4290_v17, %v4257_v54  ;;  %v4391_v59 = vmax.f32 %v4375_v47, 0.0 }
 0x2d8   : > { %v4355_v46 = vadd.f32 %v4339_v1, %v4306_v16 }
 0x2d9   : > { %v11973_v13 = vpop.f32.mrf.mxu2 }
 0x2da   : > { %v3059_v11 = vpop.f32.mrf.mxu1  ;;  %v4374_v25 = vadd.f32 %v11620_v43, %v4355_v46 }
 0x2db   : > { %v3084_v12 = vadd.f32 %v3059_v11, %v11787_v2  ;;  %v3623_v2 = vld [vmem:[#allocation2 + $0x5a9] ss:$2 sm:$0xff]  ;;  %v4407_v11 = vmin.f32 %v4391_v59, 6.0  ;;  %v3629_v59 = vld [vmem:[#allocation2 + $0x619] ss:$2 sm:$0xff] }
 0x2dc   : > { %v4390_v54 = vmax.f32 %v4374_v25, 0.0  ;;  %v3636_v17 = vpack.c.bf16 %v3625_v9, %v3623_v2  ;;  %v3627_v25 = vld [vmem:[#allocation2 + $0x609] ss:$2 sm:$0xff] }
 0x2dd   : > { %3735 = vmatmul.bf16.gmra.mxu1 %v3635_v44  ;;  %v3542_v44 = vpop.f32.mrf.mxu0 }
 0x2de   : > { %4502 = vmatmul.bf16.gmra.mxu2 %v4415_v51  ;;  %v4406_v38 = vmin.f32 %v4390_v54, 6.0  ;;  %v3375_v51 = vpop.f32.mrf.mxu3 }
 0x2e0   : > { %v4416_v43 = vpack.c.bf16 %v4407_v11, %v4406_v38  ;;  %v10326_v11 = vld [vmem:[%s13543_s3 + $0x50] sm:$0xff] }
 0x2e1   : > { %v3228_v30 = vpop.f32.mrf.mxu2 }
 0x2e2   : > { %v11987_v58 = vadd.f32 %v3228_v30, %v3084_v12  ;;  %v11989_v10 = vpop.f32.mrf.mxu1  ;;  %v10327_v30 = vld [vmem:[%s13543_s3 + $0x58] sm:$0xff] }
 0x2e3   : > { %5277 = vmatpush.bf16.msrb.mxu0 %v10327_v30  ;;  %v3413_v30 = vadd.f32 %v3373_v0, %v11703_v55  ;;  %v3948_v0 = vmul.f32 %v11891_v32, %v11505_v35 }
 0x2e5   : > { %v3544_v56 = vpop.f32.mrf.mxu0 }
 0x2e6   : > { %v3378_v2 = vpop.f32.mrf.mxu3 }
 0x2e7   : > { %5278 = vmatpush.bf16.msrb.mxu0 %v10326_v11 }
 0x2e9   : > { %v11995_v6 = vpop.f32.mrf.mxu2 }
 0x2ea   : > { %v3064_v1 = vpop.f32.mrf.mxu1 }
 0x2eb   : > { %v3086_v12 = vadd.f32 %v3064_v1, %v11844_v37  ;;  %v3637_v37 = vpack.c.bf16 %v3629_v59, %v3627_v25  ;;  %v10325_v1 = vld [vmem:[%s13543_s3 + $0x48] sm:$0xff]  ;;  %v3582_v59 = vadd.f32 %v3542_v44, %v3413_v30  ;;  %v3997_v44 = vmul.f32 %v11904_v22, %v11508_v14 }
 0x2ec   : > { %5279 = vmatpush.bf16.msrb.mxu0 %v10325_v1  ;;  %v3949_v30 = vmul.f32 %v11876_v24, %v11505_v35  ;;  %v12055_v24 = vld [vmem:[%s13544_s4] ss:$0 sm:$0xff] }
 0x2ed   : > { %3740 = vmatmul.bf16.gmra.mxu1 %v3636_v17  ;;  %v3547_v17 = vpop.f32.mrf.mxu0  ;;  %v4013_v22 = vadd.f32 %v3997_v44, %v3948_v0  ;;  %v4096_v0 = vmul.f32 %v11940_v27, %v11533_v53 }
 0x2ee   : > { %4507 = vmatmul.bf16.gmra.mxu2 %v4416_v43 }
 0x2f1   : > { %v3233_v16 = vpop.f32.mrf.mxu2 }
 0x2f2   : > { %v11998_v46 = vadd.f32 %v3233_v16, %v3086_v12  ;;  %v12000_v47 = vpop.f32.mrf.mxu1  ;;  %v3380_v12 = vpop.f32.mrf.mxu3 }
 0x2f3   : > { %13555 = vst [vmem:[#allocation22_spill] sm:$0xff] %v12000_v47 }
 0x2f5   : > { %v12022_v25 = vpop.f32.mrf.mxu0 }
 0x2f9   : > { %v12005_v9 = vpop.f32.mrf.mxu2 }
 0x2fa   : > { %13556 = vst [vmem:[#allocation23_spill] sm:$0xff] %v12005_v9  ;;  %v3069_v54 = vpop.f32.mrf.mxu1  ;;  %v12026_v1 = vpop.f32.mrf.mxu3 }
 0x2fb   : > { %v3088_v31 = vadd.f32 %v3069_v54, %v11912_v20  ;;  %v10324_v20 = vld [vmem:[%s13543_s3 + $0x40] sm:$0xff] }
 0x2fc   : > { %5280 = vmatpush.bf16.msrb.mxu0 %v10324_v20 }
 0x2fd   : > { %3745 = vmatmul.bf16.gmra.mxu1 %v3637_v37  ;;  %v12039_v20 = vpop.f32.mrf.mxu0 }
 0x301   : > { %v3238_v38 = vpop.f32.mrf.mxu2 }
 0x302   : > { %v12014_v43 = vadd.f32 %v3238_v38, %v3088_v31  ;;  %v12016_v16 = vpop.f32.mrf.mxu1  ;;  %v3414_v31 = vadd.f32 %v3375_v51, %v11737_v4  ;;  %v12032_v38 = vld [vmem:[%s13542_s2] ss:$0 sm:$0xff]  ;;  %v3998_v4 = vmul.f32 %v11899_v42, %v11508_v14 }
 0x303   : > { %13558 = vst [vmem:[#allocation25_spill] sm:$0xff] %v12016_v16 }
 0x304   : > { %13557 = vst [vmem:[#allocation24_spill] sm:$0xff] %v12014_v43  ;;  %v3583_v51 = vadd.f32 %v3544_v56, %v3414_v31  ;;  %v4014_v42 = vadd.f32 %v3998_v4, %v3949_v30  ;;  %v3415_v56 = vadd.f32 %v3378_v2, %v11770_v57  ;;  %v4144_v2 = vmul.f32 %v11962_v5, %v11546_v19 }
 0x305   : > { %v4193_v4 = vmul.f32 %v11966_v48, %v11554_v29 }
 0x306   : > { %v3584_v36 = vadd.f32 %v3547_v17, %v3415_v56  ;;  %v10487_v56 = vld [vmem:[#allocation5 + $0x28] sm:$0xff] }
 0x309   : > { %v12024_v37 = vpop.f32.mrf.mxu2 }
 0x30a   : > { %13559 = vst [vmem:[#allocation26_spill] sm:$0xff] %v12024_v37  ;;  %v3711_v54 = vpop.f32.mrf.mxu1  ;;  %v4095_v37 = vmul.f32 %v11949_v8, %v11533_v53 }
 0x30b   : > { %v3751_v11 = vadd.f32 %v3711_v54, %v3582_v59 }
 0x30d   : > { %v3767_v16 = vadd.f32 %v12032_v38, %v3751_v11 }
 0x30f   : > { %v3783_v55 = vmax.f32 %v3767_v16, 0.0  ;;  %v4046_v16 = vmul.f32 %v11914_v62, %v11519_v34  ;;  %v12059_v62 = vpop.f32.mrf.mxu3 }
 0x311   : > { %v12045_v59 = vmin.f32 %v3783_v55, 6.0  ;;  %v4478_v54 = vpop.f32.mrf.mxu2  ;;  %v4062_v55 = vadd.f32 %v4046_v16, %v4013_v22  ;;  %v12072_v16 = vpop.f32.mrf.mxu0 }
 0x312   : > { %v3713_v11 = vpop.f32.mrf.mxu1  ;;  %v4479_v43 = vadd.f32 %v12055_v24, %v4478_v54 }
 0x313   : > { %3881 = vst [vmem:[#allocation5 + $0x128] sm:$0xff] %v12045_v59  ;;  %v3752_v32 = vadd.f32 %v3713_v11, %v3583_v51  ;;  %v4047_v51 = vmul.f32 %v11916_v23, %v11519_v34  ;;  %v4111_v11 = vadd.f32 %v4095_v37, %v4062_v55  ;;  %v10488_v55 = vld [vmem:[#allocation5 + $0x30] sm:$0xff] }
 0x315   : > { %v3768_v31 = vadd.f32 %v12032_v38, %v3752_v32  ;;  %v4063_v49 = vadd.f32 %v4047_v51, %v4014_v42  ;;  %v4160_v54 = vadd.f32 %v4144_v2, %v4111_v11  ;;  %v4631_v11 = vmul.f32 %v11962_v5, %v11508_v14 }
 0x317   : > { %v3784_v44 = vmax.f32 %v3768_v31, 0.0  ;;  %v4112_v22 = vadd.f32 %v4096_v0, %v4063_v49  ;;  %v4534_v31 = vadd.f32 %v10487_v56, %v4479_v43  ;;  %v4209_v0 = vadd.f32 %v4193_v4, %v4160_v54 }
 0x319   : > { %v12066_v30 = vmin.f32 %v3784_v44, 6.0  ;;  %v4480_v57 = vpop.f32.mrf.mxu2  ;;  %v4145_v44 = vmul.f32 %v11958_v52, %v11546_v19 }
 0x31a   : > { %v4481_v23 = vadd.f32 %v12055_v24, %v4480_v57  ;;  %v3716_v32 = vpop.f32.mrf.mxu1  ;;  %v12075_v37 = vld [vmem:[#allocation5 + $0x127] sm:$0xff]  ;;  %v3416_v57 = vadd.f32 %v3380_v12, %v11801_v41  ;;  %v4584_v41 = vmul.f32 %v11940_v27, %v11505_v35  ;;  %v4632_v12 = vmul.f32 %v11958_v52, %v11508_v14 }
 0x31b   : > { %3882 = vst [vmem:[#allocation5 + $0x130] sm:$0xff] %v12066_v30  ;;  %v3753_v17 = vadd.f32 %v3716_v32, %v3584_v36  ;;  %v4243_v42 = vmul.f32 %v11560_v40, %v12075_v37  ;;  %v4161_v47 = vadd.f32 %v4145_v44, %v4112_v22  ;;  %v4583_v36 = vmul.f32 %v11949_v8, %v11505_v35  ;;  %v12088_v32 = vpop.f32.mrf.mxu3  ;;  %v12121_v44 = vpop.f32.mrf.mxu0 }
 0x31c   : > { %v4535_v51 = vadd.f32 %v10488_v55, %v4481_v23  ;;  %v4194_v23 = vmul.f32 %v11968_v3, %v11554_v29  ;;  %v4679_v8 = vmul.f32 %v11966_v48, %v11519_v34  ;;  %v3585_v4 = vadd.f32 %v12022_v25, %v3416_v57  ;;  %v12115_v55 = vld [vmem:[%s13545_s5 + $0x8] ss:$0 sm:$0xff] }
 0x31d   : > { %v3769_v49 = vadd.f32 %v12032_v38, %v3753_v17  ;;  %v4259_v43 = vadd.f32 %v4243_v42, %v4209_v0  ;;  %v4647_v27 = vadd.f32 %v4631_v11, %v4583_v36  ;;  %v4728_v52 = vmul.f32 %v12075_v37, %v11533_v53 }
 0x31e   : > { %v5187_v9 = vpack.c.bf16 %v4535_v51, %v4534_v31  ;;  %v4210_v54 = vadd.f32 %v4194_v23, %v4161_v47  ;;  %v3417_v51 = vadd.f32 %v12026_v1, %v11826_v39  ;;  %v4680_v23 = vmul.f32 %v11968_v3, %v11519_v34 }
 0x31f   : > { %v3785_v2 = vmax.f32 %v3769_v49, 0.0  ;;  %v4648_v49 = vadd.f32 %v4632_v12, %v4584_v41  ;;  %v4695_v0 = vadd.f32 %v4679_v8, %v4647_v27  ;;  %v12137_v12 = vld [vmem:[%s13546_s6] ss:$0 sm:$0xff]  ;;  %v4776_v3 = vmul.f32 %v11546_v19, %v12045_v59 }
 0x320   : > { %5281 = vmatmul.bf16.vlgmr.msrb.gmra.mxu0 %v5187_v9  ;;  %v4292_v9 = vmul.f32 %v11580_v50, %v12045_v59 }
 0x321   : > { %v12099_v5 = vmin.f32 %v3785_v2, 6.0  ;;  %v4483_v22 = vpop.f32.mrf.mxu2  ;;  %v4293_v2 = vmul.f32 %v11580_v50, %v12066_v30  ;;  %v4744_v39 = vadd.f32 %v4728_v52, %v4695_v0  ;;  %v3586_v52 = vadd.f32 %v12039_v20, %v3417_v51  ;;  %v10491_v51 = vld [vmem:[#allocation5 + $0x48] sm:$0xff] }
 0x322   : > { %v3718_v17 = vpop.f32.mrf.mxu1  ;;  %v12103_v42 = vld [vmem:[#allocation5 + $0x12f] sm:$0xff]  ;;  %v4308_v31 = vadd.f32 %v4292_v9, %v4259_v43 }
 0x323   : > { %v12105_v56 = vld [vmem:[#allocation5 + $0x129] sm:$0xff]  ;;  %3883 = vst [vmem:[#allocation5 + $0x148] sm:$0xff] %v12099_v5  ;;  %v3754_v48 = vadd.f32 %v3718_v17, %v3585_v4  ;;  %v4244_v25 = vmul.f32 %v11560_v40, %v12103_v42  ;;  %v12123_v57 = vld [vmem:[#allocation5 + $0x131] sm:$0xff]  ;;  %v4729_v4 = vmul.f32 %v12103_v42, %v11533_v53  ;;  %v4484_v17 = vadd.f32 %v12055_v24, %v4483_v22 }
 0x324   : > { %v4341_v47 = vmul.f32 %v12115_v55, %v12105_v56  ;;  %v4342_v41 = vmul.f32 %v12115_v55, %v12123_v57  ;;  %v4824_v27 = vmul.f32 %v12105_v56, %v11554_v29  ;;  %v4792_v22 = vadd.f32 %v4776_v3, %v4744_v39 }
 0x325   : > { %v3770_v36 = vadd.f32 %v12032_v38, %v3754_v48  ;;  %v4260_v11 = vadd.f32 %v4244_v25, %v4210_v54  ;;  %v4696_v54 = vadd.f32 %v4680_v23, %v4648_v49  ;;  %v3418_v39 = vadd.f32 %v12059_v62, %v11861_v15 }
 0x326   : > { %v4357_v43 = vadd.f32 %v4341_v47, %v4308_v31  ;;  %v12148_v47 = vpop.f32.mrf.mxu3  ;;  %v4825_v15 = vmul.f32 %v12123_v57, %v11554_v29  ;;  %v4921_v62 = vmul.f32 %v11580_v50, %v12099_v5 }
 0x327   : > { %v3786_v1 = vmax.f32 %v3770_v36, 0.0  ;;  %v4309_v9 = vadd.f32 %v4293_v2, %v4260_v11  ;;  %v4745_v11 = vadd.f32 %v4729_v4, %v4696_v54  ;;  %v4840_v4 = vadd.f32 %v4824_v27, %v4792_v22 }
 0x328   : > { %v4376_v8 = vadd.f32 %v12137_v12, %v4357_v43  ;;  %v4633_v27 = vmul.f32 %v11508_v14, %v12045_v59  ;;  %v4681_v22 = vmul.f32 %v12105_v56, %v11519_v34  ;;  %v4634_v59 = vmul.f32 %v11508_v14, %v12066_v30 }
 0x329   : > { %v12146_v48 = vmin.f32 %v3786_v1, 6.0  ;;  %v4485_v25 = vpop.f32.mrf.mxu2  ;;  %v4358_v31 = vadd.f32 %v4342_v41, %v4309_v9  ;;  %v4536_v1 = vadd.f32 %v10491_v51, %v4484_v17  ;;  %v10492_v9 = vld [vmem:[#allocation5 + $0x50] sm:$0xff]  ;;  %v4585_v17 = vmul.f32 %v12075_v37, %v11505_v35 }
 0x32a   : > { %v4486_v0 = vadd.f32 %v12055_v24, %v4485_v25  ;;  %v3721_v36 = vpop.f32.mrf.mxu1  ;;  %v12151_v49 = vld [vmem:[#allocation5 + $0x147] sm:$0xff]  ;;  %v4392_v23 = vmax.f32 %v4376_v8, 0.0  ;;  %v4777_v25 = vmul.f32 %v11546_v19, %v12066_v30  ;;  %v3587_v37 = vadd.f32 %v12072_v16, %v3418_v39 }
 0x32b   : > { %3884 = vst [vmem:[#allocation5 + $0x150] sm:$0xff] %v12146_v48  ;;  %v3755_v2 = vadd.f32 %v3721_v36, %v3586_v52  ;;  %v4377_v43 = vadd.f32 %v12137_v12, %v4358_v31  ;;  %v4873_v20 = vmul.f32 %v12151_v49, %v11560_v40  ;;  %v12162_v52 = vpop.f32.mrf.mxu0  ;;  %v4730_v56 = vmul.f32 %v12151_v49, %v11533_v53 }
 0x32c   : > { %v4537_v41 = vadd.f32 %v10492_v9, %v4486_v0  ;;  %v4793_v31 = vadd.f32 %v4777_v25, %v4745_v11  ;;  %v4408_v0 = vmin.f32 %v4392_v23, 6.0  ;;  %v4586_v11 = vmul.f32 %v12103_v42, %v11505_v35 }
 0x32d   : > { %v3771_v54 = vadd.f32 %v12032_v38, %v3755_v2  ;;  %v4393_v3 = vmax.f32 %v4377_v43, 0.0  ;;  %v4889_v36 = vadd.f32 %v4873_v20, %v4840_v4  ;;  %v4649_v42 = vadd.f32 %v4633_v27, %v4585_v17 }
 0x32e   : > { %v5188_v8 = vpack.c.bf16 %v4537_v41, %v4536_v1  ;;  %v4841_v1 = vadd.f32 %v4825_v15, %v4793_v31  ;;  %v4650_v31 = vadd.f32 %v4634_v59, %v4586_v11  ;;  %v4682_v27 = vmul.f32 %v12123_v57, %v11519_v34 }
 0x32f   : > { %v3787_v51 = vmax.f32 %v3771_v54, 0.0  ;;  %v4409_v9 = vmin.f32 %v4393_v3, 6.0  ;;  %v4937_v25 = vadd.f32 %v4921_v62, %v4889_v36  ;;  %v3419_v54 = vadd.f32 %v12088_v32, %v11893_v45  ;;  %v12194_v3 = vpop.f32.mrf.mxu3 }
 0x330   : > { %5286 = vmatmul.bf16.gmra.mxu0 %v5188_v8  ;;  %v4697_v36 = vadd.f32 %v4681_v22, %v4649_v42  ;;  %v4698_v59 = vadd.f32 %v4682_v27, %v4650_v31  ;;  %v10494_v27 = vld [vmem:[#allocation5 + $0x70] sm:$0xff] }
 0x331   : > { %v12177_v2 = vmin.f32 %v3787_v51, 6.0  ;;  %v4488_v43 = vpop.f32.mrf.mxu2  ;;  %v4417_v23 = vpack.c.bf16 %v4409_v9, %v4408_v0  ;;  %v4922_v0 = vmul.f32 %v11580_v50, %v12146_v48 }
 0x332   : > { %v3723_v20 = vpop.f32.mrf.mxu1  ;;  %v12181_v41 = vld [vmem:[#allocation5 + $0x14f] sm:$0xff]  ;;  %v4746_v45 = vadd.f32 %v4730_v56, %v4697_v36 }
 0x333   : > { %v12183_v4 = vld [vmem:[#allocation5 + $0x149] sm:$0xff]  ;;  %3885 = vst [vmem:[#allocation5 + $0x168] sm:$0xff] %v12177_v2  ;;  %v3756_v16 = vadd.f32 %v3723_v20, %v3587_v37  ;;  %4512 = vmatmul.bf16.gmra.mxu2 %v4417_v23  ;;  %v4874_v39 = vmul.f32 %v12181_v41, %v11560_v40  ;;  %v12196_v8 = vld [vmem:[#allocation5 + $0x151] sm:$0xff]  ;;  %v4731_v15 = vmul.f32 %v12181_v41, %v11533_v53  ;;  %v12208_v37 = vpop.f32.mrf.mxu0 }
 0x334   : > { %v4969_v30 = vmul.f32 %v12115_v55, %v12183_v4  ;;  %v4970_v11 = vmul.f32 %v12115_v55, %v12196_v8  ;;  %v4489_v23 = vadd.f32 %v12055_v24, %v4488_v43  ;;  %v4778_v20 = vmul.f32 %v11546_v19, %v12099_v5 }
 0x335   : > { %v3772_v17 = vadd.f32 %v12032_v38, %v3756_v16  ;;  %v4890_v51 = vadd.f32 %v4874_v39, %v4841_v1  ;;  %v4826_v57 = vmul.f32 %v12183_v4, %v11554_v29  ;;  %v3588_v1 = vadd.f32 %v12121_v44, %v3419_v54 }
 0x336   : > { %v4985_v9 = vadd.f32 %v4969_v30, %v4937_v25  ;;  %v3250_v16 = vadd.f32 %v11925_v60, %v11897_v21  ;;  %v4747_v43 = vadd.f32 %v4731_v15, %v4698_v59  ;;  %v4794_v31 = vadd.f32 %v4778_v20, %v4746_v45 }
 0x337   : > { %v3788_v32 = vmax.f32 %v3772_v17, 0.0  ;;  %v4938_v62 = vadd.f32 %v4922_v0, %v4890_v51  ;;  %v10493_v0 = vld [vmem:[#allocation5 + $0x68] sm:$0xff]  ;;  %v4779_v60 = vmul.f32 %v11546_v19, %v12146_v48  ;;  %v2744_v45 = vadd.f32 %v11744_v61, %v11502_v18 }
 0x338   : > { %v5001_v22 = vadd.f32 %v12137_v12, %v4985_v9  ;;  %v4538_v9 = vadd.f32 %v10493_v0, %v4489_v23  ;;  %v4842_v15 = vadd.f32 %v4826_v57, %v4794_v31  ;;  %v4587_v23 = vmul.f32 %v12151_v49, %v11505_v35 }
 0x339   : > { %v12216_v25 = vmin.f32 %v3788_v32, 6.0  ;;  %v4490_v42 = vpop.f32.mrf.mxu2  ;;  %v4986_v56 = vadd.f32 %v4970_v11, %v4938_v62  ;;  %v3420_v32 = vadd.f32 %v12148_v47, %v3250_v16  ;;  %v4795_v20 = vadd.f32 %v4779_v60, %v4747_v43 }
 0x33a   : > { %v4491_v39 = vadd.f32 %v12055_v24, %v4490_v42  ;;  %v3726_v30 = vpop.f32.mrf.mxu1  ;;  %v12221_v36 = vld [vmem:[#allocation5 + $0x167] sm:$0xff]  ;;  %v5017_v44 = vmax.f32 %v5001_v22, 0.0  ;;  %v12233_v22 = vpop.f32.mrf.mxu3  ;;  %v4635_v57 = vmul.f32 %v11508_v14, %v12099_v5  ;;  %v4827_v18 = vmul.f32 %v12196_v8, %v11554_v29 }
 0x33b   : > { %3886 = vst [vmem:[#allocation5 + $0x170] sm:$0xff] %v12216_v25  ;;  %v3757_v17 = vadd.f32 %v3726_v30, %v3588_v1  ;;  %v5002_v51 = vadd.f32 %v12137_v12, %v4986_v56  ;;  %v4875_v54 = vmul.f32 %v12221_v36, %v11560_v40  ;;  %v4923_v61 = vmul.f32 %v11580_v50, %v12177_v2 }
 0x33c   : > { %v4539_v21 = vadd.f32 %v10494_v27, %v4491_v39  ;;  %v5033_v56 = vmin.f32 %v5017_v44, 6.0  ;;  %v4588_v47 = vmul.f32 %v12181_v41, %v11505_v35  ;;  %v4683_v16 = vmul.f32 %v12183_v4, %v11519_v34 }
 0x33d   : > { %v3773_v62 = vadd.f32 %v12032_v38, %v3757_v17  ;;  %v5018_v11 = vmax.f32 %v5002_v51, 0.0  ;;  %v4891_v1 = vadd.f32 %v4875_v54, %v4842_v15  ;;  %v3589_v49 = vadd.f32 %v12162_v52, %v3420_v32  ;;  %v12252_v17 = vpop.f32.mrf.mxu0 }
 0x33e   : > { %v5189_v59 = vpack.c.bf16 %v4539_v21, %v4538_v9  ;;  %v4636_v5 = vmul.f32 %v11508_v14, %v12146_v48  ;;  %v4843_v44 = vadd.f32 %v4827_v18, %v4795_v20  ;;  %v4651_v9 = vadd.f32 %v4635_v57, %v4587_v23 }
 0x33f   : > { %v3789_v42 = vmax.f32 %v3773_v62, 0.0  ;;  %v5034_v39 = vmin.f32 %v5018_v11, 6.0  ;;  %v4939_v0 = vadd.f32 %v4923_v61, %v4891_v1  ;;  %v4732_v52 = vmul.f32 %v12221_v36, %v11533_v53 }
 0x340   : > { %5291 = vmatmul.bf16.gmra.mxu0 %v5189_v59  ;;  %v2914_v21 = vadd.f32 %v11705_v28, %v2744_v45  ;;  %v3421_v60 = vadd.f32 %v12194_v3, %v11951_v33  ;;  %v4652_v32 = vadd.f32 %v4636_v5, %v4588_v47  ;;  %v4699_v62 = vadd.f32 %v4683_v16, %v4651_v9 }
 0x341   : > { %v12248_v30 = vmin.f32 %v3789_v42, 6.0  ;;  %v4493_v43 = vpop.f32.mrf.mxu2  ;;  %v5049_v31 = vpack.c.bf16 %v5034_v39, %v5033_v56  ;;  %v4924_v20 = vmul.f32 %v11580_v50, %v12216_v25  ;;  %v4684_v42 = vmul.f32 %v12196_v8, %v11519_v34 }
 0x342   : > { %v3728_v51 = vpop.f32.mrf.mxu1  ;;  %v12254_v54 = vld [vmem:[#allocation5 + $0x16f] sm:$0xff]  ;;  %v3083_v23 = vadd.f32 %v11953_v63, %v2914_v21  ;;  %v4748_v33 = vadd.f32 %v4732_v52, %v4699_v62  ;;  %v12281_v57 = vpop.f32.mrf.mxu3  ;;  %v4494_v18 = vadd.f32 %v12055_v24, %v4493_v43  ;;  %v4780_v63 = vmul.f32 %v11546_v19, %v12177_v2 }
 0x343   : > { %v12256_v41 = vld [vmem:[#allocation5 + $0x169] sm:$0xff]  ;;  %3887 = vst [vmem:[#allocation5 + $0x188] sm:$0xff] %v12248_v30  ;;  %v3758_v4 = vadd.f32 %v3728_v51, %v3589_v49  ;;  %5065 = vmatmul.bf16.vlgmr.msrb.gmra.mxu3 %v5049_v31  ;;  %v4876_v48 = vmul.f32 %v12254_v54, %v11560_v40  ;;  %v12268_v15 = vld [vmem:[#allocation5 + $0x171] sm:$0xff]  ;;  %v4733_v28 = vmul.f32 %v12254_v54, %v11533_v53 }
 0x344   : > { %v4971_v27 = vmul.f32 %v12115_v55, %v12256_v41  ;;  %v4972_v56 = vmul.f32 %v12115_v55, %v12268_v15  ;;  %v4700_v61 = vadd.f32 %v4684_v42, %v4652_v32  ;;  %v4828_v8 = vmul.f32 %v12256_v41, %v11554_v29  ;;  %v10495_v21 = vld [vmem:[#allocation5 + $0x88] sm:$0xff] }
 0x345   : > { %v3774_v11 = vadd.f32 %v12032_v38, %v3758_v4  ;;  %v4892_v59 = vadd.f32 %v4876_v48, %v4843_v44  ;;  %v3590_v47 = vadd.f32 %v12208_v37, %v3421_v60  ;;  %v3252_v5 = vadd.f32 %v11973_v13, %v3083_v23  ;;  %v10496_v60 = vld [vmem:[#allocation5 + $0x90] sm:$0xff] }
 0x346   : > { %v4987_v1 = vadd.f32 %v4971_v27, %v4939_v0  ;;  %v4749_v0 = vadd.f32 %v4733_v28, %v4700_v61  ;;  %v4796_v43 = vadd.f32 %v4780_v63, %v4748_v33  ;;  %v12299_v27 = vpop.f32.mrf.mxu0  ;;  %v4540_v13 = vadd.f32 %v10495_v21, %v4494_v18  ;;  %v13562_v21 = vld [vmem:[#allocation18_spill] sm:$0xff] }
 0x347   : > { %v3790_v3 = vmax.f32 %v3774_v11, 0.0  ;;  %v4940_v45 = vadd.f32 %v4924_v20, %v4892_v59  ;;  %v4781_v62 = vmul.f32 %v11546_v19, %v12216_v25  ;;  %v13560_v59 = vld [vmem:[#allocation15_spill] sm:$0xff]  ;;  %v3422_v23 = vadd.f32 %v12233_v22, %v3252_v5 }
 0x348   : > { %v5003_v39 = vadd.f32 %v12137_v12, %v4987_v1  ;;  %v4844_v11 = vadd.f32 %v4828_v8, %v4796_v43  ;;  %v13561_v20 = vld [vmem:[#allocation19_spill] sm:$0xff]  ;;  %v4637_v63 = vmul.f32 %v11508_v14, %v12177_v2  ;;  %v4829_v8 = vmul.f32 %v12268_v15, %v11554_v29 }
 0x349   : > { %v12289_v16 = vmin.f32 %v3790_v3, 6.0  ;;  %v4495_v49 = vpop.f32.mrf.mxu2  ;;  %v4988_v31 = vadd.f32 %v4972_v56, %v4940_v45  ;;  %v2746_v1 = vadd.f32 %v13561_v20, %v13560_v59  ;;  %v4797_v3 = vadd.f32 %v4781_v62, %v4749_v0 }
 0x34a   : > { %v4496_v51 = vadd.f32 %v12055_v24, %v4495_v49  ;;  %v3731_v44 = vpop.f32.mrf.mxu1  ;;  %v12293_v9 = vld [vmem:[#allocation5 + $0x187] sm:$0xff]  ;;  %v5019_v48 = vmax.f32 %v5003_v39, 0.0  ;;  %v4589_v56 = vmul.f32 %v12221_v36, %v11505_v35  ;;  %v4925_v22 = vmul.f32 %v11580_v50, %v12248_v30 }
 0x34b   : > { %3888 = vst [vmem:[#allocation5 + $0x190] sm:$0xff] %v12289_v16  ;;  %v3759_v52 = vadd.f32 %v3731_v44, %v3590_v47  ;;  %v5004_v4 = vadd.f32 %v12137_v12, %v4988_v31  ;;  %v4877_v37 = vmul.f32 %v12293_v9, %v11560_v40  ;;  %v4590_v47 = vmul.f32 %v12254_v54, %v11505_v35  ;;  %v3400_v44 = vpop.f32.mrf.mxu3 }
 0x34c   : > { %v4541_v32 = vadd.f32 %v10496_v60, %v4496_v51  ;;  %v5035_v18 = vmin.f32 %v5019_v48, 6.0  ;;  %v4685_v49 = vmul.f32 %v12256_v41, %v11519_v34  ;;  %v3591_v36 = vadd.f32 %v12252_v17, %v3422_v23 }
 0x34d   : > { %v3775_v42 = vadd.f32 %v12032_v38, %v3759_v52  ;;  %v5020_v28 = vmax.f32 %v5004_v4, 0.0  ;;  %v4893_v45 = vadd.f32 %v4877_v37, %v4844_v11  ;;  %v4638_v2 = vmul.f32 %v11508_v14, %v12216_v25 }
 0x34e   : > { %v5190_v33 = vpack.c.bf16 %v4541_v32, %v4540_v13  ;;  %v4845_v43 = vadd.f32 %v4829_v8, %v4797_v3  ;;  %v4653_v54 = vadd.f32 %v4637_v63, %v4589_v56  ;;  %v4734_v41 = vmul.f32 %v12293_v9, %v11533_v53 }
 0x34f   : > { %v3791_v39 = vmax.f32 %v3775_v42, 0.0  ;;  %v5036_v61 = vmin.f32 %v5020_v28, 6.0  ;;  %v4941_v4 = vadd.f32 %v4925_v22, %v4893_v45  ;;  %v2916_v13 = vadd.f32 %v13562_v21, %v2746_v1 }
 0x350   : > { %5296 = vmatmul.bf16.gmra.mxu0 %v5190_v33  ;;  %v3423_v60 = vadd.f32 %v12281_v57, %v11987_v58  ;;  %v4654_v62 = vadd.f32 %v4638_v2, %v4590_v47  ;;  %v4701_v11 = vadd.f32 %v4685_v49, %v4653_v54  ;;  %v4926_v23 = vmul.f32 %v11580_v50, %v12289_v16  ;;  %v3569_v33 = vpop.f32.mrf.mxu0 }
 0x351   : > { %v12320_v31 = vmin.f32 %v3791_v39, 6.0  ;;  %v4498_v5 = vpop.f32.mrf.mxu2  ;;  %v5050_v51 = vpack.c.bf16 %v5036_v61, %v5035_v18  ;;  %v3085_v28 = vadd.f32 %v11989_v10, %v2916_v13  ;;  %v4686_v1 = vmul.f32 %v12268_v15, %v11519_v34 }
 0x352   : > { %v3733_v0 = vpop.f32.mrf.mxu1  ;;  %v12324_v52 = vld [vmem:[#allocation5 + $0x18f] sm:$0xff]  ;;  %v4750_v57 = vadd.f32 %v4734_v41, %v4701_v11  ;;  %v4499_v18 = vadd.f32 %v12055_v24, %v4498_v5  ;;  %v4782_v10 = vmul.f32 %v11546_v19, %v12248_v30  ;;  %v3592_v63 = vadd.f32 %v12299_v27, %v3423_v60 }
 0x353   : > { %v12326_v48 = vld [vmem:[#allocation5 + $0x189] sm:$0xff]  ;;  %3889 = vst [vmem:[#allocation5 + $0x1a8] sm:$0xff] %v12320_v31  ;;  %v3760_v17 = vadd.f32 %v3733_v0, %v3591_v36  ;;  %5070 = vmatmul.bf16.gmra.mxu3 %v5050_v51  ;;  %v4878_v37 = vmul.f32 %v12324_v52, %v11560_v40  ;;  %v12338_v32 = vld [vmem:[#allocation5 + $0x191] sm:$0xff]  ;;  %v4735_v58 = vmul.f32 %v12324_v52, %v11533_v53  ;;  %v3403_v41 = vpop.f32.mrf.mxu3 }
 0x354   : > { %v4973_v25 = vmul.f32 %v12115_v55, %v12326_v48  ;;  %v4974_v56 = vmul.f32 %v12115_v55, %v12338_v32  ;;  %v4702_v61 = vadd.f32 %v4686_v1, %v4654_v62  ;;  %v4830_v15 = vmul.f32 %v12326_v48, %v11554_v29  ;;  %v13563_v60 = vld [vmem:[#allocation16_spill] sm:$0xff] }
 0x355   : > { %v3776_v59 = vadd.f32 %v12032_v38, %v3760_v17  ;;  %v4894_v20 = vadd.f32 %v4878_v37, %v4845_v43  ;;  %v3254_v49 = vadd.f32 %v11995_v6, %v3085_v28  ;;  %v4798_v5 = vadd.f32 %v4782_v10, %v4750_v57  ;;  %v10497_v17 = vld [vmem:[#allocation5 + $0xa8] sm:$0xff]  ;;  %v10498_v6 = vld [vmem:[#allocation5 + $0xb0] sm:$0xff] }
 0x356   : > { %v4989_v42 = vadd.f32 %v4973_v25, %v4941_v4  ;;  %v4751_v2 = vadd.f32 %v4735_v58, %v4702_v61  ;;  %v4542_v37 = vadd.f32 %v10497_v17, %v4499_v18  ;;  %v4783_v21 = vmul.f32 %v11546_v19, %v12289_v16 }
 0x357   : > { %v3792_v3 = vmax.f32 %v3776_v59, 0.0  ;;  %v4942_v45 = vadd.f32 %v4926_v23, %v4894_v20  ;;  %v4846_v13 = vadd.f32 %v4830_v15, %v4798_v5  ;;  %v2748_v62 = vadd.f32 %v11872_v7, %v13563_v60 }
 0x358   : > { %v5005_v39 = vadd.f32 %v12137_v12, %v4989_v42  ;;  %v3424_v11 = vadd.f32 %v3400_v44, %v3254_v49  ;;  %v4799_v42 = vadd.f32 %v4783_v21, %v4751_v2  ;;  %v4591_v1 = vmul.f32 %v12293_v9, %v11505_v35 }
 0x359   : > { %v12357_v8 = vmin.f32 %v3792_v3, 6.0  ;;  %v4500_v22 = vpop.f32.mrf.mxu2  ;;  %v4990_v47 = vadd.f32 %v4974_v56, %v4942_v45  ;;  %v4639_v45 = vmul.f32 %v11508_v14, %v12248_v30  ;;  %v3572_v56 = vpop.f32.mrf.mxu0  ;;  %v4831_v7 = vmul.f32 %v12338_v32, %v11554_v29 }
 0x35a   : > { %v4501_v36 = vadd.f32 %v12055_v24, %v4500_v22  ;;  %v3736_v51 = vpop.f32.mrf.mxu1  ;;  %v12361_v0 = vld [vmem:[#allocation5 + $0x1a7] sm:$0xff]  ;;  %v5021_v54 = vmax.f32 %v5005_v39, 0.0  ;;  %v4927_v44 = vmul.f32 %v11580_v50, %v12320_v31  ;;  %v4592_v39 = vmul.f32 %v12324_v52, %v11505_v35 }
 0x35b   : > { %3890 = vst [vmem:[#allocation5 + $0x1b0] sm:$0xff] %v12357_v8  ;;  %v3761_v43 = vadd.f32 %v3736_v51, %v3592_v63  ;;  %v5006_v4 = vadd.f32 %v12137_v12, %v4990_v47  ;;  %v4879_v27 = vmul.f32 %v12361_v0, %v11560_v40  ;;  %v4687_v9 = vmul.f32 %v12326_v48, %v11519_v34 }
 0x35c   : > { %v4543_v25 = vadd.f32 %v10498_v6, %v4501_v36  ;;  %v5037_v57 = vmin.f32 %v5021_v54, 6.0  ;;  %v3593_v18 = vadd.f32 %v3569_v33, %v3424_v11  ;;  %v4640_v30 = vmul.f32 %v11508_v14, %v12289_v16 }
 0x35d   : > { %v3777_v59 = vadd.f32 %v12032_v38, %v3761_v43  ;;  %v5022_v20 = vmax.f32 %v5006_v4, 0.0  ;;  %v4895_v28 = vadd.f32 %v4879_v27, %v4846_v13  ;;  %v4847_v22 = vadd.f32 %v4831_v7, %v4799_v42  ;;  %v3405_v13 = vpop.f32.mrf.mxu3 }
 0x35e   : > { %v5191_v23 = vpack.c.bf16 %v4543_v25, %v4542_v37  ;;  %v4655_v51 = vadd.f32 %v4639_v45, %v4591_v1  ;;  %v4736_v52 = vmul.f32 %v12361_v0, %v11533_v53  ;;  %v2918_v2 = vadd.f32 %v11863_v26, %v2748_v62  ;;  %v13564_v25 = vld [vmem:[#allocation22_spill] sm:$0xff] }
 0x35f   : > { %v3793_v58 = vmax.f32 %v3777_v59, 0.0  ;;  %v5038_v3 = vmin.f32 %v5022_v20, 6.0  ;;  %v4943_v49 = vadd.f32 %v4927_v44, %v4895_v28  ;;  %v3425_v5 = vadd.f32 %v3403_v41, %v11998_v46 }
 0x360   : > { %5301 = vmatmul.bf16.gmra.mxu0 %v5191_v23  ;;  %v4656_v4 = vadd.f32 %v4640_v30, %v4592_v39  ;;  %v4703_v54 = vadd.f32 %v4687_v9, %v4655_v51  ;;  %v4928_v37 = vmul.f32 %v11580_v50, %v12357_v8  ;;  %v3087_v21 = vadd.f32 %v13564_v25, %v2918_v2  ;;  %v10500_v51 = vld [vmem:[#allocation5 + $0xd0] sm:$0xff] }
 0x361   : > { %v12384_v61 = vmin.f32 %v3793_v58, 6.0  ;;  %v4503_v10 = vpop.f32.mrf.mxu2  ;;  %v5051_v15 = vpack.c.bf16 %v5038_v3, %v5037_v57  ;;  %v4688_v60 = vmul.f32 %v12338_v32, %v11519_v34  ;;  %v4784_v42 = vmul.f32 %v11546_v19, %v12320_v31  ;;  %v13565_v3 = vld [vmem:[#allocation23_spill] sm:$0xff]  ;;  %v3574_v7 = vpop.f32.mrf.mxu0  ;;  %v13567_v2 = vld [vmem:[#allocation20_spill] sm:$0xff] }
 0x362   : > { %v3738_v63 = vpop.f32.mrf.mxu1  ;;  %v12388_v47 = vld [vmem:[#allocation5 + $0x1af] sm:$0xff]  ;;  %v4752_v46 = vadd.f32 %v4736_v52, %v4703_v54  ;;  %v4504_v20 = vadd.f32 %v12055_v24, %v4503_v10  ;;  %v3594_v28 = vadd.f32 %v3572_v56, %v3425_v5  ;;  %v3256_v45 = vadd.f32 %v13565_v3, %v3087_v21 }
 0x363   : > { %v12390_v36 = vld [vmem:[#allocation5 + $0x1a9] sm:$0xff]  ;;  %3891 = vst [vmem:[#allocation5 + $0x1c8] sm:$0xff] %v12384_v61  ;;  %v3762_v48 = vadd.f32 %v3738_v63, %v3593_v18  ;;  %5075 = vmatmul.bf16.gmra.mxu3 %v5051_v15  ;;  %v4880_v33 = vmul.f32 %v12388_v47, %v11560_v40  ;;  %v12401_v43 = vld [vmem:[#allocation5 + $0x1b1] sm:$0xff]  ;;  %v4737_v26 = vmul.f32 %v12388_v47, %v11533_v53 }
 0x364   : > { %v4975_v16 = vmul.f32 %v12115_v55, %v12390_v36  ;;  %v4976_v11 = vmul.f32 %v12115_v55, %v12401_v43  ;;  %v4704_v23 = vadd.f32 %v4688_v60, %v4656_v4  ;;  %v4832_v32 = vmul.f32 %v12390_v36, %v11554_v29 }
 0x365   : > { %v3778_v27 = vadd.f32 %v12032_v38, %v3762_v48  ;;  %v4896_v17 = vadd.f32 %v4880_v33, %v4847_v22  ;;  %v4800_v18 = vadd.f32 %v4784_v42, %v4752_v46  ;;  %v10499_v22 = vld [vmem:[#allocation5 + $0xc8] sm:$0xff]  ;;  %v4785_v48 = vmul.f32 %v11546_v19, %v12357_v8 }
 0x366   : > { %v4991_v6 = vadd.f32 %v4975_v16, %v4943_v49  ;;  %v4753_v9 = vadd.f32 %v4737_v26, %v4704_v23  ;;  %v4544_v49 = vadd.f32 %v10499_v22, %v4504_v20  ;;  %v13566_v16 = vld [vmem:[#allocation17_spill] sm:$0xff]  ;;  %v3426_v4 = vadd.f32 %v3405_v13, %v3256_v45 }
 0x367   : > { %v3794_v41 = vmax.f32 %v3778_v27, 0.0  ;;  %v4944_v62 = vadd.f32 %v4928_v37, %v4896_v17  ;;  %v4848_v33 = vadd.f32 %v4832_v32, %v4800_v18  ;;  %v2750_v5 = vadd.f32 %v13567_v2, %v13566_v16  ;;  %v13569_v18 = vld [vmem:[#allocation24_spill] sm:$0xff] }
 0x368   : > { %v5007_v59 = vadd.f32 %v12137_v12, %v4991_v6  ;;  %v4801_v37 = vadd.f32 %v4785_v48, %v4753_v9  ;;  %v4593_v25 = vmul.f32 %v12361_v0, %v11505_v35  ;;  %v4641_v46 = vmul.f32 %v11508_v14, %v12320_v31 }
 0x369   : > { %v12419_v1 = vmin.f32 %v3794_v41, 6.0  ;;  %v4505_v58 = vpop.f32.mrf.mxu2  ;;  %v4992_v57 = vadd.f32 %v4976_v11, %v4944_v62  ;;  %v3408_v41 = vpop.f32.mrf.mxu3  ;;  %v4833_v13 = vmul.f32 %v12401_v43, %v11554_v29  ;;  %v4929_v62 = vmul.f32 %v11580_v50, %v12384_v61 }
 0x36a   : > { %v4506_v44 = vadd.f32 %v12055_v24, %v4505_v58  ;;  %v3741_v39 = vpop.f32.mrf.mxu1  ;;  %v12423_v10 = vld [vmem:[#allocation5 + $0x1c7] sm:$0xff]  ;;  %v5023_v56 = vmax.f32 %v5007_v59, 0.0  ;;  %v4594_v11 = vmul.f32 %v12388_v47, %v11505_v35  ;;  %v4689_v0 = vmul.f32 %v12390_v36, %v11519_v34 }
 0x36b   : > { %3892 = vst [vmem:[#allocation5 + $0x1d0] sm:$0xff] %v12419_v1  ;;  %v3763_v15 = vadd.f32 %v3741_v39, %v3594_v28  ;;  %v5008_v30 = vadd.f32 %v12137_v12, %v4992_v57  ;;  %v4881_v63 = vmul.f32 %v12423_v10, %v11560_v40  ;;  %v3595_v59 = vadd.f32 %v3574_v7, %v3426_v4  ;;  %v13568_v39 = vld [vmem:[#allocation21_spill] sm:$0xff] }
 0x36c   : > { %v4545_v52 = vadd.f32 %v10500_v51, %v4506_v44  ;;  %v5039_v60 = vmin.f32 %v5023_v56, 6.0  ;;  %v4642_v31 = vmul.f32 %v11508_v14, %v12357_v8  ;;  %v4849_v28 = vadd.f32 %v4833_v13, %v4801_v37  ;;  %v13571_v13 = vld [vmem:[#allocation26_spill] sm:$0xff] }
 0x36d   : > { %v3779_v54 = vadd.f32 %v12032_v38, %v3763_v15  ;;  %v5024_v27 = vmax.f32 %v5008_v30, 0.0  ;;  %v4897_v6 = vadd.f32 %v4881_v63, %v4848_v33  ;;  %v4657_v45 = vadd.f32 %v4641_v46, %v4593_v25  ;;  %v3577_v30 = vpop.f32.mrf.mxu0  ;;  %v13570_v33 = vld [vmem:[#allocation25_spill] sm:$0xff] }
 0x36e   : > { %v5192_v17 = vpack.c.bf16 %v4545_v52, %v4544_v49  ;;  %v4738_v47 = vmul.f32 %v12423_v10, %v11533_v53  ;;  %v2920_v9 = vadd.f32 %v13568_v39, %v2750_v5  ;;  %v3427_v15 = vadd.f32 %v3408_v41, %v13569_v18 }
 0x36f   : > { %v3795_v21 = vmax.f32 %v3779_v54, 0.0  ;;  %v5040_v26 = vmin.f32 %v5024_v27, 6.0  ;;  %v4945_v57 = vadd.f32 %v4929_v62, %v4897_v6  ;;  %v4658_v63 = vadd.f32 %v4642_v31, %v4594_v11 }
 0x370   : > { %5306 = vmatmul.bf16.gmra.mxu0 %v5192_v17  ;;  %v4705_v22 = vadd.f32 %v4689_v0, %v4657_v45  ;;  %v4930_v52 = vmul.f32 %v11580_v50, %v12419_v1  ;;  %v3089_v16 = vadd.f32 %v13570_v33, %v2920_v9  ;;  %v4690_v2 = vmul.f32 %v12401_v43, %v11519_v34 }
 0x371   : > { %v12446_v20 = vmin.f32 %v3795_v21, 6.0  ;;  %v4508_v23 = vpop.f32.mrf.mxu2  ;;  %v5052_v42 = vpack.c.bf16 %v5040_v26, %v5039_v60  ;;  %v4786_v21 = vmul.f32 %v11546_v19, %v12384_v61  ;;  %v3596_v60 = vadd.f32 %v3577_v30, %v3427_v15  ;;  %v3410_v11 = vpop.f32.mrf.mxu3 }
 0x372   : > { %v3743_v32 = vpop.f32.mrf.mxu1  ;;  %v12450_v58 = vld [vmem:[#allocation5 + $0x1cf] sm:$0xff]  ;;  %v4754_v4 = vadd.f32 %v4738_v47, %v4705_v22  ;;  %v4509_v6 = vadd.f32 %v12055_v24, %v4508_v23  ;;  %v4706_v25 = vadd.f32 %v4690_v2, %v4658_v63  ;;  %v3258_v62 = vadd.f32 %v13571_v13, %v3089_v16 }
 0x373   : > { %v12452_v3 = vld [vmem:[#allocation5 + $0x1c9] sm:$0xff]  ;;  %3893 = vst [vmem:[#allocation5 + $0x1e8] sm:$0xff] %v12446_v20  ;;  %v3764_v36 = vadd.f32 %v3743_v32, %v3595_v59  ;;  %5080 = vmatmul.bf16.gmra.mxu3 %v5052_v42  ;;  %v4882_v7 = vmul.f32 %v12450_v58, %v11560_v40  ;;  %v12463_v56 = vld [vmem:[#allocation5 + $0x1d1] sm:$0xff]  ;;  %v4739_v5 = vmul.f32 %v12450_v58, %v11533_v53 }
 0x374   : > { %v4977_v44 = vmul.f32 %v12115_v55, %v12452_v3  ;;  %v4978_v17 = vmul.f32 %v12115_v55, %v12463_v56  ;;  %v4834_v43 = vmul.f32 %v12452_v3, %v11554_v29  ;;  %v4802_v23 = vadd.f32 %v4786_v21, %v4754_v4  ;;  %v10501_v47 = vld [vmem:[#allocation5 + $0xe8] sm:$0xff] }
 0x375   : > { %v3780_v49 = vadd.f32 %v12032_v38, %v3764_v36  ;;  %v4898_v51 = vadd.f32 %v4882_v7, %v4849_v28  ;;  %v4755_v42 = vadd.f32 %v4739_v5, %v4706_v25  ;;  %v4546_v36 = vadd.f32 %v10501_v47, %v4509_v6  ;;  %v10502_v7 = vld [vmem:[#allocation5 + $0xf0] sm:$0xff]  ;;  %v3579_v30 = vpop.f32.mrf.mxu0 }
 0x376   : > { %v4993_v48 = vadd.f32 %v4977_v44, %v4945_v57  ;;  %v4850_v39 = vadd.f32 %v4834_v43, %v4802_v23  ;;  %v3428_v9 = vadd.f32 %v3410_v11, %v3258_v62  ;;  %v4643_v16 = vmul.f32 %v11508_v14, %v12384_v61 }
 0x377   : > { %v3796_v54 = vmax.f32 %v3780_v49, 0.0  ;;  %v4946_v27 = vadd.f32 %v4930_v52, %v4898_v51  ;;  %v4595_v51 = vmul.f32 %v12423_v10, %v11505_v35  ;;  %v4835_v2 = vmul.f32 %v12463_v56, %v11554_v29 }
 0x378   : > { %v5009_v37 = vadd.f32 %v12137_v12, %v4993_v48  ;;  %v4596_v5 = vmul.f32 %v12450_v58, %v11505_v35  ;;  %v4691_v4 = vmul.f32 %v12452_v3, %v11519_v34  ;;  %v3597_v10 = vadd.f32 %v3579_v30, %v3428_v9 }
 0x379   : > { %v12481_v26 = vmin.f32 %v3796_v54, 6.0  ;;  %v4510_v46 = vpop.f32.mrf.mxu2  ;;  %v4994_v41 = vadd.f32 %v4978_v17, %v4946_v27  ;;  %v4644_v17 = vmul.f32 %v11508_v14, %v12419_v1 }
 0x37a   : > { %v4511_v0 = vadd.f32 %v12055_v24, %v4510_v46  ;;  %v3746_v59 = vpop.f32.mrf.mxu1  ;;  %v12485_v31 = vld [vmem:[#allocation5 + $0x1e7] sm:$0xff]  ;;  %v5025_v57 = vmax.f32 %v5009_v37, 0.0  ;;  %v4787_v24 = vmul.f32 %v11546_v19, %v12419_v1 }
 0x37b   : > { %3894 = vst [vmem:[#allocation5 + $0x1f0] sm:$0xff] %v12481_v26  ;;  %v3765_v32 = vadd.f32 %v3746_v59, %v3596_v60  ;;  %v5010_v28 = vadd.f32 %v12137_v12, %v4994_v41  ;;  %v4883_v45 = vmul.f32 %v12485_v31, %v11560_v40  ;;  %v4659_v60 = vadd.f32 %v4643_v16, %v4595_v51 }
 0x37c   : > { %v4547_v44 = vadd.f32 %v10502_v7, %v4511_v0  ;;  %v4803_v22 = vadd.f32 %v4787_v24, %v4755_v42  ;;  %v5041_v48 = vmin.f32 %v5025_v57, 6.0  ;;  %v4740_v46 = vmul.f32 %v12485_v31, %v11533_v53  ;;  %v10503_v0 = vld [vmem:[%s13542_s2] ss:$0 sm:$0xff] }
 0x37d   : > { %v3781_v18 = vadd.f32 %v12032_v38, %v3765_v32  ;;  %v5026_v15 = vmax.f32 %v5010_v28, 0.0  ;;  %v4899_v49 = vadd.f32 %v4883_v45, %v4850_v39  ;;  %v4931_v38 = vmul.f32 %v11580_v50, %v12446_v20 }
 0x37e   : > { %v5193_v63 = vpack.c.bf16 %v4547_v44, %v4546_v36  ;;  %v4851_v6 = vadd.f32 %v4835_v2, %v4803_v22  ;;  %v4660_v62 = vadd.f32 %v4644_v17, %v4596_v5  ;;  %v4707_v11 = vadd.f32 %v4691_v4, %v4659_v60 }
 0x37f   : > { %v3797_v52 = vmax.f32 %v3781_v18, 0.0  ;;  %v5042_v33 = vmin.f32 %v5026_v15, 6.0  ;;  %v4947_v21 = vadd.f32 %v4931_v38, %v4899_v49  ;;  %v4932_v23 = vmul.f32 %v11580_v50, %v12481_v26 }
 0x380   : > { %5311 = vmatmul.bf16.gmra.mxu0 %v5193_v63  ;;  %v4692_v28 = vmul.f32 %v12463_v56, %v11519_v34  ;;  %v4756_v45 = vadd.f32 %v4740_v46, %v4707_v11  ;;  %v4788_v39 = vmul.f32 %v11546_v19, %v12446_v20  ;;  %v4597_v56 = vmul.f32 %v12485_v31, %v11505_v35 }
 0x381   : > { %v12506_v54 = vmin.f32 %v3797_v52, 6.0  ;;  %v5053_v27 = vpack.c.bf16 %v5042_v33, %v5041_v48  ;;  %v4789_v31 = vmul.f32 %v11546_v19, %v12481_v26  ;;  %v4646_v16 = vmul.f32 %v11508_v14, %v12481_v26 }
 0x382   : > { %v3748_v37 = vpop.f32.mrf.mxu1  ;;  %v4868_v25 = vld [vmem:[#allocation5 + $0x1ef] sm:$0xff]  ;;  %v4708_v24 = vadd.f32 %v4692_v28, %v4660_v62  ;;  %v4804_v63 = vadd.f32 %v4788_v39, %v4756_v45 }
 0x383   : > { %v4963_v43 = vld [vmem:[#allocation5 + $0x1e9] sm:$0xff]  ;;  %3895 = vst [vmem:[#allocation5 + $0x208] sm:$0xff] %v12506_v54  ;;  %v3766_v58 = vadd.f32 %v3748_v37, %v3597_v10  ;;  %5085 = vmatmul.bf16.gmra.mxu3 %v5053_v27  ;;  %v4884_v3 = vmul.f32 %v4868_v25, %v11560_v40  ;;  %v4964_v13 = vld [vmem:[#allocation5 + $0x1f1] sm:$0xff]  ;;  %v4741_v57 = vmul.f32 %v4868_v25, %v11533_v53 }
 0x384   : > { %v4979_v41 = vmul.f32 %v12115_v55, %v4963_v43  ;;  %v4980_v7 = vmul.f32 %v12115_v55, %v4964_v13  ;;  %v4836_v15 = vmul.f32 %v4963_v43, %v11554_v29  ;;  %v4598_v49 = vmul.f32 %v4868_v25, %v11505_v35  ;;  %v10505_v39 = vld [vmem:[#allocation2 + $0xf] sm:$0xff] }
 0x385   : > { %v3782_v59 = vadd.f32 %v10503_v0, %v3766_v58  ;;  %v4900_v42 = vadd.f32 %v4884_v3, %v4851_v6  ;;  %v4757_v30 = vadd.f32 %v4741_v57, %v4708_v24  ;;  %v4645_v55 = vmul.f32 %v11508_v14, %v12446_v20 }
 0x386   : > { %v4995_v32 = vadd.f32 %v4979_v41, %v4947_v21  ;;  %v4693_v33 = vmul.f32 %v4963_v43, %v11519_v34  ;;  %v4852_v35 = vadd.f32 %v4836_v15, %v4804_v63  ;;  %v4662_v10 = vadd.f32 %v4646_v16, %v4598_v49 }
 0x387   : > { %v3798_v47 = vmax.f32 %v3782_v59, 0.0  ;;  %v4948_v36 = vadd.f32 %v4932_v23, %v4900_v42  ;;  %v4661_v38 = vadd.f32 %v4645_v55, %v4597_v56  ;;  %v4805_v4 = vadd.f32 %v4789_v31, %v4757_v30  ;;  %v4871_v42 = vld [vmem:[#allocation5 + $0x227] sm:$0xff] }
 0x388   : > { %v5011_v44 = vadd.f32 %v12137_v12, %v4995_v32  ;;  %v4837_v6 = vmul.f32 %v4964_v13, %v11554_v29  ;;  %v4694_v25 = vmul.f32 %v4964_v13, %v11519_v34  ;;  %v4933_v43 = vmul.f32 %v11580_v50, %v12506_v54  ;;  %v10504_v34 = vld [vmem:[%s13545_s5 + $0x8] ss:$0 sm:$0xff] }
 0x389   : > { %v12527_v9 = vmin.f32 %v3798_v47, 6.0  ;;  %v4996_v18 = vadd.f32 %v4980_v7, %v4948_v36  ;;  %v4709_v37 = vadd.f32 %v4693_v33, %v4661_v38  ;;  %v4790_v41 = vmul.f32 %v11546_v19, %v12506_v54 }
 0x38a   : > { %v4869_v22 = vld [vmem:[#allocation5 + $0x207] sm:$0xff]  ;;  %v5027_v52 = vmax.f32 %v5011_v44, 0.0  ;;  %v4853_v60 = vadd.f32 %v4837_v6, %v4805_v4  ;;  %v4710_v3 = vadd.f32 %v4694_v25, %v4662_v10  ;;  %v4887_v24 = vmul.f32 %v4871_v42, %v11560_v40 }
 0x38b   : > { %3896 = vst [vmem:[#allocation5 + $0x210] sm:$0xff] %v12527_v9  ;;  %v5012_v51 = vadd.f32 %v12137_v12, %v4996_v18  ;;  %v4885_v48 = vmul.f32 %v4869_v22, %v11560_v40  ;;  %v4742_v5 = vmul.f32 %v4869_v22, %v11533_v53  ;;  %v4934_v23 = vmul.f32 %v11580_v50, %v12527_v9  ;;  %v4920_v18 = vld [vmem:[#allocation5 + $0x230] sm:$0xff]  ;;  %v4919_v22 = vld [vmem:[#allocation5 + $0x228] sm:$0xff] }
 0x38c   : > { %v5043_v27 = vmin.f32 %v5027_v52, 6.0  ;;  %v4791_v32 = vmul.f32 %v11546_v19, %v12527_v9  ;;  %v10506_v19 = vld [vmem:[%s13546_s6] ss:$0 sm:$0xff] }
 0x38d   : > { %v5028_v2 = vmax.f32 %v5012_v51, 0.0  ;;  %v4901_v17 = vadd.f32 %v4885_v48, %v4852_v35  ;;  %v4758_v14 = vadd.f32 %v4742_v5, %v4709_v37  ;;  %v4936_v51 = vmul.f32 %v4920_v18, %v11580_v50  ;;  %v4968_v52 = vld [vmem:[#allocation5 + $0x231] sm:$0xff] }
 0x38e   : > { %v4984_v4 = vmul.f32 %v10504_v34, %v4968_v52 }
 0x38f   : > { %v5044_v12 = vmin.f32 %v5028_v2, 6.0  ;;  %v4949_v11 = vadd.f32 %v4933_v43, %v4901_v17  ;;  %v4806_v36 = vadd.f32 %v4790_v41, %v4758_v14  ;;  %v4967_v2 = vld [vmem:[#allocation5 + $0x229] sm:$0xff] }
 0x390   : > { %v4983_v37 = vmul.f32 %v10504_v34, %v4967_v2 }
 0x391   : > { %v5054_v21 = vpack.c.bf16 %v5044_v12, %v5043_v27 }
 0x392   : > { %v4870_v46 = vld [vmem:[#allocation5 + $0x20f] sm:$0xff] }
 0x393   : > { %v4965_v58 = vld [vmem:[#allocation5 + $0x209] sm:$0xff]  ;;  %5090 = vmatmul.bf16.gmra.mxu3 %v5054_v21  ;;  %v4886_v62 = vmul.f32 %v4870_v46, %v11560_v40  ;;  %v4966_v0 = vld [vmem:[#allocation5 + $0x211] sm:$0xff]  ;;  %v4743_v59 = vmul.f32 %v4870_v46, %v11533_v53  ;;  %v4888_v53 = vmul.f32 %v10505_v39, %v11560_v40  ;;  %v4935_v40 = vmul.f32 %v4919_v22, %v11580_v50 }
 0x394   : > { %v4981_v13 = vmul.f32 %v10504_v34, %v4965_v58  ;;  %v4838_v28 = vmul.f32 %v4965_v58, %v11554_v29  ;;  %v4982_v7 = vmul.f32 %v10504_v34, %v4966_v0  ;;  %v4839_v44 = vmul.f32 %v4966_v0, %v11554_v29  ;;  %v12570_v29 = vld [vmem:[%s13544_s4 + $0x1] ss:$0 sm:$0xff] }
 0x395   : > { %v4902_v57 = vadd.f32 %v4886_v62, %v4853_v60  ;;  %v4759_v47 = vadd.f32 %v4743_v59, %v4710_v3 }
 0x396   : > { %v4997_v45 = vadd.f32 %v4981_v13, %v4949_v11  ;;  %v4854_v63 = vadd.f32 %v4838_v28, %v4806_v36 }
 0x397   : > { %v4950_v15 = vadd.f32 %v4934_v23, %v4902_v57  ;;  %v4807_v30 = vadd.f32 %v4791_v32, %v4759_v47 }
 0x398   : > { %v5013_v56 = vadd.f32 %v10506_v19, %v4997_v45  ;;  %v4903_v31 = vadd.f32 %v4887_v24, %v4854_v63  ;;  %v10508_v63 = vld [vmem:[#allocation5 + $0x108] sm:$0xff] }
 0x399   : > { %v4998_v49 = vadd.f32 %v4982_v7, %v4950_v15  ;;  %v4855_v55 = vadd.f32 %v4839_v44, %v4807_v30  ;;  %v10339_v7 = vld [vmem:[%s13543_s3 + $0xb8] sm:$0xff]  ;;  %v12583_v44 = vld [vmem:[%s13544_s4] ss:$0 sm:$0xff]  ;;  %v10338_v15 = vld [vmem:[%s13543_s3 + $0xb0] sm:$0xff] }
 0x39a   : > { %v5029_v33 = vmax.f32 %v5013_v56, 0.0  ;;  %v4951_v17 = vadd.f32 %v4935_v40, %v4903_v31  ;;  %5861 = vmatpush.bf16.msrb.mxu1 %v10339_v7  ;;  %v12594_v56 = vld [vmem:[%s13545_s5 + $0x10] sm:$0xff] }
 0x39b   : > { %v5014_v48 = vadd.f32 %v10506_v19, %v4998_v49  ;;  %v4904_v16 = vadd.f32 %v4888_v53, %v4855_v55  ;;  %v10509_v49 = vld [vmem:[#allocation5 + $0x110] sm:$0xff]  ;;  %v12597_v40 = vperm.slane %v12594_v56, 0  ;;  %v12600_v52 = vperm.slane %v12594_v56, 1 }
 0x39c   : > { %v5045_v27 = vmin.f32 %v5029_v33, 6.0  ;;  %v4999_v43 = vadd.f32 %v4983_v37, %v4951_v17  ;;  %v5483_v33 = vld [vmem:[#allocation5 + $0x7] ss:$2 sm:$0xff]  ;;  %v5516_v31 = vld [vmem:[#allocation5 + $0x8] ss:$2 sm:$0xff] }
 0x39d   : > { %v5282_v35 = vpop.f32.mrf.mxu0  ;;  %v5030_v38 = vmax.f32 %v5014_v48, 0.0  ;;  %v4952_v5 = vadd.f32 %v4936_v51, %v4904_v16  ;;  %v10337_v16 = vld [vmem:[%s13543_s3 + $0xa8] sm:$0xff] }
 0x39e   : > { %v5283_v10 = vadd.f32 %v12570_v29, %v5282_v35  ;;  %v5015_v58 = vadd.f32 %v10506_v19, %v4999_v43  ;;  %5862 = vmatpush.bf16.msrb.mxu1 %v10338_v15  ;;  %v10335_v43 = vld [vmem:[%s13543_s3 + $0x98] sm:$0xff] }
 0x39f   : > { %v5046_v12 = vmin.f32 %v5030_v38, 6.0  ;;  %v5000_v21 = vadd.f32 %v4984_v4, %v4952_v5  ;;  %v10336_v5 = vld [vmem:[%s13543_s3 + $0xa0] sm:$0xff]  ;;  %v5499_v4 = vmul.f32 %v12597_v40, %v5483_v33 }
 0x3a0   : > { %v5362_v6 = vmax.f32 %v5283_v10, 0.0  ;;  %v5031_v11 = vmax.f32 %v5015_v58, 0.0  ;;  %v5532_v10 = vmul.f32 %v12600_v52, %v5516_v31 }
 0x3a1   : > { %v5055_v25 = vpack.c.bf16 %v5046_v12, %v5045_v27  ;;  %v5016_v60 = vadd.f32 %v10506_v19, %v5000_v21  ;;  %v12612_v27 = vperm.slane %v12594_v56, 2  ;;  %v5549_v12 = vld [vmem:[#allocation5 + $0x9] ss:$2 sm:$0xff]  ;;  %v12616_v21 = vperm.slane %v12594_v56, 3 }
 0x3a2   : > { %v5394_v50 = vmin.f32 %v5362_v6, 6.0  ;;  %v5047_v59 = vmin.f32 %v5031_v11, 6.0  ;;  %5863 = vmatpush.bf16.msrb.mxu1 %v10337_v16  ;;  %v5540_v6 = vadd.f32 %v5532_v10, %v5499_v4 }
 0x3a3   : > { %5095 = vmatmul.bf16.gmra.mxu3 %v5055_v25  ;;  %v5032_v41 = vmax.f32 %v5016_v60, 0.0  ;;  %v5565_v25 = vmul.f32 %v12612_v27, %v5549_v12 }
 0x3a4   : > { %5426 = vst [vmem:[#allocation5 + $0x28] sm:$0xff] %v5394_v50 }
 0x3a5   : > { %v5284_v14 = vpop.f32.mrf.mxu0  ;;  %v5048_v13 = vmin.f32 %v5032_v41, 6.0  ;;  %v5573_v41 = vadd.f32 %v5565_v25, %v5540_v6 }
 0x3a6   : > { %v5285_v46 = vadd.f32 %v12570_v29, %v5284_v14  ;;  %5864 = vmatpush.bf16.msrb.mxu1 %v10336_v5 }
 0x3a7   : > { %v5056_v23 = vpack.c.bf16 %v5048_v13, %v5047_v59  ;;  %v12629_v59 = vperm.slane %v12594_v56, 4 }
 0x3a8   : > { %v5363_v3 = vmax.f32 %v5285_v46, 0.0 }
 0x3aa   : > { %v5395_v62 = vmin.f32 %v5363_v3, 6.0  ;;  %5865 = vmatpush.bf16.msrb.mxu1 %v10335_v43  ;;  %v10334_v3 = vld [vmem:[%s13543_s3 + $0x90] sm:$0xff] }
 0x3ac   : > { %5427 = vst [vmem:[#allocation5 + $0x30] sm:$0xff] %v5395_v62 }
 0x3ad   : > { %v5287_v0 = vpop.f32.mrf.mxu0 }
 0x3ae   : > { %v5288_v34 = vadd.f32 %v12570_v29, %v5287_v0  ;;  %5866 = vmatpush.bf16.msrb.mxu1 %v10334_v3 }
 0x3b0   : > { %v5364_v42 = vmax.f32 %v5288_v34, 0.0 }
 0x3b2   : > { %v5396_v32 = vmin.f32 %v5364_v42, 6.0  ;;  %v10510_v42 = vld [vmem:[#allocation5 + $0x128] sm:$0xff] }
 0x3b3   : > { %5100 = vmatmul.bf16.gmra.mxu3 %v5056_v23  ;;  %v5582_v50 = vld [vmem:[#allocation5 + $0x27] ss:$2 sm:$0xff] }
 0x3b4   : > { %5428 = vst [vmem:[#allocation5 + $0x48] sm:$0xff] %v5396_v32  ;;  %v5598_v62 = vmul.f32 %v12616_v21, %v5582_v50  ;;  %v10511_v32 = vld [vmem:[#allocation5 + $0x130] sm:$0xff] }
 0x3b5   : > { %v5289_v28 = vpop.f32.mrf.mxu0  ;;  %v5648_v15 = vld [vmem:[#allocation5 + $0x29] ss:$2 sm:$0xff] }
 0x3b6   : > { %v5290_v57 = vadd.f32 %v12570_v29, %v5289_v28  ;;  %v4513_v45 = vpop.f32.mrf.mxu2  ;;  %v5606_v7 = vadd.f32 %v5598_v62, %v5573_v41 }
 0x3b7   : > { %v4514_v24 = vadd.f32 %v12583_v44, %v4513_v45 }
 0x3b8   : > { %v5365_v47 = vmax.f32 %v5290_v57, 0.0  ;;  %v5615_v57 = vld [vmem:[#allocation5 + $0x28] ss:$2 sm:$0xff] }
 0x3b9   : > { %v4548_v22 = vadd.f32 %v10508_v63, %v4514_v24 }
 0x3ba   : > { %v5397_v36 = vmin.f32 %v5365_v47, 6.0 }
 0x3bc   : > { %5429 = vst [vmem:[#allocation5 + $0x50] sm:$0xff] %v5397_v36 }
 0x3bd   : > { %v5292_v39 = vpop.f32.mrf.mxu0 }
 0x3be   : > { %v5293_v53 = vadd.f32 %v12570_v29, %v5292_v39  ;;  %v4515_v18 = vpop.f32.mrf.mxu2  ;;  %v12634_v39 = vperm.slane %v12594_v56, 5 }
 0x3bf   : > { %v4516_v19 = vadd.f32 %v12583_v44, %v4515_v18  ;;  %v5631_v18 = vmul.f32 %v12629_v59, %v5615_v57 }
 0x3c0   : > { %v5366_v30 = vmax.f32 %v5293_v53, 0.0  ;;  %v10333_v53 = vld [vmem:[%s13543_s3 + $0x88] sm:$0xff]  ;;  %v5664_v16 = vmul.f32 %v12634_v39, %v5648_v15 }
 0x3c1   : > { %v4549_v55 = vadd.f32 %v10509_v49, %v4516_v19  ;;  %v12641_v19 = vperm.slane %v12594_v56, 6  ;;  %5867 = vmatpush.bf16.msrb.mxu1 %v10333_v53  ;;  %v5639_v31 = vadd.f32 %v5631_v18, %v5606_v7 }
 0x3c2   : > { %v5398_v51 = vmin.f32 %v5366_v30, 6.0 }
 0x3c3   : > { %v5194_v48 = vpack.c.bf16 %v4549_v55, %v4548_v22  ;;  %v5485_v0 = vld [vmem:[#allocation5 + $0x47] ss:$2 sm:$0xff]  ;;  %v5518_v13 = vld [vmem:[#allocation5 + $0x48] ss:$2 sm:$0xff]  ;;  %v5672_v12 = vadd.f32 %v5664_v16, %v5639_v31 }
 0x3c4   : > { %5430 = vst [vmem:[#allocation5 + $0x68] sm:$0xff] %v5398_v51  ;;  %v5500_v47 = vmul.f32 %v12597_v40, %v5485_v0  ;;  %v5533_v36 = vmul.f32 %v12600_v52, %v5518_v13  ;;  %v5551_v63 = vld [vmem:[#allocation5 + $0x49] ss:$2 sm:$0xff]  ;;  %v5714_v6 = vld [vmem:[#allocation5 + $0x48] ss:$2 sm:$0xff] }
 0x3c5   : > { %v5294_v2 = vpop.f32.mrf.mxu0  ;;  %5316 = vmatmul.bf16.gmra.mxu0 %v5194_v48  ;;  %v5681_v49 = vld [vmem:[#allocation5 + $0x47] ss:$2 sm:$0xff]  ;;  %v10332_v48 = vld [vmem:[%s13543_s3 + $0x80] sm:$0xff] }
 0x3c6   : > { %v5295_v35 = vadd.f32 %v12570_v29, %v5294_v2  ;;  %v5066_v38 = vpop.f32.mrf.mxu3  ;;  %v5541_v33 = vadd.f32 %v5533_v36, %v5500_v47  ;;  %v5697_v5 = vmul.f32 %v12641_v19, %v5681_v49  ;;  %5868 = vmatpush.bf16.msrb.mxu1 %v10332_v48 }
 0x3c7   : > { %v5067_v14 = vadd.f32 %v12583_v44, %v5066_v38 }
 0x3c8   : > { %v5367_v17 = vmax.f32 %v5295_v35, 0.0  ;;  %v5566_v35 = vmul.f32 %v12612_v27, %v5551_v63  ;;  %v5705_v50 = vadd.f32 %v5697_v5, %v5672_v12 }
 0x3c9   : > { %v5122_v23 = vadd.f32 %v10510_v42, %v5067_v14  ;;  %v10512_v42 = vld [vmem:[#allocation5 + $0x148] sm:$0xff] }
 0x3ca   : > { %v5399_v37 = vmin.f32 %v5367_v17, 6.0  ;;  %v5574_v10 = vadd.f32 %v5566_v35, %v5541_v33  ;;  %v12652_v17 = vperm.slane %v12594_v56, 7  ;;  %v12661_v56 = vld [vmem:[%s13545_s5 + $0x18] ss:$0 sm:$0xff] }
 0x3cc   : > { %5431 = vst [vmem:[#allocation5 + $0x70] sm:$0xff] %v5399_v37  ;;  %v5730_v3 = vmul.f32 %v12652_v17, %v5714_v6 }
 0x3cd   : > { %v5297_v60 = vpop.f32.mrf.mxu0 }
 0x3ce   : > { %v5298_v46 = vadd.f32 %v12570_v29, %v5297_v60  ;;  %v5068_v58 = vpop.f32.mrf.mxu3 }
 0x3cf   : > { %v5069_v11 = vadd.f32 %v12583_v44, %v5068_v58 }
 0x3d0   : > { %v5368_v34 = vmax.f32 %v5298_v46, 0.0 }
 0x3d1   : > { %v5123_v28 = vadd.f32 %v10511_v32, %v5069_v11  ;;  %v5747_v11 = vld [vmem:[#allocation5 + $0x49] ss:$2 sm:$0xff] }
 0x3d2   : > { %v5400_v45 = vmin.f32 %v5368_v34, 6.0  ;;  %v5738_v34 = vadd.f32 %v5730_v3, %v5705_v50  ;;  %v10513_v32 = vld [vmem:[#allocation5 + $0x150] sm:$0xff]  ;;  %v5763_v47 = vmul.f32 %v12661_v56, %v5747_v11 }
 0x3d3   : > { %v5195_v24 = vpack.c.bf16 %v5123_v28, %v5122_v23  ;;  %v5584_v22 = vld [vmem:[#allocation5 + $0x67] ss:$2 sm:$0xff]  ;;  %v5617_v37 = vld [vmem:[#allocation5 + $0x68] ss:$2 sm:$0xff] }
 0x3d4   : > { %5432 = vst [vmem:[#allocation5 + $0x88] sm:$0xff] %v5400_v45  ;;  %v5599_v38 = vmul.f32 %v12616_v21, %v5584_v22  ;;  %v5632_v58 = vmul.f32 %v12629_v59, %v5617_v37  ;;  %v5650_v62 = vld [vmem:[#allocation5 + $0x69] ss:$2 sm:$0xff]  ;;  %v5771_v15 = vadd.f32 %v5763_v47, %v5738_v34 }
 0x3d5   : > { %v5299_v30 = vpop.f32.mrf.mxu0  ;;  %5321 = vmatmul.bf16.gmra.mxu0 %v5195_v24  ;;  %v5665_v45 = vmul.f32 %v12634_v39, %v5650_v62  ;;  %v10515_v3 = vld [vmem:[#allocation5 + $0x170] sm:$0xff] }
 0x3d6   : > { %v5300_v55 = vadd.f32 %v12570_v29, %v5299_v30  ;;  %v5071_v51 = vpop.f32.mrf.mxu3  ;;  %v5607_v25 = vadd.f32 %v5599_v38, %v5574_v10  ;;  %v12670_v30 = vld [vmem:[%s13546_s6 + $0x1] ss:$0 sm:$0xff] }
 0x3d7   : > { %v5072_v43 = vadd.f32 %v12583_v44, %v5071_v51 }
 0x3d8   : > { %v5369_v2 = vmax.f32 %v5300_v55, 0.0  ;;  %v5640_v13 = vadd.f32 %v5632_v58, %v5607_v25 }
 0x3d9   : > { %v5124_v23 = vadd.f32 %v10512_v42, %v5072_v43 }
 0x3da   : > { %v5401_v4 = vmin.f32 %v5369_v2, 6.0  ;;  %v5673_v53 = vadd.f32 %v5665_v45, %v5640_v13  ;;  %v5782_v2 = vadd.f32 %v12670_v30, %v5771_v15 }
 0x3dc   : > { %5433 = vst [vmem:[#allocation5 + $0x90] sm:$0xff] %v5401_v4  ;;  %v5790_v4 = vmax.f32 %v5782_v2, 0.0 }
 0x3dd   : > { %v5302_v14 = vpop.f32.mrf.mxu0 }
 0x3de   : > { %v5303_v60 = vadd.f32 %v12570_v29, %v5302_v14  ;;  %v5073_v46 = vpop.f32.mrf.mxu3  ;;  %v5798_v14 = vmin.f32 %v5790_v4, 6.0 }
 0x3df   : > { %v5074_v41 = vadd.f32 %v12583_v44, %v5073_v46  ;;  %v10514_v46 = vld [vmem:[#allocation5 + $0x168] sm:$0xff] }
 0x3e0   : > { %v5370_v0 = vmax.f32 %v5303_v60, 0.0 }
 0x3e1   : > { %v5125_v28 = vadd.f32 %v10513_v32, %v5074_v41 }
 0x3e2   : > { %v5402_v57 = vmin.f32 %v5370_v0, 6.0 }
 0x3e3   : > { %v5196_v36 = vpack.c.bf16 %v5125_v28, %v5124_v23  ;;  %v5683_v7 = vld [vmem:[#allocation5 + $0x87] ss:$2 sm:$0xff]  ;;  %v5716_v24 = vld [vmem:[#allocation5 + $0x88] ss:$2 sm:$0xff] }
 0x3e4   : > { %5434 = vst [vmem:[#allocation5 + $0xa8] sm:$0xff] %v5402_v57  ;;  %v5698_v18 = vmul.f32 %v12641_v19, %v5683_v7  ;;  %v5749_v22 = vld [vmem:[#allocation5 + $0x89] ss:$2 sm:$0xff]  ;;  %v5731_v48 = vmul.f32 %v12652_v17, %v5716_v24 }
 0x3e5   : > { %v5304_v63 = vpop.f32.mrf.mxu0  ;;  %5326 = vmatmul.bf16.gmra.mxu0 %v5196_v36  ;;  %v5764_v16 = vmul.f32 %v12661_v56, %v5749_v22  ;;  %v10516_v24 = vld [vmem:[#allocation5 + $0x188] sm:$0xff] }
 0x3e6   : > { %v5305_v49 = vadd.f32 %v12570_v29, %v5304_v63  ;;  %v5076_v55 = vpop.f32.mrf.mxu3  ;;  %v5706_v51 = vadd.f32 %v5698_v18, %v5673_v53  ;;  %v10517_v18 = vld [vmem:[#allocation5 + $0x190] sm:$0xff] }
 0x3e7   : > { %v5077_v10 = vadd.f32 %v12583_v44, %v5076_v55 }
 0x3e8   : > { %v5371_v33 = vmax.f32 %v5305_v49, 0.0  ;;  %v5739_v31 = vadd.f32 %v5731_v48, %v5706_v51 }
 0x3e9   : > { %v5126_v58 = vadd.f32 %v10514_v46, %v5077_v10 }
 0x3ea   : > { %v5403_v35 = vmin.f32 %v5371_v33, 6.0  ;;  %v5772_v38 = vadd.f32 %v5764_v16, %v5739_v31 }
 0x3ec   : > { %5435 = vst [vmem:[#allocation5 + $0xb0] sm:$0xff] %v5403_v35  ;;  %v5783_v5 = vadd.f32 %v12670_v30, %v5772_v38  ;;  %v10518_v35 = vld [vmem:[#allocation5 + $0x1a8] sm:$0xff] }
 0x3ed   : > { %v5307_v12 = vpop.f32.mrf.mxu0 }
 0x3ee   : > { %v5308_v37 = vadd.f32 %v12570_v29, %v5307_v12  ;;  %v5078_v6 = vpop.f32.mrf.mxu3  ;;  %v5791_v25 = vmax.f32 %v5783_v5, 0.0 }
 0x3ef   : > { %v5079_v50 = vadd.f32 %v12583_v44, %v5078_v6 }
 0x3f0   : > { %v5372_v43 = vmax.f32 %v5308_v37, 0.0  ;;  %v5799_v60 = vmin.f32 %v5791_v25, 6.0 }
 0x3f1   : > { %v5127_v41 = vadd.f32 %v10515_v3, %v5079_v50 }
 0x3f2   : > { %v5404_v62 = vmin.f32 %v5372_v43, 6.0  ;;  %v5806_v11 = vpack.c.bf16 %v5799_v60, %v5798_v14 }
 0x3f3   : > { %v5197_v0 = vpack.c.bf16 %v5127_v41, %v5126_v58 }
 0x3f4   : > { %5436 = vst [vmem:[#allocation5 + $0xc8] sm:$0xff] %v5404_v62  ;;  %5869 = vmatmul.bf16.vlgmr.msrb.gmra.mxu1 %v5806_v11  ;;  %v5487_v11 = vld [vmem:[#allocation5 + $0x87] ss:$2 sm:$0xff] }
 0x3f5   : > { %v5309_v13 = vpop.f32.mrf.mxu0  ;;  %5331 = vmatmul.bf16.gmra.mxu0 %v5197_v0  ;;  %v5520_v0 = vld [vmem:[#allocation5 + $0x88] ss:$2 sm:$0xff] }
 0x3f6   : > { %v5310_v34 = vadd.f32 %v12570_v29, %v5309_v13  ;;  %v5081_v42 = vpop.f32.mrf.mxu3  ;;  %v5534_v13 = vmul.f32 %v12600_v52, %v5520_v0 }
 0x3f7   : > { %v5082_v28 = vadd.f32 %v12583_v44, %v5081_v42 }
 0x3f8   : > { %v5373_v23 = vmax.f32 %v5310_v34, 0.0 }
 0x3f9   : > { %v5128_v53 = vadd.f32 %v10516_v24, %v5082_v28  ;;  %v10347_v28 = vld [vmem:[%s13543_s3 + $0xf8] sm:$0xff] }
 0x3fa   : > { %v5405_v32 = vmin.f32 %v5373_v23, 6.0  ;;  %v5553_v23 = vld [vmem:[#allocation5 + $0x89] ss:$2 sm:$0xff]  ;;  %5980 = vmatpush.bf16.msrb.mxu2 %v10347_v28 }
 0x3fc   : > { %5437 = vst [vmem:[#allocation5 + $0xd0] sm:$0xff] %v5405_v32  ;;  %v5586_v32 = vld [vmem:[#allocation5 + $0xa7] ss:$2 sm:$0xff] }
 0x3fd   : > { %v5312_v57 = vpop.f32.mrf.mxu0 }
 0x3fe   : > { %v5313_v45 = vadd.f32 %v12570_v29, %v5312_v57  ;;  %v5083_v47 = vpop.f32.mrf.mxu3 }
 0x3ff   : > { %v5084_v36 = vadd.f32 %v12583_v44, %v5083_v47 }
 0x400   : > { %v5374_v7 = vmax.f32 %v5313_v45, 0.0 }
 0x401   : > { %v5129_v15 = vadd.f32 %v10517_v18, %v5084_v36 }
 0x402   : > { %v5406_v63 = vmin.f32 %v5374_v7, 6.0  ;;  %v5567_v7 = vmul.f32 %v12612_v27, %v5553_v23 }
 0x403   : > { %v5198_v22 = vpack.c.bf16 %v5129_v15, %v5128_v53  ;;  %v5489_v24 = vld [vmem:[#allocation5 + $0xc7] ss:$2 sm:$0xff]  ;;  %v5522_v53 = vld [vmem:[#allocation5 + $0xc8] ss:$2 sm:$0xff] }
 0x404   : > { %5438 = vst [vmem:[#allocation5 + $0xe8] sm:$0xff] %v5406_v63  ;;  %v5502_v63 = vmul.f32 %v12597_v40, %v5489_v24 }
 0x405   : > { %v5314_v49 = vpop.f32.mrf.mxu0  ;;  %5336 = vmatmul.bf16.gmra.mxu0 %v5198_v22  ;;  %v5535_v22 = vmul.f32 %v12600_v52, %v5522_v53 }
 0x406   : > { %v5315_v55 = vadd.f32 %v12570_v29, %v5314_v49  ;;  %v5086_v51 = vpop.f32.mrf.mxu3 }
 0x407   : > { %v5087_v31 = vadd.f32 %v12583_v44, %v5086_v51 }
 0x408   : > { %v5375_v48 = vmax.f32 %v5315_v55, 0.0  ;;  %v10346_v55 = vld [vmem:[%s13543_s3 + $0xf0] sm:$0xff] }
 0x409   : > { %v5130_v38 = vadd.f32 %v10518_v35, %v5087_v31  ;;  %v5555_v31 = vld [vmem:[#allocation5 + $0xc9] ss:$2 sm:$0xff]  ;;  %5981 = vmatpush.bf16.msrb.mxu2 %v10346_v55 }
 0x40a   : > { %v5407_v33 = vmin.f32 %v5375_v48, 6.0  ;;  %v5652_v48 = vld [vmem:[#allocation5 + $0xa9] ss:$2 sm:$0xff] }
 0x40c   : > { %5439 = vst [vmem:[#allocation5 + $0xf0] sm:$0xff] %v5407_v33 }
 0x40e   : > { %v5088_v16 = vpop.f32.mrf.mxu3 }
 0x40f   : > { %v5089_v2 = vadd.f32 %v12583_v44, %v5088_v16 }
 0x411   : > { %v5131_v5 = vadd.f32 %v5089_v2, %v12357_v8  ;;  %v5685_v2 = vld [vmem:[#allocation5 + $0xc7] ss:$2 sm:$0xff] }
 0x413   : > { %v5199_v4 = vpack.c.bf16 %v5131_v5, %v5130_v38  ;;  %v5588_v16 = vld [vmem:[#allocation5 + $0xe7] ss:$2 sm:$0xff]  ;;  %v5543_v5 = vadd.f32 %v5535_v22, %v5502_v63 }
 0x414   : > { %v10345_v38 = vld [vmem:[%s13543_s3 + $0xe8] sm:$0xff] }
 0x415   : > { %5341 = vmatmul.bf16.gmra.mxu0 %v5199_v4  ;;  %5982 = vmatpush.bf16.msrb.mxu2 %v10345_v38 }
 0x416   : > { %v5091_v10 = vpop.f32.mrf.mxu3 }
 0x417   : > { %v5092_v12 = vadd.f32 %v12583_v44, %v5091_v10  ;;  %v5666_v10 = vmul.f32 %v12634_v39, %v5652_v48 }
 0x419   : > { %v5132_v25 = vadd.f32 %v5092_v12, %v12384_v61 }
 0x41e   : > { %v5093_v37 = vpop.f32.mrf.mxu3 }
 0x41f   : > { %v5094_v6 = vadd.f32 %v12583_v44, %v5093_v37  ;;  %v5568_v37 = vmul.f32 %v12612_v27, %v5555_v31  ;;  %v10340_v31 = vld [vmem:[%s13543_s3 + $0xc0] sm:$0xff] }
 0x421   : > { %v5133_v50 = vadd.f32 %v5094_v6, %v12419_v1  ;;  %v5501_v1 = vmul.f32 %v12597_v40, %v5487_v11  ;;  %v5601_v6 = vmul.f32 %v12616_v21, %v5588_v16 }
 0x423   : > { %v5200_v43 = vpack.c.bf16 %v5133_v50, %v5132_v25  ;;  %v5542_v57 = vadd.f32 %v5534_v13, %v5501_v1  ;;  %v5699_v25 = vmul.f32 %v12641_v19, %v5685_v2  ;;  %v5654_v1 = vld [vmem:[#allocation5 + $0xe9] ss:$2 sm:$0xff] }
 0x424   : > { %v5751_v13 = vld [vmem:[#allocation5 + $0xc9] ss:$2 sm:$0xff] }
 0x425   : > { %5346 = vmatmul.bf16.gmra.mxu0 %v5200_v43  ;;  %v5576_v43 = vadd.f32 %v5568_v37, %v5543_v5 }
 0x426   : > { %v5096_v14 = vpop.f32.mrf.mxu3 }
 0x427   : > { %v5097_v60 = vadd.f32 %v12583_v44, %v5096_v14 }
 0x429   : > { %v5134_v58 = vadd.f32 %v5097_v60, %v12446_v20  ;;  %v5621_v60 = vld [vmem:[#allocation5 + $0xe8] ss:$2 sm:$0xff] }
 0x42a   : > { %v5634_v11 = vmul.f32 %v12629_v59, %v5621_v60 }
 0x42e   : > { %v5098_v46 = vpop.f32.mrf.mxu3 }
 0x42f   : > { %v5099_v8 = vadd.f32 %v12583_v44, %v5098_v46  ;;  %v5718_v46 = vld [vmem:[#allocation5 + $0xc8] ss:$2 sm:$0xff] }
 0x430   : > { %v5732_v0 = vmul.f32 %v12652_v17, %v5718_v46 }
 0x431   : > { %v5135_v3 = vadd.f32 %v5099_v8, %v12481_v26  ;;  %v5609_v8 = vadd.f32 %v5601_v6, %v5576_v43 }
 0x433   : > { %v5201_v41 = vpack.c.bf16 %v5135_v3, %v5134_v58  ;;  %v10344_v3 = vld [vmem:[%s13543_s3 + $0xe0] sm:$0xff] }
 0x434   : > { %5983 = vmatpush.bf16.msrb.mxu2 %v10344_v3 }
 0x435   : > { %5351 = vmatmul.bf16.gmra.mxu0 %v5201_v41 }
 0x436   : > { %v5101_v62 = vpop.f32.mrf.mxu3 }
 0x437   : > { %v5102_v61 = vadd.f32 %v12583_v44, %v5101_v62 }
 0x439   : > { %v5136_v20 = vadd.f32 %v5102_v61, %v12506_v54  ;;  %v5575_v54 = vadd.f32 %v5567_v7, %v5542_v57  ;;  %v10343_v61 = vld [vmem:[%s13543_s3 + $0xd8] sm:$0xff]  ;;  %v10342_v7 = vld [vmem:[%s13543_s3 + $0xd0] sm:$0xff] }
 0x43a   : > { %5984 = vmatpush.bf16.msrb.mxu2 %v10343_v61 }
 0x43e   : > { %v5103_v34 = vpop.f32.mrf.mxu3  ;;  %5985 = vmatpush.bf16.msrb.mxu2 %v10342_v7 }
 0x43f   : > { %v5104_v42 = vadd.f32 %v12583_v44, %v5103_v34  ;;  %v5600_v44 = vmul.f32 %v12616_v21, %v5586_v32 }
 0x441   : > { %v5137_v26 = vadd.f32 %v5104_v42, %v12527_v9  ;;  %v5619_v9 = vld [vmem:[#allocation5 + $0xa8] ss:$2 sm:$0xff]  ;;  %v5608_v49 = vadd.f32 %v5600_v44, %v5575_v54  ;;  %v5642_v42 = vadd.f32 %v5634_v11, %v5609_v8  ;;  %v12754_v8 = vld [vmem:[%s13544_s4 + $0x2] ss:$0 sm:$0xff] }
 0x442   : > { %v5317_v45 = vpop.f32.mrf.mxu0  ;;  %v5633_v51 = vmul.f32 %v12629_v59, %v5619_v9  ;;  %v10341_v9 = vld [vmem:[%s13543_s3 + $0xc8] sm:$0xff] }
 0x443   : > { %v5318_v47 = vadd.f32 %v12570_v29, %v5317_v45  ;;  %v5202_v36 = vpack.c.bf16 %v5137_v26, %v5136_v20  ;;  %v5667_v20 = vmul.f32 %v12634_v39, %v5654_v1  ;;  %v5765_v26 = vmul.f32 %v12661_v56, %v5751_v13  ;;  %5986 = vmatpush.bf16.msrb.mxu2 %v10341_v9 }
 0x444   : > { %v5641_v4 = vadd.f32 %v5633_v51, %v5608_v49 }
 0x445   : > { %v5376_v18 = vmax.f32 %v5318_v47, 0.0  ;;  %5356 = vmatmul.bf16.gmra.mxu0 %v5202_v36  ;;  %v5675_v45 = vadd.f32 %v5667_v20, %v5642_v42 }
 0x446   : > { %v5674_v14 = vadd.f32 %v5666_v10, %v5641_v4 }
 0x447   : > { %v5408_v15 = vmin.f32 %v5376_v18, 6.0  ;;  %5987 = vmatpush.bf16.msrb.mxu2 %v10340_v31 }
 0x448   : > { %v5707_v58 = vadd.f32 %v5699_v25, %v5674_v14 }
 0x449   : > { %5440 = vst [vmem:[#allocation5 + $0x108] sm:$0xff] %v5408_v15 }
 0x44a   : > { %v5319_v33 = vpop.f32.mrf.mxu0  ;;  %v5740_v23 = vadd.f32 %v5732_v0, %v5707_v58 }
 0x44b   : > { %v5320_v35 = vadd.f32 %v12570_v29, %v5319_v33 }
 0x44c   : > { %v5773_v36 = vadd.f32 %v5765_v26, %v5740_v23 }
 0x44d   : > { %v5377_v12 = vmax.f32 %v5320_v35, 0.0 }
 0x44e   : > { %v5784_v49 = vadd.f32 %v12670_v30, %v5773_v36 }
 0x44f   : > { %v5409_v50 = vmin.f32 %v5377_v12, 6.0 }
 0x450   : > { %v5792_v33 = vmax.f32 %v5784_v49, 0.0 }
 0x451   : > { %5441 = vst [vmem:[#allocation5 + $0x110] sm:$0xff] %v5409_v50 }
 0x452   : > { %v5322_v41 = vpop.f32.mrf.mxu0  ;;  %v5800_v5 = vmin.f32 %v5792_v33, 6.0 }
 0x453   : > { %v5323_v62 = vadd.f32 %v12570_v29, %v5322_v41 }
 0x455   : > { %v5378_v34 = vmax.f32 %v5323_v62, 0.0 }
 0x457   : > { %v5410_v32 = vmin.f32 %v5378_v34, 6.0 }
 0x458   : > { %v5687_v28 = vld [vmem:[#allocation5 + $0x107] ss:$2 sm:$0xff]  ;;  %v5720_v57 = vld [vmem:[#allocation5 + $0x108] ss:$2 sm:$0xff] }
 0x459   : > { %5442 = vst [vmem:[#allocation5 + $0x128] sm:$0xff] %v5410_v32  ;;  %v5700_v47 = vmul.f32 %v12641_v19, %v5687_v28  ;;  %v5753_v24 = vld [vmem:[#allocation5 + $0x109] ss:$2 sm:$0xff]  ;;  %v5733_v54 = vmul.f32 %v12652_v17, %v5720_v57  ;;  %v5524_v61 = vld [vmem:[#allocation5 + $0x108] ss:$2 sm:$0xff] }
 0x45a   : > { %v5324_v44 = vpop.f32.mrf.mxu0  ;;  %v5766_v22 = vmul.f32 %v12661_v56, %v5753_v24  ;;  %v5491_v0 = vld [vmem:[#allocation5 + $0x107] ss:$2 sm:$0xff]  ;;  %v5536_v23 = vmul.f32 %v12600_v52, %v5524_v61 }
 0x45b   : > { %v5325_v53 = vadd.f32 %v12570_v29, %v5324_v44  ;;  %v5708_v18 = vadd.f32 %v5700_v47, %v5675_v45  ;;  %v5503_v42 = vmul.f32 %v12597_v40, %v5491_v0  ;;  %v5557_v20 = vld [vmem:[#allocation5 + $0x109] ss:$2 sm:$0xff] }
 0x45c   : > { %v5569_v47 = vmul.f32 %v12612_v27, %v5557_v20 }
 0x45d   : > { %v5379_v15 = vmax.f32 %v5325_v53, 0.0  ;;  %v5741_v63 = vadd.f32 %v5733_v54, %v5708_v18  ;;  %v5544_v28 = vadd.f32 %v5536_v23, %v5503_v42 }
 0x45f   : > { %v5411_v55 = vmin.f32 %v5379_v15, 6.0  ;;  %v5774_v51 = vadd.f32 %v5766_v22, %v5741_v63  ;;  %v5577_v53 = vadd.f32 %v5569_v47, %v5544_v28 }
 0x461   : > { %5443 = vst [vmem:[#allocation5 + $0x130] sm:$0xff] %v5411_v55  ;;  %v5785_v48 = vadd.f32 %v12670_v30, %v5774_v51 }
 0x462   : > { %v5327_v16 = vpop.f32.mrf.mxu0 }
 0x463   : > { %v5328_v2 = vadd.f32 %v12570_v29, %v5327_v16  ;;  %v5793_v35 = vmax.f32 %v5785_v48, 0.0 }
 0x465   : > { %v5380_v38 = vmax.f32 %v5328_v2, 0.0  ;;  %v5801_v4 = vmin.f32 %v5793_v35, 6.0 }
 0x467   : > { %v5412_v10 = vmin.f32 %v5380_v38, 6.0  ;;  %v5807_v12 = vpack.c.bf16 %v5801_v4, %v5800_v5 }
 0x468   : > { %v5590_v26 = vld [vmem:[#allocation5 + $0x127] ss:$2 sm:$0xff]  ;;  %v5623_v18 = vld [vmem:[#allocation5 + $0x128] ss:$2 sm:$0xff] }
 0x469   : > { %5444 = vst [vmem:[#allocation5 + $0x148] sm:$0xff] %v5412_v10  ;;  %5874 = vmatmul.bf16.gmra.mxu1 %v5807_v12  ;;  %v5602_v36 = vmul.f32 %v12616_v21, %v5590_v26  ;;  %v5635_v22 = vmul.f32 %v12629_v59, %v5623_v18  ;;  %v5656_v49 = vld [vmem:[#allocation5 + $0x129] ss:$2 sm:$0xff] }
 0x46a   : > { %v5329_v37 = vpop.f32.mrf.mxu0  ;;  %v5668_v35 = vmul.f32 %v12634_v39, %v5656_v49 }
 0x46b   : > { %v5330_v6 = vadd.f32 %v12570_v29, %v5329_v37  ;;  %v5610_v63 = vadd.f32 %v5602_v36, %v5577_v53 }
 0x46d   : > { %v5381_v25 = vmax.f32 %v5330_v6, 0.0  ;;  %v5643_v2 = vadd.f32 %v5635_v22, %v5610_v63 }
 0x46f   : > { %v5413_v50 = vmin.f32 %v5381_v25, 6.0  ;;  %v5676_v6 = vadd.f32 %v5668_v35, %v5643_v2 }
 0x471   : > { %5445 = vst [vmem:[#allocation5 + $0x150] sm:$0xff] %v5413_v50  ;;  %v5870_v43 = vpop.f32.mrf.mxu1 }
 0x472   : > { %v5332_v14 = vpop.f32.mrf.mxu0  ;;  %v12757_v41 = vadd.f32 %v12754_v8, %v5870_v43 }
 0x473   : > { %v5333_v60 = vadd.f32 %v12570_v29, %v5332_v14 }
 0x475   : > { %v5382_v46 = vmax.f32 %v5333_v60, 0.0 }
 0x477   : > { %v5414_v58 = vmin.f32 %v5382_v46, 6.0 }
 0x478   : > { %v5493_v7 = vld [vmem:[#allocation5 + $0x147] ss:$2 sm:$0xff]  ;;  %v5526_v44 = vld [vmem:[#allocation5 + $0x148] ss:$2 sm:$0xff] }
 0x479   : > { %5446 = vst [vmem:[#allocation5 + $0x168] sm:$0xff] %v5414_v58  ;;  %v5872_v3 = vpop.f32.mrf.mxu1  ;;  %v5504_v9 = vmul.f32 %v12597_v40, %v5493_v7  ;;  %v5537_v15 = vmul.f32 %v12600_v52, %v5526_v44  ;;  %v5559_v51 = vld [vmem:[#allocation5 + $0x149] ss:$2 sm:$0xff]  ;;  %v5722_v50 = vld [vmem:[#allocation5 + $0x148] ss:$2 sm:$0xff] }
 0x47a   : > { %v12760_v62 = vadd.f32 %v12754_v8, %v5872_v3  ;;  %v5334_v11 = vpop.f32.mrf.mxu0  ;;  %v5689_v33 = vld [vmem:[#allocation5 + $0x147] ss:$2 sm:$0xff]  ;;  %v5570_v5 = vmul.f32 %v12612_v27, %v5559_v51  ;;  %v5734_v3 = vmul.f32 %v12652_v17, %v5722_v50 }
 0x47b   : > { %v5335_v1 = vadd.f32 %v12570_v29, %v5334_v11  ;;  %v5545_v16 = vadd.f32 %v5537_v15, %v5504_v9  ;;  %v5701_v10 = vmul.f32 %v12641_v19, %v5689_v33  ;;  %v5755_v0 = vld [vmem:[#allocation5 + $0x149] ss:$2 sm:$0xff] }
 0x47c   : > { %v5906_v13 = vpack.c.bf16 %v12760_v62, %v12757_v41  ;;  %v5767_v23 = vmul.f32 %v12661_v56, %v5755_v0 }
 0x47d   : > { %v5383_v34 = vmax.f32 %v5335_v1, 0.0  ;;  %v5578_v37 = vadd.f32 %v5570_v5, %v5545_v16  ;;  %v5709_v14 = vadd.f32 %v5701_v10, %v5676_v6 }
 0x47e   : > { %5988 = vmatmul.bf16.vlgmr.msrb.gmra.mxu2 %v5906_v13 }
 0x47f   : > { %v5415_v32 = vmin.f32 %v5383_v34, 6.0  ;;  %v5742_v13 = vadd.f32 %v5734_v3, %v5709_v14 }
 0x481   : > { %5447 = vst [vmem:[#allocation5 + $0x170] sm:$0xff] %v5415_v32 }
 0x482   : > { %v5337_v57 = vpop.f32.mrf.mxu0 }
 0x483   : > { %v5338_v45 = vadd.f32 %v12570_v29, %v5337_v57  ;;  %v5775_v57 = vadd.f32 %v5767_v23, %v5742_v13 }
 0x485   : > { %v5384_v24 = vmax.f32 %v5338_v45, 0.0 }
 0x487   : > { %v5416_v54 = vmin.f32 %v5384_v24, 6.0 }
 0x488   : > { %v5592_v48 = vld [vmem:[#allocation5 + $0x167] ss:$2 sm:$0xff]  ;;  %v5625_v25 = vld [vmem:[#allocation5 + $0x168] ss:$2 sm:$0xff] }
 0x489   : > { %5448 = vst [vmem:[#allocation5 + $0x188] sm:$0xff] %v5416_v54  ;;  %v5603_v4 = vmul.f32 %v12616_v21, %v5592_v48  ;;  %v5636_v58 = vmul.f32 %v12629_v59, %v5625_v25  ;;  %v5658_v11 = vld [vmem:[#allocation5 + $0x169] ss:$2 sm:$0xff]  ;;  %v5786_v54 = vadd.f32 %v12670_v30, %v5775_v57 }
 0x48a   : > { %v5339_v55 = vpop.f32.mrf.mxu0  ;;  %v5669_v42 = vmul.f32 %v12634_v39, %v5658_v11 }
 0x48b   : > { %v5340_v31 = vadd.f32 %v12570_v29, %v5339_v55  ;;  %v5611_v43 = vadd.f32 %v5603_v4, %v5578_v37  ;;  %v5794_v22 = vmax.f32 %v5786_v54, 0.0 }
 0x48d   : > { %v5385_v38 = vmax.f32 %v5340_v31, 0.0  ;;  %v5644_v1 = vadd.f32 %v5636_v58, %v5611_v43  ;;  %v5802_v33 = vmin.f32 %v5794_v22, 6.0 }
 0x48f   : > { %v5417_v12 = vmin.f32 %v5385_v38, 6.0  ;;  %v5677_v26 = vadd.f32 %v5669_v42, %v5644_v1 }
 0x491   : > { %5449 = vst [vmem:[#allocation5 + $0x190] sm:$0xff] %v5417_v12 }
 0x492   : > { %v5342_v60 = vpop.f32.mrf.mxu0 }
 0x493   : > { %v5343_v46 = vadd.f32 %v12570_v29, %v5342_v60 }
 0x495   : > { %v5386_v61 = vmax.f32 %v5343_v46, 0.0 }
 0x497   : > { %v5418_v34 = vmin.f32 %v5386_v61, 6.0 }
 0x498   : > { %v5691_v32 = vld [vmem:[#allocation5 + $0x187] ss:$2 sm:$0xff]  ;;  %v5724_v20 = vld [vmem:[#allocation5 + $0x188] ss:$2 sm:$0xff] }
 0x499   : > { %5450 = vst [vmem:[#allocation5 + $0x1a8] sm:$0xff] %v5418_v34  ;;  %v5702_v28 = vmul.f32 %v12641_v19, %v5691_v32  ;;  %v5757_v47 = vld [vmem:[#allocation5 + $0x189] ss:$2 sm:$0xff]  ;;  %v5735_v44 = vmul.f32 %v12652_v17, %v5724_v20  ;;  %v5528_v43 = vld [vmem:[#allocation5 + $0x188] ss:$2 sm:$0xff] }
 0x49a   : > { %v5344_v45 = vpop.f32.mrf.mxu0  ;;  %v5768_v18 = vmul.f32 %v12661_v56, %v5757_v47  ;;  %v5495_v50 = vld [vmem:[#allocation5 + $0x187] ss:$2 sm:$0xff]  ;;  %v5538_v58 = vmul.f32 %v12600_v52, %v5528_v43 }
 0x49b   : > { %v5345_v36 = vadd.f32 %v12570_v29, %v5344_v45  ;;  %v5710_v7 = vadd.f32 %v5702_v28, %v5677_v26  ;;  %v5505_v46 = vmul.f32 %v12597_v40, %v5495_v50  ;;  %v5561_v11 = vld [vmem:[#allocation5 + $0x189] ss:$2 sm:$0xff] }
 0x49c   : > { %v5571_v34 = vmul.f32 %v12612_v27, %v5561_v11 }
 0x49d   : > { %v5387_v24 = vmax.f32 %v5345_v36, 0.0  ;;  %v5743_v53 = vadd.f32 %v5735_v44, %v5710_v7  ;;  %v5546_v61 = vadd.f32 %v5538_v58, %v5505_v46 }
 0x49f   : > { %v5419_v9 = vmin.f32 %v5387_v24, 6.0  ;;  %v5776_v15 = vadd.f32 %v5768_v18, %v5743_v53  ;;  %v5579_v26 = vadd.f32 %v5571_v34, %v5546_v61 }
 0x4a1   : > { %5451 = vst [vmem:[#allocation5 + $0x1b0] sm:$0xff] %v5419_v9  ;;  %v5787_v63 = vadd.f32 %v12670_v30, %v5776_v15 }
 0x4a2   : > { %v5347_v49 = vpop.f32.mrf.mxu0 }
 0x4a3   : > { %v5348_v55 = vadd.f32 %v12570_v29, %v5347_v49  ;;  %v5795_v51 = vmax.f32 %v5787_v63, 0.0 }
 0x4a5   : > { %v5388_v48 = vmax.f32 %v5348_v55, 0.0  ;;  %v5803_v31 = vmin.f32 %v5795_v51, 6.0 }
 0x4a7   : > { %v5420_v16 = vmin.f32 %v5388_v48, 6.0  ;;  %v5808_v2 = vpack.c.bf16 %v5803_v31, %v5802_v33 }
 0x4a8   : > { %v5594_v0 = vld [vmem:[#allocation5 + $0x1a7] ss:$2 sm:$0xff]  ;;  %v5627_v28 = vld [vmem:[#allocation5 + $0x1a8] ss:$2 sm:$0xff] }
 0x4a9   : > { %5452 = vst [vmem:[#allocation5 + $0x1c8] sm:$0xff] %v5420_v16  ;;  %5879 = vmatmul.bf16.gmra.mxu1 %v5808_v2  ;;  %v5604_v42 = vmul.f32 %v12616_v21, %v5594_v0  ;;  %v5637_v7 = vmul.f32 %v12629_v59, %v5627_v28  ;;  %v5660_v44 = vld [vmem:[#allocation5 + $0x1a9] ss:$2 sm:$0xff] }
 0x4aa   : > { %v5349_v35 = vpop.f32.mrf.mxu0  ;;  %v5670_v22 = vmul.f32 %v12634_v39, %v5660_v44 }
 0x4ab   : > { %v5350_v38 = vadd.f32 %v12570_v29, %v5349_v35  ;;  %v5612_v36 = vadd.f32 %v5604_v42, %v5579_v26 }
 0x4ad   : > { %v5389_v5 = vmax.f32 %v5350_v38, 0.0  ;;  %v5645_v63 = vadd.f32 %v5637_v7, %v5612_v36 }
 0x4af   : > { %v5421_v4 = vmin.f32 %v5389_v5, 6.0  ;;  %v5678_v33 = vadd.f32 %v5670_v22, %v5645_v63 }
 0x4b1   : > { %5453 = vst [vmem:[#allocation5 + $0x1d0] sm:$0xff] %v5421_v4 }
 0x4b2   : > { %v5352_v10 = vpop.f32.mrf.mxu0 }
 0x4b3   : > { %v5353_v12 = vadd.f32 %v12570_v29, %v5352_v10 }
 0x4b5   : > { %v5390_v37 = vmax.f32 %v5353_v12, 0.0 }
 0x4b7   : > { %v5422_v6 = vmin.f32 %v5390_v37, 6.0 }
 0x4b8   : > { %v5497_v23 = vld [vmem:[#allocation5 + $0x1c7] ss:$2 sm:$0xff]  ;;  %v5530_v32 = vld [vmem:[#allocation5 + $0x1c8] ss:$2 sm:$0xff] }
 0x4b9   : > { %5454 = vst [vmem:[#allocation5 + $0x1e8] sm:$0xff] %v5422_v6  ;;  %v5506_v45 = vmul.f32 %v12597_v40, %v5497_v23  ;;  %v5539_v47 = vmul.f32 %v12600_v52, %v5530_v32  ;;  %v5563_v53 = vld [vmem:[#allocation5 + $0x1c9] ss:$2 sm:$0xff]  ;;  %v5726_v16 = vld [vmem:[#allocation5 + $0x1c8] ss:$2 sm:$0xff] }
 0x4ba   : > { %v5354_v25 = vpop.f32.mrf.mxu0  ;;  %v5693_v54 = vld [vmem:[#allocation5 + $0x1c7] ss:$2 sm:$0xff]  ;;  %v5572_v40 = vmul.f32 %v12612_v27, %v5563_v53  ;;  %v5736_v38 = vmul.f32 %v12652_v17, %v5726_v16 }
 0x4bb   : > { %v5355_v14 = vadd.f32 %v12570_v29, %v5354_v25  ;;  %v5547_v15 = vadd.f32 %v5539_v47, %v5506_v45  ;;  %v5703_v55 = vmul.f32 %v12641_v19, %v5693_v54  ;;  %v5759_v4 = vld [vmem:[#allocation5 + $0x1c9] ss:$2 sm:$0xff] }
 0x4bc   : > { %v5769_v12 = vmul.f32 %v12661_v56, %v5759_v4  ;;  %v6083_v45 = vld [vmem:[#allocation8 + $0x8] sm:$0xff] }
 0x4bd   : > { %v5391_v60 = vmax.f32 %v5355_v14, 0.0  ;;  %v5580_v48 = vadd.f32 %v5572_v40, %v5547_v15  ;;  %v5711_v35 = vadd.f32 %v5703_v55, %v5678_v33 }
 0x4bf   : > { %v5423_v3 = vmin.f32 %v5391_v60, 6.0  ;;  %v5744_v27 = vadd.f32 %v5736_v38, %v5711_v35 }
 0x4c1   : > { %5455 = vst [vmem:[#allocation5 + $0x1f0] sm:$0xff] %v5423_v3  ;;  %v5777_v43 = vadd.f32 %v5769_v12, %v5744_v27 }
 0x4c2   : > { %v5357_v1 = vpop.f32.mrf.mxu0 }
 0x4c3   : > { %v5358_v13 = vadd.f32 %v12570_v29, %v5357_v1  ;;  %v5788_v3 = vadd.f32 %v12670_v30, %v5777_v43 }
 0x4c5   : > { %v5392_v20 = vmax.f32 %v5358_v13, 0.0  ;;  %v5796_v0 = vmax.f32 %v5788_v3, 0.0 }
 0x4c7   : > { %v5424_v57 = vmin.f32 %v5392_v20, 6.0  ;;  %v5804_v1 = vmin.f32 %v5796_v0, 6.0  ;;  %v9611_v20 = vld [vmem:[%s13545_s5 + $0x20] sm:$0xff] }
 0x4c8   : > { %v5596_v18 = vld [vmem:[#allocation5 + $0x1e7] ss:$2 sm:$0xff]  ;;  %v5629_v31 = vld [vmem:[#allocation5 + $0x1e8] ss:$2 sm:$0xff]  ;;  %v12832_v28 = vperm.slane %v9611_v20, 0  ;;  %v12834_v36 = vperm.slane %v9611_v20, 1 }
 0x4c9   : > { %5456 = vst [vmem:[#allocation5 + $0x208] sm:$0xff] %v5424_v57  ;;  %v5605_v52 = vmul.f32 %v12616_v21, %v5596_v18  ;;  %v5662_v5 = vld [vmem:[#allocation5 + $0x1e9] ss:$2 sm:$0xff]  ;;  %v12838_v53 = vperm.slane %v9611_v20, 2  ;;  %v12846_v55 = vperm.slane %v9611_v20, 4  ;;  %v12853_v35 = vperm.slane %v9611_v20, 5 }
 0x4ca   : > { %v5359_v24 = vpop.f32.mrf.mxu0  ;;  %v5671_v21 = vmul.f32 %v12634_v39, %v5662_v5  ;;  %v6058_v57 = vld [vmem:[#allocation8 + $0x7] sm:$0xff]  ;;  %v12855_v4 = vperm.slane %v9611_v20, 6 }
 0x4cb   : > { %v5360_v9 = vadd.f32 %v12570_v29, %v5359_v24  ;;  %v5613_v2 = vadd.f32 %v5605_v52, %v5580_v48  ;;  %v5638_v29 = vmul.f32 %v12629_v59, %v5629_v31  ;;  %v6067_v44 = vmul.f32 %v12832_v28, %v6058_v57  ;;  %v6108_v18 = vld [vmem:[#allocation8 + $0x9] sm:$0xff] }
 0x4cc   : > { %v6092_v24 = vmul.f32 %v12834_v36, %v6083_v45  ;;  %v6117_v63 = vmul.f32 %v12838_v53, %v6108_v18  ;;  %v10350_v57 = vld [vmem:[%s13543_s3 + $0x110] sm:$0xff] }
 0x4cd   : > { %v5393_v49 = vmax.f32 %v5360_v9, 0.0  ;;  %v5646_v10 = vadd.f32 %v5638_v29, %v5613_v2 }
 0x4ce   : > { %v6100_v15 = vadd.f32 %v6092_v24, %v6067_v44 }
 0x4cf   : > { %v5425_v51 = vmin.f32 %v5393_v49, 6.0  ;;  %v5679_v25 = vadd.f32 %v5671_v21, %v5646_v10  ;;  %v12842_v49 = vperm.slane %v9611_v20, 3  ;;  %v12859_v21 = vperm.slane %v9611_v20, 7 }
 0x4d0   : > { %v6125_v52 = vadd.f32 %v6117_v63, %v6100_v15  ;;  %v12913_v63 = vld [vmem:[%s13545_s5 + $0x28] ss:$0 sm:$0xff] }
 0x4d1   : > { %5457 = vst [vmem:[#allocation5 + $0x210] sm:$0xff] %v5425_v51 }
 0x4d8   : > { %v5695_v37 = vld [vmem:[#allocation5 + $0x207] ss:$2 sm:$0xff]  ;;  %v5728_v6 = vld [vmem:[#allocation5 + $0x208] ss:$2 sm:$0xff] }
 0x4d9   : > { %v5704_v50 = vmul.f32 %v12641_v19, %v5695_v37  ;;  %v5761_v14 = vld [vmem:[#allocation5 + $0x209] ss:$2 sm:$0xff]  ;;  %v5737_v59 = vmul.f32 %v12652_v17, %v5728_v6 }
 0x4da   : > { %v5770_v58 = vmul.f32 %v12661_v56, %v5761_v14 }
 0x4db   : > { %v5712_v60 = vadd.f32 %v5704_v50, %v5679_v25 }
 0x4dd   : > { %v5745_v46 = vadd.f32 %v5737_v59, %v5712_v60 }
 0x4df   : > { %v5778_v11 = vadd.f32 %v5770_v58, %v5745_v46 }
 0x4e1   : > { %v5789_v39 = vadd.f32 %v12670_v30, %v5778_v11  ;;  %v12826_v30 = vld [vmem:[%s13544_s4 + $0x3] ss:$0 sm:$0xff] }
 0x4e3   : > { %v5797_v61 = vmax.f32 %v5789_v39, 0.0 }
 0x4e5   : > { %v5805_v13 = vmin.f32 %v5797_v61, 6.0 }
 0x4e6   : > { %v5875_v34 = vpop.f32.mrf.mxu1 }
 0x4e7   : > { %v5809_v42 = vpack.c.bf16 %v5805_v13, %v5804_v1  ;;  %v12816_v23 = vadd.f32 %v12754_v8, %v5875_v34  ;;  %v10355_v1 = vld [vmem:[%s13543_s3 + $0x138] sm:$0xff]  ;;  %v10354_v13 = vld [vmem:[%s13543_s3 + $0x130] sm:$0xff]  ;;  %v10353_v34 = vld [vmem:[%s13543_s3 + $0x128] sm:$0xff] }
 0x4e8   : > { %6366 = vmatpush.bf16.msra.mxu3 %v10355_v1 }
 0x4e9   : > { %5884 = vmatmul.bf16.gmra.mxu1 %v5809_v42 }
 0x4ec   : > { %6367 = vmatpush.bf16.msra.mxu3 %v10354_v13 }
 0x4ee   : > { %v5877_v19 = vpop.f32.mrf.mxu1 }
 0x4ef   : > { %v12819_v17 = vadd.f32 %v12754_v8, %v5877_v19  ;;  %v10352_v19 = vld [vmem:[%s13543_s3 + $0x120] sm:$0xff] }
 0x4f0   : > { %6368 = vmatpush.bf16.msra.mxu3 %v10353_v34 }
 0x4f1   : > { %v5907_v56 = vpack.c.bf16 %v12819_v17, %v12816_v23 }
 0x4f3   : > { %5993 = vmatmul.bf16.gmra.mxu2 %v5907_v56  ;;  %v10351_v56 = vld [vmem:[%s13543_s3 + $0x118] sm:$0xff] }
 0x4f4   : > { %6369 = vmatpush.bf16.msra.mxu3 %v10352_v19 }
 0x4f8   : > { %6370 = vmatpush.bf16.msra.mxu3 %v10351_v56 }
 0x4fc   : > { %6371 = vmatpush.bf16.msra.mxu3 %v10350_v57 }
 0x501   : > { %v5989_v32 = vpop.f32.mrf.mxu2 }
 0x502   : > { %v5990_v26 = vadd.f32 %v12826_v30, %v5989_v32 }
 0x504   : > { %v6009_v47 = vmax.f32 %v5990_v26, 0.0 }
 0x506   : > { %v6017_v7 = vmin.f32 %v6009_v47, 6.0  ;;  %v10349_v47 = vld [vmem:[%s13543_s3 + $0x108] sm:$0xff] }
 0x507   : > { %6372 = vmatpush.bf16.msra.mxu3 %v10349_v47 }
 0x508   : > { %6026 = vst [vmem:[#allocation8 + $0x20] sm:$0xff] %v6017_v7  ;;  %v6093_v31 = vmul.f32 %v12834_v36, %v6017_v7  ;;  %v6167_v2 = vmul.f32 %v12846_v55, %v6017_v7 }
 0x509   : > { %v5991_v54 = vpop.f32.mrf.mxu2 }
 0x50a   : > { %v5992_v9 = vadd.f32 %v12826_v30, %v5991_v54 }
 0x50c   : > { %v6010_v22 = vmax.f32 %v5992_v9, 0.0 }
 0x50e   : > { %v12844_v40 = vmin.f32 %v6010_v22, 6.0 }
 0x50f   : > { %v6059_v51 = vld [vmem:[#allocation8 + $0x1f] sm:$0xff] }
 0x510   : > { %6027 = vst [vmem:[#allocation8 + $0x38] sm:$0xff] %v12844_v40  ;;  %v6068_v48 = vmul.f32 %v12832_v28, %v6059_v51  ;;  %v6142_v33 = vmul.f32 %v12842_v49, %v6059_v51  ;;  %v6109_v29 = vld [vmem:[#allocation8 + $0x21] sm:$0xff]  ;;  %v6168_v14 = vmul.f32 %v12846_v55, %v12844_v40  ;;  %v6243_v59 = vmul.f32 %v12859_v21, %v12844_v40 }
 0x511   : > { %v6118_v10 = vmul.f32 %v12838_v53, %v6109_v29  ;;  %v6192_v27 = vmul.f32 %v12853_v35, %v6109_v29 }
 0x512   : > { %v6150_v16 = vadd.f32 %v6142_v33, %v6125_v52  ;;  %v6101_v38 = vadd.f32 %v6093_v31, %v6068_v48  ;;  %v6094_v52 = vmul.f32 %v12834_v36, %v12844_v40 }
 0x514   : > { %v6175_v5 = vadd.f32 %v6167_v2, %v6150_v16  ;;  %v6126_v37 = vadd.f32 %v6118_v10, %v6101_v38 }
 0x516   : > { %v6200_v25 = vadd.f32 %v6192_v27, %v6175_v5  ;;  %v12924_v27 = vld [vmem:[%s13546_s6 + $0x2] ss:$0 sm:$0xff] }
 0x517   : > { %v6134_v12 = vld [vmem:[#allocation8 + $0x37] sm:$0xff] }
 0x518   : > { %v6143_v6 = vmul.f32 %v12842_v49, %v6134_v12  ;;  %v6218_v50 = vmul.f32 %v12855_v4, %v6134_v12  ;;  %v6069_v9 = vmul.f32 %v6134_v12, %v12832_v28  ;;  %v6184_v22 = vld [vmem:[#allocation8 + $0x39] sm:$0xff] }
 0x519   : > { %v6193_v31 = vmul.f32 %v12853_v35, %v6184_v22  ;;  %v6268_v16 = vmul.f32 %v12913_v63, %v6184_v22  ;;  %v6119_v29 = vmul.f32 %v6184_v22, %v12838_v53 }
 0x51a   : > { %v6151_v43 = vadd.f32 %v6143_v6, %v6126_v37  ;;  %v6226_v60 = vadd.f32 %v6218_v50, %v6200_v25  ;;  %v6102_v48 = vadd.f32 %v6094_v52, %v6069_v9 }
 0x51c   : > { %v6176_v46 = vadd.f32 %v6168_v14, %v6151_v43  ;;  %v6251_v58 = vadd.f32 %v6243_v59, %v6226_v60  ;;  %v6127_v12 = vadd.f32 %v6119_v29, %v6102_v48 }
 0x51e   : > { %v6201_v38 = vadd.f32 %v6193_v31, %v6176_v46  ;;  %v6276_v10 = vadd.f32 %v6268_v16, %v6251_v58 }
 0x520   : > { %v6287_v59 = vadd.f32 %v12924_v27, %v6276_v10 }
 0x522   : > { %v6295_v1 = vmax.f32 %v6287_v59, 0.0 }
 0x526   : > { %v5880_v3 = vpop.f32.mrf.mxu1 }
 0x527   : > { %v12868_v39 = vadd.f32 %v12754_v8, %v5880_v3 }
 0x52e   : > { %v5882_v11 = vpop.f32.mrf.mxu1 }
 0x52f   : > { %v12871_v0 = vadd.f32 %v12754_v8, %v5882_v11 }
 0x531   : > { %v5908_v61 = vpack.c.bf16 %v12871_v0, %v12868_v39 }
 0x533   : > { %5998 = vmatmul.bf16.gmra.mxu2 %v5908_v61 }
 0x566   : > { %v5885_v42 = vpop.f32.mrf.mxu1 }
 0x567   : > { %v12891_v20 = vadd.f32 %v12754_v8, %v5885_v42 }
 0x56e   : > { %v5887_v32 = vpop.f32.mrf.mxu1 }
 0x56f   : > { %v12894_v26 = vadd.f32 %v12754_v8, %v5887_v32  ;;  %v10348_v8 = vld [vmem:[%s13543_s3 + $0x100] sm:$0xff]  ;;  %v6303_v32 = vmin.f32 %v6295_v1, 6.0 }
 0x570   : > { %6373 = vmatpush.bf16.msra.mxu3 %v10348_v8 }
 0x571   : > { %v5909_v45 = vpack.c.bf16 %v12894_v26, %v12891_v20 }
 0x573   : > { %6003 = vmatmul.bf16.gmra.mxu2 %v5909_v45 }
 0x576   : > { %v5994_v7 = vpop.f32.mrf.mxu2 }
 0x577   : > { %v5995_v44 = vadd.f32 %v12826_v30, %v5994_v7 }
 0x579   : > { %v6011_v24 = vmax.f32 %v5995_v44, 0.0 }
 0x57b   : > { %v6019_v18 = vmin.f32 %v6011_v24, 6.0 }
 0x57d   : > { %6028 = vst [vmem:[#allocation8 + $0x50] sm:$0xff] %v6019_v18  ;;  %v6244_v25 = vmul.f32 %v12859_v21, %v6019_v18  ;;  %v6169_v43 = vmul.f32 %v12846_v55, %v6019_v18  ;;  %v6095_v44 = vmul.f32 %v12834_v36, %v6019_v18 }
 0x57e   : > { %v5996_v54 = vpop.f32.mrf.mxu2 }
 0x57f   : > { %v5997_v15 = vadd.f32 %v12826_v30, %v5996_v54 }
 0x581   : > { %v6012_v51 = vmax.f32 %v5997_v15, 0.0 }
 0x583   : > { %v6020_v33 = vmin.f32 %v6012_v51, 6.0 }
 0x584   : > { %v6210_v2 = vld [vmem:[#allocation8 + $0x4f] sm:$0xff] }
 0x585   : > { %6029 = vst [vmem:[#allocation8 + $0x68] sm:$0xff] %v6020_v33  ;;  %v6219_v5 = vmul.f32 %v12855_v4, %v6210_v2  ;;  %v6260_v40 = vld [vmem:[#allocation8 + $0x51] sm:$0xff]  ;;  %v6144_v37 = vmul.f32 %v6210_v2, %v12842_v49  ;;  %v6245_v56 = vmul.f32 %v12859_v21, %v6020_v33  ;;  %v6070_v7 = vmul.f32 %v6210_v2, %v12832_v28 }
 0x586   : > { %v6269_v60 = vmul.f32 %v12913_v63, %v6260_v40  ;;  %v6194_v3 = vmul.f32 %v6260_v40, %v12853_v35  ;;  %v6120_v15 = vmul.f32 %v6260_v40, %v12838_v53  ;;  %v6170_v18 = vmul.f32 %v12846_v55, %v6020_v33 }
 0x587   : > { %v6227_v6 = vadd.f32 %v6219_v5, %v6201_v38  ;;  %v6152_v50 = vadd.f32 %v6144_v37, %v6127_v12  ;;  %v6103_v54 = vadd.f32 %v6095_v44, %v6070_v7  ;;  %v6096_v38 = vmul.f32 %v12834_v36, %v6020_v33 }
 0x589   : > { %v6252_v14 = vadd.f32 %v6244_v25, %v6227_v6  ;;  %v6177_v46 = vadd.f32 %v6169_v43, %v6152_v50  ;;  %v6128_v51 = vadd.f32 %v6120_v15, %v6103_v54 }
 0x58b   : > { %v6277_v58 = vadd.f32 %v6269_v60, %v6252_v14  ;;  %v6202_v13 = vadd.f32 %v6194_v3, %v6177_v46 }
 0x58c   : > { %v6136_v11 = vld [vmem:[#allocation8 + $0x67] sm:$0xff] }
 0x58d   : > { %v6288_v61 = vadd.f32 %v12924_v27, %v6277_v58  ;;  %v6220_v34 = vmul.f32 %v12855_v4, %v6136_v11  ;;  %v6145_v22 = vmul.f32 %v12842_v49, %v6136_v11  ;;  %v6071_v16 = vmul.f32 %v6136_v11, %v12832_v28  ;;  %v6186_v29 = vld [vmem:[#allocation8 + $0x69] sm:$0xff] }
 0x58e   : > { %v6195_v37 = vmul.f32 %v12853_v35, %v6186_v29  ;;  %v6270_v6 = vmul.f32 %v12913_v63, %v6186_v29  ;;  %v6121_v50 = vmul.f32 %v6186_v29, %v12838_v53 }
 0x58f   : > { %v6296_v42 = vmax.f32 %v6288_v61, 0.0  ;;  %v6228_v19 = vadd.f32 %v6220_v34, %v6202_v13  ;;  %v6153_v48 = vadd.f32 %v6145_v22, %v6128_v51  ;;  %v6104_v12 = vadd.f32 %v6096_v38, %v6071_v16  ;;  %v10363_v51 = vld [vmem:[%s13543_s3 + $0x178] sm:$0xff]  ;;  %v10360_v16 = vld [vmem:[%s13543_s3 + $0x160] sm:$0xff] }
 0x590   : > { %6501 = vmatpush.bf16.msra.mxu1 %v10363_v51 }
 0x591   : > { %v6304_v57 = vmin.f32 %v6296_v42, 6.0  ;;  %v6253_v45 = vadd.f32 %v6245_v56, %v6228_v19  ;;  %v6178_v10 = vadd.f32 %v6170_v18, %v6153_v48  ;;  %v6129_v33 = vadd.f32 %v6121_v50, %v6104_v12  ;;  %v10362_v48 = vld [vmem:[%s13543_s3 + $0x170] sm:$0xff] }
 0x593   : > { %v6311_v47 = vpack.c.bf16 %v6304_v57, %v6303_v32  ;;  %v6203_v43 = vadd.f32 %v6195_v37, %v6178_v10  ;;  %v6278_v60 = vadd.f32 %v6270_v6, %v6253_v45 }
 0x594   : > { %6502 = vmatpush.bf16.msra.mxu1 %v10362_v48 }
 0x595   : > { %6374 = vmatmul.bf16.vlgmr.msra.gmra.mxu3 %v6311_v47  ;;  %v6289_v34 = vadd.f32 %v12924_v27, %v6278_v60 }
 0x597   : > { %v6297_v45 = vmax.f32 %v6289_v34, 0.0 }
 0x599   : > { %v6305_v54 = vmin.f32 %v6297_v45, 6.0 }
 0x5b6   : > { %v5999_v8 = vpop.f32.mrf.mxu2 }
 0x5b7   : > { %v6000_v24 = vadd.f32 %v12826_v30, %v5999_v8 }
 0x5b9   : > { %v6013_v9 = vmax.f32 %v6000_v24, 0.0 }
 0x5bb   : > { %v6021_v52 = vmin.f32 %v6013_v9, 6.0 }
 0x5bd   : > { %6030 = vst [vmem:[#allocation8 + $0x80] sm:$0xff] %v6021_v52  ;;  %v6246_v3 = vmul.f32 %v12859_v21, %v6021_v52  ;;  %v6171_v61 = vmul.f32 %v12846_v55, %v6021_v52  ;;  %v6097_v18 = vmul.f32 %v12834_v36, %v6021_v52  ;;  %v10358_v52 = vld [vmem:[%s13543_s3 + $0x150] sm:$0xff] }
 0x5be   : > { %v6001_v31 = vpop.f32.mrf.mxu2 }
 0x5bf   : > { %v6002_v2 = vadd.f32 %v12826_v30, %v6001_v31  ;;  %v10361_v31 = vld [vmem:[%s13543_s3 + $0x168] sm:$0xff] }
 0x5c0   : > { %6503 = vmatpush.bf16.msra.mxu1 %v10361_v31 }
 0x5c1   : > { %v6014_v5 = vmax.f32 %v6002_v2, 0.0 }
 0x5c3   : > { %v12944_v40 = vmin.f32 %v6014_v5, 6.0 }
 0x5c4   : > { %v6212_v25 = vld [vmem:[#allocation8 + $0x7f] sm:$0xff]  ;;  %6504 = vmatpush.bf16.msra.mxu1 %v10360_v16 }
 0x5c5   : > { %6031 = vst [vmem:[#allocation8 + $0x98] sm:$0xff] %v12944_v40  ;;  %v6221_v14 = vmul.f32 %v12855_v4, %v6212_v25  ;;  %v6262_v59 = vld [vmem:[#allocation8 + $0x81] sm:$0xff]  ;;  %v6146_v46 = vmul.f32 %v6212_v25, %v12842_v49  ;;  %v6247_v24 = vmul.f32 %v12859_v21, %v12944_v40  ;;  %v6072_v2 = vmul.f32 %v6212_v25, %v12832_v28 }
 0x5c6   : > { %v6271_v13 = vmul.f32 %v12913_v63, %v6262_v59  ;;  %v6196_v56 = vmul.f32 %v6262_v59, %v12853_v35  ;;  %v6122_v12 = vmul.f32 %v6262_v59, %v12838_v53 }
 0x5c7   : > { %v6229_v58 = vadd.f32 %v6221_v14, %v6203_v43  ;;  %v6154_v11 = vadd.f32 %v6146_v46, %v6129_v33  ;;  %v6105_v5 = vadd.f32 %v6097_v18, %v6072_v2  ;;  %v10359_v43 = vld [vmem:[%s13543_s3 + $0x158] sm:$0xff]  ;;  %v6172_v33 = vmul.f32 %v12846_v55, %v12944_v40 }
 0x5c8   : > { %6505 = vmatpush.bf16.msra.mxu1 %v10359_v43 }
 0x5c9   : > { %v6254_v1 = vadd.f32 %v6246_v3, %v6229_v58  ;;  %v6179_v42 = vadd.f32 %v6171_v61, %v6154_v11  ;;  %v6130_v50 = vadd.f32 %v6122_v12, %v6105_v5  ;;  %v6098_v58 = vmul.f32 %v12834_v36, %v12944_v40  ;;  %v10357_v40 = vld [vmem:[%s13543_s3 + $0x148] sm:$0xff] }
 0x5cb   : > { %v6279_v19 = vadd.f32 %v6271_v13, %v6254_v1  ;;  %v6204_v47 = vadd.f32 %v6196_v56, %v6179_v42 }
 0x5cc   : > { %v6138_v32 = vld [vmem:[#allocation8 + $0x97] sm:$0xff]  ;;  %6506 = vmatpush.bf16.msra.mxu1 %v10358_v52 }
 0x5cd   : > { %v6290_v57 = vadd.f32 %v12924_v27, %v6279_v19  ;;  %v6222_v7 = vmul.f32 %v12855_v4, %v6138_v32  ;;  %v6147_v37 = vmul.f32 %v12842_v49, %v6138_v32  ;;  %v6073_v60 = vmul.f32 %v6138_v32, %v12832_v28  ;;  %v6188_v46 = vld [vmem:[#allocation8 + $0x99] sm:$0xff] }
 0x5ce   : > { %v6272_v61 = vmul.f32 %v12913_v63, %v6188_v46  ;;  %v6197_v34 = vmul.f32 %v12853_v35, %v6188_v46 }
 0x5cf   : > { %v6298_v44 = vmax.f32 %v6290_v57, 0.0  ;;  %v6230_v8 = vadd.f32 %v6222_v7, %v6204_v47  ;;  %v6155_v14 = vadd.f32 %v6147_v37, %v6130_v50  ;;  %v6106_v1 = vadd.f32 %v6098_v58, %v6073_v60  ;;  %v6216_v37 = vld [vmem:[#allocation8 + $0xdf] sm:$0xff] }
 0x5d0   : > { %6507 = vmatpush.bf16.msra.mxu1 %v10357_v40 }
 0x5d1   : > { %v6306_v9 = vmin.f32 %v6298_v44, 6.0  ;;  %v6255_v15 = vadd.f32 %v6247_v24, %v6230_v8  ;;  %v6180_v11 = vadd.f32 %v6172_v33, %v6155_v14  ;;  %v6241_v33 = vld [vmem:[#allocation8 + $0xe0] sm:$0xff] }
 0x5d3   : > { %v6312_v22 = vpack.c.bf16 %v6306_v9, %v6305_v54  ;;  %v6280_v19 = vadd.f32 %v6272_v61, %v6255_v15  ;;  %v6205_v56 = vadd.f32 %v6197_v34, %v6180_v11  ;;  %v10356_v54 = vld [vmem:[%s13543_s3 + $0x140] sm:$0xff]  ;;  %v6266_v11 = vld [vmem:[#allocation8 + $0xe1] sm:$0xff] }
 0x5d4   : > { %6508 = vmatpush.bf16.msra.mxu1 %v10356_v54 }
 0x5d5   : > { %6379 = vmatmul.bf16.gmra.mxu3 %v6312_v22  ;;  %v6291_v9 = vadd.f32 %v12924_v27, %v6280_v19 }
 0x5d7   : > { %v6299_v18 = vmax.f32 %v6291_v9, 0.0 }
 0x5d9   : > { %v6307_v60 = vmin.f32 %v6299_v18, 6.0  ;;  %v9712_v18 = vld [vmem:[%s13545_s5 + $0x30] sm:$0xff] }
 0x5f6   : > { %v6004_v29 = vpop.f32.mrf.mxu2 }
 0x5f7   : > { %v6005_v38 = vadd.f32 %v12826_v30, %v6004_v29 }
 0x5f9   : > { %v6015_v10 = vmax.f32 %v6005_v38, 0.0 }
 0x5fb   : > { %v6023_v6 = vmin.f32 %v6015_v10, 6.0 }
 0x5fd   : > { %6032 = vst [vmem:[#allocation8 + $0xb0] sm:$0xff] %v6023_v6  ;;  %v6099_v47 = vmul.f32 %v12834_v36, %v6023_v6  ;;  %v6248_v24 = vmul.f32 %v12859_v21, %v6023_v6 }
 0x5fe   : > { %v6006_v25 = vpop.f32.mrf.mxu2 }
 0x5ff   : > { %v6007_v59 = vadd.f32 %v12826_v30, %v6006_v25  ;;  %v6123_v30 = vmul.f32 %v6188_v46, %v12838_v53 }
 0x601   : > { %v6016_v3 = vmax.f32 %v6007_v59, 0.0  ;;  %v6131_v7 = vadd.f32 %v6123_v30, %v6106_v1  ;;  %v6225_v59 = vmul.f32 %v12855_v4, %v6216_v37  ;;  %v6579_v37 = vld [vmem:[#allocation8 + $0x7] ss:$2 sm:$0xf] }
 0x603   : > { %v6024_v13 = vmin.f32 %v6016_v3, 6.0 }
 0x604   : > { %v6214_v42 = vld [vmem:[#allocation8 + $0xaf] sm:$0xff] }
 0x605   : > { %6033 = vst [vmem:[#allocation8 + $0xc8] sm:$0xff] %v6024_v13  ;;  %v6223_v32 = vmul.f32 %v12855_v4, %v6214_v42  ;;  %v6074_v57 = vmul.f32 %v6214_v42, %v12832_v28  ;;  %v6264_v45 = vld [vmem:[#allocation8 + $0xb1] sm:$0xff]  ;;  %v6148_v44 = vmul.f32 %v6214_v42, %v12842_v49  ;;  %v6173_v28 = vmul.f32 %v12846_v55, %v6023_v6 }
 0x606   : > { %v6273_v36 = vmul.f32 %v12913_v63, %v6264_v45  ;;  %v6124_v48 = vmul.f32 %v6264_v45, %v12838_v53  ;;  %v6198_v2 = vmul.f32 %v6264_v45, %v12853_v35  ;;  %v6174_v50 = vmul.f32 %v12846_v55, %v6024_v13 }
 0x607   : > { %v6231_v8 = vadd.f32 %v6223_v32, %v6205_v56  ;;  %v6107_v15 = vadd.f32 %v6099_v47, %v6074_v57  ;;  %v6156_v22 = vadd.f32 %v6148_v44, %v6131_v7  ;;  %v6249_v25 = vmul.f32 %v12859_v21, %v6024_v13 }
 0x608   : > { %v6250_v55 = vmul.f32 %v12859_v21, %v6241_v33  ;;  %v6275_v13 = vmul.f32 %v12913_v63, %v6266_v11 }
 0x609   : > { %v6256_v51 = vadd.f32 %v6248_v24, %v6231_v8  ;;  %v6181_v31 = vadd.f32 %v6173_v28, %v6156_v22  ;;  %v6132_v29 = vadd.f32 %v6124_v48, %v6107_v15 }
 0x60b   : > { %v6281_v16 = vadd.f32 %v6273_v36, %v6256_v51  ;;  %v6206_v12 = vadd.f32 %v6198_v2, %v6181_v31 }
 0x60c   : > { %v6140_v38 = vld [vmem:[#allocation8 + $0xc7] sm:$0xff] }
 0x60d   : > { %v6292_v5 = vadd.f32 %v12924_v27, %v6281_v16  ;;  %v6149_v10 = vmul.f32 %v12842_v49, %v6140_v38  ;;  %v6224_v6 = vmul.f32 %v12855_v4, %v6140_v38  ;;  %v6190_v43 = vld [vmem:[#allocation8 + $0xc9] sm:$0xff] }
 0x60e   : > { %v6199_v49 = vmul.f32 %v12853_v35, %v6190_v43  ;;  %v6274_v34 = vmul.f32 %v12913_v63, %v6190_v43  ;;  %v10464_v35 = vld [vmem:[%s13544_s4 + $0x4] ss:$0 sm:$0xff] }
 0x60f   : > { %v6300_v53 = vmax.f32 %v6292_v5, 0.0  ;;  %v6157_v14 = vadd.f32 %v6149_v10, %v6132_v29  ;;  %v6232_v52 = vadd.f32 %v6224_v6, %v6206_v12  ;;  %v13039_v5 = vperm.slane %v9712_v18, 0  ;;  %v6596_v6 = vld [vmem:[#allocation8 + $0x8] ss:$2 sm:$0xf] }
 0x610   : > { %v13041_v10 = vperm.slane %v9712_v18, 1 }
 0x611   : > { %v6308_v46 = vmin.f32 %v6300_v53, 6.0  ;;  %v6182_v58 = vadd.f32 %v6174_v50, %v6157_v14  ;;  %v6257_v3 = vadd.f32 %v6249_v25, %v6232_v52  ;;  %v6587_v14 = vmul.f32 %v13039_v5, %v6579_v37 }
 0x612   : > { %v13045_v52 = vperm.slane %v9712_v18, 2 }
 0x613   : > { %v6313_v61 = vpack.c.bf16 %v6308_v46, %v6307_v60  ;;  %v6207_v1 = vadd.f32 %v6199_v49, %v6182_v58  ;;  %v6282_v19 = vadd.f32 %v6274_v34, %v6257_v3  ;;  %v13049_v46 = vperm.slane %v9712_v18, 3 }
 0x614   : > { %v13051_v34 = vperm.slane %v9712_v18, 4 }
 0x615   : > { %6384 = vmatmul.bf16.gmra.mxu3 %v6313_v61  ;;  %v6233_v42 = vadd.f32 %v6225_v59, %v6207_v1  ;;  %v6293_v32 = vadd.f32 %v12924_v27, %v6282_v19 }
 0x617   : > { %v6258_v30 = vadd.f32 %v6250_v55, %v6233_v42  ;;  %v6301_v57 = vmax.f32 %v6293_v32, 0.0 }
 0x618   : > { %v6375_v4 = vpop.f32.mrf.mxu3 }
 0x619   : > { %v6283_v56 = vadd.f32 %v6275_v13, %v6258_v30  ;;  %v6376_v45 = vadd.f32 %v10464_v35, %v6375_v4  ;;  %v6309_v8 = vmin.f32 %v6301_v57, 6.0 }
 0x61b   : > { %v6294_v40 = vadd.f32 %v12924_v27, %v6283_v56  ;;  %v6403_v63 = vadd.f32 %v6376_v45, %v12757_v41 }
 0x61d   : > { %v6302_v21 = vmax.f32 %v6294_v40, 0.0  ;;  %v13057_v40 = vperm.slane %v9712_v18, 5 }
 0x61f   : > { %v6310_v47 = vmin.f32 %v6302_v21, 6.0  ;;  %v13059_v21 = vperm.slane %v9712_v18, 6 }
 0x620   : > { %v6377_v7 = vpop.f32.mrf.mxu3 }
 0x621   : > { %v6378_v44 = vadd.f32 %v10464_v35, %v6377_v7  ;;  %v6314_v54 = vpack.c.bf16 %v6310_v47, %v6309_v8  ;;  %v13062_v47 = vperm.slane %v9712_v18, 7  ;;  %v13068_v8 = vld [vmem:[%s13545_s5 + $0x38] ss:$0 sm:$0xff] }
 0x623   : > { %v6404_v24 = vadd.f32 %v6378_v44, %v12760_v62  ;;  %v13031_v62 = vld [vmem:[%s13544_s4 + $0x5] ss:$0 sm:$0xff] }
 0x625   : > { %v6427_v9 = vpack.c.bf16 %v6404_v24, %v6403_v63  ;;  %6389 = vmatmul.bf16.gmra.mxu3 %v6314_v54 }
 0x627   : > { %6509 = vmatmul.bf16.vlgmr.msra.gmra.mxu1 %v6427_v9 }
 0x658   : > { %v6380_v15 = vpop.f32.mrf.mxu3 }
 0x659   : > { %v6381_v22 = vadd.f32 %v10464_v35, %v6380_v15 }
 0x65b   : > { %v6405_v27 = vadd.f32 %v6381_v22, %v12816_v23  ;;  %v13075_v22 = vld [vmem:[%s13546_s6 + $0x3] ss:$0 sm:$0xff] }
 0x660   : > { %v6382_v28 = vpop.f32.mrf.mxu3 }
 0x661   : > { %v6383_v51 = vadd.f32 %v10464_v35, %v6382_v28 }
 0x663   : > { %v6406_v36 = vadd.f32 %v6383_v51, %v12819_v17 }
 0x665   : > { %v6428_v48 = vpack.c.bf16 %v6406_v36, %v6405_v27 }
 0x667   : > { %6514 = vmatmul.bf16.gmra.mxu1 %v6428_v48  ;;  %v10371_v48 = vld [vmem:[%s13543_s3 + $0x1b8] sm:$0xff] }
 0x668   : > { %6813 = vmatpush.bf16.msra.mxu2 %v10371_v48 }
 0x698   : > { %v6385_v31 = vpop.f32.mrf.mxu3 }
 0x699   : > { %v6386_v16 = vadd.f32 %v10464_v35, %v6385_v31 }
 0x69b   : > { %v6407_v29 = vadd.f32 %v6386_v16, %v12868_v39  ;;  %v6604_v39 = vmul.f32 %v13041_v10, %v6596_v6 }
 0x69d   : > { %v6608_v60 = vadd.f32 %v6604_v39, %v6587_v14 }
 0x6a0   : > { %v6387_v2 = vpop.f32.mrf.mxu3 }
 0x6a1   : > { %v6388_v41 = vadd.f32 %v10464_v35, %v6387_v2 }
 0x6a3   : > { %v6408_v23 = vadd.f32 %v6388_v41, %v12871_v0  ;;  %v6613_v0 = vld [vmem:[#allocation8 + $0x9] ss:$2 sm:$0xf] }
 0x6a4   : > { %v6510_v17 = vpop.f32.mrf.mxu1  ;;  %v6621_v59 = vmul.f32 %v13045_v52, %v6613_v0 }
 0x6a5   : > { %v6511_v38 = vadd.f32 %v13031_v62, %v6510_v17  ;;  %v6429_v12 = vpack.c.bf16 %v6408_v23, %v6407_v29 }
 0x6a6   : > { %v6625_v11 = vadd.f32 %v6621_v59, %v6608_v60 }
 0x6a7   : > { %v6530_v50 = vmax.f32 %v6511_v38, 0.0  ;;  %6519 = vmatmul.bf16.gmra.mxu1 %v6429_v12 }
 0x6a8   : > { %v6390_v43 = vpop.f32.mrf.mxu3 }
 0x6a9   : > { %v6538_v53 = vmin.f32 %v6530_v50, 6.0  ;;  %v6391_v58 = vadd.f32 %v10464_v35, %v6390_v43 }
 0x6ab   : > { %6546 = vst [vmem:[#allocation8 + $0x20] sm:$0xff] %v6538_v53  ;;  %v6409_v19 = vadd.f32 %v6391_v58, %v12891_v20 }
 0x6ac   : > { %v6512_v25 = vpop.f32.mrf.mxu1 }
 0x6ad   : > { %v6513_v33 = vadd.f32 %v13031_v62, %v6512_v25 }
 0x6af   : > { %v6531_v49 = vmax.f32 %v6513_v33, 0.0 }
 0x6b0   : > { %v6392_v3 = vpop.f32.mrf.mxu3 }
 0x6b1   : > { %v6539_v61 = vmin.f32 %v6531_v49, 6.0  ;;  %v6393_v1 = vadd.f32 %v10464_v35, %v6392_v3 }
 0x6b2   : > { %v6630_v55 = vld [vmem:[#allocation8 + $0x1f] ss:$2 sm:$0xf]  ;;  %v6647_v13 = vld [vmem:[#allocation8 + $0x20] ss:$2 sm:$0xf] }
 0x6b3   : > { %v6638_v42 = vmul.f32 %v13049_v46, %v6630_v55  ;;  %6547 = vst [vmem:[#allocation8 + $0x38] sm:$0xff] %v6539_v61  ;;  %v6410_v30 = vadd.f32 %v6393_v1, %v12894_v26  ;;  %v6655_v32 = vmul.f32 %v13051_v34, %v6647_v13  ;;  %v6664_v57 = vld [vmem:[#allocation8 + $0x21] ss:$2 sm:$0xf] }
 0x6b4   : > { %v6672_v45 = vmul.f32 %v13057_v40, %v6664_v57 }
 0x6b5   : > { %v6642_v4 = vadd.f32 %v6638_v42, %v6625_v11  ;;  %v6430_v56 = vpack.c.bf16 %v6410_v30, %v6409_v19 }
 0x6b7   : > { %6524 = vmatmul.bf16.gmra.mxu1 %v6430_v56  ;;  %v6659_v35 = vadd.f32 %v6655_v32, %v6642_v4 }
 0x6b9   : > { %v6676_v20 = vadd.f32 %v6672_v45, %v6659_v35  ;;  %v10370_v35 = vld [vmem:[%s13543_s3 + $0x1b0] sm:$0xff]  ;;  %v10369_v45 = vld [vmem:[%s13543_s3 + $0x1a8] sm:$0xff] }
 0x6ba   : > { %v6681_v7 = vld [vmem:[#allocation8 + $0x37] ss:$2 sm:$0xf]  ;;  %v6698_v26 = vld [vmem:[#allocation8 + $0x38] ss:$2 sm:$0xf]  ;;  %6814 = vmatpush.bf16.msra.mxu2 %v10370_v35 }
 0x6bb   : > { %v6689_v44 = vmul.f32 %v13059_v21, %v6681_v7  ;;  %v6715_v63 = vld [vmem:[#allocation8 + $0x39] ss:$2 sm:$0xf]  ;;  %v6706_v54 = vmul.f32 %v13062_v47, %v6698_v26  ;;  %v6598_v18 = vld [vmem:[#allocation8 + $0x38] ss:$2 sm:$0xf] }
 0x6bc   : > { %v6723_v15 = vmul.f32 %v13068_v8, %v6715_v63  ;;  %v6581_v41 = vld [vmem:[#allocation8 + $0x37] ss:$2 sm:$0xf]  ;;  %v6605_v17 = vmul.f32 %v13041_v10, %v6598_v18 }
 0x6bd   : > { %v6693_v24 = vadd.f32 %v6689_v44, %v6676_v20  ;;  %v6588_v23 = vmul.f32 %v13039_v5, %v6581_v41  ;;  %v6615_v37 = vld [vmem:[#allocation8 + $0x39] ss:$2 sm:$0xf] }
 0x6be   : > { %v6622_v53 = vmul.f32 %v13045_v52, %v6615_v37  ;;  %6815 = vmatpush.bf16.msra.mxu2 %v10369_v45  ;;  %v10368_v7 = vld [vmem:[%s13543_s3 + $0x1a0] sm:$0xff] }
 0x6bf   : > { %v6710_v9 = vadd.f32 %v6706_v54, %v6693_v24  ;;  %v6609_v50 = vadd.f32 %v6605_v17, %v6588_v23 }
 0x6c1   : > { %v6727_v28 = vadd.f32 %v6723_v15, %v6710_v9  ;;  %v6626_v39 = vadd.f32 %v6622_v53, %v6609_v50 }
 0x6c2   : > { %6816 = vmatpush.bf16.msra.mxu2 %v10368_v7  ;;  %v10379_v7 = vld [vmem:[%s13543_s3 + $0x1f8] sm:$0xff] }
 0x6c3   : > { %v6734_v51 = vadd.f32 %v13075_v22, %v6727_v28  ;;  %6927 = vmatpush.bf16.msrb.mxu3 %v10379_v7  ;;  %v10387_v7 = vld [vmem:[%s13543_s3 + $0x238] sm:$0xff] }
 0x6c5   : > { %v6738_v27 = vmax.f32 %v6734_v51, 0.0 }
 0x6c7   : > { %v6742_v36 = vmin.f32 %v6738_v27, 6.0 }
 0x6c9   : > { %6750 = vst [vmem:[#allocation1] ss:$2 sm:$0xff] %v6742_v36 }
 0x6e4   : > { %v6515_v31 = vpop.f32.mrf.mxu1 }
 0x6e5   : > { %v6516_v16 = vadd.f32 %v13031_v62, %v6515_v31 }
 0x6e7   : > { %v6532_v2 = vmax.f32 %v6516_v16, 0.0 }
 0x6e9   : > { %v6540_v29 = vmin.f32 %v6532_v2, 6.0 }
 0x6eb   : > { %6548 = vst [vmem:[#allocation8 + $0x50] sm:$0xff] %v6540_v29 }
 0x6ec   : > { %v6517_v38 = vpop.f32.mrf.mxu1 }
 0x6ed   : > { %v6518_v12 = vadd.f32 %v13031_v62, %v6517_v38 }
 0x6ef   : > { %v6533_v6 = vmax.f32 %v6518_v12, 0.0 }
 0x6f1   : > { %v6541_v43 = vmin.f32 %v6533_v6, 6.0 }
 0x6f2   : > { %v6632_v14 = vld [vmem:[#allocation8 + $0x4f] ss:$2 sm:$0xf]  ;;  %v6649_v25 = vld [vmem:[#allocation8 + $0x50] ss:$2 sm:$0xf] }
 0x6f3   : > { %6549 = vst [vmem:[#allocation8 + $0x68] sm:$0xff] %v6541_v43  ;;  %v6639_v0 = vmul.f32 %v13049_v46, %v6632_v14  ;;  %v6656_v59 = vmul.f32 %v13051_v34, %v6649_v25  ;;  %v6666_v33 = vld [vmem:[#allocation8 + $0x51] ss:$2 sm:$0xf] }
 0x6f4   : > { %v6673_v49 = vmul.f32 %v13057_v40, %v6666_v33 }
 0x6f5   : > { %v6643_v60 = vadd.f32 %v6639_v0, %v6626_v39 }
 0x6f7   : > { %v6660_v58 = vadd.f32 %v6656_v59, %v6643_v60 }
 0x6f9   : > { %v6677_v11 = vadd.f32 %v6673_v49, %v6660_v58 }
 0x6fa   : > { %v6683_v3 = vld [vmem:[#allocation8 + $0x67] ss:$2 sm:$0xf]  ;;  %v6700_v1 = vld [vmem:[#allocation8 + $0x68] ss:$2 sm:$0xf] }
 0x6fb   : > { %v6690_v61 = vmul.f32 %v13059_v21, %v6683_v3  ;;  %v6717_v55 = vld [vmem:[#allocation8 + $0x69] ss:$2 sm:$0xf]  ;;  %v6707_v13 = vmul.f32 %v13062_v47, %v6700_v1  ;;  %v6600_v24 = vld [vmem:[#allocation8 + $0x68] ss:$2 sm:$0xf] }
 0x6fc   : > { %v6724_v30 = vmul.f32 %v13068_v8, %v6717_v55  ;;  %v6583_v63 = vld [vmem:[#allocation8 + $0x67] ss:$2 sm:$0xf]  ;;  %v6606_v15 = vmul.f32 %v13041_v10, %v6600_v24 }
 0x6fd   : > { %v6694_v42 = vadd.f32 %v6690_v61, %v6677_v11  ;;  %v6589_v9 = vmul.f32 %v13039_v5, %v6583_v63  ;;  %v6617_v27 = vld [vmem:[#allocation8 + $0x69] ss:$2 sm:$0xf] }
 0x6fe   : > { %v6623_v16 = vmul.f32 %v13045_v52, %v6617_v27 }
 0x6ff   : > { %v6711_v19 = vadd.f32 %v6707_v13, %v6694_v42  ;;  %v6610_v48 = vadd.f32 %v6606_v15, %v6589_v9 }
 0x701   : > { %v6728_v4 = vadd.f32 %v6724_v30, %v6711_v19  ;;  %v6627_v41 = vadd.f32 %v6623_v16, %v6610_v48 }
 0x703   : > { %v6735_v56 = vadd.f32 %v13075_v22, %v6728_v4  ;;  %v10366_v4 = vld [vmem:[%s13543_s3 + $0x190] sm:$0xff] }
 0x705   : > { %v6739_v32 = vmax.f32 %v6735_v56, 0.0 }
 0x707   : > { %v6743_v57 = vmin.f32 %v6739_v32, 6.0 }
 0x709   : > { %6752 = vst [vmem:[#allocation1 + $0x1] ss:$2 sm:$0xff] %v6743_v57 }
 0x724   : > { %v6520_v20 = vpop.f32.mrf.mxu1 }
 0x725   : > { %v6521_v44 = vadd.f32 %v13031_v62, %v6520_v20 }
 0x727   : > { %v6534_v26 = vmax.f32 %v6521_v44, 0.0 }
 0x729   : > { %v6542_v54 = vmin.f32 %v6534_v26, 6.0  ;;  %v10378_v26 = vld [vmem:[%s13543_s3 + $0x1f0] sm:$0xff] }
 0x72a   : > { %6928 = vmatpush.bf16.msrb.mxu3 %v10378_v26 }
 0x72b   : > { %6550 = vst [vmem:[#allocation8 + $0x80] sm:$0xff] %v6542_v54 }
 0x72c   : > { %v6522_v28 = vpop.f32.mrf.mxu1 }
 0x72d   : > { %v6523_v51 = vadd.f32 %v13031_v62, %v6522_v28  ;;  %v10377_v28 = vld [vmem:[%s13543_s3 + $0x1e8] sm:$0xff] }
 0x72e   : > { %6929 = vmatpush.bf16.msrb.mxu3 %v10377_v28 }
 0x72f   : > { %v6535_v36 = vmax.f32 %v6523_v51, 0.0 }
 0x731   : > { %v6543_v31 = vmin.f32 %v6535_v36, 6.0 }
 0x732   : > { %v6634_v2 = vld [vmem:[#allocation8 + $0x7f] ss:$2 sm:$0xf]  ;;  %v6651_v23 = vld [vmem:[#allocation8 + $0x80] ss:$2 sm:$0xf] }
 0x733   : > { %6551 = vst [vmem:[#allocation8 + $0x98] sm:$0xff] %v6543_v31  ;;  %v6640_v18 = vmul.f32 %v13049_v46, %v6634_v2  ;;  %v6657_v37 = vmul.f32 %v13051_v34, %v6651_v23  ;;  %v6668_v6 = vld [vmem:[#allocation8 + $0x81] ss:$2 sm:$0xf]  ;;  %v10376_v2 = vld [vmem:[%s13543_s3 + $0x1e0] sm:$0xff] }
 0x734   : > { %v6525_v29 = vpop.f32.mrf.mxu1  ;;  %v6674_v25 = vmul.f32 %v13057_v40, %v6668_v6  ;;  %6930 = vmatpush.bf16.msrb.mxu3 %v10376_v2  ;;  %v10468_v6 = vld [vmem:[%s13544_s4 + $0x6] ss:$0 sm:$0xff] }
 0x735   : > { %v6526_v17 = vadd.f32 %v13031_v62, %v6525_v29  ;;  %v6644_v38 = vadd.f32 %v6640_v18, %v6627_v41 }
 0x737   : > { %v6536_v12 = vmax.f32 %v6526_v17, 0.0  ;;  %v6661_v43 = vadd.f32 %v6657_v37, %v6644_v38  ;;  %v6757_v38 = vld.sshfl [vmem:[#allocation1] sm:$0xff pattern:$0x75316420] }
 0x739   : > { %v6544_v50 = vmin.f32 %v6536_v12, 6.0  ;;  %v6678_v49 = vadd.f32 %v6674_v25, %v6661_v43 }
 0x73a   : > { %v6585_v53 = vld [vmem:[#allocation8 + $0x97] ss:$2 sm:$0xf]  ;;  %v6602_v14 = vld [vmem:[#allocation8 + $0x98] ss:$2 sm:$0xf] }
 0x73b   : > { %6552 = vst [vmem:[#allocation8 + $0xb0] sm:$0xff] %v6544_v50  ;;  %v6590_v39 = vmul.f32 %v13039_v5, %v6585_v53  ;;  %v6607_v0 = vmul.f32 %v13041_v10, %v6602_v14  ;;  %v6685_v59 = vld [vmem:[#allocation8 + $0x97] ss:$2 sm:$0xf] }
 0x73c   : > { %v6527_v60 = vpop.f32.mrf.mxu1  ;;  %v6702_v33 = vld [vmem:[#allocation8 + $0x98] ss:$2 sm:$0xf]  ;;  %v6691_v3 = vmul.f32 %v13059_v21, %v6685_v59  ;;  %v6619_v11 = vld [vmem:[#allocation8 + $0x99] ss:$2 sm:$0xf] }
 0x73d   : > { %v6528_v58 = vadd.f32 %v13031_v62, %v6527_v60  ;;  %v6719_v61 = vld [vmem:[#allocation8 + $0x99] ss:$2 sm:$0xf]  ;;  %v6611_v55 = vadd.f32 %v6607_v0, %v6590_v39  ;;  %v6708_v13 = vmul.f32 %v13062_v47, %v6702_v33  ;;  %v10367_v5 = vld [vmem:[%s13543_s3 + $0x198] sm:$0xff]  ;;  %v6624_v19 = vmul.f32 %v13045_v52, %v6619_v11 }
 0x73e   : > { %v6695_v42 = vadd.f32 %v6691_v3, %v6678_v49  ;;  %v6725_v62 = vmul.f32 %v13068_v8, %v6719_v61  ;;  %6817 = vmatpush.bf16.msra.mxu2 %v10367_v5  ;;  %v10372_v50 = vld [vmem:[%s13543_s3 + $0x1c0] sm:$0xff] }
 0x73f   : > { %v6537_v1 = vmax.f32 %v6528_v58, 0.0  ;;  %v6628_v57 = vadd.f32 %v6624_v19, %v6611_v55  ;;  %v10469_v61 = vld [vmem:[%s13544_s4 + $0x7] ss:$0 sm:$0xff]  ;;  %v6980_v19 = vld [vmem:[#allocation11 + $0x7] sm:$0xf] }
 0x740   : > { %v6712_v30 = vadd.f32 %v6708_v13, %v6695_v42 }
 0x741   : > { %v6545_v10 = vmin.f32 %v6537_v1, 6.0  ;;  %v9813_v1 = vld [vmem:[%s13545_s5 + $0x40] sm:$0xff] }
 0x742   : > { %v6636_v56 = vld [vmem:[#allocation8 + $0xaf] ss:$2 sm:$0xf]  ;;  %v6653_v32 = vld [vmem:[#allocation8 + $0xb0] ss:$2 sm:$0xf]  ;;  %v6729_v45 = vadd.f32 %v6725_v62, %v6712_v30  ;;  %6818 = vmatpush.bf16.msra.mxu2 %v10366_v4 }
 0x743   : > { %6553 = vst [vmem:[#allocation8 + $0xc8] sm:$0xff] %v6545_v10  ;;  %v6641_v35 = vmul.f32 %v13049_v46, %v6636_v56  ;;  %v6658_v20 = vmul.f32 %v13051_v34, %v6653_v32  ;;  %v6670_v63 = vld [vmem:[#allocation8 + $0xb1] ss:$2 sm:$0xf]  ;;  %v10365_v46 = vld [vmem:[%s13543_s3 + $0x188] sm:$0xff]  ;;  %v10364_v34 = vld [vmem:[%s13543_s3 + $0x180] sm:$0xff] }
 0x744   : > { %v6736_v44 = vadd.f32 %v13075_v22, %v6729_v45  ;;  %v6675_v9 = vmul.f32 %v13057_v40, %v6670_v63  ;;  %v13171_v13 = vperm.slane %v9813_v1, 0  ;;  %v13173_v5 = vperm.slane %v9813_v1, 1  ;;  %v6993_v30 = vld [vmem:[#allocation11 + $0x8] sm:$0xf] }
 0x745   : > { %v6645_v52 = vadd.f32 %v6641_v35, %v6628_v57  ;;  %v13177_v32 = vperm.slane %v9813_v1, 2  ;;  %v7006_v35 = vld [vmem:[#allocation11 + $0x9] sm:$0xf]  ;;  %v13183_v63 = vperm.slane %v9813_v1, 3 }
 0x746   : > { %v6740_v54 = vmax.f32 %v6736_v44, 0.0  ;;  %6819 = vmatpush.bf16.msra.mxu2 %v10365_v46  ;;  %v6985_v4 = vmul.f32 %v13171_v13, %v6980_v19  ;;  %v6998_v56 = vmul.f32 %v13173_v5, %v6993_v30  ;;  %v10386_v46 = vld [vmem:[%s13543_s3 + $0x230] sm:$0xff]  ;;  %v13223_v30 = vld [vmem:[%s13546_s6 + $0x4] ss:$0 sm:$0xff] }
 0x747   : > { %v6662_v24 = vadd.f32 %v6658_v20, %v6645_v52  ;;  %v7011_v44 = vmul.f32 %v13177_v32, %v7006_v35 }
 0x748   : > { %v6744_v15 = vmin.f32 %v6740_v54, 6.0  ;;  %v7002_v20 = vadd.f32 %v6998_v56, %v6985_v4 }
 0x749   : > { %v6679_v36 = vadd.f32 %v6675_v9, %v6662_v24  ;;  %v13188_v24 = vperm.slane %v9813_v1, 4 }
 0x74a   : > { %v6687_v51 = vld [vmem:[#allocation8 + $0xc7] ss:$2 sm:$0xf]  ;;  %v6704_v27 = vld [vmem:[#allocation8 + $0xc8] ss:$2 sm:$0xf]  ;;  %6820 = vmatpush.bf16.msra.mxu2 %v10364_v34  ;;  %v7015_v34 = vadd.f32 %v7011_v44, %v7002_v20 }
 0x74b   : > { %v6692_v48 = vmul.f32 %v13059_v21, %v6687_v51  ;;  %6754 = vst [vmem:[#allocation1 + $0x10] ss:$2 sm:$0xff] %v6744_v15  ;;  %v6721_v31 = vld [vmem:[#allocation8 + $0xc9] ss:$2 sm:$0xf]  ;;  %v6709_v40 = vmul.f32 %v13062_v47, %v6704_v27  ;;  %v10375_v21 = vld [vmem:[%s13543_s3 + $0x1d8] sm:$0xff] }
 0x74c   : > { %v6726_v18 = vmul.f32 %v13068_v8, %v6721_v31  ;;  %6931 = vmatpush.bf16.msrb.mxu3 %v10375_v21  ;;  %v10374_v8 = vld [vmem:[%s13543_s3 + $0x1d0] sm:$0xff] }
 0x74d   : > { %v6696_v16 = vadd.f32 %v6692_v48, %v6679_v36  ;;  %v13192_v48 = vperm.slane %v9813_v1, 5 }
 0x74e   : > { %7180 = vmatpush.bf16.msrb.mxu2 %v10387_v7 }
 0x74f   : > { %v6713_v41 = vadd.f32 %v6709_v40, %v6696_v16 }
 0x750   : > { %6932 = vmatpush.bf16.msrb.mxu3 %v10374_v8 }
 0x751   : > { %v6730_v29 = vadd.f32 %v6726_v18, %v6713_v41 }
 0x752   : > { %7181 = vmatpush.bf16.msrb.mxu2 %v10386_v46 }
 0x753   : > { %v6737_v23 = vadd.f32 %v13075_v22, %v6730_v29  ;;  %v10373_v22 = vld [vmem:[%s13543_s3 + $0x1c8] sm:$0xff] }
 0x754   : > { %6933 = vmatpush.bf16.msrb.mxu3 %v10373_v22  ;;  %v13201_v22 = vperm.slane %v9813_v1, 7 }
 0x755   : > { %v6741_v17 = vmax.f32 %v6737_v23, 0.0 }
 0x757   : > { %v6745_v47 = vmin.f32 %v6741_v17, 6.0 }
 0x758   : > { %6934 = vmatpush.bf16.msrb.mxu3 %v10372_v50  ;;  %v10385_v50 = vld [vmem:[%s13543_s3 + $0x228] sm:$0xff] }
 0x759   : > { %6756 = vst [vmem:[#allocation1 + $0x11] ss:$2 sm:$0xff] %v6745_v47  ;;  %7182 = vmatpush.bf16.msrb.mxu2 %v10385_v50 }
 0x760   : > { %v6758_v12 = vld.sshfl [vmem:[#allocation1 + $0x10] sm:$0xff pattern:$0x75316420] }
 0x761   : > { %v6761_v37 = vpack.c.bf16 %v6758_v12, %v6757_v38  ;;  %v13197_v38 = vperm.slane %v9813_v1, 6 }
 0x763   : > { %6821 = vmatmul.bf16.vlgmr.msra.gmra.mxu2 %v6761_v37 }
 0x7e6   : > { %v6822_v43 = vpop.f32.mrf.mxu2 }
 0x7e7   : > { %v6823_v53 = vadd.f32 %v10468_v6, %v6822_v43 }
 0x7e9   : > { %v6829_v14 = vrot.slane %v6823_v53, 4  ;;  %6833 = vst [vmem:[#allocation9] sm:$0xf] %v6823_v53 }
 0x7eb   : > { %6834 = vst [vmem:[#allocation9 + $0x4] sm:$0xf] %v6829_v14 }
 0x7ee   : > { %v6824_v39 = vpop.f32.mrf.mxu2 }
 0x7ef   : > { %v6825_v0 = vadd.f32 %v10468_v6, %v6824_v39 }
 0x7f0   : > { %v6837_v25 = vld [vmem:[#allocation9] sm:$0xf] }
 0x7f1   : > { %6845 = vst [vmem:[#allocation1] ss:$2 sm:$0xff] %v6837_v25  ;;  %v6830_v60 = vrot.slane %v6825_v0, 4 }
 0x7f2   : > { %v6838_v59 = vld [vmem:[#allocation9 + $0x4] sm:$0xf]  ;;  %6835 = vst [vmem:[#allocation9 + $0x8] sm:$0xf] %v6825_v0 }
 0x7f3   : > { %6847 = vst [vmem:[#allocation1 + $0x1] ss:$2 sm:$0xff] %v6838_v59  ;;  %v10384_v59 = vld [vmem:[%s13543_s3 + $0x220] sm:$0xff] }
 0x7f4   : > { %6836 = vst [vmem:[#allocation9 + $0xc] sm:$0xf] %v6830_v60  ;;  %7183 = vmatpush.bf16.msrb.mxu2 %v10384_v59  ;;  %v7075_v59 = vld [vmem:[#allocation11 + $0x80] sm:$0xf] }
 0x7f9   : > { %v6839_v33 = vld [vmem:[#allocation9 + $0x8] sm:$0xf] }
 0x7fa   : > { %6849 = vst [vmem:[#allocation1 + $0x10] ss:$2 sm:$0xff] %v6839_v33  ;;  %v6852_v49 = vld.sshfl [vmem:[#allocation1] sm:$0xff pattern:$0x75316420] }
 0x7fb   : > { %v6840_v58 = vld [vmem:[#allocation9 + $0xc] sm:$0xf] }
 0x7fc   : > { %6851 = vst [vmem:[#allocation1 + $0x11] ss:$2 sm:$0xff] %v6840_v58 }
 0x803   : > { %v6853_v3 = vld.sshfl [vmem:[#allocation1 + $0x10] sm:$0xff pattern:$0x75316420] }
 0x804   : > { %v6856_v11 = vpack.c.bf16 %v6853_v3, %v6852_v49  ;;  %v13216_v3 = vld [vmem:[%s13545_s5 + $0x48] ss:$0 sm:$0xff] }
 0x806   : > { %6935 = vmatmul.bf16.vlgmr.msrb.gmra.mxu3 %v6856_v11 }
 0x889   : > { %v6936_v55 = vpop.f32.mrf.mxu3 }
 0x88a   : > { %v6937_v42 = vadd.f32 %v10469_v61, %v6936_v55 }
 0x88c   : > { %v6941_v10 = vmax.f32 %v6937_v42, 0.0 }
 0x88e   : > { %v6943_v62 = vmin.f32 %v6941_v10, 6.0 }
 0x890   : > { %v6947_v57 = vrot.slane %v6943_v62, 4  ;;  %6952 = vst [vmem:[#allocation11 + $0x20] sm:$0xf] %v6943_v62  ;;  %v10383_v62 = vld [vmem:[%s13543_s3 + $0x218] sm:$0xff] }
 0x891   : > { %v6938_v45 = vpop.f32.mrf.mxu3  ;;  %7184 = vmatpush.bf16.msrb.mxu2 %v10383_v62  ;;  %v10380_v62 = vld [vmem:[%s13543_s3 + $0x200] sm:$0xff] }
 0x892   : > { %6953 = vst [vmem:[#allocation11 + $0x38] sm:$0xf] %v6947_v57  ;;  %v6939_v52 = vadd.f32 %v10469_v61, %v6938_v45 }
 0x894   : > { %v6942_v26 = vmax.f32 %v6939_v52, 0.0 }
 0x896   : > { %v6944_v31 = vmin.f32 %v6942_v26, 6.0 }
 0x897   : > { %v6981_v54 = vld [vmem:[#allocation11 + $0x1f] sm:$0xf] }
 0x898   : > { %v6994_v9 = vld [vmem:[#allocation11 + $0x20] sm:$0xf]  ;;  %v6986_v28 = vmul.f32 %v13171_v13, %v6981_v54  ;;  %6954 = vst [vmem:[#allocation11 + $0x50] sm:$0xf] %v6944_v31  ;;  %v6948_v39 = vrot.slane %v6944_v31, 4 }
 0x899   : > { %v7007_v15 = vld [vmem:[#allocation11 + $0x21] sm:$0xf]  ;;  %v6999_v51 = vmul.f32 %v13173_v5, %v6994_v9  ;;  %v6982_v2 = vld [vmem:[#allocation11 + $0x37] sm:$0xf] }
 0x89a   : > { %v7019_v27 = vld [vmem:[#allocation11 + $0x1f] sm:$0xf]  ;;  %v6995_v41 = vld [vmem:[#allocation11 + $0x38] sm:$0xf]  ;;  %v7012_v29 = vmul.f32 %v13177_v32, %v7007_v15  ;;  %v6987_v43 = vmul.f32 %v13171_v13, %v6982_v2  ;;  %6955 = vst [vmem:[#allocation11 + $0x68] sm:$0xf] %v6948_v39 }
 0x89b   : > { %v7032_v36 = vld [vmem:[#allocation11 + $0x20] sm:$0xf]  ;;  %v7024_v16 = vmul.f32 %v13183_v63, %v7019_v27  ;;  %v7003_v18 = vadd.f32 %v6999_v51, %v6986_v28  ;;  %v7020_v21 = vld [vmem:[#allocation11 + $0x37] sm:$0xf]  ;;  %v7000_v53 = vmul.f32 %v13173_v5, %v6995_v41 }
 0x89c   : > { %v7045_v40 = vld [vmem:[#allocation11 + $0x21] sm:$0xf]  ;;  %v7033_v17 = vld [vmem:[#allocation11 + $0x38] sm:$0xf]  ;;  %v7037_v47 = vmul.f32 %v13188_v24, %v7032_v36  ;;  %v7025_v37 = vmul.f32 %v13183_v63, %v7020_v21  ;;  %v10381_v39 = vld [vmem:[%s13543_s3 + $0x208] sm:$0xff] }
 0x89d   : > { %v7028_v23 = vadd.f32 %v7024_v16, %v7015_v34  ;;  %v7016_v12 = vadd.f32 %v7012_v29, %v7003_v18  ;;  %v7050_v8 = vmul.f32 %v13192_v48, %v7045_v40  ;;  %v7059_v6 = vld [vmem:[#allocation11 + $0x37] sm:$0xf]  ;;  %v7038_v25 = vmul.f32 %v13188_v24, %v7033_v17 }
 0x89e   : > { %v7072_v60 = vld [vmem:[#allocation11 + $0x38] sm:$0xf]  ;;  %v7064_v49 = vmul.f32 %v13197_v38, %v7059_v6  ;;  %v7004_v55 = vadd.f32 %v7000_v53, %v6987_v43  ;;  %v7062_v6 = vld [vmem:[#allocation11 + $0x7f] sm:$0xf] }
 0x89f   : > { %v7041_v14 = vadd.f32 %v7037_v47, %v7028_v23  ;;  %v7029_v0 = vadd.f32 %v7025_v37, %v7016_v12  ;;  %v7046_v33 = vld [vmem:[#allocation11 + $0x39] sm:$0xf]  ;;  %v7077_v10 = vmul.f32 %v13201_v22, %v7072_v60  ;;  %v6983_v35 = vld [vmem:[#allocation11 + $0x4f] sm:$0xf] }
 0x8a0   : > { %v7008_v11 = vld [vmem:[#allocation11 + $0x39] sm:$0xf]  ;;  %v7051_v19 = vmul.f32 %v13192_v48, %v7046_v33  ;;  %v6996_v45 = vld [vmem:[#allocation11 + $0x50] sm:$0xf]  ;;  %v6988_v20 = vmul.f32 %v13171_v13, %v6983_v35 }
 0x8a1   : > { %v7054_v58 = vadd.f32 %v7050_v8, %v7041_v14  ;;  %v7042_v61 = vadd.f32 %v7038_v25, %v7029_v0  ;;  %v7085_v1 = vld [vmem:[#allocation11 + $0x39] sm:$0xf]  ;;  %v7013_v4 = vmul.f32 %v13177_v32, %v7008_v11  ;;  %v7009_v7 = vld [vmem:[#allocation11 + $0x51] sm:$0xf]  ;;  %v7001_v44 = vmul.f32 %v13173_v5, %v6996_v45  ;;  %v7022_v36 = vld [vmem:[#allocation11 + $0x67] sm:$0xf] }
 0x8a2   : > { %v7090_v57 = vmul.f32 %v13216_v3, %v7085_v1  ;;  %v7021_v26 = vld [vmem:[#allocation11 + $0x4f] sm:$0xf]  ;;  %v7014_v27 = vmul.f32 %v13177_v32, %v7009_v7  ;;  %v7035_v5 = vld [vmem:[#allocation11 + $0x68] sm:$0xf]  ;;  %v7027_v29 = vmul.f32 %v13183_v63, %v7022_v36  ;;  %v10382_v32 = vld [vmem:[%s13543_s3 + $0x210] sm:$0xff] }
 0x8a3   : > { %v7068_v42 = vadd.f32 %v7064_v49, %v7054_v58  ;;  %v7055_v52 = vadd.f32 %v7051_v19, %v7042_v61  ;;  %v7034_v46 = vld [vmem:[#allocation11 + $0x50] sm:$0xf]  ;;  %v7017_v54 = vadd.f32 %v7013_v4, %v7004_v55  ;;  %v7026_v15 = vmul.f32 %v13183_v63, %v7021_v26  ;;  %v7061_v21 = vld [vmem:[#allocation11 + $0x67] sm:$0xf]  ;;  %7185 = vmatpush.bf16.msrb.mxu2 %v10382_v32  ;;  %v7088_v55 = vld [vmem:[#allocation11 + $0x81] sm:$0xf] }
 0x8a4   : > { %v7060_v34 = vld [vmem:[#allocation11 + $0x4f] sm:$0xf]  ;;  %v7005_v51 = vadd.f32 %v7001_v44, %v6988_v20  ;;  %v7039_v2 = vmul.f32 %v13188_v24, %v7034_v46  ;;  %v7048_v37 = vld [vmem:[#allocation11 + $0x69] sm:$0xf]  ;;  %v7040_v43 = vmul.f32 %v13188_v24, %v7035_v5  ;;  %v7066_v60 = vmul.f32 %v13197_v38, %v7061_v21  ;;  %v10394_v36 = vld [vmem:[%s13543_s3 + $0x270] sm:$0xff] }
 0x8a5   : > { %v7081_v56 = vadd.f32 %v7077_v10, %v7068_v42  ;;  %v7073_v28 = vld [vmem:[#allocation11 + $0x50] sm:$0xf]  ;;  %v7065_v16 = vmul.f32 %v13197_v38, %v7060_v34  ;;  %v7030_v40 = vadd.f32 %v7026_v15, %v7017_v54  ;;  %v7074_v53 = vld [vmem:[#allocation11 + $0x68] sm:$0xf]  ;;  %v7053_v58 = vmul.f32 %v13192_v48, %v7048_v37  ;;  %v7194_v15 = vld [vmem:[#allocation9] sm:$0xf] }
 0x8a6   : > { %v7047_v31 = vld [vmem:[#allocation11 + $0x51] sm:$0xf]  ;;  %v7018_v18 = vadd.f32 %v7014_v27, %v7005_v51  ;;  %v7078_v17 = vmul.f32 %v13201_v22, %v7073_v28  ;;  %v7067_v49 = vmul.f32 %v13197_v38, %v7062_v6  ;;  %v7087_v24 = vld [vmem:[#allocation11 + $0x69] sm:$0xf]  ;;  %v7079_v1 = vmul.f32 %v13201_v22, %v7074_v53  ;;  %v10390_v5 = vld [vmem:[%s13543_s3 + $0x250] sm:$0xff] }
 0x8a7   : > { %v7094_v9 = vadd.f32 %v7090_v57, %v7081_v56  ;;  %v7086_v41 = vld [vmem:[#allocation11 + $0x51] sm:$0xf]  ;;  %v7069_v23 = vadd.f32 %v7065_v16, %v7055_v52  ;;  %v7043_v12 = vadd.f32 %v7039_v2, %v7030_v40  ;;  %v7052_v8 = vmul.f32 %v13192_v48, %v7047_v31  ;;  %7186 = vmatpush.bf16.msrb.mxu2 %v10381_v39  ;;  %v7196_v34 = vld [vmem:[#allocation9 + $0x8] sm:$0xf]  ;;  %v7197_v51 = vld [vmem:[#allocation9 + $0xc] sm:$0xf] }
 0x8a8   : > { %v7031_v50 = vadd.f32 %v7027_v29, %v7018_v18  ;;  %v7091_v63 = vmul.f32 %v13216_v3, %v7086_v41  ;;  %v7080_v10 = vmul.f32 %v13201_v22, %v7075_v59  ;;  %v7092_v38 = vmul.f32 %v13216_v3, %v7087_v24  ;;  %v10393_v31 = vld [vmem:[%s13543_s3 + $0x268] sm:$0xff]  ;;  %v10392_v16 = vld [vmem:[%s13543_s3 + $0x260] sm:$0xff]  ;;  %v10403_v21 = vld [vmem:[%s13543_s3 + $0x2b8] sm:$0xff] }
 0x8a9   : > { %v7101_v13 = vadd.f32 %v13223_v30, %v7094_v9  ;;  %v7082_v14 = vadd.f32 %v7078_v17, %v7069_v23  ;;  %v7056_v25 = vadd.f32 %v7052_v8, %v7043_v12  ;;  %v7093_v56 = vmul.f32 %v13216_v3, %v7088_v55  ;;  %v7195_v3 = vld [vmem:[#allocation9 + $0x4] sm:$0xf]  ;;  %v10472_v40 = vld [vmem:[%s13544_s4 + $0x8] ss:$0 sm:$0xff]  ;;  %7566 = vmatpush.bf16.msrb.mxu1 %v10403_v21  ;;  %v10388_v32 = vld [vmem:[%s13543_s3 + $0x240] sm:$0xff] }
 0x8aa   : > { %v7044_v33 = vadd.f32 %v7040_v43, %v7031_v50  ;;  %v10389_v29 = vld [vmem:[%s13543_s3 + $0x248] sm:$0xff] }
 0x8ab   : > { %v7105_v47 = vmax.f32 %v7101_v13, 0.0  ;;  %v7095_v11 = vadd.f32 %v7091_v63, %v7082_v14  ;;  %v7070_v61 = vadd.f32 %v7066_v60, %v7056_v25  ;;  %7187 = vmatpush.bf16.msrb.mxu2 %v10380_v62  ;;  %v10391_v13 = vld [vmem:[%s13543_s3 + $0x258] sm:$0xff]  ;;  %v10473_v25 = vld [vmem:[%s13544_s4 + $0x9] ss:$0 sm:$0xff]  ;;  %v9914_v60 = vld [vmem:[%s13545_s5 + $0x50] sm:$0xff] }
 0x8ac   : > { %v7057_v42 = vadd.f32 %v7053_v58, %v7044_v33  ;;  %v13297_v58 = vperm.slane %v9914_v60, 0 }
 0x8ad   : > { %v7109_v0 = vmin.f32 %v7105_v47, 6.0  ;;  %v7102_v19 = vadd.f32 %v13223_v30, %v7095_v11  ;;  %v7083_v48 = vadd.f32 %v7079_v1, %v7070_v61  ;;  %v7367_v11 = vld [vmem:[#allocation11 + $0x7] sm:$0xf]  ;;  %v10402_v1 = vld [vmem:[%s13543_s3 + $0x2b0] sm:$0xff] }
 0x8ae   : > { %v7071_v4 = vadd.f32 %v7067_v49, %v7057_v42  ;;  %v13299_v49 = vperm.slane %v9914_v60, 1  ;;  %v7380_v61 = vld [vmem:[#allocation11 + $0x8] sm:$0xf]  ;;  %v7372_v42 = vmul.f32 %v13297_v58, %v7367_v11  ;;  %7567 = vmatpush.bf16.msrb.mxu1 %v10402_v1 }
 0x8af   : > { %7117 = vst [vmem:[#allocation1] ss:$2 sm:$0xff] %v7109_v0  ;;  %v7106_v57 = vmax.f32 %v7102_v19, 0.0  ;;  %v7096_v35 = vadd.f32 %v7092_v38, %v7083_v48  ;;  %v13306_v19 = vperm.slane %v9914_v60, 2  ;;  %v7393_v48 = vld [vmem:[#allocation11 + $0x9] sm:$0xf] }
 0x8b0   : > { %v7084_v45 = vadd.f32 %v7080_v10, %v7071_v4  ;;  %v7385_v10 = vmul.f32 %v13299_v49, %v7380_v61  ;;  %v10398_v61 = vld [vmem:[%s13543_s3 + $0x290] sm:$0xff] }
 0x8b1   : > { %v7110_v7 = vmin.f32 %v7106_v57, 6.0  ;;  %v7103_v22 = vadd.f32 %v13223_v30, %v7096_v35  ;;  %v7398_v57 = vmul.f32 %v13306_v19, %v7393_v48 }
 0x8b2   : > { %v7097_v52 = vadd.f32 %v7093_v56, %v7084_v45  ;;  %v7389_v56 = vadd.f32 %v7385_v10, %v7372_v42  ;;  %v10401_v45 = vld [vmem:[%s13543_s3 + $0x2a8] sm:$0xff] }
 0x8b3   : > { %7119 = vst [vmem:[#allocation1 + $0x1] ss:$2 sm:$0xff] %v7110_v7  ;;  %v7107_v20 = vmax.f32 %v7103_v22, 0.0  ;;  %v13312_v7 = vperm.slane %v9914_v60, 3  ;;  %v13314_v22 = vperm.slane %v9914_v60, 4  ;;  %7568 = vmatpush.bf16.msrb.mxu1 %v10401_v45 }
 0x8b4   : > { %v7104_v44 = vadd.f32 %v13223_v30, %v7097_v52  ;;  %v10395_v30 = vld [vmem:[%s13543_s3 + $0x278] sm:$0xff] }
 0x8b5   : > { %v7111_v26 = vmin.f32 %v7107_v20, 6.0  ;;  %7315 = vmatpush.bf16.msra.mxu3 %v10395_v30 }
 0x8b6   : > { %v7108_v46 = vmax.f32 %v7104_v44, 0.0 }
 0x8b7   : > { %7121 = vst [vmem:[#allocation1 + $0x10] ss:$2 sm:$0xff] %v7111_v26 }
 0x8b8   : > { %v7112_v54 = vmin.f32 %v7108_v46, 6.0  ;;  %v7402_v46 = vadd.f32 %v7398_v57, %v7389_v56 }
 0x8b9   : > { %7316 = vmatpush.bf16.msra.mxu3 %v10394_v36 }
 0x8ba   : > { %v7124_v9 = vld.sshfl [vmem:[#allocation1] sm:$0xff pattern:$0x75316420]  ;;  %7123 = vst [vmem:[#allocation1 + $0x11] ss:$2 sm:$0xff] %v7112_v54 }
 0x8bb   : > { %7202 = vst [vmem:[#allocation1] ss:$2 sm:$0xff] %v7194_v15 }
 0x8bc   : > { %7204 = vst [vmem:[#allocation1 + $0x1] ss:$2 sm:$0xff] %v7195_v3 }
 0x8bd   : > { %7317 = vmatpush.bf16.msra.mxu3 %v10393_v31 }
 0x8c1   : > { %v7125_v28 = vld.sshfl [vmem:[#allocation1 + $0x10] sm:$0xff pattern:$0x75316420]  ;;  %7318 = vmatpush.bf16.msra.mxu3 %v10392_v16  ;;  %v13322_v16 = vperm.slane %v9914_v60, 6 }
 0x8c2   : > { %7206 = vst [vmem:[#allocation1 + $0x10] ss:$2 sm:$0xff] %v7196_v34  ;;  %v7128_v27 = vpack.c.bf16 %v7125_v28, %v7124_v9 }
 0x8c3   : > { %7208 = vst [vmem:[#allocation1 + $0x11] ss:$2 sm:$0xff] %v7197_v51  ;;  %v7209_v18 = vld.sshfl [vmem:[#allocation1] sm:$0xff pattern:$0x75316420]  ;;  %v13319_v51 = vperm.slane %v9914_v60, 5 }
 0x8c4   : > { %7188 = vmatmul.bf16.vlgmr.msrb.gmra.mxu2 %v7128_v27 }
 0x8c5   : > { %7319 = vmatpush.bf16.msra.mxu3 %v10391_v13 }
 0x8c9   : > { %7320 = vmatpush.bf16.msra.mxu3 %v10390_v5 }
 0x8ca   : > { %v7210_v37 = vld.sshfl [vmem:[#allocation1 + $0x10] sm:$0xff pattern:$0x75316420] }
 0x8cd   : > { %7321 = vmatpush.bf16.msra.mxu3 %v10389_v29 }
 0x8d1   : > { %7322 = vmatpush.bf16.msra.mxu3 %v10388_v32  ;;  %v10400_v32 = vld [vmem:[%s13543_s3 + $0x2a0] sm:$0xff] }
 0x8d2   : > { %7569 = vmatpush.bf16.msrb.mxu1 %v10400_v32 }
 0x947   : > { %v7189_v2 = vpop.f32.mrf.mxu2 }
 0x948   : > { %v7190_v41 = vadd.f32 %v10472_v40, %v7189_v2 }
 0x94a   : > { %v7213_v23 = vadd.f32 %v7209_v18, %v7190_v41 }
 0x94c   : > { %v7217_v17 = vrot.slane %v7213_v23, 4  ;;  %7221 = vst [vmem:[#allocation10] sm:$0xf] %v7213_v23 }
 0x94e   : > { %7222 = vst [vmem:[#allocation10 + $0x4] sm:$0xf] %v7217_v17 }
 0x94f   : > { %v7191_v47 = vpop.f32.mrf.mxu2 }
 0x950   : > { %v7192_v12 = vadd.f32 %v10472_v40, %v7191_v47 }
 0x952   : > { %v7214_v8 = vadd.f32 %v7210_v37, %v7192_v12 }
 0x953   : > { %v7225_v6 = vld [vmem:[#allocation10] sm:$0xf] }
 0x954   : > { %7233 = vst [vmem:[#allocation1] ss:$2 sm:$0xff] %v7225_v6  ;;  %v7218_v50 = vrot.slane %v7214_v8, 4  ;;  %v13337_v6 = vld [vmem:[%s13545_s5 + $0x58] ss:$0 sm:$0xff] }
 0x955   : > { %v7226_v43 = vld [vmem:[#allocation10 + $0x4] sm:$0xf]  ;;  %7223 = vst [vmem:[#allocation10 + $0x8] sm:$0xf] %v7214_v8  ;;  %v13332_v8 = vperm.slane %v9914_v60, 7 }
 0x956   : > { %7235 = vst [vmem:[#allocation1 + $0x1] ss:$2 sm:$0xff] %v7226_v43 }
 0x957   : > { %7224 = vst [vmem:[#allocation10 + $0xc] sm:$0xf] %v7218_v50 }
 0x95c   : > { %v7227_v53 = vld [vmem:[#allocation10 + $0x8] sm:$0xf] }
 0x95d   : > { %7237 = vst [vmem:[#allocation1 + $0x10] ss:$2 sm:$0xff] %v7227_v53  ;;  %v7240_v63 = vld.sshfl [vmem:[#allocation1] sm:$0xff pattern:$0x75316420] }
 0x95e   : > { %v7228_v14 = vld [vmem:[#allocation10 + $0xc] sm:$0xf] }
 0x95f   : > { %7239 = vst [vmem:[#allocation1 + $0x11] ss:$2 sm:$0xff] %v7228_v14  ;;  %v10399_v14 = vld [vmem:[%s13543_s3 + $0x298] sm:$0xff] }
 0x960   : > { %7570 = vmatpush.bf16.msrb.mxu1 %v10399_v14 }
 0x964   : > { %7571 = vmatpush.bf16.msrb.mxu1 %v10398_v61 }
 0x966   : > { %v7241_v39 = vld.sshfl [vmem:[#allocation1 + $0x10] sm:$0xff pattern:$0x75316420] }
 0x967   : > { %v7244_v0 = vpack.c.bf16 %v7241_v39, %v7240_v63 }
 0x969   : > { %7323 = vmatmul.bf16.vlgmr.msra.gmra.mxu3 %v7244_v0 }
 0x9ec   : > { %v7324_v59 = vpop.f32.mrf.mxu3 }
 0x9ed   : > { %v7325_v33 = vadd.f32 %v10473_v25, %v7324_v59 }
 0x9ef   : > { %v7329_v24 = vmax.f32 %v7325_v33, 0.0 }
 0x9f1   : > { %v7331_v55 = vmin.f32 %v7329_v24, 6.0 }
 0x9f3   : > { %v7335_v62 = vrot.slane %v7331_v55, 4  ;;  %7339 = vst [vmem:[#allocation11 + $0x20] sm:$0xf] %v7331_v55 }
 0x9f4   : > { %v7326_v38 = vpop.f32.mrf.mxu3 }
 0x9f5   : > { %7340 = vst [vmem:[#allocation11 + $0x38] sm:$0xf] %v7335_v62  ;;  %v7327_v4 = vadd.f32 %v10473_v25, %v7326_v38 }
 0x9f7   : > { %v7330_v35 = vmax.f32 %v7327_v4, 0.0  ;;  %v13354_v4 = vld [vmem:[%s13546_s6 + $0x5] ss:$0 sm:$0xff] }
 0x9f9   : > { %v7332_v52 = vmin.f32 %v7330_v35, 6.0 }
 0x9fa   : > { %v7368_v20 = vld [vmem:[#allocation11 + $0x1f] sm:$0xf] }
 0x9fb   : > { %v7381_v44 = vld [vmem:[#allocation11 + $0x20] sm:$0xf]  ;;  %v7373_v54 = vmul.f32 %v13297_v58, %v7368_v20  ;;  %7341 = vst [vmem:[#allocation11 + $0x50] sm:$0xf] %v7332_v52  ;;  %v7336_v21 = vrot.slane %v7332_v52, 4 }
 0x9fc   : > { %v7394_v26 = vld [vmem:[#allocation11 + $0x21] sm:$0xf]  ;;  %v7386_v9 = vmul.f32 %v13299_v49, %v7381_v44  ;;  %v7407_v34 = vld [vmem:[#allocation11 + $0x37] sm:$0xf] }
 0x9fd   : > { %v7406_v15 = vld [vmem:[#allocation11 + $0x1f] sm:$0xf]  ;;  %v7399_v30 = vmul.f32 %v13306_v19, %v7394_v26  ;;  %v7420_v36 = vld [vmem:[#allocation11 + $0x38] sm:$0xf]  ;;  %v7412_v13 = vmul.f32 %v13312_v7, %v7407_v34  ;;  %7342 = vst [vmem:[#allocation11 + $0x68] sm:$0xf] %v7336_v21 }
 0x9fe   : > { %v7419_v3 = vld [vmem:[#allocation11 + $0x20] sm:$0xf]  ;;  %v7411_v28 = vmul.f32 %v13312_v7, %v7406_v15  ;;  %v7390_v27 = vadd.f32 %v7386_v9, %v7373_v54  ;;  %v7369_v2 = vld [vmem:[#allocation11 + $0x37] sm:$0xf]  ;;  %v7425_v43 = vmul.f32 %v13314_v22, %v7420_v36 }
 0x9ff   : > { %v7432_v31 = vld [vmem:[#allocation11 + $0x21] sm:$0xf]  ;;  %v7424_v5 = vmul.f32 %v13314_v22, %v7419_v3  ;;  %v7382_v41 = vld [vmem:[#allocation11 + $0x38] sm:$0xf]  ;;  %v7374_v23 = vmul.f32 %v13297_v58, %v7369_v2  ;;  %v10397_v36 = vld [vmem:[%s13543_s3 + $0x288] sm:$0xff] }
 0xa00   : > { %v7415_v40 = vadd.f32 %v7411_v28, %v7402_v46  ;;  %v7403_v18 = vadd.f32 %v7399_v30, %v7390_v27  ;;  %v7445_v29 = vld [vmem:[#allocation11 + $0x37] sm:$0xf]  ;;  %v7387_v17 = vmul.f32 %v13299_v49, %v7382_v41  ;;  %v7437_v37 = vmul.f32 %v13319_v51, %v7432_v31  ;;  %7572 = vmatpush.bf16.msrb.mxu1 %v10397_v36 }
 0xa01   : > { %v7433_v12 = vld [vmem:[#allocation11 + $0x39] sm:$0xf]  ;;  %v7450_v39 = vmul.f32 %v13322_v16, %v7445_v29 }
 0xa02   : > { %v7428_v47 = vadd.f32 %v7424_v5, %v7415_v40  ;;  %v7416_v50 = vadd.f32 %v7412_v13, %v7403_v18  ;;  %v7458_v53 = vld [vmem:[#allocation11 + $0x38] sm:$0xf]  ;;  %v7391_v59 = vadd.f32 %v7387_v17, %v7374_v23  ;;  %v7438_v33 = vmul.f32 %v13319_v51, %v7433_v12  ;;  %v7370_v55 = vld [vmem:[#allocation11 + $0x4f] sm:$0xf]  ;;  %v7448_v5 = vld [vmem:[#allocation11 + $0x7f] sm:$0xf] }
 0xa03   : > { %v7471_v0 = vld [vmem:[#allocation11 + $0x39] sm:$0xf]  ;;  %v7463_v11 = vmul.f32 %v13332_v8, %v7458_v53  ;;  %v7383_v42 = vld [vmem:[#allocation11 + $0x50] sm:$0xf]  ;;  %v7375_v56 = vmul.f32 %v13297_v58, %v7370_v55 }
 0xa04   : > { %v7441_v63 = vadd.f32 %v7437_v37, %v7428_v47  ;;  %v7395_v25 = vld [vmem:[#allocation11 + $0x39] sm:$0xf]  ;;  %v7429_v60 = vadd.f32 %v7425_v43, %v7416_v50  ;;  %v7476_v1 = vmul.f32 %v13337_v6, %v7471_v0  ;;  %v7396_v10 = vld [vmem:[#allocation11 + $0x51] sm:$0xf]  ;;  %v7388_v57 = vmul.f32 %v13299_v49, %v7383_v42  ;;  %v7409_v15 = vld [vmem:[#allocation11 + $0x67] sm:$0xf] }
 0xa05   : > { %v7400_v62 = vmul.f32 %v13306_v19, %v7395_v25  ;;  %v7408_v35 = vld [vmem:[#allocation11 + $0x4f] sm:$0xf]  ;;  %v7401_v9 = vmul.f32 %v13306_v19, %v7396_v10  ;;  %v7422_v3 = vld [vmem:[#allocation11 + $0x68] sm:$0xf]  ;;  %v7414_v19 = vmul.f32 %v13312_v7, %v7409_v15  ;;  %v7461_v43 = vld [vmem:[#allocation11 + $0x80] sm:$0xf] }
 0xa06   : > { %v7454_v24 = vadd.f32 %v7450_v39, %v7441_v63  ;;  %v7442_v48 = vadd.f32 %v7438_v33, %v7429_v60  ;;  %v7421_v45 = vld [vmem:[#allocation11 + $0x50] sm:$0xf]  ;;  %v7413_v20 = vmul.f32 %v13312_v7, %v7408_v35  ;;  %v7392_v54 = vadd.f32 %v7388_v57, %v7375_v56  ;;  %v7447_v40 = vld [vmem:[#allocation11 + $0x67] sm:$0xf] }
 0xa07   : > { %v7404_v52 = vadd.f32 %v7400_v62, %v7391_v59  ;;  %v7446_v44 = vld [vmem:[#allocation11 + $0x4f] sm:$0xf]  ;;  %v7426_v58 = vmul.f32 %v13314_v22, %v7421_v45  ;;  %v7427_v41 = vmul.f32 %v13314_v22, %v7422_v3  ;;  %v7435_v29 = vld [vmem:[#allocation11 + $0x69] sm:$0xf]  ;;  %v7452_v50 = vmul.f32 %v13322_v16, %v7447_v40  ;;  %v7474_v59 = vld [vmem:[#allocation11 + $0x81] sm:$0xf] }
 0xa08   : > { %v7467_v38 = vadd.f32 %v7463_v11, %v7454_v24  ;;  %v7459_v26 = vld [vmem:[#allocation11 + $0x50] sm:$0xf]  ;;  %v7451_v28 = vmul.f32 %v13322_v16, %v7446_v44  ;;  %v7405_v13 = vadd.f32 %v7401_v9, %v7392_v54  ;;  %v7460_v32 = vld [vmem:[#allocation11 + $0x68] sm:$0xf]  ;;  %v7453_v7 = vmul.f32 %v13322_v16, %v7448_v5  ;;  %v7581_v44 = vld [vmem:[#allocation10 + $0x4] sm:$0xf] }
 0xa09   : > { %v7434_v34 = vld [vmem:[#allocation11 + $0x51] sm:$0xf]  ;;  %v7417_v27 = vadd.f32 %v7413_v20, %v7404_v52  ;;  %v7464_v49 = vmul.f32 %v13332_v8, %v7459_v26  ;;  %v10396_v22 = vld [vmem:[%s13543_s3 + $0x280] sm:$0xff]  ;;  %v7440_v63 = vmul.f32 %v13319_v51, %v7435_v29  ;;  %v7465_v60 = vmul.f32 %v13332_v8, %v7460_v32  ;;  %v10410_v9 = vld [vmem:[%s13543_s3 + $0x2f0] sm:$0xff] }
 0xa0a   : > { %v7480_v46 = vadd.f32 %v7476_v1, %v7467_v38  ;;  %v7472_v30 = vld [vmem:[#allocation11 + $0x51] sm:$0xf]  ;;  %v7455_v2 = vadd.f32 %v7451_v28, %v7442_v48  ;;  %v7439_v21 = vmul.f32 %v13319_v51, %v7434_v34  ;;  %v7418_v17 = vadd.f32 %v7414_v19, %v7405_v13  ;;  %v7473_v39 = vld [vmem:[#allocation11 + $0x69] sm:$0xf]  ;;  %7573 = vmatpush.bf16.msrb.mxu1 %v10396_v22  ;;  %v10407_v34 = vld [vmem:[%s13543_s3 + $0x2d8] sm:$0xff] }
 0xa0b   : > { %v7430_v18 = vadd.f32 %v7426_v58, %v7417_v27  ;;  %v7477_v12 = vmul.f32 %v13337_v6, %v7472_v30  ;;  %v7466_v16 = vmul.f32 %v13332_v8, %v7461_v43  ;;  %v7478_v61 = vmul.f32 %v13337_v6, %v7473_v39  ;;  %v7580_v20 = vld [vmem:[#allocation10] sm:$0xf]  ;;  %v10408_v3 = vld [vmem:[%s13543_s3 + $0x2e0] sm:$0xff]  ;;  %v10406_v28 = vld [vmem:[%s13543_s3 + $0x2d0] sm:$0xff] }
 0xa0c   : > { %v7487_v31 = vadd.f32 %v13354_v4, %v7480_v46  ;;  %v7468_v47 = vadd.f32 %v7464_v49, %v7455_v2  ;;  %v7431_v14 = vadd.f32 %v7427_v41, %v7418_v17  ;;  %v7479_v55 = vmul.f32 %v13337_v6, %v7474_v59  ;;  %v7582_v6 = vld [vmem:[#allocation10 + $0x8] sm:$0xf]  ;;  %v7583_v46 = vld [vmem:[#allocation10 + $0xc] sm:$0xf]  ;;  %v10409_v15 = vld [vmem:[%s13543_s3 + $0x2e8] sm:$0xff] }
 0xa0d   : > { %v7443_v37 = vadd.f32 %v7439_v21, %v7430_v18  ;;  %v10476_v27 = vld [vmem:[%s13544_s4 + $0xa] ss:$0 sm:$0xff]  ;;  %v10418_v43 = vld [vmem:[%s13543_s3 + $0x330] sm:$0xff]  ;;  %v7754_v39 = vld [vmem:[#allocation11 + $0x7] ss:$2 sm:$0x3] }
 0xa0e   : > { %v7491_v23 = vmax.f32 %v7487_v31, 0.0  ;;  %v7481_v0 = vadd.f32 %v7477_v12, %v7468_v47  ;;  %v7444_v33 = vadd.f32 %v7440_v63, %v7431_v14  ;;  %v10405_v58 = vld [vmem:[%s13543_s3 + $0x2c8] sm:$0xff]  ;;  %v10404_v31 = vld [vmem:[%s13543_s3 + $0x2c0] sm:$0xff] }
 0xa0f   : > { %v7456_v25 = vadd.f32 %v7452_v50, %v7443_v37  ;;  %v10419_v37 = vld [vmem:[%s13543_s3 + $0x338] sm:$0xff]  ;;  %v10477_v50 = vld [vmem:[%s13544_s4 + $0xb] ss:$0 sm:$0xff] }
 0xa10   : > { %v7495_v53 = vmin.f32 %v7491_v23, 6.0  ;;  %v7488_v24 = vadd.f32 %v13354_v4, %v7481_v0  ;;  %v7457_v1 = vadd.f32 %v7453_v7, %v7444_v33  ;;  %7902 = vmatpush.bf16.msrb.mxu3 %v10419_v37  ;;  %v13420_v7 = vld [vmem:[%s13545_s5 + $0x60] sm:$0xff]  ;;  %v10426_v37 = vld [vmem:[%s13543_s3 + $0x370] sm:$0xff] }
 0xa11   : > { %v7469_v11 = vadd.f32 %v7465_v60, %v7456_v25  ;;  %v7766_v14 = vperm.slane %v13420_v7, 1  ;;  %v7763_v0 = vld [vmem:[#allocation11 + $0x8] ss:$2 sm:$0x3]  ;;  %v10417_v60 = vld [vmem:[%s13543_s3 + $0x328] sm:$0xff] }
 0xa12   : > { %7503 = vst [vmem:[#allocation1] ss:$2 sm:$0xff] %v7495_v53  ;;  %v7492_v51 = vmax.f32 %v7488_v24, 0.0  ;;  %v7470_v10 = vadd.f32 %v7466_v16, %v7457_v1  ;;  %v7757_v53 = vperm.slane %v13420_v7, 0  ;;  %v7775_v16 = vperm.slane %v13420_v7, 2  ;;  %v10416_v1 = vld [vmem:[%s13543_s3 + $0x320] sm:$0xff] }
 0xa13   : > { %v7482_v42 = vadd.f32 %v7478_v61, %v7469_v11  ;;  %v7767_v33 = vmul.f32 %v7766_v14, %v7763_v0  ;;  %v7772_v11 = vld [vmem:[#allocation11 + $0x9] ss:$2 sm:$0x3] }
 0xa14   : > { %v7496_v62 = vmin.f32 %v7492_v51, 6.0  ;;  %v7483_v38 = vadd.f32 %v7479_v55, %v7470_v10  ;;  %7903 = vmatpush.bf16.msrb.mxu3 %v10418_v43  ;;  %v7758_v59 = vmul.f32 %v7757_v53, %v7754_v39 }
 0xa15   : > { %v7489_v48 = vadd.f32 %v13354_v4, %v7482_v42  ;;  %v7776_v42 = vmul.f32 %v7775_v16, %v7772_v11 }
 0xa16   : > { %7505 = vst [vmem:[#allocation1 + $0x1] ss:$2 sm:$0xff] %v7496_v62  ;;  %v7490_v8 = vadd.f32 %v13354_v4, %v7483_v38  ;;  %v10411_v4 = vld [vmem:[%s13543_s3 + $0x2f8] sm:$0xff]  ;;  %v7769_v51 = vadd.f32 %v7767_v33, %v7758_v59  ;;  %v7784_v62 = vperm.slane %v13420_v7, 3 }
 0xa17   : > { %v7493_v56 = vmax.f32 %v7489_v48, 0.0  ;;  %7701 = vmatpush.bf16.msra.mxu2 %v10411_v4  ;;  %v10415_v38 = vld [vmem:[%s13543_s3 + $0x318] sm:$0xff] }
 0xa18   : > { %v7494_v35 = vmax.f32 %v7490_v8, 0.0  ;;  %7904 = vmatpush.bf16.msrb.mxu3 %v10417_v60  ;;  %v7793_v8 = vperm.slane %v13420_v7, 4 }
 0xa19   : > { %v7497_v57 = vmin.f32 %v7493_v56, 6.0  ;;  %v7778_v56 = vadd.f32 %v7776_v42, %v7769_v51 }
 0xa1a   : > { %v7498_v45 = vmin.f32 %v7494_v35, 6.0  ;;  %v10414_v35 = vld [vmem:[%s13543_s3 + $0x310] sm:$0xff] }
 0xa1b   : > { %7507 = vst [vmem:[#allocation1 + $0x10] ss:$2 sm:$0xff] %v7497_v57  ;;  %7702 = vmatpush.bf16.msra.mxu2 %v10410_v9 }
 0xa1c   : > { %7509 = vst [vmem:[#allocation1 + $0x11] ss:$2 sm:$0xff] %v7498_v45  ;;  %7905 = vmatpush.bf16.msrb.mxu3 %v10416_v1 }
 0xa1d   : > { %v7510_v52 = vld.sshfl [vmem:[#allocation1] sm:$0xff pattern:$0x75316420] }
 0xa1e   : > { %7588 = vst [vmem:[#allocation1] ss:$2 sm:$0xff] %v7580_v20 }
 0xa1f   : > { %7590 = vst [vmem:[#allocation1 + $0x1] ss:$2 sm:$0xff] %v7581_v44  ;;  %7703 = vmatpush.bf16.msra.mxu2 %v10409_v15  ;;  %v7802_v44 = vperm.slane %v13420_v7, 5 }
 0xa20   : > { %7906 = vmatpush.bf16.msrb.mxu3 %v10415_v38 }
 0xa23   : > { %v7511_v26 = vld.sshfl [vmem:[#allocation1 + $0x10] sm:$0xff pattern:$0x75316420]  ;;  %7704 = vmatpush.bf16.msra.mxu2 %v10408_v3 }
 0xa24   : > { %v7514_v54 = vpack.c.bf16 %v7511_v26, %v7510_v52  ;;  %7592 = vst [vmem:[#allocation1 + $0x10] ss:$2 sm:$0xff] %v7582_v6  ;;  %v7811_v6 = vperm.slane %v13420_v7, 6  ;;  %7907 = vmatpush.bf16.msrb.mxu3 %v10414_v35  ;;  %v10424_v35 = vld [vmem:[%s13543_s3 + $0x360] sm:$0xff] }
 0xa25   : > { %7594 = vst [vmem:[#allocation1 + $0x11] ss:$2 sm:$0xff] %v7583_v46 }
 0xa26   : > { %7574 = vmatmul.bf16.vlgmr.msrb.gmra.mxu1 %v7514_v54  ;;  %v7595_v36 = vld.sshfl [vmem:[#allocation1] sm:$0xff pattern:$0x75316420] }
 0xa27   : > { %7705 = vmatpush.bf16.msra.mxu2 %v10407_v34  ;;  %v10413_v34 = vld [vmem:[%s13543_s3 + $0x308] sm:$0xff] }
 0xa28   : > { %7908 = vmatpush.bf16.msrb.mxu3 %v10413_v34 }
 0xa2b   : > { %7706 = vmatpush.bf16.msra.mxu2 %v10406_v28 }
 0xa2c   : > { %v7596_v2 = vld.sshfl [vmem:[#allocation1 + $0x10] sm:$0xff pattern:$0x75316420] }
 0xa2f   : > { %7707 = vmatpush.bf16.msra.mxu2 %v10405_v58 }
 0xa33   : > { %7708 = vmatpush.bf16.msra.mxu2 %v10404_v31 }
 0xaa3   : > { %v7575_v49 = vpop.f32.mrf.mxu1 }
 0xaa4   : > { %v7576_v30 = vadd.f32 %v10476_v27, %v7575_v49 }
 0xaa6   : > { %v7599_v13 = vadd.f32 %v7595_v36, %v7576_v30  ;;  %v7820_v36 = vperm.slane %v13420_v7, 7 }
 0xaa8   : > { %v7603_v19 = vrot.slane %v7599_v13, 4  ;;  %7607 = vst [vmem:[#allocation9] sm:$0xf] %v7599_v13 }
 0xaaa   : > { %7608 = vst [vmem:[#allocation9 + $0x4] sm:$0xf] %v7603_v19  ;;  %v10478_v19 = vld [vmem:[%s13545_s5 + $0x68] ss:$0 sm:$0xff] }
 0xaab   : > { %v7577_v40 = vpop.f32.mrf.mxu1 }
 0xaac   : > { %v7578_v5 = vadd.f32 %v10476_v27, %v7577_v40 }
 0xaae   : > { %v7600_v41 = vadd.f32 %v7596_v2, %v7578_v5 }
 0xaaf   : > { %v7611_v18 = vld [vmem:[#allocation9] sm:$0xf] }
 0xab0   : > { %7619 = vst [vmem:[#allocation1] ss:$2 sm:$0xff] %v7611_v18  ;;  %v7604_v29 = vrot.slane %v7600_v41, 4  ;;  %v10412_v18 = vld [vmem:[%s13543_s3 + $0x300] sm:$0xff] }
 0xab1   : > { %v7612_v21 = vld [vmem:[#allocation9 + $0x4] sm:$0xf]  ;;  %7609 = vst [vmem:[#allocation9 + $0x8] sm:$0xf] %v7600_v41  ;;  %7909 = vmatpush.bf16.msrb.mxu3 %v10412_v18 }
 0xab2   : > { %7621 = vst [vmem:[#allocation1 + $0x1] ss:$2 sm:$0xff] %v7612_v21 }
 0xab3   : > { %7610 = vst [vmem:[#allocation9 + $0xc] sm:$0xf] %v7604_v29  ;;  %v10427_v29 = vld [vmem:[%s13543_s3 + $0x378] sm:$0xff] }
 0xab4   : > { %8000 = vmatpush.bf16.msra.mxu1 %v10427_v29 }
 0xab8   : > { %v7613_v23 = vld [vmem:[#allocation9 + $0x8] sm:$0xf]  ;;  %8001 = vmatpush.bf16.msra.mxu1 %v10426_v37  ;;  %v10430_v37 = vld [vmem:[%s13543_s3 + $0x390] sm:$0xff] }
 0xab9   : > { %7623 = vst [vmem:[#allocation1 + $0x10] ss:$2 sm:$0xff] %v7613_v23  ;;  %v7626_v32 = vld.sshfl [vmem:[#allocation1] sm:$0xff pattern:$0x75316420] }
 0xaba   : > { %v7614_v17 = vld [vmem:[#allocation9 + $0xc] sm:$0xf] }
 0xabb   : > { %7625 = vst [vmem:[#allocation1 + $0x11] ss:$2 sm:$0xff] %v7614_v17 }
 0xac2   : > { %v7627_v47 = vld.sshfl [vmem:[#allocation1 + $0x10] sm:$0xff pattern:$0x75316420] }
 0xac3   : > { %v7630_v12 = vpack.c.bf16 %v7627_v47, %v7626_v32 }
 0xac5   : > { %7709 = vmatmul.bf16.vlgmr.msra.gmra.mxu2 %v7630_v12 }
 0xb48   : > { %v7710_v22 = vpop.f32.mrf.mxu2 }
 0xb49   : > { %v7711_v63 = vadd.f32 %v10477_v50, %v7710_v22 }
 0xb4b   : > { %v7715_v25 = vmax.f32 %v7711_v63, 0.0 }
 0xb4d   : > { %v7717_v24 = vmin.f32 %v7715_v25, 6.0 }
 0xb4f   : > { %v7721_v61 = vrot.slane %v7717_v24, 4  ;;  %7725 = vst [vmem:[#allocation11 + $0x20] sm:$0xf] %v7717_v24 }
 0xb50   : > { %v7712_v55 = vpop.f32.mrf.mxu2 }
 0xb51   : > { %7726 = vst [vmem:[#allocation11 + $0x38] sm:$0xf] %v7721_v61  ;;  %v7713_v10 = vadd.f32 %v10477_v50, %v7712_v55 }
 0xb53   : > { %v7716_v48 = vmax.f32 %v7713_v10, 0.0 }
 0xb55   : > { %v7718_v57 = vmin.f32 %v7716_v48, 6.0 }
 0xb56   : > { %v7781_v45 = vld [vmem:[#allocation11 + $0x1f] ss:$2 sm:$0x3]  ;;  %v7790_v52 = vld [vmem:[#allocation11 + $0x20] ss:$2 sm:$0x3] }
 0xb57   : > { %v7785_v20 = vmul.f32 %v7784_v62, %v7781_v45  ;;  %v7722_v26 = vrot.slane %v7718_v57, 4  ;;  %7727 = vst [vmem:[#allocation11 + $0x50] sm:$0xf] %v7718_v57  ;;  %v7799_v46 = vld [vmem:[#allocation11 + $0x21] ss:$2 sm:$0x3]  ;;  %v7794_v9 = vmul.f32 %v7793_v8, %v7790_v52 }
 0xb58   : > { %v7756_v54 = vld [vmem:[#allocation11 + $0x37] ss:$2 sm:$0x3]  ;;  %v7765_v3 = vld [vmem:[#allocation11 + $0x38] ss:$2 sm:$0x3]  ;;  %v7803_v30 = vmul.f32 %v7802_v44, %v7799_v46 }
 0xb59   : > { %v7787_v4 = vadd.f32 %v7785_v20, %v7778_v56  ;;  %7728 = vst [vmem:[#allocation11 + $0x68] sm:$0xf] %v7722_v26  ;;  %v7759_v15 = vmul.f32 %v7757_v53, %v7756_v54  ;;  %v7808_v28 = vld [vmem:[#allocation11 + $0x37] ss:$2 sm:$0x3]  ;;  %v7768_v27 = vmul.f32 %v7766_v14, %v7765_v3  ;;  %v10423_v45 = vld [vmem:[%s13543_s3 + $0x358] sm:$0xff] }
 0xb5a   : > { %v7774_v58 = vld [vmem:[#allocation11 + $0x39] ss:$2 sm:$0x3]  ;;  %v7817_v13 = vld [vmem:[#allocation11 + $0x38] ss:$2 sm:$0x3]  ;;  %v7812_v5 = vmul.f32 %v7811_v6, %v7808_v28 }
 0xb5b   : > { %v7796_v49 = vadd.f32 %v7794_v9, %v7787_v4  ;;  %v7770_v31 = vadd.f32 %v7768_v27, %v7759_v15  ;;  %v7777_v2 = vmul.f32 %v7775_v16, %v7774_v58  ;;  %v7826_v41 = vld [vmem:[#allocation11 + $0x39] ss:$2 sm:$0x3]  ;;  %v7821_v12 = vmul.f32 %v7820_v36, %v7817_v13  ;;  %v10479_v14 = vld [vmem:[%s13546_s6 + $0x6] ss:$0 sm:$0xff]  ;;  %v10425_v57 = vld [vmem:[%s13543_s3 + $0x368] sm:$0xff] }
 0xb5c   : > { %v7830_v53 = vmul.f32 %v10478_v19, %v7826_v41  ;;  %8002 = vmatpush.bf16.msra.mxu1 %v10425_v57  ;;  %v10422_v52 = vld [vmem:[%s13543_s3 + $0x350] sm:$0xff]  ;;  %v10421_v20 = vld [vmem:[%s13543_s3 + $0x348] sm:$0xff]  ;;  %v10435_v28 = vld [vmem:[%s13543_s3 + $0x3b8] sm:$0xff] }
 0xb5d   : > { %v7805_v40 = vadd.f32 %v7803_v30, %v7796_v49  ;;  %v7779_v32 = vadd.f32 %v7777_v2, %v7770_v31  ;;  %8177 = vmatpush.bf16.msrb.mxu2 %v10435_v28  ;;  %v10434_v27 = vld [vmem:[%s13543_s3 + $0x3b0] sm:$0xff]  ;;  %v10481_v58 = vld [vmem:[%s13544_s4 + $0xd] ss:$0 sm:$0xff]  ;;  %v8052_v2 = vld [vmem:[#allocation14 + $0x8] sm:$0x3] }
 0xb5e   : > { %v7783_v21 = vld [vmem:[#allocation11 + $0x4f] ss:$2 sm:$0x3]  ;;  %v7792_v23 = vld [vmem:[#allocation11 + $0x50] ss:$2 sm:$0x3] }
 0xb5f   : > { %v7814_v17 = vadd.f32 %v7812_v5, %v7805_v40  ;;  %v7786_v47 = vmul.f32 %v7784_v62, %v7783_v21  ;;  %v7801_v50 = vld [vmem:[#allocation11 + $0x51] ss:$2 sm:$0x3]  ;;  %v7795_v43 = vmul.f32 %v7793_v8, %v7792_v23  ;;  %v13496_v49 = vld [vmem:[%s13545_s5 + $0x70] sm:$0xff]  ;;  %v10432_v41 = vld [vmem:[%s13543_s3 + $0x3a0] sm:$0xff] }
 0xb60   : > { %v7810_v63 = vld [vmem:[#allocation11 + $0x67] ss:$2 sm:$0x3]  ;;  %v7804_v0 = vmul.f32 %v7802_v44, %v7801_v50  ;;  %v7819_v60 = vld [vmem:[#allocation11 + $0x68] ss:$2 sm:$0x3]  ;;  %8003 = vmatpush.bf16.msra.mxu1 %v10424_v35 }
 0xb61   : > { %v7788_v7 = vadd.f32 %v7786_v47, %v7779_v32  ;;  %v7823_v22 = vadd.f32 %v7821_v12, %v7814_v17  ;;  %v7813_v33 = vmul.f32 %v7811_v6, %v7810_v63  ;;  %v7828_v24 = vld [vmem:[#allocation11 + $0x69] ss:$2 sm:$0x3]  ;;  %v7822_v61 = vmul.f32 %v7820_v36, %v7819_v60  ;;  %v10480_v6 = vld [vmem:[%s13544_s4 + $0xc] ss:$0 sm:$0xff]  ;;  %8178 = vmatpush.bf16.msrb.mxu2 %v10434_v27  ;;  %v10431_v47 = vld [vmem:[%s13543_s3 + $0x398] sm:$0xff] }
 0xb62   : > { %v7831_v51 = vmul.f32 %v10478_v19, %v7828_v24  ;;  %v10420_v44 = vld [vmem:[%s13543_s3 + $0x340] sm:$0xff]  ;;  %v10433_v30 = vld [vmem:[%s13543_s3 + $0x3a8] sm:$0xff]  ;;  %v8047_v13 = vperm.slane %v13496_v49, 0  ;;  %v8054_v19 = vperm.slane %v13496_v49, 1  ;;  %v8045_v5 = vld [vmem:[#allocation14 + $0x7] sm:$0x3] }
 0xb63   : > { %v7797_v39 = vadd.f32 %v7795_v43, %v7788_v7  ;;  %v7832_v25 = vadd.f32 %v7830_v53, %v7823_v22  ;;  %v8061_v23 = vperm.slane %v13496_v49, 2  ;;  %v8059_v32 = vld [vmem:[#allocation14 + $0x9] sm:$0x3]  ;;  %v8068_v43 = vperm.slane %v13496_v49, 3  ;;  %v10429_v53 = vld [vmem:[%s13543_s3 + $0x388] sm:$0xff] }
 0xb64   : > { %8004 = vmatpush.bf16.msra.mxu1 %v10423_v45  ;;  %v8048_v29 = vmul.f32 %v8047_v13, %v8045_v5  ;;  %v8055_v21 = vmul.f32 %v8054_v19, %v8052_v2  ;;  %v8075_v22 = vperm.slane %v13496_v49, 4 }
 0xb65   : > { %v7806_v59 = vadd.f32 %v7804_v0, %v7797_v39  ;;  %v7837_v16 = vadd.f32 %v10479_v14, %v7832_v25  ;;  %8179 = vmatpush.bf16.msrb.mxu2 %v10433_v30  ;;  %v8062_v7 = vmul.f32 %v8061_v23, %v8059_v32  ;;  %v8103_v30 = vld [vmem:[#allocation14 + $0x51] sm:$0x3] }
 0xb66   : > { %v8057_v50 = vadd.f32 %v8055_v21, %v8048_v29 }
 0xb67   : > { %v7815_v11 = vadd.f32 %v7813_v33, %v7806_v59  ;;  %v7839_v1 = vmax.f32 %v7837_v16, 0.0 }
 0xb68   : > { %8005 = vmatpush.bf16.msra.mxu1 %v10422_v52  ;;  %v8064_v0 = vadd.f32 %v8062_v7, %v8057_v50  ;;  %v8089_v52 = vld [vmem:[#allocation14 + $0x4f] sm:$0x3] }
 0xb69   : > { %v7824_v55 = vadd.f32 %v7822_v61, %v7815_v11  ;;  %v7841_v42 = vmin.f32 %v7839_v1, 6.0  ;;  %8180 = vmatpush.bf16.msrb.mxu2 %v10432_v41  ;;  %v8082_v11 = vperm.slane %v13496_v49, 5 }
 0xb6b   : > { %v7833_v10 = vadd.f32 %v7831_v51, %v7824_v55  ;;  %7845 = vst [vmem:[#allocation1] ss:$4 sm:$0xff] %v7841_v42  ;;  %v10428_v51 = vld [vmem:[%s13543_s3 + $0x380] sm:$0xff] }
 0xb6c   : > { %8006 = vmatpush.bf16.msra.mxu1 %v10421_v20  ;;  %v8097_v20 = vperm.slane %v13496_v49, 7 }
 0xb6d   : > { %v7838_v62 = vadd.f32 %v10479_v14, %v7833_v10  ;;  %8181 = vmatpush.bf16.msrb.mxu2 %v10431_v47 }
 0xb6f   : > { %v7840_v48 = vmax.f32 %v7838_v62, 0.0 }
 0xb70   : > { %8007 = vmatpush.bf16.msra.mxu1 %v10420_v44 }
 0xb71   : > { %v7842_v38 = vmin.f32 %v7840_v48, 6.0  ;;  %8182 = vmatpush.bf16.msrb.mxu2 %v10430_v37  ;;  %v8090_v48 = vperm.slane %v13496_v49, 6 }
 0xb73   : > { %7847 = vst [vmem:[#allocation1 + $0x1] ss:$4 sm:$0xff] %v7842_v38 }
 0xb75   : > { %8183 = vmatpush.bf16.msrb.mxu2 %v10429_v53 }
 0xb79   : > { %8184 = vmatpush.bf16.msrb.mxu2 %v10428_v51 }
 0xb7a   : > { %v7848_v56 = vld.sshfl [vmem:[#allocation1] sm:$0xff pattern:$0x73625140] }
 0xb7b   : > { %v7850_v8 = vpack.c.bf16 %v7848_v56, %v7848_v56 }
 0xb7d   : > { %7910 = vmatmul.bf16.vlgmr.msrb.gmra.mxu3 %v7850_v8 }
 0xc00   : > { %v7911_v26 = vpop.f32.mrf.mxu3 }
 0xc01   : > { %v7912_v46 = vadd.f32 %v10480_v6, %v7911_v26 }
 0xc03   : > { %v7916_v54 = vrot.slane %v7912_v46, 2  ;;  %7918 = vst [vmem:[#allocation12] sm:$0x3] %v7912_v46 }
 0xc05   : > { %7919 = vst [vmem:[#allocation12 + $0x2] sm:$0x3] %v7916_v54 }
 0xc08   : > { %v7913_v4 = vpop.f32.mrf.mxu3 }
 0xc09   : > { %v8096_v4 = vld [vmem:[#allocation14 + $0x50] sm:$0x3] }
 0xc0a   : > { %v7920_v9 = vld [vmem:[#allocation12] sm:$0x3]  ;;  %v8099_v49 = vmul.f32 %v8097_v20, %v8096_v4 }
 0xc0b   : > { %7924 = vst [vmem:[#allocation1] ss:$4 sm:$0xff] %v7920_v9  ;;  %v10482_v9 = vld [vmem:[%s13545_s5 + $0x78] ss:$0 sm:$0xff] }
 0xc0c   : > { %v7921_v15 = vld [vmem:[#allocation12 + $0x2] sm:$0x3]  ;;  %v8106_v5 = vmul.f32 %v10482_v9, %v8103_v30 }
 0xc0d   : > { %7926 = vst [vmem:[#allocation1 + $0x1] ss:$4 sm:$0xff] %v7921_v15  ;;  %v8191_v50 = vld [vmem:[#allocation12 + $0x2] sm:$0x3] }
 0xc14   : > { %v7927_v3 = vld.sshfl [vmem:[#allocation1] sm:$0xff pattern:$0x73625140] }
 0xc15   : > { %v7929_v34 = vpack.c.bf16 %v7927_v3, %v7927_v3 }
 0xc17   : > { %8008 = vmatmul.bf16.vlgmr.msra.gmra.mxu1 %v7929_v34  ;;  %v8092_v34 = vmul.f32 %v8090_v48, %v8089_v52 }
 0xc94   : > { %v8009_v36 = vpop.f32.mrf.mxu1 }
 0xc95   : > { %v8010_v31 = vadd.f32 %v10481_v58, %v8009_v36 }
 0xc97   : > { %v8013_v40 = vmax.f32 %v8010_v31, 0.0 }
 0xc99   : > { %v8014_v18 = vmin.f32 %v8013_v40, 6.0 }
 0xc9b   : > { %v8016_v17 = vrot.slane %v8014_v18, 2  ;;  %8019 = vst [vmem:[#allocation14 + $0x20] sm:$0x3] %v8014_v18 }
 0xc9c   : > { %v8011_v12 = vpop.f32.mrf.mxu1 }
 0xc9d   : > { %8020 = vst [vmem:[#allocation14 + $0x38] sm:$0x3] %v8016_v17  ;;  %v8190_v12 = vld [vmem:[#allocation12] sm:$0x3] }
 0xca2   : > { %v8046_v14 = vld [vmem:[#allocation14 + $0x1f] sm:$0x3]  ;;  %v8060_v39 = vld [vmem:[#allocation14 + $0x21] sm:$0x3] }
 0xca3   : > { %v8053_v63 = vld [vmem:[#allocation14 + $0x20] sm:$0x3]  ;;  %v8049_v25 = vmul.f32 %v8047_v13, %v8046_v14  ;;  %v8063_v1 = vmul.f32 %v8061_v23, %v8060_v39 }
 0xca4   : > { %v8056_v60 = vmul.f32 %v8054_v19, %v8053_v63  ;;  %v8066_v59 = vld [vmem:[#allocation14 + $0x1f] sm:$0x3]  ;;  %v8067_v16 = vld [vmem:[#allocation14 + $0x37] sm:$0x3]  ;;  %v8080_v55 = vld [vmem:[#allocation14 + $0x21] sm:$0x3] }
 0xca5   : > { %v8073_v33 = vld [vmem:[#allocation14 + $0x20] sm:$0x3]  ;;  %v8069_v24 = vmul.f32 %v8068_v43, %v8066_v59  ;;  %v8074_v10 = vld [vmem:[#allocation14 + $0x38] sm:$0x3]  ;;  %v8070_v56 = vmul.f32 %v8068_v43, %v8067_v16  ;;  %v8083_v45 = vmul.f32 %v8082_v11, %v8080_v55  ;;  %v10483_v19 = vld [vmem:[%s13546_s6 + $0x7] ss:$0 sm:$0xff] }
 0xca6   : > { %v8058_v61 = vadd.f32 %v8056_v60, %v8049_v25  ;;  %v8076_v62 = vmul.f32 %v8075_v22, %v8073_v33  ;;  %v8088_v8 = vld [vmem:[#allocation14 + $0x37] sm:$0x3]  ;;  %v8081_v35 = vld [vmem:[#allocation14 + $0x39] sm:$0x3]  ;;  %v8077_v6 = vmul.f32 %v8075_v22, %v8074_v10  ;;  %v10484_v43 = vld [vmem:[%s13544_s4 + $0xe] ss:$0 sm:$0xff] }
 0xca7   : > { %v8071_v42 = vadd.f32 %v8069_v24, %v8064_v0  ;;  %v8095_v26 = vld [vmem:[#allocation14 + $0x38] sm:$0x3]  ;;  %v8091_v54 = vmul.f32 %v8090_v48, %v8088_v8  ;;  %v8084_v3 = vmul.f32 %v8082_v11, %v8081_v35 }
 0xca8   : > { %v8065_v38 = vadd.f32 %v8063_v1, %v8058_v61  ;;  %v8102_v28 = vld [vmem:[#allocation14 + $0x39] sm:$0x3]  ;;  %v8098_v58 = vmul.f32 %v8097_v20, %v8095_v26 }
 0xca9   : > { %v8078_v57 = vadd.f32 %v8076_v62, %v8071_v42  ;;  %v8105_v13 = vmul.f32 %v10482_v9, %v8102_v28 }
 0xcaa   : > { %v8072_v44 = vadd.f32 %v8070_v56, %v8065_v38 }
 0xcab   : > { %v8085_v46 = vadd.f32 %v8083_v45, %v8078_v57 }
 0xcac   : > { %v8079_v15 = vadd.f32 %v8077_v6, %v8072_v44 }
 0xcad   : > { %v8093_v27 = vadd.f32 %v8091_v54, %v8085_v46 }
 0xcae   : > { %v8086_v36 = vadd.f32 %v8084_v3, %v8079_v15 }
 0xcaf   : > { %v8100_v31 = vadd.f32 %v8098_v58, %v8093_v27 }
 0xcb0   : > { %v8094_v40 = vadd.f32 %v8092_v34, %v8086_v36 }
 0xcb1   : > { %v8107_v2 = vadd.f32 %v8105_v13, %v8100_v31 }
 0xcb2   : > { %v8101_v41 = vadd.f32 %v8099_v49, %v8094_v40 }
 0xcb3   : > { %v8112_v18 = vadd.f32 %v10483_v19, %v8107_v2 }
 0xcb4   : > { %v8108_v29 = vadd.f32 %v8106_v5, %v8101_v41 }
 0xcb5   : > { %v8114_v21 = vmax.f32 %v8112_v18, 0.0 }
 0xcb6   : > { %v8113_v23 = vadd.f32 %v10483_v19, %v8108_v29 }
 0xcb7   : > { %v8116_v17 = vmin.f32 %v8114_v21, 6.0 }
 0xcb8   : > { %v8115_v32 = vmax.f32 %v8113_v23, 0.0 }
 0xcb9   : > { %8120 = vst [vmem:[#allocation1] ss:$4 sm:$0xff] %v8116_v17 }
 0xcba   : > { %v8117_v47 = vmin.f32 %v8115_v32, 6.0 }
 0xcbc   : > { %8122 = vst [vmem:[#allocation1 + $0x1] ss:$4 sm:$0xff] %v8117_v47 }
 0xcc3   : > { %v8123_v37 = vld.sshfl [vmem:[#allocation1] sm:$0xff pattern:$0x73625140] }
 0xcc4   : > { %v8125_v7 = vpack.c.bf16 %v8123_v37, %v8123_v37  ;;  %8194 = vst [vmem:[#allocation1] ss:$4 sm:$0xff] %v8190_v12 }
 0xcc5   : > { %8196 = vst [vmem:[#allocation1 + $0x1] ss:$4 sm:$0xff] %v8191_v50 }
 0xcc6   : > { %8185 = vmatmul.bf16.vlgmr.msrb.gmra.mxu2 %v8125_v7 }
 0xccc   : > { %v8197_v14 = vld.sshfl [vmem:[#allocation1] sm:$0xff pattern:$0x73625140] }
 0xd49   : > { %v8186_v22 = vpop.f32.mrf.mxu2 }
 0xd4a   : > { %v8187_v53 = vadd.f32 %v10484_v43, %v8186_v22 }
 0xd4c   : > { %v8199_v63 = vadd.f32 %v8197_v14, %v8187_v53 }
 0xd4e   : > { %v8201_v39 = vrot.slane %v8199_v63, 2  ;;  %8203 = vst [vmem:[#allocation13] sm:$0x3] %v8199_v63 }
 0xd50   : > { %8204 = vst [vmem:[#allocation13 + $0x2] sm:$0x3] %v8201_v39 }
 0xd51   : > { %v8188_v0 = vpop.f32.mrf.mxu2 }
 0xd57   : > { %v8205_v25 = vld [vmem:[#allocation13] sm:$0xf]  }
 0xd58   : > { %8207 = vst [vmem:[%s278_s15] sm:$0xf] %v8205_v25  }
 0xd59 PF: > { %s17_s24 = sadd.s32 1, %s10525_s24  }
 0xd5a   : > { %p14_p4 = scmp.ge.s32.totalorder %s17_s24, 4  }
 0xd5c   :  { %16 = sbr.rel (!%p14_p4) target bundleno = 1 (0x1), region = 593 }

</bundles_post_ra>
